<compile_context>
chip_gen: v7x
topology: tpu7x:2x2x1
jax: 0.10.0
libtpu: 0.0.40
codegen_flags: <defaults>
</compile_context>

<pallas_src>
import warnings

import jax
import jax.numpy as jnp
from jax import lax
from jax.experimental import pallas as pl
from jax.experimental.pallas import tpu as pltpu


def _self_attention_block_kernel(
    seq_ref,        # (Bt, S, H) f32 — Bt batch rows per grid step
    bias_ref,       # (S, S) f32 additive mask bias (0 / -1e10)
    ln_ref,         # (4, H) f32 rows: [sa_gamma, sa_beta, ffn_gamma, ffn_beta]
    wqkv_ref,       # (H, 3H) bf16: [Wq.T/sqrt(H) | Wk.T | Wv.T]
    cw1_ref,        # (H, H) bf16 Conv1d(k=1) #1 weight
    cw2_ref,        # (H, H) bf16 Conv1d(k=1) #2 weight
    cb_ref,         # (H, 2) f32 columns: [conv1 bias, conv2 bias]
    out_ref,        # (Bt, S, H) f32
):
    f32 = jnp.float32
    bf16 = jnp.bfloat16
    eps = f32(1e-8)

    Bt, S, H = seq_ref.shape

    g1, be1 = ln_ref[0:1, :], ln_ref[1:2, :]
    g2, be2 = ln_ref[2:3, :], ln_ref[3:4, :]

    # ---- sa_layer_norm on the stacked (Bt*S, H) slab (f32; rsqrt -> EUP) ----
    s2d = seq_ref[...].reshape(Bt * S, H)
    mu = jnp.mean(s2d, axis=-1, keepdims=True)
    var = jnp.mean((s2d - mu) ** 2, axis=-1, keepdims=True)
    x = (s2d - mu) * lax.rsqrt(var + eps) * g1 + be1          # (Bt*S, H) f32

    # ---- fused QKV projection: one tall bf16 GEMM, M = Bt*S ----
    qkv = jnp.dot(x.astype(bf16), wqkv_ref[...], preferred_element_type=f32)
    # q/k/v only ever consumed as bf16 -> cast eagerly to cut f32 live ranges.
    q = qkv[:, :H].astype(bf16).reshape(Bt, S, H)
    k = qkv[:, H:2 * H].astype(bf16).reshape(Bt, S, H)
    v = qkv[:, 2 * H:].astype(bf16).reshape(Bt, S, H)

    # ---- attention scores (1/sqrt(H) already folded into Wq) ----
    energy = jnp.einsum("bqh,bkh->bqk", q, k, preferred_element_type=f32)
    energy = energy + bias_ref[...]                           # (Bt, S, S)

    # ---- softmax (f32; EUP approx reciprocal for the denominator) ----
    m = jnp.max(energy, axis=-1, keepdims=True)
    p = jnp.exp(energy - m)
    attn = p * pl.reciprocal(jnp.sum(p, axis=-1, keepdims=True), approx=True)

    sa = jnp.einsum("bqk,bkh->bqh", attn.astype(bf16), v,
                    preferred_element_type=f32)               # (Bt, S, H) f32

    # ---- first residual: re-read seq_ref; stage result in the output tile ----
    seq1 = seq_ref[...] + sa
    out_ref[...] = seq1

    # ---- ffn_layer_norm ----
    s1_2d = seq1.reshape(Bt * S, H)
    mu2 = jnp.mean(s1_2d, axis=-1, keepdims=True)
    var2 = jnp.mean((s1_2d - mu2) ** 2, axis=-1, keepdims=True)
    x2 = ((s1_2d - mu2) * lax.rsqrt(var2 + eps) * g2 + be2).astype(bf16)
    x2 = x2.reshape(Bt, S, H)

    # ---- pointwise FFN: Conv1d(k=1) over axis-0 channels (requires S == H).
    # Batch-stack along lanes so both GEMMs are (H, H) @ (H, Bt*H): N >= 256.
    xcols = jnp.concatenate([x2[b] for b in range(Bt)], axis=1)   # (S, Bt*H)
    cb1 = cb_ref[:, 0:1]                                          # (H, 1)
    cb2 = cb_ref[:, 1:2]
    h = jnp.dot(cw1_ref[...], xcols, preferred_element_type=f32) + cb1
    h = jnp.maximum(h, 0.0)
    ffn = jnp.dot(cw2_ref[...], h.astype(bf16), preferred_element_type=f32) + cb2

    # ---- second residual (dropout = identity) ----
    for b in range(Bt):
        out_ref[b, :, :] = out_ref[b, :, :] + ffn[:, b * H:(b + 1) * H]


def _default_grid_steps(batch):
    """Two parallel grid steps on dual-TensorCore chips (v7x), else one."""
    try:
        kind = jax.devices()[0].device_kind.lower()
    except Exception:
        kind = ""
    dual_tc = ("v7" in kind) or ("7x" in kind)
    if dual_tc and batch >= 2 and batch % 2 == 0:
        return 2
    return 1


def pack_params(params):
    """Wrapper-side (one-time) parameter fusion:
      * Wq/Wk/Wv pre-transposed, fused to (H, 3H), 1/sqrt(H) folded into Wq, bf16.
      * LayerNorm gammas/betas packed into a single (4, H) f32 operand.
      * Conv1d biases packed into a single (H, 2) f32 operand (column layout).
      * Conv1d weights pre-cast to bf16 for the MXU.
    """
    H = params["wq"].shape[0]
    inv_scale = 1.0 / jnp.sqrt(jnp.float32(H))
    wqkv = jnp.concatenate(
        [params["wq"].T * inv_scale, params["wk"].T, params["wv"].T],
        axis=1).astype(jnp.bfloat16)                               # (H, 3H)
    lnpack = jnp.concatenate(
        [params["ln1_g"], params["ln1_b"], params["ln2_g"], params["ln2_b"]],
        axis=0).astype(jnp.float32)                                # (4, H)
    cbpack = jnp.concatenate([params["cb1"], params["cb2"]],
                             axis=1).astype(jnp.float32)           # (H, 2)
    return (lnpack, wqkv,
            params["cw1"].astype(jnp.bfloat16),
            params["cw2"].astype(jnp.bfloat16),
            cbpack)


def self_attention_block(seq, mask, params, *, num_steps=None):
    """seq: (B, S, H) f32, mask: (S, S) (1 = attend, 0 = masked).

    NOTE: seq is donated to the output via input_output_aliases; do not reuse
    the seq array after this call.
    """
    assert seq.ndim == 3
    B, S, H = seq.shape
    # The PyTorch module's Conv1d-over-channels trick silently requires S == H.
    assert S == H, "SelfAttentionBlock's Conv1d usage requires seq_len == hidden_dim"
    assert mask.shape == (S, S)

    if num_steps is None:
        num_steps = _default_grid_steps(B)
    assert B % num_steps == 0
    Bt = B // num_steps

    lnpack, wqkv, cw1, cw2, cbpack = pack_params(params)
    # masked_fill(-1e10) -> equivalent additive bias (softmax output identical).
    bias = jnp.where(mask == 0, jnp.float32(-1e10), jnp.float32(0.0))

    args = (seq, bias, lnpack, wqkv, cw1, cw2, cbpack)

    flops = int(B * (10 * S * H * H + 4 * S * S * H))
    transcendentals = int(B * (S * S + 3 * S))
    bytes_accessed = int(sum(int(a.size) * a.dtype.itemsize for a in args)
                         + B * S * H * 4)

    return pl.pallas_call(
        _self_attention_block_kernel,
        out_shape=jax.ShapeDtypeStruct((B, S, H), seq.dtype),
        grid=(num_steps,),
        in_specs=[
            pl.BlockSpec((Bt, S, H), lambda i: (i, 0, 0)),   # seq: tiled over batch
            pl.BlockSpec((S, S), lambda i: (0, 0)),          # additive mask bias
            pl.BlockSpec((4, H), lambda i: (0, 0)),          # packed LN params
            pl.BlockSpec((H, 3 * H), lambda i: (0, 0)),      # fused QKV weight
            pl.BlockSpec((H, H), lambda i: (0, 0)),          # conv1 weight
            pl.BlockSpec((H, H), lambda i: (0, 0)),          # conv2 weight
            pl.BlockSpec((H, 2), lambda i: (0, 0)),          # packed conv biases
        ],
        out_specs=pl.BlockSpec((Bt, S, H), lambda i: (i, 0, 0)),
        input_output_aliases={0: 0},                          # out reuses seq buffer
        compiler_params=pltpu.CompilerParams(
            dimension_semantics=("parallel",)),
        cost_estimate=pl.CostEstimate(
            flops=flops,
            transcendentals=transcendentals,
            bytes_accessed=bytes_accessed),
    )(*args)


# ----------------------------- references -----------------------------------

def reference_f32(seq, mask, p):
    """Pure-JAX f32 reference mirroring the PyTorch forward (eval mode)."""
    def ln(x, g, b):
        mu = x.mean(-1, keepdims=True)
        var = ((x - mu) ** 2).mean(-1, keepdims=True)
        return (x - mu) / jnp.sqrt(var + 1e-8) * g + b

    x = ln(seq, p["ln1_g"], p["ln1_b"])
    q, k, v = x @ p["wq"].T, x @ p["wk"].T, x @ p["wv"].T
    e = q @ k.T / jnp.sqrt(jnp.float32(seq.shape[-1]))
    e = jnp.where(mask == 0, -1e10, e)
    a = jax.nn.softmax(e, axis=-1)
    seq1 = seq + a @ v
    x2 = ln(seq1, p["ln2_g"], p["ln2_b"])
    h = jax.nn.relu(p["cw1"] @ x2 + p["cb1"])
    return seq1 + (p["cw2"] @ h + p["cb2"])


def reference_matched(seq, bias, p, wqkv_bf, cw1_bf, cw2_bf):
    """Reference using the same bf16-input / f32-accumulate recipe as the kernel."""
    H = seq.shape[-1]
    bf = jnp.bfloat16
    f32 = jnp.float32

    def ln(x, g, b):
        mu = x.mean(-1, keepdims=True)
        var = ((x - mu) ** 2).mean(-1, keepdims=True)
        return (x - mu) * lax.rsqrt(var + 1e-8) * g + b

    x = ln(seq, p["ln1_g"], p["ln1_b"])
    qkv = jnp.dot(x.astype(bf), wqkv_bf, preferred_element_type=f32)
    q, k, v = qkv[:, :H], qkv[:, H:2 * H], qkv[:, 2 * H:]
    e = lax.dot_general(q.astype(bf), k.astype(bf),
                        dimension_numbers=(((1,), (1,)), ((), ())),
                        preferred_element_type=f32) + bias
    e = e - e.max(-1, keepdims=True)
    pe = jnp.exp(e)
    a = pe / pe.sum(-1, keepdims=True)
    seq1 = seq + jnp.dot(a.astype(bf), v.astype(bf), preferred_element_type=f32)
    x2 = ln(seq1, p["ln2_g"], p["ln2_b"])
    h = jnp.maximum(
        jnp.dot(cw1_bf, x2.astype(bf), preferred_element_type=f32) + p["cb1"], 0.0)
    return seq1 + jnp.dot(cw2_bf, h.astype(bf), preferred_element_type=f32) + p["cb2"]


def init_params(key, H):
    ks = jax.random.split(key, 7)
    bound = 1.0 / jnp.sqrt(jnp.float32(H))  # PyTorch default uniform bound
    u = lambda k, shape: jax.random.uniform(
        k, shape, jnp.float32, minval=-bound, maxval=bound)
    return {
        "ln1_g": jnp.ones((1, H), jnp.float32),
        "ln1_b": jnp.zeros((1, H), jnp.float32),
        "wq": u(ks[0], (H, H)),
        "wk": u(ks[1], (H, H)),
        "wv": u(ks[2], (H, H)),
        "ln2_g": jnp.ones((1, H), jnp.float32),
        "ln2_b": jnp.zeros((1, H), jnp.float32),
        "cw1": u(ks[3], (H, H)),          # Conv1d weight (H, H, 1) squeezed
        "cb1": u(ks[4], (H, 1)),          # bias broadcast over length axis
        "cw2": u(ks[5], (H, H)),
        "cb2": u(ks[6], (H, 1)),
    }


if __name__ == "__main__":
    warnings.filterwarnings("ignore", message=".*donat.*")  # buffer-donation info

    H = 128          # hidden_dim (lane-aligned; the module itself requires S == H)
    S = H            # seq_len
    B = 4            # batch of sequences

    key = jax.random.PRNGKey(0)
    k_seq, k_params = jax.random.split(key)
    seq = jax.random.normal(k_seq, (B, S, H), jnp.float32)
    mask = jnp.tril(jnp.ones((S, S), jnp.float32))   # causal: 1 = attend, 0 = masked
    params = init_params(k_params, H)

    # Compute references BEFORE the kernel call: seq is donated to the output
    # via input_output_aliases and must not be reused afterwards.
    lnpack, wqkv_bf, cw1_bf, cw2_bf, cbpack = pack_params(params)
    bias = jnp.where(mask == 0, jnp.float32(-1e10), jnp.float32(0.0))
    ref_m = jnp.stack(
        [reference_matched(seq[b], bias, params, wqkv_bf, cw1_bf, cw2_bf)
         for b in range(B)])
    ref_f = jnp.stack([reference_f32(seq[b], mask, params) for b in range(B)])
    ref_m, ref_f = jax.block_until_ready((ref_m, ref_f))

    out = jax.block_until_ready(self_attention_block(seq, mask, params))
    assert out.shape == (B, S, H) and out.dtype == jnp.float32

    # Tight check vs. a reference with the same precision recipe
    # (approx EUP reciprocal in-kernel => allow a few e-3).
    err_m = float(jnp.max(jnp.abs(out - ref_m)))
    assert jnp.allclose(out, ref_m, rtol=5e-3, atol=5e-3), err_m

    # Looser check vs. the full-f32 PyTorch-equivalent forward
    # (bf16 MXU inputs => ~1e-2-level deviation is expected and accepted).
    err_f = float(jnp.max(jnp.abs(out - ref_f)))
    assert jnp.allclose(out, ref_f, rtol=5e-2, atol=1e-1), err_f

    print("KERNEL_OK")
</pallas_src>

<mosaic_0001>
module attributes {stable_mosaic.version = 11 : i64} {
  func.func @_self_attention_block_kernel(%arg0: i32, %arg1: memref<4x128x128xf32, #tpu.memory_space<vmem>>, %arg2: memref<128x128xf32, #tpu.memory_space<vmem>>, %arg3: memref<4x128xf32, #tpu.memory_space<vmem>>, %arg4: memref<128x384xbf16, #tpu.memory_space<vmem>>, %arg5: memref<128x128xbf16, #tpu.memory_space<vmem>>, %arg6: memref<128x128xbf16, #tpu.memory_space<vmem>>, %arg7: memref<128x2xf32, #tpu.memory_space<vmem>>, %arg8: memref<4x128x128xf32, #tpu.memory_space<vmem>>) attributes {dimension_semantics = [#tpu.dimension_semantics<parallel>], iteration_bounds = array<i64: 1>, scalar_prefetch = 0 : i64, scratch_operands = 0 : i64, tpu.core_type = #tpu.core_type<tc>, window_params = [{transform_indices = @transform_0, window_bounds = array<i64: 4, 128, 128>}, {pipeline_mode = #tpu.pipeline_mode<synchronous>, transform_indices = @transform_1, window_bounds = array<i64: 128, 128>}, {pipeline_mode = #tpu.pipeline_mode<synchronous>, transform_indices = @transform_2, window_bounds = array<i64: 4, 128>}, {pipeline_mode = #tpu.pipeline_mode<synchronous>, transform_indices = @transform_3, window_bounds = array<i64: 128, 384>}, {pipeline_mode = #tpu.pipeline_mode<synchronous>, transform_indices = @transform_4, window_bounds = array<i64: 128, 128>}, {pipeline_mode = #tpu.pipeline_mode<synchronous>, transform_indices = @transform_5, window_bounds = array<i64: 128, 128>}, {pipeline_mode = #tpu.pipeline_mode<synchronous>, transform_indices = @transform_6, window_bounds = array<i64: 128, 2>}, {transform_indices = @transform_7, window_bounds = array<i64: 4, 128, 128>}]} {
    %c0 = arith.constant 0 : index
    %c0_0 = arith.constant 0 : index
    %0 = vector.load %arg3[%c0, %c0_0] : memref<4x128xf32, #tpu.memory_space<vmem>>, vector<1x128xf32>
    %c1 = arith.constant 1 : index
    %c0_1 = arith.constant 0 : index
    %1 = vector.load %arg3[%c1, %c0_1] : memref<4x128xf32, #tpu.memory_space<vmem>>, vector<1x128xf32>
    %c2 = arith.constant 2 : index
    %c0_2 = arith.constant 0 : index
    %2 = vector.load %arg3[%c2, %c0_2] : memref<4x128xf32, #tpu.memory_space<vmem>>, vector<1x128xf32>
    %c3 = arith.constant 3 : index
    %c0_3 = arith.constant 0 : index
    %3 = vector.load %arg3[%c3, %c0_3] : memref<4x128xf32, #tpu.memory_space<vmem>>, vector<1x128xf32>
    %c0_4 = arith.constant 0 : index
    %c0_5 = arith.constant 0 : index
    %c0_6 = arith.constant 0 : index
    %4 = vector.load %arg1[%c0_4, %c0_5, %c0_6] : memref<4x128x128xf32, #tpu.memory_space<vmem>>, vector<4x128x128xf32>
    %5 = vector.shape_cast %4 : vector<4x128x128xf32> to vector<512x128xf32>
    %cst = arith.constant dense<0.000000e+00> : vector<512xf32>
    %6 = vector.multi_reduction <add>, %5, %cst [1] : vector<512x128xf32> to vector<512xf32>
    %7 = vector.shape_cast %6 : vector<512xf32> to vector<512x1xf32>
    %cst_7 = arith.constant 1.280000e+02 : f32
    %8 = vector.broadcast %cst_7 : f32 to vector<512x1xf32>
    %9 = arith.divf %7, %8 : vector<512x1xf32>
    %10 = vector.broadcast %9 : vector<512x1xf32> to vector<512x128xf32>
    %11 = arith.subf %5, %10 : vector<512x128xf32>
    %12 = arith.mulf %11, %11 : vector<512x128xf32>
    %cst_8 = arith.constant dense<0.000000e+00> : vector<512xf32>
    %13 = vector.multi_reduction <add>, %12, %cst_8 [1] : vector<512x128xf32> to vector<512xf32>
    %14 = vector.shape_cast %13 : vector<512xf32> to vector<512x1xf32>
    %cst_9 = arith.constant 1.280000e+02 : f32
    %15 = vector.broadcast %cst_9 : f32 to vector<512x1xf32>
    %16 = arith.divf %14, %15 : vector<512x1xf32>
    %17 = vector.broadcast %9 : vector<512x1xf32> to vector<512x128xf32>
    %18 = arith.subf %5, %17 : vector<512x128xf32>
    %cst_10 = arith.constant 9.99999993E-9 : f32
    %19 = vector.broadcast %cst_10 : f32 to vector<512x1xf32>
    %20 = arith.addf %16, %19 : vector<512x1xf32>
    %21 = math.rsqrt %20 : vector<512x1xf32>
    %22 = vector.broadcast %21 : vector<512x1xf32> to vector<512x128xf32>
    %23 = arith.mulf %18, %22 : vector<512x128xf32>
    %24 = vector.broadcast %0 : vector<1x128xf32> to vector<512x128xf32>
    %25 = arith.mulf %23, %24 : vector<512x128xf32>
    %26 = vector.broadcast %1 : vector<1x128xf32> to vector<512x128xf32>
    %27 = arith.addf %25, %26 : vector<512x128xf32>
    %28 = arith.truncf %27 : vector<512x128xf32> to vector<512x128xbf16>
    %c0_11 = arith.constant 0 : index
    %c0_12 = arith.constant 0 : index
    %29 = vector.load %arg4[%c0_11, %c0_12] : memref<128x384xbf16, #tpu.memory_space<vmem>>, vector<128x384xbf16>
    %cst_13 = arith.constant dense<0.000000e+00> : vector<512x384xf32>
    %30 = tpu.matmul %28, %29, %cst_13 {dimension_numbers = #tpu.dot_dimension_numbers<[1], [0], [0], [1], [0, 0, 1, 1], [], []>} : vector<512x128xbf16>, vector<128x384xbf16>, vector<512x384xf32> -> vector<512x384xf32>
    %31 = vector.extract_strided_slice %30 {offsets = [0, 0], sizes = [512, 128], strides = [1, 1]} : vector<512x384xf32> to vector<512x128xf32>
    %32 = arith.truncf %31 : vector<512x128xf32> to vector<512x128xbf16>
    %33 = vector.shape_cast %32 : vector<512x128xbf16> to vector<4x128x128xbf16>
    %34 = vector.extract_strided_slice %30 {offsets = [0, 128], sizes = [512, 128], strides = [1, 1]} : vector<512x384xf32> to vector<512x128xf32>
    %35 = arith.truncf %34 : vector<512x128xf32> to vector<512x128xbf16>
    %36 = vector.shape_cast %35 : vector<512x128xbf16> to vector<4x128x128xbf16>
    %37 = vector.extract_strided_slice %30 {offsets = [0, 256], sizes = [512, 128], strides = [1, 1]} : vector<512x384xf32> to vector<512x128xf32>
    %38 = arith.truncf %37 : vector<512x128xf32> to vector<512x128xbf16>
    %39 = vector.shape_cast %38 : vector<512x128xbf16> to vector<4x128x128xbf16>
    "tpu.trace_start"() <{level = 10 : i32, message = "bqh,bkh->bqk"}> : () -> ()
    %cst_14 = arith.constant dense<0.000000e+00> : vector<4x128x128xf32>
    %40 = tpu.matmul %33, %36, %cst_14 {dimension_numbers = #tpu.dot_dimension_numbers<[2], [2], [1], [1], [0, 0, 0, 1, 1, 1], [0], [0]>} : vector<4x128x128xbf16>, vector<4x128x128xbf16>, vector<4x128x128xf32> -> vector<4x128x128xf32>
    "tpu.trace_stop"() : () -> ()
    %c0_15 = arith.constant 0 : index
    %c0_16 = arith.constant 0 : index
    %41 = vector.load %arg2[%c0_15, %c0_16] : memref<128x128xf32, #tpu.memory_space<vmem>>, vector<128x128xf32>
    %42 = vector.shape_cast %41 : vector<128x128xf32> to vector<1x128x128xf32>
    %43 = vector.broadcast %42 : vector<1x128x128xf32> to vector<4x128x128xf32>
    %44 = arith.addf %40, %43 : vector<4x128x128xf32>
    %cst_17 = arith.constant dense<0xFF800000> : vector<4x128xf32>
    %45 = vector.multi_reduction <maximumf>, %44, %cst_17 [2] : vector<4x128x128xf32> to vector<4x128xf32>
    %46 = vector.shape_cast %45 : vector<4x128xf32> to vector<4x128x1xf32>
    %47 = vector.broadcast %46 : vector<4x128x1xf32> to vector<4x128x128xf32>
    %48 = arith.subf %44, %47 : vector<4x128x128xf32>
    %49 = math.exp %48 : vector<4x128x128xf32>
    %cst_18 = arith.constant dense<0.000000e+00> : vector<4x128xf32>
    %50 = vector.multi_reduction <add>, %49, %cst_18 [2] : vector<4x128x128xf32> to vector<4x128xf32>
    %51 = vector.shape_cast %50 : vector<4x128xf32> to vector<4x128x1xf32>
    %52 = tpu.reciprocal %51 {approx = true} : vector<4x128x1xf32> -> vector<4x128x1xf32>
    %53 = vector.broadcast %52 : vector<4x128x1xf32> to vector<4x128x128xf32>
    %54 = arith.mulf %49, %53 : vector<4x128x128xf32>
    %55 = arith.truncf %54 : vector<4x128x128xf32> to vector<4x128x128xbf16>
    "tpu.trace_start"() <{level = 10 : i32, message = "bqk,bkh->bqh"}> : () -> ()
    %cst_19 = arith.constant dense<0.000000e+00> : vector<4x128x128xf32>
    %56 = tpu.matmul %55, %39, %cst_19 {dimension_numbers = #tpu.dot_dimension_numbers<[2], [1], [1], [2], [0, 0, 0, 1, 1, 2], [0], [0]>} : vector<4x128x128xbf16>, vector<4x128x128xbf16>, vector<4x128x128xf32> -> vector<4x128x128xf32>
    "tpu.trace_stop"() : () -> ()
    %c0_20 = arith.constant 0 : index
    %c0_21 = arith.constant 0 : index
    %c0_22 = arith.constant 0 : index
    %57 = vector.load %arg1[%c0_20, %c0_21, %c0_22] : memref<4x128x128xf32, #tpu.memory_space<vmem>>, vector<4x128x128xf32>
    %58 = arith.addf %57, %56 : vector<4x128x128xf32>
    %c0_23 = arith.constant 0 : index
    %c0_24 = arith.constant 0 : index
    %c0_25 = arith.constant 0 : index
    %59 = vector.load %arg8[%c0_23, %c0_24, %c0_25] : memref<4x128x128xf32, #tpu.memory_space<vmem>>, vector<4x128x128xf32>
    tpu.vector_store %arg8[%c0_23, %c0_24, %c0_25], %58 {strides = array<i32>} : memref<4x128x128xf32, #tpu.memory_space<vmem>>, vector<4x128x128xf32>,
    %60 = vector.shape_cast %58 : vector<4x128x128xf32> to vector<512x128xf32>
    %cst_26 = arith.constant dense<0.000000e+00> : vector<512xf32>
    %61 = vector.multi_reduction <add>, %60, %cst_26 [1] : vector<512x128xf32> to vector<512xf32>
    %62 = vector.shape_cast %61 : vector<512xf32> to vector<512x1xf32>
    %cst_27 = arith.constant 1.280000e+02 : f32
    %63 = vector.broadcast %cst_27 : f32 to vector<512x1xf32>
    %64 = arith.divf %62, %63 : vector<512x1xf32>
    %65 = vector.broadcast %64 : vector<512x1xf32> to vector<512x128xf32>
    %66 = arith.subf %60, %65 : vector<512x128xf32>
    %67 = arith.mulf %66, %66 : vector<512x128xf32>
    %cst_28 = arith.constant dense<0.000000e+00> : vector<512xf32>
    %68 = vector.multi_reduction <add>, %67, %cst_28 [1] : vector<512x128xf32> to vector<512xf32>
    %69 = vector.shape_cast %68 : vector<512xf32> to vector<512x1xf32>
    %cst_29 = arith.constant 1.280000e+02 : f32
    %70 = vector.broadcast %cst_29 : f32 to vector<512x1xf32>
    %71 = arith.divf %69, %70 : vector<512x1xf32>
    %72 = vector.broadcast %64 : vector<512x1xf32> to vector<512x128xf32>
    %73 = arith.subf %60, %72 : vector<512x128xf32>
    %cst_30 = arith.constant 9.99999993E-9 : f32
    %74 = vector.broadcast %cst_30 : f32 to vector<512x1xf32>
    %75 = arith.addf %71, %74 : vector<512x1xf32>
    %76 = math.rsqrt %75 : vector<512x1xf32>
    %77 = vector.broadcast %76 : vector<512x1xf32> to vector<512x128xf32>
    %78 = arith.mulf %73, %77 : vector<512x128xf32>
    %79 = vector.broadcast %2 : vector<1x128xf32> to vector<512x128xf32>
    %80 = arith.mulf %78, %79 : vector<512x128xf32>
    %81 = vector.broadcast %3 : vector<1x128xf32> to vector<512x128xf32>
    %82 = arith.addf %80, %81 : vector<512x128xf32>
    %83 = arith.truncf %82 : vector<512x128xf32> to vector<512x128xbf16>
    %84 = vector.shape_cast %83 : vector<512x128xbf16> to vector<4x128x128xbf16>
    %85 = vector.extract_strided_slice %84 {offsets = [0, 0, 0], sizes = [1, 128, 128], strides = [1, 1, 1]} : vector<4x128x128xbf16> to vector<1x128x128xbf16>
    %86 = vector.shape_cast %85 : vector<1x128x128xbf16> to vector<128x128xbf16>
    %87 = vector.extract_strided_slice %84 {offsets = [1, 0, 0], sizes = [1, 128, 128], strides = [1, 1, 1]} : vector<4x128x128xbf16> to vector<1x128x128xbf16>
    %88 = vector.shape_cast %87 : vector<1x128x128xbf16> to vector<128x128xbf16>
    %89 = vector.extract_strided_slice %84 {offsets = [2, 0, 0], sizes = [1, 128, 128], strides = [1, 1, 1]} : vector<4x128x128xbf16> to vector<1x128x128xbf16>
    %90 = vector.shape_cast %89 : vector<1x128x128xbf16> to vector<128x128xbf16>
    %91 = vector.extract_strided_slice %84 {offsets = [3, 0, 0], sizes = [1, 128, 128], strides = [1, 1, 1]} : vector<4x128x128xbf16> to vector<1x128x128xbf16>
    %92 = vector.shape_cast %91 : vector<1x128x128xbf16> to vector<128x128xbf16>
    %93 = tpu.concatenate %86, %88, %90, %92 in 1 : vector<128x128xbf16>, vector<128x128xbf16>, vector<128x128xbf16>, vector<128x128xbf16> -> vector<128x512xbf16>
    %c0_31 = arith.constant 0 : index
    %c0_32 = arith.constant 0 : index
    %94 = vector.load %arg7[%c0_31, %c0_32] : memref<128x2xf32, #tpu.memory_space<vmem>>, vector<128x1xf32>
    %c0_33 = arith.constant 0 : index
    %c1_34 = arith.constant 1 : index
    %95 = vector.load %arg7[%c0_33, %c1_34] : memref<128x2xf32, #tpu.memory_space<vmem>>, vector<128x1xf32>
    %c0_35 = arith.constant 0 : index
    %c0_36 = arith.constant 0 : index
    %96 = vector.load %arg5[%c0_35, %c0_36] : memref<128x128xbf16, #tpu.memory_space<vmem>>, vector<128x128xbf16>
    %cst_37 = arith.constant dense<0.000000e+00> : vector<128x512xf32>
    %97 = tpu.matmul %96, %93, %cst_37 {dimension_numbers = #tpu.dot_dimension_numbers<[1], [0], [0], [1], [0, 0, 1, 1], [], []>} : vector<128x128xbf16>, vector<128x512xbf16>, vector<128x512xf32> -> vector<128x512xf32>
    %98 = vector.broadcast %94 : vector<128x1xf32> to vector<128x512xf32>
    %99 = arith.addf %97, %98 : vector<128x512xf32>
    %cst_38 = arith.constant 0.000000e+00 : f32
    %100 = vector.broadcast %cst_38 : f32 to vector<128x512xf32>
    %101 = arith.maximumf %99, %100 : vector<128x512xf32>
    %c0_39 = arith.constant 0 : index
    %c0_40 = arith.constant 0 : index
    %102 = vector.load %arg6[%c0_39, %c0_40] : memref<128x128xbf16, #tpu.memory_space<vmem>>, vector<128x128xbf16>
    %103 = arith.truncf %101 : vector<128x512xf32> to vector<128x512xbf16>
    %cst_41 = arith.constant dense<0.000000e+00> : vector<128x512xf32>
    %104 = tpu.matmul %102, %103, %cst_41 {dimension_numbers = #tpu.dot_dimension_numbers<[1], [0], [0], [1], [0, 0, 1, 1], [], []>} : vector<128x128xbf16>, vector<128x512xbf16>, vector<128x512xf32> -> vector<128x512xf32>
    %105 = vector.broadcast %95 : vector<128x1xf32> to vector<128x512xf32>
    %106 = arith.addf %104, %105 : vector<128x512xf32>
    %c0_42 = arith.constant 0 : index
    %c0_43 = arith.constant 0 : index
    %c0_44 = arith.constant 0 : index
    %107 = vector.load %arg8[%c0_42, %c0_43, %c0_44] : memref<4x128x128xf32, #tpu.memory_space<vmem>>, vector<1x128x128xf32>
    %108 = vector.shape_cast %107 : vector<1x128x128xf32> to vector<128x128xf32>
    %109 = vector.extract_strided_slice %106 {offsets = [0, 0], sizes = [128, 128], strides = [1, 1]} : vector<128x512xf32> to vector<128x128xf32>
    %110 = arith.addf %108, %109 : vector<128x128xf32>
    %c0_45 = arith.constant 0 : index
    %c0_46 = arith.constant 0 : index
    %c0_47 = arith.constant 0 : index
    %111 = vector.load %arg8[%c0_45, %c0_46, %c0_47] : memref<4x128x128xf32, #tpu.memory_space<vmem>>, vector<1x128x128xf32>
    %112 = vector.shape_cast %111 : vector<1x128x128xf32> to vector<128x128xf32>
    %113 = vector.shape_cast %110 : vector<128x128xf32> to vector<1x128x128xf32>
    tpu.vector_store %arg8[%c0_45, %c0_46, %c0_47], %113 {strides = array<i32>} : memref<4x128x128xf32, #tpu.memory_space<vmem>>, vector<1x128x128xf32>,
    %c1_48 = arith.constant 1 : index
    %c0_49 = arith.constant 0 : index
    %c0_50 = arith.constant 0 : index
    %114 = vector.load %arg8[%c1_48, %c0_49, %c0_50] : memref<4x128x128xf32, #tpu.memory_space<vmem>>, vector<1x128x128xf32>
    %115 = vector.shape_cast %114 : vector<1x128x128xf32> to vector<128x128xf32>
    %116 = vector.extract_strided_slice %106 {offsets = [0, 128], sizes = [128, 128], strides = [1, 1]} : vector<128x512xf32> to vector<128x128xf32>
    %117 = arith.addf %115, %116 : vector<128x128xf32>
    %c1_51 = arith.constant 1 : index
    %c0_52 = arith.constant 0 : index
    %c0_53 = arith.constant 0 : index
    %118 = vector.load %arg8[%c1_51, %c0_52, %c0_53] : memref<4x128x128xf32, #tpu.memory_space<vmem>>, vector<1x128x128xf32>
    %119 = vector.shape_cast %118 : vector<1x128x128xf32> to vector<128x128xf32>
    %120 = vector.shape_cast %117 : vector<128x128xf32> to vector<1x128x128xf32>
    tpu.vector_store %arg8[%c1_51, %c0_52, %c0_53], %120 {strides = array<i32>} : memref<4x128x128xf32, #tpu.memory_space<vmem>>, vector<1x128x128xf32>,
    %c2_54 = arith.constant 2 : index
    %c0_55 = arith.constant 0 : index
    %c0_56 = arith.constant 0 : index
    %121 = vector.load %arg8[%c2_54, %c0_55, %c0_56] : memref<4x128x128xf32, #tpu.memory_space<vmem>>, vector<1x128x128xf32>
    %122 = vector.shape_cast %121 : vector<1x128x128xf32> to vector<128x128xf32>
    %123 = vector.extract_strided_slice %106 {offsets = [0, 256], sizes = [128, 128], strides = [1, 1]} : vector<128x512xf32> to vector<128x128xf32>
    %124 = arith.addf %122, %123 : vector<128x128xf32>
    %c2_57 = arith.constant 2 : index
    %c0_58 = arith.constant 0 : index
    %c0_59 = arith.constant 0 : index
    %125 = vector.load %arg8[%c2_57, %c0_58, %c0_59] : memref<4x128x128xf32, #tpu.memory_space<vmem>>, vector<1x128x128xf32>
    %126 = vector.shape_cast %125 : vector<1x128x128xf32> to vector<128x128xf32>
    %127 = vector.shape_cast %124 : vector<128x128xf32> to vector<1x128x128xf32>
    tpu.vector_store %arg8[%c2_57, %c0_58, %c0_59], %127 {strides = array<i32>} : memref<4x128x128xf32, #tpu.memory_space<vmem>>, vector<1x128x128xf32>,
    %c3_60 = arith.constant 3 : index
    %c0_61 = arith.constant 0 : index
    %c0_62 = arith.constant 0 : index
    %128 = vector.load %arg8[%c3_60, %c0_61, %c0_62] : memref<4x128x128xf32, #tpu.memory_space<vmem>>, vector<1x128x128xf32>
    %129 = vector.shape_cast %128 : vector<1x128x128xf32> to vector<128x128xf32>
    %130 = vector.extract_strided_slice %106 {offsets = [0, 384], sizes = [128, 128], strides = [1, 1]} : vector<128x512xf32> to vector<128x128xf32>
    %131 = arith.addf %129, %130 : vector<128x128xf32>
    %c3_63 = arith.constant 3 : index
    %c0_64 = arith.constant 0 : index
    %c0_65 = arith.constant 0 : index
    %132 = vector.load %arg8[%c3_63, %c0_64, %c0_65] : memref<4x128x128xf32, #tpu.memory_space<vmem>>, vector<1x128x128xf32>
    %133 = vector.shape_cast %132 : vector<1x128x128xf32> to vector<128x128xf32>
    %134 = vector.shape_cast %131 : vector<128x128xf32> to vector<1x128x128xf32>
    tpu.vector_store %arg8[%c3_63, %c0_64, %c0_65], %134 {strides = array<i32>} : memref<4x128x128xf32, #tpu.memory_space<vmem>>, vector<1x128x128xf32>,
    return
  }
  func.func @transform_0(%arg0: i32) -> (i32, i32, i32) {
    %c0_i32 = arith.constant 0 : i32
    %c0_i32_0 = arith.constant 0 : i32
    %c0_i32_1 = arith.constant 0 : i32
    return %arg0, %c0_i32, %c0_i32_0 : i32, i32, i32
  }
  func.func @transform_1(%arg0: i32) -> (i32, i32) {
    %c0_i32 = arith.constant 0 : i32
    %c0_i32_0 = arith.constant 0 : i32
    %c0_i32_1 = arith.constant 0 : i32
    return %c0_i32, %c0_i32_0 : i32, i32
  }
  func.func @transform_2(%arg0: i32) -> (i32, i32) {
    %c0_i32 = arith.constant 0 : i32
    %c0_i32_0 = arith.constant 0 : i32
    %c0_i32_1 = arith.constant 0 : i32
    return %c0_i32, %c0_i32_0 : i32, i32
  }
  func.func @transform_3(%arg0: i32) -> (i32, i32) {
    %c0_i32 = arith.constant 0 : i32
    %c0_i32_0 = arith.constant 0 : i32
    %c0_i32_1 = arith.constant 0 : i32
    return %c0_i32, %c0_i32_0 : i32, i32
  }
  func.func @transform_4(%arg0: i32) -> (i32, i32) {
    %c0_i32 = arith.constant 0 : i32
    %c0_i32_0 = arith.constant 0 : i32
    %c0_i32_1 = arith.constant 0 : i32
    return %c0_i32, %c0_i32_0 : i32, i32
  }
  func.func @transform_5(%arg0: i32) -> (i32, i32) {
    %c0_i32 = arith.constant 0 : i32
    %c0_i32_0 = arith.constant 0 : i32
    %c0_i32_1 = arith.constant 0 : i32
    return %c0_i32, %c0_i32_0 : i32, i32
  }
  func.func @transform_6(%arg0: i32) -> (i32, i32) {
    %c0_i32 = arith.constant 0 : i32
    %c0_i32_0 = arith.constant 0 : i32
    %c0_i32_1 = arith.constant 0 : i32
    return %c0_i32, %c0_i32_0 : i32, i32
  }
  func.func @transform_7(%arg0: i32) -> (i32, i32, i32) {
    %c0_i32 = arith.constant 0 : i32
    %c0_i32_0 = arith.constant 0 : i32
    %c0_i32_1 = arith.constant 0 : i32
    return %arg0, %c0_i32, %c0_i32_0 : i32, i32, i32
  }
}

</mosaic_0001>

<bundles_post_ra>
// kernel: tpu_custom_call.1
= control target key start
LH: loop header
LB: loop body
LE: loop exit
PB: predicated region body
PF: predicated region fallthrough
CT: control target
= control target key end

     0   :  { %12 = vsyncpa [#allocation3], 0  ;;  %s9649_s0 = inlined_call_operand.hbm [shape: f32[4,128,128], index: 0, kind: input, shape index: {}, may-alias: {0,7}]   ;;  %s9650_s1 = inlined_call_operand.vmem [shape: f32[128,128], index: 1, kind: input, shape index: {}]   ;;  %s9651_s2 = inlined_call_operand.vmem [shape: f32[4,128], index: 2, kind: input, shape index: {}]   ;;  %s9652_s3 = inlined_call_operand.vmem [shape: bf16[128,384], index: 3, kind: input, shape index: {}]   ;;  %s9653_s4 = inlined_call_operand.vmem [shape: bf16[128,128], index: 4, kind: input, shape index: {}]   ;;  %s9654_s5 = inlined_call_operand.vmem [shape: bf16[128,128], index: 5, kind: input, shape index: {}]   ;;  %s9655_s6 = inlined_call_operand.vmem [shape: f32[128,2], index: 6, kind: input, shape index: {}]   ;;  %s9656_s7 = inlined_call_operand.hbm [shape: f32[4,128,128], index: 7, kind: output, shape index: {}, may-alias: {0,7}]  }
   0x1   :  { %13 = vsyncpa [#allocation4], 0  ;;  %s6567_s24 = smov [#allocation2]   ;;  %s6519_s28 = scalar_lea.hbm %s9649_s0, 8192 }
   0x2   :  { %s19_s25 = sshll.u32 %s6567_s24, 4  ;;  %p6520_p0 = scmp.ne.s32.totalorder %s9649_s0, %s6519_s28  ;;  %s20_s25 = int_to_ptr.vmem [resolvable:$true] %s19_s25 }
   0x3   :  { %p6523_p1 = scmp.lt.u32.totalorder %s6519_s28, %s9649_s0 }
   0x5   :  { %p6525_p2 = pnand %p6523_p1, %p6520_p0 }
   0x7   :  { %6528 = shalt.err (!%p6525_p2)
}
   0x8   :  { %s6529_s10 = scalar_lea.vmem %s20_s25, 8192  ;;  %p6534_p4 = scmp.lt.s32.totalorder %s20_s25, %s20_s25 }
   0x9   :  { %p6530_p3 = scmp.ne.s32.totalorder %s20_s25, %s6529_s10  ;;  %p6535_p5 = scmp.lt.s32.totalorder %s6529_s10, %s6529_s10 }
   0xb   :  { %p6536_p6 = por %p6535_p5, %p6534_p4 }
   0xd   :  { %p6537_p7 = pnand %p6536_p6, %p6530_p3 }
   0xf   :  { %6540 = shalt.err (!%p6537_p7)
}
  0x10   :  { %s6568_s11 = smov 128   ;;  %s6569_s12 = smov 8  }
  0x11   :  { %25 = dma.hbm_to_vmem [thread:$0]  %s9649_s0, 8192, %s20_s25, [#allocation3], %s6568_s11, %s6568_s11, %s6569_s12  }
  0x12   :  { %6563 = dma.done.wait [#allocation3], 8192  }
  0x13   :  { %6564 = vsyncadd [#allocation3], 4294959104  ;;  %v46_v0 = vld [vmem:[#allocation2] sm:$0xff]  ;;  %v48_v1 = vld [vmem:[#allocation2 + $0x10] sm:$0xff] }
  0x14   :  { %110 = vadd.xlane.f32.xlu0 %v46_v0  ;;  %114 = vadd.xlane.f32.xlu1 %v48_v1  ;;  %v47_v2 = vld [vmem:[#allocation2 + $0x8] sm:$0xff]  ;;  %v49_v3 = vld [vmem:[#allocation2 + $0x18] sm:$0xff]  ;;  %v6628_v4 = vld [vmem:[#allocation2 + $0x20] sm:$0xff] }
  0x15   :  { %v6630_v5 = vld [vmem:[#allocation2 + $0x28] sm:$0xff]  ;;  %v6632_v6 = vld [vmem:[#allocation2 + $0x30] sm:$0xff]  ;;  %v6634_v7 = vld [vmem:[#allocation2 + $0x38] sm:$0xff] }
  0x16   :  { %v6638_v8 = vld [vmem:[#allocation2 + $0x40] sm:$0xff]  ;;  %v6640_v9 = vld [vmem:[#allocation2 + $0x48] sm:$0xff]  ;;  %v6644_v10 = vld [vmem:[#allocation2 + $0x50] sm:$0xff] }
  0x17   :  { %v6646_v11 = vld [vmem:[#allocation2 + $0x58] sm:$0xff]  ;;  %v6650_v12 = vld [vmem:[#allocation2 + $0x60] sm:$0xff]  ;;  %v6654_v13 = vld [vmem:[#allocation2 + $0x68] sm:$0xff] }
  0x18   :  { %112 = vadd.xlane.f32.xlu0 %v47_v2  ;;  %116 = vadd.xlane.f32.xlu1 %v49_v3  ;;  %v6656_v14 = vld [vmem:[#allocation2 + $0x70] sm:$0xff]  ;;  %v6658_v15 = vld [vmem:[#allocation2 + $0x78] sm:$0xff]  ;;  %v6664_v16 = vld [vmem:[#allocation2 + $0x80] sm:$0xff] }
  0x19   :  { %v6666_v17 = vld [vmem:[#allocation2 + $0x88] sm:$0xff]  ;;  %v6670_v18 = vld [vmem:[#allocation2 + $0x90] sm:$0xff]  ;;  %v6672_v19 = vld [vmem:[#allocation2 + $0x98] sm:$0xff] }
  0x1a   :  { %v5951_v20 = vld [vmem:[%s9652_s3 + $0x4] ss:$12 sps:$4 sm:$0xff]   ;;  %v5953_v21 = vld [vmem:[%s9652_s3] ss:$12 sps:$4 sm:$0xff]   ;;  %v5954_v22 = vld [vmem:[%s9652_s3 + $0x1c] ss:$12 sps:$4 sm:$0xff]  }
  0x1b   :  { %1143 = vmatprep.subr.bf16.mxu0 %v5951_v20  ;;  %v6693_v35 = vld [vmem:[#allocation2 + $0xa0] sm:$0xff]  ;;  %v6702_v41 = vld [vmem:[#allocation2 + $0xa8] sm:$0xff]  ;;  %v6710_v46 = vld [vmem:[#allocation2 + $0xb0] sm:$0xff] }
  0x1c   :  { %118 = vadd.xlane.f32.xlu0 %v6628_v4  ;;  %120 = vadd.xlane.f32.xlu1 %v6630_v5  ;;  %v5956_v51 = vld [vmem:[%s9652_s3 + $0x18] ss:$12 sps:$4 sm:$0xff]   ;;  %v5957_v54 = vld [vmem:[%s9652_s3 + $0x34] ss:$12 sps:$4 sm:$0xff]   ;;  %v5960_v59 = vld [vmem:[%s9652_s3 + $0x30] ss:$12 sps:$4 sm:$0xff]  }
  0x1d   :  { %1144 = vmatpush1.bf16.msra.mxu0 %v5953_v21  ;;  %v6721_v52 = vld [vmem:[#allocation2 + $0xb8] sm:$0xff]  ;;  %v5959_v55 = vld [vmem:[%s9652_s3 + $0x8] ss:$12 sps:$4 sm:$0xff]   ;;  %v6738_v60 = vld [vmem:[#allocation2 + $0xc0] sm:$0xff] }
  0x1e   :  { %1145 = vmatprep.subr.bf16.mxu0 %v5954_v22  ;;  %5605 = vmatprep.subr.bf16.mxu1 %v5959_v55  ;;  %v5961_v62 = vld [vmem:[%s9652_s3 + $0x4c] ss:$12 sps:$4 sm:$0xff]  }
  0x1f   :  { %5606 = vmatpush3.bf16.msra.mxu1 %v5959_v55  ;;  %v5963_v63 = vld [vmem:[%s9652_s3 + $0x20] ss:$12 sps:$4 sm:$0xff]  }
  0x20   :  { %122 = vadd.xlane.f32.xlu0 %v6632_v6  ;;  %124 = vadd.xlane.f32.xlu1 %v6634_v7  ;;  %v6823_v55 = vld [vmem:[#allocation2 + $0xe8] sm:$0xff] }
  0x21   :  { %1146 = vmatpush1.bf16.msra.mxu0 %v5956_v51  ;;  %5607 = vmatprep.subr.bf16.mxu1 %v5963_v63 }
  0x22   :  { %1147 = vmatprep.subr.bf16.mxu0 %v5957_v54  ;;  %v5980_v54 = vld [vmem:[%s9652_s3 + $0xa8] ss:$12 sps:$4 sm:$0xff]  }
  0x23   :  { %5608 = vmatpush3.bf16.msra.mxu1 %v5963_v63 }
  0x24   :  { %126 = vadd.xlane.f32.xlu0 %v6638_v8  ;;  %128 = vadd.xlane.f32.xlu1 %v6640_v9 }
  0x25   :  { %1148 = vmatpush1.bf16.msra.mxu0 %v5960_v59 }
  0x26   :  { %1149 = vmatprep.subr.bf16.mxu0 %v5961_v62  ;;  %v6834_v62 = vld [vmem:[#allocation2 + $0xf0] sm:$0xff] }
  0x28   :  { %130 = vadd.xlane.f32.xlu0 %v6644_v10  ;;  %132 = vadd.xlane.f32.xlu1 %v6646_v11 }
  0x2c   :  { %134 = vadd.xlane.f32.xlu0 %v6650_v12  ;;  %136 = vadd.xlane.f32.xlu1 %v6654_v13 }
  0x30   :  { %138 = vadd.xlane.f32.xlu0 %v6656_v14  ;;  %140 = vadd.xlane.f32.xlu1 %v6658_v15 }
  0x34   :  { %142 = vadd.xlane.f32.xlu0 %v6664_v16  ;;  %144 = vadd.xlane.f32.xlu1 %v6666_v17 }
  0x38   :  { %146 = vadd.xlane.f32.xlu0 %v6670_v18  ;;  %148 = vadd.xlane.f32.xlu1 %v6672_v19 }
  0xa1   :  { %v111_v23 = vpop.xlane.xlu0 %110  ;;  %v115_v24 = vpop.xlane.xlu1 %114 }
  0xa2   :  { %v239_v25 = vmul.f32 0.0078125, %v111_v23  ;;  %v241_v27 = vmul.f32 0.0078125, %v115_v24  ;;  %v5968_v23 = vld [vmem:[%s9652_s3 + $0x60] ss:$12 sps:$4 sm:$0xff]   ;;  %v6772_v24 = vld [vmem:[#allocation2 + $0xd0] sm:$0xff] }
  0xa4   :  { %v6685_v26 = vsub.f32 %v46_v0, %v239_v25  ;;  %v6691_v34 = vsub.f32 %v48_v1, %v241_v27  ;;  %v5969_v27 = vld [vmem:[%s9652_s3 + $0x7c] ss:$12 sps:$4 sm:$0xff]  }
  0xa5   :  { %v113_v28 = vpop.xlane.xlu0 %112  ;;  %v117_v29 = vpop.xlane.xlu1 %116 }
  0xa6   :  { %v240_v30 = vmul.f32 0.0078125, %v113_v28  ;;  %v367_v31 = vmul.f32 %v6685_v26, %v6685_v26  ;;  %v242_v33 = vmul.f32 0.0078125, %v117_v29  ;;  %v369_v38 = vmul.f32 %v6691_v34, %v6691_v34 }
  0xa8   :  { %431 = vadd.xlane.f32.xlu0 %v367_v31  ;;  %v6689_v32 = vsub.f32 %v47_v2, %v240_v30  ;;  %v6700_v40 = vsub.f32 %v49_v3, %v242_v33  ;;  %v5964_v3 = vld [vmem:[%s9652_s3 + $0x48] ss:$12 sps:$4 sm:$0xff]   ;;  %v5972_v31 = vld [vmem:[%s9652_s3 + $0x78] ss:$12 sps:$4 sm:$0xff]  }
  0xa9   :  { %v119_v36 = vpop.xlane.xlu0 %118  ;;  %v121_v42 = vpop.xlane.xlu1 %120  ;;  %1150 = vmatpush1.bf16.msra.mxu0 %v5964_v3  ;;  %v6789_v33 = vld [vmem:[#allocation2 + $0xd8] sm:$0xff] }
  0xaa   :  { %v368_v37 = vmul.f32 %v6689_v32, %v6689_v32  ;;  %v243_v39 = vmul.f32 0.0078125, %v119_v36  ;;  %v370_v43 = vmul.f32 %v6700_v40, %v6700_v40  ;;  %v244_v44 = vmul.f32 0.0078125, %v121_v42 }
  0xac   :  { %150 = vadd.xlane.f32.xlu0 %v6693_v35  ;;  %433 = vadd.xlane.f32.xlu1 %v368_v37  ;;  %v6708_v45 = vsub.f32 %v6628_v4, %v243_v39  ;;  %v6716_v50 = vsub.f32 %v6630_v5, %v244_v44  ;;  %v6755_v4 = vld [vmem:[#allocation2 + $0xc8] sm:$0xff]  ;;  %v5973_v37 = vld [vmem:[%s9652_s3 + $0x94] ss:$12 sps:$4 sm:$0xff]  }
  0xad   :  { %v123_v47 = vpop.xlane.xlu0 %122  ;;  %v125_v53 = vpop.xlane.xlu1 %124  ;;  %v6806_v44 = vld [vmem:[#allocation2 + $0xe0] sm:$0xff] }
  0xae   :  { %v371_v48 = vmul.f32 %v6708_v45, %v6708_v45  ;;  %v245_v49 = vmul.f32 0.0078125, %v123_v47  ;;  %v372_v56 = vmul.f32 %v6716_v50, %v6716_v50  ;;  %v246_v57 = vmul.f32 0.0078125, %v125_v53 }
  0xb0   :  { %435 = vadd.xlane.f32.xlu0 %v369_v38  ;;  %152 = vadd.xlane.f32.xlu1 %v6702_v41  ;;  %v6733_v58 = vsub.f32 %v6632_v6, %v245_v49  ;;  %v6750_v2 = vsub.f32 %v6634_v7, %v246_v57  ;;  %v5965_v6 = vld [vmem:[%s9652_s3 + $0x64] ss:$12 sps:$4 sm:$0xff]  }
  0xb1   :  { %v127_v61 = vpop.xlane.xlu0 %126  ;;  %v129_v5 = vpop.xlane.xlu1 %128  ;;  %v5967_v7 = vld [vmem:[%s9652_s3 + $0x38] ss:$12 sps:$4 sm:$0xff]   ;;  %1151 = vmatprep.subr.bf16.mxu0 %v5965_v6 }
  0xb2   :  { %v373_v0 = vmul.f32 %v6733_v58, %v6733_v58  ;;  %v247_v1 = vmul.f32 0.0078125, %v127_v61  ;;  %v374_v20 = vmul.f32 %v6750_v2, %v6750_v2  ;;  %v248_v21 = vmul.f32 0.0078125, %v129_v5  ;;  %5609 = vmatprep.subr.bf16.mxu1 %v5967_v7  ;;  %1152 = vmatpush1.bf16.msra.mxu0 %v5968_v23  ;;  %v5981_v57 = vld [vmem:[%s9652_s3 + $0x98] ss:$12 sps:$4 sm:$0xff]  }
  0xb3   :  { %5610 = vmatpush3.bf16.msra.mxu1 %v5967_v7  ;;  %1153 = vmatprep.subr.bf16.mxu0 %v5969_v27  ;;  %v6848_v6 = vld [vmem:[#allocation2 + $0xf8] sm:$0xff] }
  0xb4   :  { %154 = vadd.xlane.f32.xlu0 %v6710_v46  ;;  %437 = vadd.xlane.f32.xlu1 %v370_v43  ;;  %v6767_v22 = vsub.f32 %v6638_v8, %v247_v1  ;;  %v5971_v8 = vld [vmem:[%s9652_s3 + $0x50] ss:$12 sps:$4 sm:$0xff]   ;;  %v6784_v30 = vsub.f32 %v6640_v9, %v248_v21  ;;  %v5975_v9 = vld [vmem:[%s9652_s3 + $0x68] ss:$12 sps:$4 sm:$0xff]  }
  0xb5   :  { %v131_v25 = vpop.xlane.xlu0 %130  ;;  %v133_v36 = vpop.xlane.xlu1 %132  ;;  %5611 = vmatprep.subr.bf16.mxu1 %v5971_v8  ;;  %v5976_v43 = vld [vmem:[%s9652_s3 + $0x90] ss:$12 sps:$4 sm:$0xff]  }
  0xb6   :  { %v375_v28 = vmul.f32 %v6767_v22, %v6767_v22  ;;  %v249_v29 = vmul.f32 0.0078125, %v131_v25  ;;  %1154 = vmatpush1.bf16.msra.mxu0 %v5972_v31  ;;  %v376_v38 = vmul.f32 %v6784_v30, %v6784_v30  ;;  %v250_v39 = vmul.f32 0.0078125, %v133_v36  ;;  %v5982_v1 = vld [vmem:[%s9652_s3 + $0xb0] ss:$12 sps:$4 sm:$0xff]   ;;  %v6856_v25 = vld [vmem:[#allocation2 + $0x100] sm:$0xff] }
  0xb7   :  { %5612 = vmatpush3.bf16.msra.mxu1 %v5971_v8  ;;  %1155 = vmatprep.subr.bf16.mxu0 %v5973_v37 }
  0xb8   :  { %156 = vadd.xlane.f32.xlu1 %v6721_v52  ;;  %439 = vadd.xlane.f32.xlu0 %v371_v48  ;;  %v6801_v42 = vsub.f32 %v6644_v10, %v249_v29  ;;  %v5977_v48 = vld [vmem:[%s9652_s3 + $0xac] ss:$12 sps:$4 sm:$0xff]   ;;  %v6818_v53 = vsub.f32 %v6646_v11, %v250_v39 }
  0xb9   :  { %v135_v47 = vpop.xlane.xlu0 %134  ;;  %5613 = vmatprep.subr.bf16.mxu1 %v5975_v9  ;;  %v5979_v10 = vld [vmem:[%s9652_s3 + $0x80] ss:$12 sps:$4 sm:$0xff]  }
  0xba   :  { %1156 = vmatpush1.bf16.msra.mxu0 %v5976_v43  ;;  %v377_v49 = vmul.f32 %v6801_v42, %v6801_v42  ;;  %v251_v51 = vmul.f32 0.0078125, %v135_v47  ;;  %v378_v11 = vmul.f32 %v6818_v53, %v6818_v53  ;;  %v6864_v29 = vld [vmem:[#allocation2 + $0x108] sm:$0xff]  ;;  %v6880_v47 = vld [vmem:[#allocation2 + $0x118] sm:$0xff] }
  0xbb   :  { %5614 = vmatpush3.bf16.msra.mxu1 %v5975_v9  ;;  %1157 = vmatprep.subr.bf16.mxu0 %v5977_v48  ;;  %v6872_v9 = vld [vmem:[#allocation2 + $0x110] sm:$0xff] }
  0xbc   :  { %441 = vadd.xlane.f32.xlu1 %v372_v56  ;;  %158 = vadd.xlane.f32.xlu0 %v6738_v60  ;;  %v137_v56 = vpop.xlane.xlu1 %136  ;;  %v6832_v61 = vsub.f32 %v6650_v12, %v251_v51  ;;  %v6888_v51 = vld [vmem:[#allocation2 + $0x120] sm:$0xff] }
  0xbd   :  { %5615 = vmatprep.subr.bf16.mxu1 %v5979_v10  ;;  %v252_v59 = vmul.f32 0.0078125, %v137_v56  ;;  %v139_v63 = vpop.xlane.xlu0 %138  ;;  %v6896_v56 = vld [vmem:[#allocation2 + $0x128] sm:$0xff] }
  0xbe   :  { %1158 = vmatpush1.bf16.msra.mxu0 %v5980_v54  ;;  %v379_v12 = vmul.f32 %v6832_v61, %v6832_v61  ;;  %v253_v3 = vmul.f32 0.0078125, %v139_v63 }
  0xbf   :  { %5616 = vmatpush3.bf16.msra.mxu1 %v5979_v10  ;;  %v6846_v5 = vsub.f32 %v6654_v13, %v252_v59 }
  0xc0   :  { %160 = vadd.xlane.f32.xlu1 %v6755_v4  ;;  %443 = vadd.xlane.f32.xlu0 %v373_v0  ;;  %v9657_v0 = vmov 0   ;;  %v141_v7 = vpop.xlane.xlu1 %140  ;;  %v6854_v23 = vsub.f32 %v6656_v14, %v253_v3 }
  0xc1   :  { %1175 = vmatprep.mubr.bf16.mxu0 %v9657_v0  ;;  %5617 = vmatprep.subr.bf16.mxu1 %v5981_v57  ;;  %v254_v21 = vmul.f32 0.0078125, %v141_v7  ;;  %v143_v27 = vpop.xlane.xlu0 %142 }
  0xc2   :  { %5948 = vset.pattern.permute.xlu1 %v9657_v0  ;;  %5947 = vset.pattern.permute.xlu0 %v9657_v0  ;;  %v381_v13 = vmul.f32 %v6854_v23, %v6854_v23  ;;  %v255_v8 = vmul.f32 0.0078125, %v143_v27 }
  0xc3   :  { %5618 = vmatpush3.bf16.msra.mxu1 %v5981_v57  ;;  %v6901_v57 = vld [vmem:[#allocation2 + $0x130] sm:$0xff] }
  0xc4   :  { %445 = vadd.xlane.f32.xlu1 %v374_v20  ;;  %162 = vadd.xlane.f32.xlu0 %v6772_v24  ;;  %v380_v20 = vmul.f32 %v6846_v5, %v6846_v5  ;;  %v145_v31 = vpop.xlane.xlu1 %144  ;;  %v6870_v37 = vsub.f32 %v6664_v16, %v255_v8 }
  0xc5   :  { %5619 = vmatprep.subr.bf16.mxu1 %v5982_v1  ;;  %v256_v36 = vmul.f32 0.0078125, %v145_v31 }
  0xc7   :  { %5620 = vmatpush3.bf16.msra.mxu1 %v5982_v1  ;;  %v6878_v43 = vsub.f32 %v6666_v17, %v256_v36 }
  0xc8   :  { %164 = vadd.xlane.f32.xlu1 %v6789_v33  ;;  %447 = vadd.xlane.f32.xlu0 %v375_v28  ;;  %v6862_v28 = vsub.f32 %v6658_v15, %v254_v21  ;;  %v383_v15 = vmul.f32 %v6870_v37, %v6870_v37  ;;  %v149_v48 = vpop.xlane.xlu1 %148 }
  0xc9   :  { %v384_v16 = vmul.f32 %v6878_v43, %v6878_v43  ;;  %v258_v10 = vmul.f32 0.0078125, %v149_v48  ;;  %v6915_v48 = vld [vmem:[#allocation2 + $0x140] sm:$0xff] }
  0xca   :  { %v382_v14 = vmul.f32 %v6862_v28, %v6862_v28 }
  0xcb   :  { %v6894_v54 = vsub.f32 %v6672_v19, %v258_v10 }
  0xcc   :  { %449 = vadd.xlane.f32.xlu1 %v376_v38  ;;  %166 = vadd.xlane.f32.xlu0 %v6806_v44  ;;  %v147_v38 = vpop.xlane.xlu0 %146 }
  0xcd   :  { %v257_v39 = vmul.f32 0.0078125, %v147_v38 }
  0xd0   :  { %168 = vadd.xlane.f32.xlu1 %v6823_v55  ;;  %451 = vadd.xlane.f32.xlu0 %v377_v49  ;;  %v6886_v49 = vsub.f32 %v6670_v18, %v257_v39  ;;  %v386_v18 = vmul.f32 %v6894_v54, %v6894_v54 }
  0xd2   :  { %v385_v17 = vmul.f32 %v6886_v49, %v6886_v49 }
  0xd4   :  { %453 = vadd.xlane.f32.xlu1 %v378_v11  ;;  %170 = vadd.xlane.f32.xlu0 %v6834_v62  ;;  %v6904_v11 = vld [vmem:[#allocation2 + $0x138] sm:$0xff] }
  0xd8   :  { %172 = vadd.xlane.f32.xlu1 %v6848_v6  ;;  %455 = vadd.xlane.f32.xlu0 %v379_v12 }
  0xdc   :  { %457 = vadd.xlane.f32.xlu1 %v380_v20  ;;  %174 = vadd.xlane.f32.xlu0 %v6856_v25 }
  0xe0   :  { %176 = vadd.xlane.f32.xlu1 %v6864_v29  ;;  %459 = vadd.xlane.f32.xlu0 %v381_v13 }
  0xe4   :  { %461 = vadd.xlane.f32.xlu1 %v382_v14  ;;  %178 = vadd.xlane.f32.xlu0 %v6872_v9 }
  0xe8   :  { %180 = vadd.xlane.f32.xlu1 %v6880_v47  ;;  %463 = vadd.xlane.f32.xlu0 %v383_v15 }
  0xec   :  { %465 = vadd.xlane.f32.xlu1 %v384_v16  ;;  %182 = vadd.xlane.f32.xlu0 %v6888_v51 }
  0xf0   :  { %184 = vadd.xlane.f32.xlu1 %v6896_v56  ;;  %467 = vadd.xlane.f32.xlu0 %v385_v17 }
  0xf4   :  { %469 = vadd.xlane.f32.xlu1 %v386_v18  ;;  %186 = vadd.xlane.f32.xlu0 %v6901_v57 }
  0xf8   :  { %188 = vadd.xlane.f32.xlu1 %v6904_v11 }
 0x135   :  { %v432_v59 = vpop.xlane.xlu0 %431 }
 0x136   :  { %v559_v19 = vmul.f32 0.0078125, %v432_v59 }
 0x138   :  { %v623_v63 = vadd.f32 1e-08, %v559_v19 }
 0x139   :  { %v434_v1 = vpop.xlane.xlu1 %433  ;;  %v151_v12 = vpop.xlane.xlu0 %150 }
 0x13a   :  { %5999 = vrsqrt.f32 %v623_v63  ;;  %v560_v3 = vmul.f32 0.0078125, %v434_v1  ;;  %v259_v7 = vmul.f32 0.0078125, %v151_v12  ;;  %v6923_v63 = vld [vmem:[#allocation2 + $0x148] sm:$0xff] }
 0x13c   :  { %v624_v20 = vadd.f32 1e-08, %v560_v3  ;;  %v6908_v21 = vsub.f32 %v6693_v35, %v259_v7 }
 0x13d   :  { %v153_v27 = vpop.xlane.xlu1 %152  ;;  %v436_v13 = vpop.xlane.xlu0 %435 }
 0x13e   :  { %6001 = vrsqrt.f32 %v624_v20  ;;  %v260_v8 = vmul.f32 0.0078125, %v153_v27  ;;  %v561_v31 = vmul.f32 0.0078125, %v436_v13  ;;  %v387_v14 = vmul.f32 %v6908_v21, %v6908_v21  ;;  %v6931_v20 = vld [vmem:[%s9651_s2] ss:$0 sm:$0xff] }
 0x140   :  { %v625_v36 = vadd.f32 1e-08, %v561_v31  ;;  %471 = vadd.xlane.f32.xlu0 %v387_v14  ;;  %v6913_v38 = vsub.f32 %v6702_v41, %v260_v8  ;;  %v6937_v31 = vld [vmem:[#allocation2 + $0x150] sm:$0xff] }
 0x141   :  { %v438_v15 = vpop.xlane.xlu1 %437  ;;  %v155_v39 = vpop.xlane.xlu0 %154 }
 0x142   :  { %6003 = vrsqrt.f32 %v625_v36  ;;  %v562_v35 = vmul.f32 0.0078125, %v438_v15  ;;  %v261_v16 = vmul.f32 0.0078125, %v155_v39  ;;  %v388_v10 = vmul.f32 %v6913_v38, %v6913_v38 }
 0x144   :  { %v6000_v17 = vpop.eup %5999  ;;  %v626_v18 = vadd.f32 1e-08, %v562_v35  ;;  %473 = vadd.xlane.f32.xlu1 %v388_v10  ;;  %190 = vadd.xlane.f32.xlu0 %v6915_v48  ;;  %v6921_v59 = vsub.f32 %v6710_v46, %v261_v16  ;;  %v6946_v16 = vld [vmem:[%s9651_s2 + $0x1] ss:$0 sm:$0xff] }
 0x145   :  { %v157_v41 = vpop.xlane.xlu1 %156  ;;  %v440_v19 = vpop.xlane.xlu0 %439  ;;  %v751_v1 = vmul.f32 %v6000_v17, %v6685_v26 }
 0x146   :  { %6005 = vrsqrt.f32 %v626_v18  ;;  %v262_v12 = vmul.f32 0.0078125, %v157_v41  ;;  %v563_v3 = vmul.f32 0.0078125, %v440_v19  ;;  %v389_v7 = vmul.f32 %v6921_v59, %v6921_v59  ;;  %v6953_v19 = vld [vmem:[#allocation2 + $0x158] sm:$0xff] }
 0x147   :  { %v819_v36 = vmul.f32 %v6931_v20, %v751_v1 }
 0x148   :  { %v6002_v27 = vpop.eup %6001  ;;  %v627_v46 = vadd.f32 1e-08, %v563_v3  ;;  %192 = vadd.xlane.f32.xlu1 %v6923_v63  ;;  %475 = vadd.xlane.f32.xlu0 %v389_v7  ;;  %v6935_v13 = vsub.f32 %v6721_v52, %v262_v12 }
 0x149   :  { %v442_v26 = vpop.xlane.xlu1 %441  ;;  %v159_v8 = vpop.xlane.xlu0 %158  ;;  %v752_v14 = vmul.f32 %v6002_v27, %v6689_v32  ;;  %v887_v1 = vadd.f32 %v6946_v16, %v819_v36 }
 0x14a   :  { %6007 = vrsqrt.f32 %v627_v46  ;;  %v564_v15 = vmul.f32 0.0078125, %v442_v26  ;;  %v263_v39 = vmul.f32 0.0078125, %v159_v8  ;;  %v390_v35 = vmul.f32 %v6935_v13, %v6935_v13 }
 0x14b   :  { %v820_v52 = vmul.f32 %v6931_v20, %v752_v14 }
 0x14c   :  { %v6004_v10 = vpop.eup %6003  ;;  %v628_v17 = vadd.f32 1e-08, %v564_v15  ;;  %477 = vadd.xlane.f32.xlu1 %v390_v35  ;;  %194 = vadd.xlane.f32.xlu0 %v6937_v31  ;;  %v6951_v32 = vsub.f32 %v6738_v60, %v263_v39 }
 0x14d   :  { %v161_v18 = vpop.xlane.xlu1 %160  ;;  %v444_v41 = vpop.xlane.xlu0 %443  ;;  %v888_v12 = vadd.f32 %v6946_v16, %v820_v52  ;;  %v753_v3 = vmul.f32 %v6004_v10, %v6691_v34  ;;  %v6964_v34 = vld [vmem:[#allocation2 + $0x160] sm:$0xff] }
 0x14e   :  { %6009 = vrsqrt.f32 %v628_v17  ;;  %v264_v7 = vmul.f32 0.0078125, %v161_v18  ;;  %v565_v27 = vmul.f32 0.0078125, %v444_v41  ;;  %v391_v46 = vmul.f32 %v6951_v32, %v6951_v32 }
 0x14f   :  { %v951_v26 = vpack.c.bf16 %v888_v12, %v887_v1  ;;  %v821_v35 = vmul.f32 %v6931_v20, %v753_v3  ;;  %v6976_v3 = vld [vmem:[#allocation2 + $0x168] sm:$0xff] }
 0x150   :  { %v6006_v8 = vpop.eup %6005  ;;  %v629_v60 = vadd.f32 1e-08, %v565_v27  ;;  %196 = vadd.xlane.f32.xlu1 %v6953_v19  ;;  %479 = vadd.xlane.f32.xlu0 %v391_v46  ;;  %v6962_v14 = vsub.f32 %v6755_v4, %v264_v7 }
 0x151   :  { %v446_v36 = vpop.xlane.xlu1 %445  ;;  %v163_v15 = vpop.xlane.xlu0 %162  ;;  %1176 = vmatmul.mubr.bf16.vlgmr.msra.gmra.mrb[0].mxu0 %v951_v26  ;;  %5621 = vmatprep.mubr.bf16.mxu1 %v951_v26  ;;  %v754_v39 = vmul.f32 %v6006_v8, %v6700_v40  ;;  %v889_v7 = vadd.f32 %v6946_v16, %v821_v35 }
 0x152   :  { %6011 = vrsqrt.f32 %v629_v60  ;;  %v566_v52 = vmul.f32 0.0078125, %v446_v36  ;;  %v265_v10 = vmul.f32 0.0078125, %v163_v15  ;;  %v392_v17 = vmul.f32 %v6962_v14, %v6962_v14  ;;  %1185 = vmatprep.mubr.bf16.mxu0 %v9657_v0 }
 0x153   :  { %v822_v4 = vmul.f32 %v6931_v20, %v754_v39 }
 0x154   :  { %v6008_v18 = vpop.eup %6007  ;;  %v630_v41 = vadd.f32 1e-08, %v566_v52  ;;  %481 = vadd.xlane.f32.xlu1 %v392_v17  ;;  %198 = vadd.xlane.f32.xlu0 %v6964_v34  ;;  %v6974_v1 = vsub.f32 %v6772_v24, %v265_v10 }
 0x155   :  { %v165_v40 = vpop.xlane.xlu1 %164  ;;  %v448_v12 = vpop.xlane.xlu0 %447  ;;  %v890_v27 = vadd.f32 %v6946_v16, %v822_v4  ;;  %v755_v46 = vmul.f32 %v6008_v18, %v6708_v45  ;;  %v6987_v45 = vld [vmem:[#allocation2 + $0x170] sm:$0xff] }
 0x156   :  { %6013 = vrsqrt.f32 %v630_v41  ;;  %v266_v26 = vmul.f32 0.0078125, %v165_v40  ;;  %v567_v8 = vmul.f32 0.0078125, %v448_v12  ;;  %v393_v60 = vmul.f32 %v6974_v1, %v6974_v1 }
 0x157   :  { %v952_v36 = vpack.c.bf16 %v890_v27, %v889_v7  ;;  %v823_v17 = vmul.f32 %v6931_v20, %v755_v46  ;;  %v6999_v46 = vld [vmem:[#allocation2 + $0x178] sm:$0xff] }
 0x158   :  { %v6010_v15 = vpop.eup %6009  ;;  %v631_v24 = vadd.f32 1e-08, %v567_v8  ;;  %200 = vadd.xlane.f32.xlu1 %v6976_v3  ;;  %483 = vadd.xlane.f32.xlu0 %v393_v60  ;;  %v6985_v39 = vsub.f32 %v6789_v33, %v266_v26 }
 0x159   :  { %v450_v35 = vpop.xlane.xlu1 %449  ;;  %v167_v52 = vpop.xlane.xlu0 %166  ;;  %1186 = vmatmul.mubr.bf16.gmra.mrb[4].mxu0 %v952_v36  ;;  %5622 = vmatmul.mubr.bf16.vlgmr.msra.gmra.mrb[0].mxu1 %v952_v36  ;;  %v756_v10 = vmul.f32 %v6010_v15, %v6716_v50  ;;  %v891_v26 = vadd.f32 %v6946_v16, %v823_v17 }
 0x15a   :  { %6015 = vrsqrt.f32 %v631_v24  ;;  %v568_v4 = vmul.f32 0.0078125, %v450_v35  ;;  %v267_v18 = vmul.f32 0.0078125, %v167_v52  ;;  %v394_v41 = vmul.f32 %v6985_v39, %v6985_v39  ;;  %1195 = vmatprep.mubr.bf16.mxu0 %v9657_v0 }
 0x15b   :  { %v824_v33 = vmul.f32 %v6931_v20, %v756_v10 }
 0x15c   :  { %v6012_v40 = vpop.eup %6011  ;;  %v632_v12 = vadd.f32 1e-08, %v568_v4  ;;  %485 = vadd.xlane.f32.xlu1 %v394_v41  ;;  %202 = vadd.xlane.f32.xlu0 %v6987_v45  ;;  %v6997_v7 = vsub.f32 %v6806_v44, %v267_v18 }
 0x15d   :  { %v169_v50 = vpop.xlane.xlu1 %168  ;;  %v452_v27 = vpop.xlane.xlu0 %451  ;;  %v892_v8 = vadd.f32 %v6946_v16, %v824_v33  ;;  %v757_v60 = vmul.f32 %v6012_v40, %v6733_v58  ;;  %v7010_v58 = vld [vmem:[#allocation2 + $0x180] sm:$0xff] }
 0x15e   :  { %6017 = vrsqrt.f32 %v632_v12  ;;  %v268_v36 = vmul.f32 0.0078125, %v169_v50  ;;  %v569_v15 = vmul.f32 0.0078125, %v452_v27  ;;  %v395_v24 = vmul.f32 %v6997_v7, %v6997_v7 }
 0x15f   :  { %v953_v35 = vpack.c.bf16 %v892_v8, %v891_v26  ;;  %v825_v41 = vmul.f32 %v6931_v20, %v757_v60  ;;  %v7022_v60 = vld [vmem:[#allocation2 + $0x188] sm:$0xff] }
 0x160   :  { %v6014_v52 = vpop.eup %6013  ;;  %v633_v44 = vadd.f32 1e-08, %v569_v15  ;;  %204 = vadd.xlane.f32.xlu1 %v6999_v46  ;;  %487 = vadd.xlane.f32.xlu0 %v395_v24  ;;  %v7008_v10 = vsub.f32 %v6823_v55, %v268_v36 }
 0x161   :  { %v454_v17 = vpop.xlane.xlu1 %453  ;;  %v171_v4 = vpop.xlane.xlu0 %170  ;;  %1196 = vmatmul.mubr.bf16.gmra.mrb[8].mxu0 %v953_v35  ;;  %5625 = vmatprep.mubr.bf16.mxu1 %v953_v35  ;;  %v758_v18 = vmul.f32 %v6014_v52, %v6750_v2  ;;  %v893_v36 = vadd.f32 %v6946_v16, %v825_v41 }
 0x162   :  { %6019 = vrsqrt.f32 %v633_v44  ;;  %v570_v33 = vmul.f32 0.0078125, %v454_v17  ;;  %v269_v40 = vmul.f32 0.0078125, %v171_v4  ;;  %v396_v12 = vmul.f32 %v7008_v10, %v7008_v10  ;;  %1205 = vmatprep.mubr.bf16.mxu0 %v9657_v0 }
 0x163   :  { %v826_v55 = vmul.f32 %v6931_v20, %v758_v18 }
 0x164   :  { %v6016_v50 = vpop.eup %6015  ;;  %v634_v27 = vadd.f32 1e-08, %v570_v33  ;;  %489 = vadd.xlane.f32.xlu1 %v396_v12  ;;  %206 = vadd.xlane.f32.xlu0 %v7010_v58  ;;  %v7020_v26 = vsub.f32 %v6834_v62, %v269_v40 }
 0x165   :  { %v173_v2 = vpop.xlane.xlu1 %172  ;;  %v456_v8 = vpop.xlane.xlu0 %455  ;;  %v894_v15 = vadd.f32 %v6946_v16, %v826_v55  ;;  %v759_v24 = vmul.f32 %v6016_v50, %v6767_v22  ;;  %v7033_v22 = vld [vmem:[#allocation2 + $0x190] sm:$0xff] }
 0x166   :  { %6021 = vrsqrt.f32 %v634_v27  ;;  %v270_v35 = vmul.f32 0.0078125, %v173_v2  ;;  %v571_v52 = vmul.f32 0.0078125, %v456_v8  ;;  %v397_v44 = vmul.f32 %v7020_v26, %v7020_v26 }
 0x167   :  { %v954_v17 = vpack.c.bf16 %v894_v15, %v893_v36  ;;  %v827_v12 = vmul.f32 %v6931_v20, %v759_v24  ;;  %v7045_v24 = vld [vmem:[#allocation2 + $0x198] sm:$0xff] }
 0x168   :  { %v6018_v4 = vpop.eup %6017  ;;  %v635_v62 = vadd.f32 1e-08, %v571_v52  ;;  %208 = vadd.xlane.f32.xlu1 %v7022_v60  ;;  %491 = vadd.xlane.f32.xlu0 %v397_v44  ;;  %v7031_v18 = vsub.f32 %v6848_v6, %v270_v35 }
 0x169   :  { %v458_v41 = vpop.xlane.xlu1 %457  ;;  %v175_v33 = vpop.xlane.xlu0 %174  ;;  %1206 = vmatmul.mubr.bf16.gmra.mrb[12].mxu0 %v954_v17  ;;  %5626 = vmatmul.mubr.bf16.gmra.mrb[4].mxu1 %v954_v17  ;;  %v760_v40 = vmul.f32 %v6018_v4, %v6784_v30  ;;  %v895_v35 = vadd.f32 %v6946_v16, %v827_v12 }
 0x16a   :  { %6023 = vrsqrt.f32 %v635_v62  ;;  %v572_v55 = vmul.f32 0.0078125, %v458_v41  ;;  %v271_v50 = vmul.f32 0.0078125, %v175_v33  ;;  %v398_v27 = vmul.f32 %v7031_v18, %v7031_v18  ;;  %1215 = vmatprep.mubr.bf16.mxu0 %v9657_v0 }
 0x16b   :  { %v828_v6 = vmul.f32 %v6931_v20, %v760_v40 }
 0x16c   :  { %v6020_v2 = vpop.eup %6019  ;;  %v636_v8 = vadd.f32 1e-08, %v572_v55  ;;  %493 = vadd.xlane.f32.xlu1 %v398_v27  ;;  %210 = vadd.xlane.f32.xlu0 %v7033_v22  ;;  %v7043_v36 = vsub.f32 %v6856_v25, %v271_v50 }
 0x16d   :  { %v177_v30 = vpop.xlane.xlu1 %176  ;;  %v460_v15 = vpop.xlane.xlu0 %459  ;;  %v896_v52 = vadd.f32 %v6946_v16, %v828_v6  ;;  %v761_v44 = vmul.f32 %v6020_v2, %v6801_v42  ;;  %v7056_v42 = vld [vmem:[#allocation2 + $0x1a0] sm:$0xff] }
 0x16e   :  { %6025 = vrsqrt.f32 %v636_v8  ;;  %v272_v17 = vmul.f32 0.0078125, %v177_v30  ;;  %v573_v4 = vmul.f32 0.0078125, %v460_v15  ;;  %v399_v62 = vmul.f32 %v7043_v36, %v7043_v36 }
 0x16f   :  { %v955_v41 = vpack.c.bf16 %v896_v52, %v895_v35  ;;  %v829_v27 = vmul.f32 %v6931_v20, %v761_v44  ;;  %v7068_v44 = vld [vmem:[#allocation2 + $0x1a8] sm:$0xff] }
 0x170   :  { %v6022_v33 = vpop.eup %6021  ;;  %v637_v25 = vadd.f32 1e-08, %v573_v4  ;;  %212 = vadd.xlane.f32.xlu1 %v7045_v24  ;;  %495 = vadd.xlane.f32.xlu0 %v399_v62  ;;  %v7054_v40 = vsub.f32 %v6864_v29, %v272_v17 }
 0x171   :  { %v462_v12 = vpop.xlane.xlu1 %461  ;;  %v179_v55 = vpop.xlane.xlu0 %178  ;;  %1216 = vmatmul.mubr.bf16.gmra.mrb[16].mxu0 %v955_v41  ;;  %5629 = vmatprep.mubr.bf16.mxu1 %v955_v41  ;;  %v762_v50 = vmul.f32 %v6022_v33, %v6818_v53  ;;  %v897_v17 = vadd.f32 %v6946_v16, %v829_v27 }
 0x172   :  { %6027 = vrsqrt.f32 %v637_v25  ;;  %v574_v6 = vmul.f32 0.0078125, %v462_v12  ;;  %v273_v2 = vmul.f32 0.0078125, %v179_v55  ;;  %v400_v8 = vmul.f32 %v7054_v40, %v7054_v40  ;;  %1225 = vmatprep.mubr.bf16.mxu0 %v9657_v0 }
 0x173   :  { %v830_v29 = vmul.f32 %v6931_v20, %v762_v50 }
 0x174   :  { %v6024_v30 = vpop.eup %6023  ;;  %v638_v15 = vadd.f32 1e-08, %v574_v6  ;;  %497 = vadd.xlane.f32.xlu1 %v400_v8  ;;  %214 = vadd.xlane.f32.xlu0 %v7056_v42  ;;  %v7066_v35 = vsub.f32 %v6872_v9, %v273_v2 }
 0x175   :  { %v181_v53 = vpop.xlane.xlu1 %180  ;;  %v464_v52 = vpop.xlane.xlu0 %463  ;;  %v898_v4 = vadd.f32 %v6946_v16, %v830_v29  ;;  %v763_v62 = vmul.f32 %v6024_v30, %v6832_v61  ;;  %v7079_v61 = vld [vmem:[#allocation2 + $0x1b0] sm:$0xff] }
 0x176   :  { %6029 = vrsqrt.f32 %v638_v15  ;;  %v274_v41 = vmul.f32 0.0078125, %v181_v53  ;;  %v575_v33 = vmul.f32 0.0078125, %v464_v52  ;;  %v401_v25 = vmul.f32 %v7066_v35, %v7066_v35 }
 0x177   :  { %v956_v12 = vpack.c.bf16 %v898_v4, %v897_v17  ;;  %v831_v8 = vmul.f32 %v6931_v20, %v763_v62  ;;  %v7091_v62 = vld [vmem:[#allocation2 + $0x1b8] sm:$0xff] }
 0x178   :  { %v6026_v55 = vpop.eup %6025  ;;  %v639_v9 = vadd.f32 1e-08, %v575_v33  ;;  %216 = vadd.xlane.f32.xlu1 %v7068_v44  ;;  %499 = vadd.xlane.f32.xlu0 %v401_v25  ;;  %v7077_v50 = vsub.f32 %v6880_v47, %v274_v41 }
 0x179   :  { %v466_v27 = vpop.xlane.xlu1 %465  ;;  %v183_v6 = vpop.xlane.xlu0 %182  ;;  %1226 = vmatmul.mubr.bf16.gmra.mrb[20].mxu0 %v956_v12  ;;  %5630 = vmatmul.mubr.bf16.gmra.mrb[8].mxu1 %v956_v12  ;;  %v764_v2 = vmul.f32 %v6026_v55, %v6846_v5  ;;  %v899_v41 = vadd.f32 %v6946_v16, %v831_v8 }
 0x17a   :  { %6031 = vrsqrt.f32 %v639_v9  ;;  %v576_v29 = vmul.f32 0.0078125, %v466_v27  ;;  %v275_v30 = vmul.f32 0.0078125, %v183_v6  ;;  %v402_v15 = vmul.f32 %v7077_v50, %v7077_v50  ;;  %1235 = vmatprep.mubr.bf16.mxu0 %v9657_v0 }
 0x17b   :  { %v832_v47 = vmul.f32 %v6931_v20, %v764_v2 }
 0x17c   :  { %v6028_v53 = vpop.eup %6027  ;;  %v640_v52 = vadd.f32 1e-08, %v576_v29  ;;  %501 = vadd.xlane.f32.xlu1 %v402_v15  ;;  %218 = vadd.xlane.f32.xlu0 %v7079_v61  ;;  %v7089_v17 = vsub.f32 %v6888_v51, %v275_v30 }
 0x17d   :  { %v185_v5 = vpop.xlane.xlu1 %184  ;;  %v468_v4 = vpop.xlane.xlu0 %467  ;;  %v900_v33 = vadd.f32 %v6946_v16, %v832_v47  ;;  %v765_v25 = vmul.f32 %v6028_v53, %v6854_v23  ;;  %v7102_v23 = vld [vmem:[#allocation2 + $0x1c0] sm:$0xff] }
 0x17e   :  { %6033 = vrsqrt.f32 %v640_v52  ;;  %v276_v12 = vmul.f32 0.0078125, %v185_v5  ;;  %v577_v55 = vmul.f32 0.0078125, %v468_v4  ;;  %v403_v9 = vmul.f32 %v7089_v17, %v7089_v17 }
 0x17f   :  { %v957_v27 = vpack.c.bf16 %v900_v33, %v899_v41  ;;  %v833_v15 = vmul.f32 %v6931_v20, %v765_v25  ;;  %v7114_v33 = vld [vmem:[#allocation2 + $0x1c8] sm:$0xff] }
 0x180   :  { %v6030_v6 = vpop.eup %6029  ;;  %v641_v51 = vadd.f32 1e-08, %v577_v55  ;;  %220 = vadd.xlane.f32.xlu1 %v7091_v62  ;;  %503 = vadd.xlane.f32.xlu0 %v403_v9  ;;  %v7100_v2 = vsub.f32 %v6896_v56, %v276_v12 }
 0x181   :  { %v470_v8 = vpop.xlane.xlu1 %469  ;;  %v187_v29 = vpop.xlane.xlu0 %186  ;;  %1236 = vmatmul.mubr.bf16.gmra.mrb[24].mxu0 %v957_v27  ;;  %5633 = vmatprep.mubr.bf16.mxu1 %v957_v27  ;;  %v766_v30 = vmul.f32 %v6030_v6, %v6862_v28  ;;  %v901_v25 = vadd.f32 %v6946_v16, %v833_v15 }
 0x182   :  { %6035 = vrsqrt.f32 %v641_v51  ;;  %v578_v47 = vmul.f32 0.0078125, %v470_v8  ;;  %v277_v53 = vmul.f32 0.0078125, %v187_v29  ;;  %v404_v52 = vmul.f32 %v7100_v2, %v7100_v2  ;;  %1245 = vmatprep.mubr.bf16.mxu0 %v9657_v0  ;;  %v7125_v8 = vld [vmem:[#allocation2 + $0x1d0] sm:$0xff] }
 0x183   :  { %v834_v56 = vmul.f32 %v6931_v20, %v766_v30 }
 0x184   :  { %v6032_v5 = vpop.eup %6031  ;;  %v642_v4 = vadd.f32 1e-08, %v578_v47  ;;  %505 = vadd.xlane.f32.xlu1 %v404_v52  ;;  %222 = vadd.xlane.f32.xlu0 %v7102_v23  ;;  %v7112_v41 = vsub.f32 %v6901_v57, %v277_v53 }
 0x185   :  { %v189_v28 = vpop.xlane.xlu1 %188  ;;  %v902_v12 = vadd.f32 %v6946_v16, %v834_v56  ;;  %v767_v55 = vmul.f32 %v6032_v5, %v6870_v37 }
 0x186   :  { %6037 = vrsqrt.f32 %v642_v4  ;;  %v278_v9 = vmul.f32 0.0078125, %v189_v28  ;;  %v405_v27 = vmul.f32 %v7112_v41, %v7112_v41 }
 0x187   :  { %v958_v6 = vpack.c.bf16 %v902_v12, %v901_v25  ;;  %v835_v37 = vmul.f32 %v6931_v20, %v767_v55 }
 0x188   :  { %v6034_v51 = vpop.eup %6033  ;;  %224 = vadd.xlane.f32.xlu1 %v7114_v33  ;;  %507 = vadd.xlane.f32.xlu0 %v405_v27  ;;  %v7123_v57 = vsub.f32 %v6904_v11, %v278_v9  ;;  %v7134_v11 = vld [vmem:[#allocation2 + $0x1d8] sm:$0xff] }
 0x189   :  { %1246 = vmatmul.mubr.bf16.gmra.mrb[28].mxu0 %v958_v6  ;;  %5634 = vmatmul.mubr.bf16.gmra.mrb[12].mxu1 %v958_v6  ;;  %v768_v29 = vmul.f32 %v6034_v51, %v6878_v43  ;;  %v903_v53 = vadd.f32 %v6946_v16, %v835_v37 }
 0x18a   :  { %v406_v30 = vmul.f32 %v7123_v57, %v7123_v57  ;;  %1255 = vmatprep.mubr.bf16.mxu0 %v9657_v0 }
 0x18b   :  { %v836_v15 = vmul.f32 %v6931_v20, %v768_v29 }
 0x18c   :  { %v6036_v47 = vpop.eup %6035  ;;  %509 = vadd.xlane.f32.xlu1 %v406_v30  ;;  %226 = vadd.xlane.f32.xlu0 %v7125_v8 }
 0x18d   :  { %v904_v52 = vadd.f32 %v6946_v16, %v836_v15  ;;  %v769_v43 = vmul.f32 %v6036_v47, %v6886_v49 }
 0x18f   :  { %v959_v56 = vpack.c.bf16 %v904_v52, %v903_v53  ;;  %v837_v28 = vmul.f32 %v6931_v20, %v769_v43 }
 0x190   :  { %v6038_v5 = vpop.eup %6037  ;;  %228 = vadd.xlane.f32.xlu1 %v7134_v11 }
 0x191   :  { %1256 = vmatmul.mubr.bf16.gmra.mrb[32].mxu0 %v959_v56  ;;  %5637 = vmatprep.mubr.bf16.mxu1 %v959_v56  ;;  %v770_v4 = vmul.f32 %v6038_v5, %v6894_v54  ;;  %v905_v12 = vadd.f32 %v6946_v16, %v837_v28 }
 0x192   :  { %1265 = vmatprep.mubr.bf16.mxu0 %v9657_v0 }
 0x193   :  { %v838_v25 = vmul.f32 %v6931_v20, %v770_v4 }
 0x195   :  { %v906_v55 = vadd.f32 %v6946_v16, %v838_v25 }
 0x197   :  { %v960_v9 = vpack.c.bf16 %v906_v55, %v905_v12  ;;  %v7155_v12 = vld [vmem:[#allocation2 + $0x1e0] sm:$0xff] }
 0x199   :  { %1266 = vmatmul.mubr.bf16.gmra.mrb[36].mxu0 %v960_v9  ;;  %5638 = vmatmul.mubr.bf16.gmra.mrb[16].mxu1 %v960_v9 }
 0x19a   :  { %1275 = vmatprep.mubr.bf16.mxu0 %v9657_v0 }
 0x1cd   :  { %v472_v49 = vpop.xlane.xlu0 %471 }
 0x1ce   :  { %v579_v27 = vmul.f32 0.0078125, %v472_v49 }
 0x1d0   :  { %v643_v6 = vadd.f32 1e-08, %v579_v27 }
 0x1d1   :  { %v474_v51 = vpop.xlane.xlu1 %473  ;;  %v191_v54 = vpop.xlane.xlu0 %190 }
 0x1d2   :  { %6039 = vrsqrt.f32 %v643_v6  ;;  %v580_v29 = vmul.f32 0.0078125, %v474_v51  ;;  %v279_v37 = vmul.f32 0.0078125, %v191_v54  ;;  %v7163_v54 = vld [vmem:[#allocation2 + $0x1e8] sm:$0xff] }
 0x1d4   :  { %v644_v30 = vadd.f32 1e-08, %v580_v29  ;;  %v7148_v15 = vsub.f32 %v6915_v48, %v279_v37 }
 0x1d5   :  { %v193_v47 = vpop.xlane.xlu1 %192  ;;  %v476_v53 = vpop.xlane.xlu0 %475 }
 0x1d6   :  { %6041 = vrsqrt.f32 %v644_v30  ;;  %v280_v52 = vmul.f32 0.0078125, %v193_v47  ;;  %v581_v43 = vmul.f32 0.0078125, %v476_v53  ;;  %v407_v56 = vmul.f32 %v7148_v15, %v7148_v15 }
 0x1d8   :  { %v7153_v5 = vsub.f32 %v6923_v63, %v280_v52  ;;  %v645_v4 = vadd.f32 1e-08, %v581_v43  ;;  %511 = vadd.xlane.f32.xlu0 %v407_v56 }
 0x1d9   :  { %v478_v28 = vpop.xlane.xlu1 %477  ;;  %v195_v25 = vpop.xlane.xlu0 %194 }
 0x1da   :  { %6043 = vrsqrt.f32 %v645_v4  ;;  %v582_v48 = vmul.f32 0.0078125, %v478_v28  ;;  %v281_v55 = vmul.f32 0.0078125, %v195_v25  ;;  %v408_v9 = vmul.f32 %v7153_v5, %v7153_v5  ;;  %v7172_v4 = vld [vmem:[#allocation2 + $0x1f0] sm:$0xff] }
 0x1dc   :  { %v6040_v49 = vpop.eup %6039  ;;  %v646_v27 = vadd.f32 1e-08, %v582_v48  ;;  %v7160_v6 = vsub.f32 %v6937_v31, %v281_v55  ;;  %513 = vadd.xlane.f32.xlu1 %v408_v9  ;;  %230 = vadd.xlane.f32.xlu0 %v7155_v12 }
 0x1dd   :  { %v197_v63 = vpop.xlane.xlu1 %196  ;;  %v480_v51 = vpop.xlane.xlu0 %479  ;;  %v771_v29 = vmul.f32 %v6040_v49, %v6908_v21 }
 0x1de   :  { %6045 = vrsqrt.f32 %v646_v27  ;;  %v282_v37 = vmul.f32 0.0078125, %v197_v63  ;;  %v583_v30 = vmul.f32 0.0078125, %v480_v51  ;;  %v409_v47 = vmul.f32 %v7160_v6, %v7160_v6  ;;  %v7183_v51 = vld [vmem:[#allocation2 + $0x1f8] sm:$0xff] }
 0x1df   :  { %v839_v28 = vmul.f32 %v6931_v20, %v771_v29 }
 0x1e0   :  { %v6042_v53 = vpop.eup %6041  ;;  %v7169_v52 = vsub.f32 %v6953_v19, %v282_v37  ;;  %v647_v31 = vadd.f32 1e-08, %v583_v30  ;;  %232 = vadd.xlane.f32.xlu1 %v7163_v54  ;;  %515 = vadd.xlane.f32.xlu0 %v409_v47 }
 0x1e1   :  { %v482_v43 = vpop.xlane.xlu1 %481  ;;  %v199_v56 = vpop.xlane.xlu0 %198  ;;  %v772_v21 = vmul.f32 %v6042_v53, %v6913_v38  ;;  %v907_v29 = vadd.f32 %v6946_v16, %v839_v28 }
 0x1e2   :  { %6047 = vrsqrt.f32 %v647_v31  ;;  %v584_v25 = vmul.f32 0.0078125, %v482_v43  ;;  %v283_v48 = vmul.f32 0.0078125, %v199_v56  ;;  %v410_v55 = vmul.f32 %v7169_v52, %v7169_v52 }
 0x1e3   :  { %v840_v19 = vmul.f32 %v6931_v20, %v772_v21 }
 0x1e4   :  { %v6044_v9 = vpop.eup %6043  ;;  %v648_v49 = vadd.f32 1e-08, %v584_v25  ;;  %v7180_v27 = vsub.f32 %v6964_v34, %v283_v48  ;;  %517 = vadd.xlane.f32.xlu1 %v410_v55  ;;  %234 = vadd.xlane.f32.xlu0 %v7172_v4 }
 0x1e5   :  { %v201_v63 = vpop.xlane.xlu1 %200  ;;  %v484_v38 = vpop.xlane.xlu0 %483  ;;  %v908_v37 = vadd.f32 %v6946_v16, %v840_v19  ;;  %v773_v30 = vmul.f32 %v6044_v9, %v6921_v59 }
 0x1e6   :  { %6049 = vrsqrt.f32 %v648_v49  ;;  %v284_v47 = vmul.f32 0.0078125, %v201_v63  ;;  %v585_v53 = vmul.f32 0.0078125, %v484_v38  ;;  %v411_v34 = vmul.f32 %v7180_v27, %v7180_v27 }
 0x1e7   :  { %v961_v31 = vpack.c.bf16 %v908_v37, %v907_v29  ;;  %v841_v48 = vmul.f32 %v6931_v20, %v773_v30 }
 0x1e8   :  { %v6046_v43 = vpop.eup %6045  ;;  %v7191_v56 = vsub.f32 %v6976_v3, %v284_v47  ;;  %v649_v21 = vadd.f32 1e-08, %v585_v53  ;;  %236 = vadd.xlane.f32.xlu1 %v7183_v51  ;;  %519 = vadd.xlane.f32.xlu0 %v411_v34 }
 0x1e9   :  { %v486_v28 = vpop.xlane.xlu1 %485  ;;  %v203_v25 = vpop.xlane.xlu0 %202  ;;  %1276 = vmatmul.mubr.bf16.gmra.mrb[40].mxu0 %v961_v31  ;;  %5641 = vmatprep.mubr.bf16.mxu1 %v961_v31  ;;  %v774_v59 = vmul.f32 %v6046_v43, %v6935_v13  ;;  %v909_v37 = vadd.f32 %v6946_v16, %v841_v48 }
 0x1ea   :  { %6051 = vrsqrt.f32 %v649_v21  ;;  %v586_v55 = vmul.f32 0.0078125, %v486_v28  ;;  %v285_v19 = vmul.f32 0.0078125, %v203_v25  ;;  %v412_v9 = vmul.f32 %v7191_v56, %v7191_v56  ;;  %1285 = vmatprep.mubr.bf16.mxu0 %v9657_v0 }
 0x1eb   :  { %v842_v3 = vmul.f32 %v6931_v20, %v774_v59 }
 0x1ec   :  { %v6048_v49 = vpop.eup %6047  ;;  %v650_v63 = vadd.f32 1e-08, %v586_v55  ;;  %v7201_v38 = vsub.f32 %v6987_v45, %v285_v19  ;;  %521 = vadd.xlane.f32.xlu1 %v412_v9 }
 0x1ed   :  { %v205_v29 = vpop.xlane.xlu1 %204  ;;  %v488_v13 = vpop.xlane.xlu0 %487  ;;  %v910_v30 = vadd.f32 %v6946_v16, %v842_v3  ;;  %v775_v47 = vmul.f32 %v6048_v49, %v6951_v32 }
 0x1ee   :  { %6053 = vrsqrt.f32 %v650_v63  ;;  %v286_v53 = vmul.f32 0.0078125, %v205_v29  ;;  %v587_v34 = vmul.f32 0.0078125, %v488_v13  ;;  %v413_v31 = vmul.f32 %v7201_v38, %v7201_v38 }
 0x1ef   :  { %v962_v43 = vpack.c.bf16 %v910_v30, %v909_v37  ;;  %v843_v32 = vmul.f32 %v6931_v20, %v775_v47 }
 0x1f0   :  { %v6050_v21 = vpop.eup %6049  ;;  %v7209_v45 = vsub.f32 %v6999_v46, %v286_v53  ;;  %v651_v28 = vadd.f32 1e-08, %v587_v34  ;;  %523 = vadd.xlane.f32.xlu0 %v413_v31 }
 0x1f1   :  { %v490_v25 = vpop.xlane.xlu1 %489  ;;  %v207_v59 = vpop.xlane.xlu0 %206  ;;  %1286 = vmatmul.mubr.bf16.gmra.mrb[44].mxu0 %v962_v43  ;;  %5642 = vmatmul.mubr.bf16.gmra.mrb[20].mxu1 %v962_v43  ;;  %v776_v48 = vmul.f32 %v6050_v21, %v6962_v14  ;;  %v911_v13 = vadd.f32 %v6946_v16, %v843_v32 }
 0x1f2   :  { %6055 = vrsqrt.f32 %v651_v28  ;;  %v588_v55 = vmul.f32 0.0078125, %v490_v25  ;;  %v287_v19 = vmul.f32 0.0078125, %v207_v59  ;;  %v414_v9 = vmul.f32 %v7209_v45, %v7209_v45  ;;  %1295 = vmatprep.mubr.bf16.mxu0 %v9657_v0 }
 0x1f3   :  { %v844_v46 = vmul.f32 %v6931_v20, %v776_v48 }
 0x1f4   :  { %v6052_v3 = vpop.eup %6051  ;;  %v652_v49 = vadd.f32 1e-08, %v588_v55  ;;  %v7218_v63 = vsub.f32 %v7010_v58, %v287_v19  ;;  %525 = vadd.xlane.f32.xlu1 %v414_v9 }
 0x1f5   :  { %v209_v29 = vpop.xlane.xlu1 %208  ;;  %v492_v14 = vpop.xlane.xlu0 %491  ;;  %v912_v37 = vadd.f32 %v6946_v16, %v844_v46  ;;  %v777_v30 = vmul.f32 %v6052_v3, %v6974_v1 }
 0x1f6   :  { %6057 = vrsqrt.f32 %v652_v49  ;;  %v288_v47 = vmul.f32 0.0078125, %v209_v29  ;;  %v589_v53 = vmul.f32 0.0078125, %v492_v14  ;;  %v415_v34 = vmul.f32 %v7218_v63, %v7218_v63 }
 0x1f7   :  { %v963_v31 = vpack.c.bf16 %v912_v37, %v911_v13  ;;  %v845_v1 = vmul.f32 %v6931_v20, %v777_v30 }
 0x1f8   :  { %v6054_v43 = vpop.eup %6053  ;;  %v7226_v58 = vsub.f32 %v7022_v60, %v288_v47  ;;  %v653_v21 = vadd.f32 1e-08, %v589_v53  ;;  %527 = vadd.xlane.f32.xlu0 %v415_v34 }
 0x1f9   :  { %v494_v28 = vpop.xlane.xlu1 %493  ;;  %v211_v25 = vpop.xlane.xlu0 %210  ;;  %1296 = vmatmul.mubr.bf16.gmra.mrb[48].mxu0 %v963_v31  ;;  %5645 = vmatprep.mubr.bf16.mxu1 %v963_v31  ;;  %v778_v59 = vmul.f32 %v6054_v43, %v6985_v39  ;;  %v913_v49 = vadd.f32 %v6946_v16, %v845_v1 }
 0x1fa   :  { %6059 = vrsqrt.f32 %v653_v21  ;;  %v590_v48 = vmul.f32 0.0078125, %v494_v28  ;;  %v289_v32 = vmul.f32 0.0078125, %v211_v25  ;;  %v416_v55 = vmul.f32 %v7226_v58, %v7226_v58  ;;  %1305 = vmatprep.mubr.bf16.mxu0 %v9657_v0 }
 0x1fb   :  { %v846_v60 = vmul.f32 %v6931_v20, %v778_v59 }
 0x1fc   :  { %v6056_v19 = vpop.eup %6055  ;;  %v654_v9 = vadd.f32 1e-08, %v590_v48  ;;  %v7235_v46 = vsub.f32 %v7033_v22, %v289_v32  ;;  %529 = vadd.xlane.f32.xlu1 %v416_v55 }
 0x1fd   :  { %v213_v3 = vpop.xlane.xlu1 %212  ;;  %v496_v39 = vpop.xlane.xlu0 %495  ;;  %v914_v29 = vadd.f32 %v6946_v16, %v846_v60  ;;  %v779_v14 = vmul.f32 %v6056_v19, %v6997_v7 }
 0x1fe   :  { %6061 = vrsqrt.f32 %v654_v9  ;;  %v290_v13 = vmul.f32 0.0078125, %v213_v3  ;;  %v591_v37 = vmul.f32 0.0078125, %v496_v39  ;;  %v417_v30 = vmul.f32 %v7235_v46, %v7235_v46 }
 0x1ff   :  { %v964_v47 = vpack.c.bf16 %v914_v29, %v913_v49  ;;  %v847_v7 = vmul.f32 %v6931_v20, %v779_v14 }
 0x200   :  { %v6058_v53 = vpop.eup %6057  ;;  %v7243_v22 = vsub.f32 %v7045_v24, %v290_v13  ;;  %v655_v34 = vadd.f32 1e-08, %v591_v37  ;;  %531 = vadd.xlane.f32.xlu0 %v417_v30 }
 0x201   :  { %v498_v31 = vpop.xlane.xlu1 %497  ;;  %v215_v43 = vpop.xlane.xlu0 %214  ;;  %1306 = vmatmul.mubr.bf16.gmra.mrb[52].mxu0 %v964_v47  ;;  %5646 = vmatmul.mubr.bf16.gmra.mrb[24].mxu1 %v964_v47  ;;  %v780_v21 = vmul.f32 %v6058_v53, %v7008_v10  ;;  %v915_v60 = vadd.f32 %v6946_v16, %v847_v7 }
 0x202   :  { %6063 = vrsqrt.f32 %v655_v34  ;;  %v592_v28 = vmul.f32 0.0078125, %v498_v31  ;;  %v291_v25 = vmul.f32 0.0078125, %v215_v43  ;;  %v418_v59 = vmul.f32 %v7243_v22, %v7243_v22  ;;  %1315 = vmatprep.mubr.bf16.mxu0 %v9657_v0 }
 0x203   :  { %v848_v24 = vmul.f32 %v6931_v20, %v780_v21 }
 0x204   :  { %v6060_v1 = vpop.eup %6059  ;;  %v656_v48 = vadd.f32 1e-08, %v592_v28  ;;  %v7252_v32 = vsub.f32 %v7056_v42, %v291_v25  ;;  %533 = vadd.xlane.f32.xlu1 %v418_v59 }
 0x205   :  { %v217_v55 = vpop.xlane.xlu1 %216  ;;  %v500_v10 = vpop.xlane.xlu0 %499  ;;  %v916_v19 = vadd.f32 %v6946_v16, %v848_v24  ;;  %v781_v9 = vmul.f32 %v6060_v1, %v7020_v26 }
 0x206   :  { %6065 = vrsqrt.f32 %v656_v48  ;;  %v292_v3 = vmul.f32 0.0078125, %v217_v55  ;;  %v593_v39 = vmul.f32 0.0078125, %v500_v10  ;;  %v419_v49 = vmul.f32 %v7252_v32, %v7252_v32 }
 0x207   :  { %v965_v29 = vpack.c.bf16 %v916_v19, %v915_v60  ;;  %v849_v26 = vmul.f32 %v6931_v20, %v781_v9 }
 0x208   :  { %v6062_v14 = vpop.eup %6061  ;;  %v7260_v42 = vsub.f32 %v7068_v44, %v292_v3  ;;  %v657_v13 = vadd.f32 1e-08, %v593_v39  ;;  %535 = vadd.xlane.f32.xlu0 %v419_v49 }
 0x209   :  { %v502_v37 = vpop.xlane.xlu1 %501  ;;  %v219_v30 = vpop.xlane.xlu0 %218  ;;  %1316 = vmatmul.mubr.bf16.gmra.mrb[56].mxu0 %v965_v29  ;;  %5649 = vmatprep.mubr.bf16.mxu1 %v965_v29  ;;  %v782_v47 = vmul.f32 %v6062_v14, %v7031_v18  ;;  %v917_v25 = vadd.f32 %v6946_v16, %v849_v26 }
 0x20a   :  { %6067 = vrsqrt.f32 %v657_v13  ;;  %v594_v53 = vmul.f32 0.0078125, %v502_v37  ;;  %v293_v34 = vmul.f32 0.0078125, %v219_v30  ;;  %v420_v31 = vmul.f32 %v7260_v42, %v7260_v42  ;;  %1325 = vmatprep.mubr.bf16.mxu0 %v9657_v0 }
 0x20b   :  { %v850_v44 = vmul.f32 %v6931_v20, %v782_v47  ;;  %v7296_v47 = vld [vmem:[%s9651_s2 + $0x1] ss:$0 sm:$0xff] }
 0x20c   :  { %v6064_v43 = vpop.eup %6063  ;;  %v658_v21 = vadd.f32 1e-08, %v594_v53  ;;  %v7269_v7 = vsub.f32 %v7079_v61, %v293_v34  ;;  %537 = vadd.xlane.f32.xlu1 %v420_v31 }
 0x20d   :  { %v221_v28 = vpop.xlane.xlu1 %220  ;;  %v504_v18 = vpop.xlane.xlu0 %503  ;;  %v918_v59 = vadd.f32 %v6946_v16, %v850_v44  ;;  %v783_v24 = vmul.f32 %v6064_v43, %v7043_v36  ;;  %v7283_v36 = vld [vmem:[%s9651_s2] ss:$0 sm:$0xff] }
 0x20e   :  { %6069 = vrsqrt.f32 %v658_v21  ;;  %v294_v1 = vmul.f32 0.0078125, %v221_v28  ;;  %v595_v48 = vmul.f32 0.0078125, %v504_v18  ;;  %v421_v20 = vmul.f32 %v7269_v7, %v7269_v7 }
 0x20f   :  { %v966_v55 = vpack.c.bf16 %v918_v59, %v917_v25  ;;  %v851_v3 = vmul.f32 %v7283_v36, %v783_v24 }
 0x210   :  { %v6066_v10 = vpop.eup %6065  ;;  %v7277_v61 = vsub.f32 %v7091_v62, %v294_v1  ;;  %v659_v60 = vadd.f32 1e-08, %v595_v48  ;;  %539 = vadd.xlane.f32.xlu0 %v421_v20 }
 0x211   :  { %v506_v19 = vpop.xlane.xlu1 %505  ;;  %v223_v9 = vpop.xlane.xlu0 %222  ;;  %1326 = vmatmul.mubr.bf16.gmra.mrb[60].mxu0 %v966_v55  ;;  %5650 = vmatmul.mubr.bf16.gmra.mrb[28].mxu1 %v966_v55  ;;  %v784_v16 = vmul.f32 %v6066_v10, %v7054_v40  ;;  %v919_v26 = vadd.f32 %v7296_v47, %v851_v3 }
 0x212   :  { %6071 = vrsqrt.f32 %v659_v60  ;;  %v596_v39 = vmul.f32 0.0078125, %v506_v19  ;;  %v295_v49 = vmul.f32 0.0078125, %v223_v9  ;;  %v422_v62 = vmul.f32 %v7277_v61, %v7277_v61  ;;  %1335 = vmatprep.mubr.bf16.mxu0 %v9657_v0 }
 0x213   :  { %v852_v29 = vmul.f32 %v7283_v36, %v784_v16 }
 0x214   :  { %v6068_v14 = vpop.eup %6067  ;;  %v660_v13 = vadd.f32 1e-08, %v596_v39  ;;  %v7291_v40 = vsub.f32 %v7102_v23, %v295_v49  ;;  %541 = vadd.xlane.f32.xlu1 %v422_v62 }
 0x215   :  { %v225_v37 = vpop.xlane.xlu1 %224  ;;  %v508_v30 = vpop.xlane.xlu0 %507  ;;  %v920_v53 = vadd.f32 %v7296_v47, %v852_v29  ;;  %v785_v34 = vmul.f32 %v6068_v14, %v7066_v35 }
 0x216   :  { %6073 = vrsqrt.f32 %v660_v13  ;;  %v296_v31 = vmul.f32 0.0078125, %v225_v37  ;;  %v597_v44 = vmul.f32 0.0078125, %v508_v30  ;;  %v423_v23 = vmul.f32 %v7291_v40, %v7291_v40 }
 0x217   :  { %v967_v43 = vpack.c.bf16 %v920_v53, %v919_v26  ;;  %v853_v35 = vmul.f32 %v7283_v36, %v785_v34 }
 0x218   :  { %v6070_v21 = vpop.eup %6069  ;;  %v7304_v28 = vsub.f32 %v7114_v33, %v296_v31  ;;  %v661_v18 = vadd.f32 1e-08, %v597_v44  ;;  %543 = vadd.xlane.f32.xlu0 %v423_v23 }
 0x219   :  { %v510_v25 = vpop.xlane.xlu1 %509  ;;  %v227_v59 = vpop.xlane.xlu0 %226  ;;  %1336 = vmatmul.mubr.bf16.gmra.mrb[64].mxu0 %v967_v43  ;;  %5653 = vmatprep.mubr.bf16.mxu1 %v967_v43  ;;  %v786_v24 = vmul.f32 %v6070_v21, %v7077_v50  ;;  %v921_v50 = vadd.f32 %v7296_v47, %v853_v35 }
 0x21a   :  { %6075 = vrsqrt.f32 %v661_v18  ;;  %v598_v1 = vmul.f32 0.0078125, %v510_v25  ;;  %v297_v48 = vmul.f32 0.0078125, %v227_v59  ;;  %v424_v20 = vmul.f32 %v7304_v28, %v7304_v28  ;;  %1345 = vmatprep.mubr.bf16.mxu0 %v9657_v0 }
 0x21b   :  { %v854_v33 = vmul.f32 %v7283_v36, %v786_v24 }
 0x21c   :  { %v6072_v55 = vpop.eup %6071  ;;  %v662_v10 = vadd.f32 1e-08, %v598_v1  ;;  %v7313_v60 = vsub.f32 %v7125_v8, %v297_v48  ;;  %545 = vadd.xlane.f32.xlu1 %v424_v20 }
 0x21d   :  { %v229_v19 = vpop.xlane.xlu1 %228  ;;  %v922_v9 = vadd.f32 %v7296_v47, %v854_v33  ;;  %v787_v16 = vmul.f32 %v6072_v55, %v7089_v17 }
 0x21e   :  { %6077 = vrsqrt.f32 %v662_v10  ;;  %v298_v3 = vmul.f32 0.0078125, %v229_v19  ;;  %v425_v39 = vmul.f32 %v7313_v60, %v7313_v60 }
 0x21f   :  { %v968_v49 = vpack.c.bf16 %v922_v9, %v921_v50  ;;  %v855_v14 = vmul.f32 %v7283_v36, %v787_v16 }
 0x220   :  { %v6074_v62 = vpop.eup %6073  ;;  %v7321_v29 = vsub.f32 %v7134_v11, %v298_v3  ;;  %547 = vadd.xlane.f32.xlu0 %v425_v39 }
 0x221   :  { %1346 = vmatmul.mubr.bf16.gmra.mrb[68].mxu0 %v968_v49  ;;  %5654 = vmatmul.mubr.bf16.gmra.mrb[32].mxu1 %v968_v49  ;;  %v788_v8 = vmul.f32 %v6074_v62, %v7100_v2  ;;  %v923_v26 = vadd.f32 %v7296_v47, %v855_v14 }
 0x222   :  { %v426_v17 = vmul.f32 %v7321_v29, %v7321_v29  ;;  %1355 = vmatprep.mubr.bf16.mxu0 %v9657_v0 }
 0x223   :  { %v856_v13 = vmul.f32 %v7283_v36, %v788_v8 }
 0x224   :  { %v6076_v37 = vpop.eup %6075  ;;  %549 = vadd.xlane.f32.xlu1 %v426_v17  ;;  %v7329_v30 = vpop.f32.mrb[0].mxu0 }
 0x225   :  { %v1179_v11 = vpop.f32.mrb[1].mxu0  ;;  %v924_v53 = vadd.f32 %v7296_v47, %v856_v13  ;;  %v789_v2 = vmul.f32 %v6076_v37, %v7112_v41 }
 0x226   :  { %v7334_v34 = vpop.f32.mrb[2].mxu0 }
 0x227   :  { %v1183_v44 = vpop.f32.mrb[3].mxu0  ;;  %v969_v23 = vpack.c.bf16 %v924_v53, %v923_v26  ;;  %v857_v25 = vmul.f32 %v7283_v36, %v789_v2 }
 0x228   :  { %v6078_v43 = vpop.eup %6077  ;;  %v1817_v21 = vpack.c.bf16 %v1183_v44, %v1179_v11 }
 0x229   :  { %1356 = vmatmul.mubr.bf16.gmra.mrb[72].mxu0 %v969_v23  ;;  %5657 = vmatprep.mubr.bf16.mxu1 %v969_v23  ;;  %v790_v18 = vmul.f32 %v6078_v43, %v7123_v57  ;;  %v925_v48 = vadd.f32 %v7296_v47, %v857_v25 }
 0x22a   :  { %5685 = vmatprep.subr.bf16.mxu1 %v1817_v21  ;;  %1365 = vmatprep.mubr.bf16.mxu0 %v9657_v0 }
 0x22b   :  { %5686 = vmatpush3.bf16.xpose.msra.mxu1 %v1817_v21  ;;  %v858_v41 = vmul.f32 %v7283_v36, %v790_v18 }
 0x22c   :  { %v7342_v59 = vpop.f32.mrb[4].mxu0  ;;  %v5623_v24 = vpop.f32.mrb[0].mxu1 }
 0x22d   :  { %v1189_v35 = vpop.f32.mrb[5].mxu0  ;;  %v1530_v1 = vpop.f32.mrb[1].mxu1  ;;  %v926_v20 = vadd.f32 %v7296_v47, %v858_v41 }
 0x22e   :  { %v7346_v33 = vpop.f32.mrb[6].mxu0  ;;  %v5624_v57 = vpop.f32.mrb[2].mxu1 }
 0x22f   :  { %v7350_v10 = vpack.c.bf16 %v5624_v57, %v5623_v24  ;;  %v1193_v19 = vpop.f32.mrb[7].mxu0  ;;  %v1533_v50 = vpop.f32.mrb[3].mxu1  ;;  %v970_v9 = vpack.c.bf16 %v926_v20, %v925_v48 }
 0x230   :  { %v1818_v16 = vpack.c.bf16 %v1193_v19, %v1189_v35  ;;  %v7352_v3 = vpack.c.bf16 %v1533_v50, %v1530_v1 }
 0x231   :  { %9775 = vst [vmem:[#allocation8_spill] sm:$0xff] %v7350_v10  ;;  %1366 = vmatmul.mubr.bf16.gmra.mrb[76].mxu0 %v970_v9  ;;  %5658 = vmatmul.mubr.bf16.gmra.mrb[36].mxu1 %v970_v9 }
 0x232   :  { %9776 = vst [vmem:[#allocation9_spill] sm:$0xff] %v7352_v3  ;;  %5687 = vmatprep.subr.bf16.mxu1 %v1818_v16  ;;  %1375 = vmatprep.mubr.bf16.mxu0 %v9657_v0 }
 0x233   :  { %5688 = vmatpush3.bf16.xpose.msra.mxu1 %v1818_v16 }
 0x234   :  { %v7355_v39 = vpop.f32.mrb[8].mxu0 }
 0x235   :  { %v1199_v49 = vpop.f32.mrb[9].mxu0 }
 0x236   :  { %v7357_v62 = vpop.f32.mrb[10].mxu0 }
 0x237   :  { %v1203_v14 = vpop.f32.mrb[11].mxu0 }
 0x238   :  { %v1819_v17 = vpack.c.bf16 %v1203_v14, %v1199_v49 }
 0x23a   :  { %5689 = vmatprep.subr.bf16.mxu1 %v1819_v17 }
 0x23b   :  { %5690 = vmatpush3.bf16.xpose.msra.mxu1 %v1819_v17 }
 0x23c   :  { %v7361_v13 = vpop.f32.mrb[12].mxu0  ;;  %v5627_v37 = vpop.f32.mrb[4].mxu1 }
 0x23d   :  { %v1209_v11 = vpop.f32.mrb[13].mxu0  ;;  %v1546_v26 = vpop.f32.mrb[5].mxu1 }
 0x23e   :  { %v7363_v53 = vpop.f32.mrb[14].mxu0  ;;  %v5628_v2 = vpop.f32.mrb[6].mxu1 }
 0x23f   :  { %v7367_v23 = vpack.c.bf16 %v5628_v2, %v5627_v37  ;;  %v1213_v43 = vpop.f32.mrb[15].mxu0  ;;  %v1549_v21 = vpop.f32.mrb[7].mxu1 }
 0x240   :  { %v1820_v18 = vpack.c.bf16 %v1213_v43, %v1209_v11  ;;  %v7369_v25 = vpack.c.bf16 %v1549_v21, %v1546_v26 }
 0x241   :  { %9777 = vst [vmem:[#allocation10_spill] sm:$0xff] %v7367_v23 }
 0x242   :  { %9778 = vst [vmem:[#allocation11_spill] sm:$0xff] %v7369_v25  ;;  %5691 = vmatprep.subr.bf16.mxu1 %v1820_v18 }
 0x243   :  { %5692 = vmatpush3.bf16.xpose.msra.mxu1 %v1820_v18 }
 0x244   :  { %v7371_v41 = vpop.f32.mrb[16].mxu0 }
 0x245   :  { %v1219_v24 = vpop.f32.mrb[17].mxu0 }
 0x246   :  { %v7373_v35 = vpop.f32.mrb[18].mxu0 }
 0x247   :  { %v1223_v48 = vpop.f32.mrb[19].mxu0 }
 0x248   :  { %v1821_v20 = vpack.c.bf16 %v1223_v48, %v1219_v24 }
 0x24a   :  { %5693 = vmatprep.subr.bf16.mxu1 %v1821_v20 }
 0x24b   :  { %5694 = vmatpush3.bf16.xpose.msra.mxu1 %v1821_v20 }
 0x24c   :  { %v7377_v57 = vpop.f32.mrb[20].mxu0  ;;  %v5631_v19 = vpop.f32.mrb[8].mxu1 }
 0x24d   :  { %v1229_v50 = vpop.f32.mrb[21].mxu0  ;;  %v1562_v9 = vpop.f32.mrb[9].mxu1 }
 0x24e   :  { %v7379_v16 = vpop.f32.mrb[22].mxu0  ;;  %v5632_v49 = vpop.f32.mrb[10].mxu1 }
 0x24f   :  { %v7383_v17 = vpack.c.bf16 %v5632_v49, %v5631_v19  ;;  %v1233_v37 = vpop.f32.mrb[23].mxu0  ;;  %v1565_v11 = vpop.f32.mrb[11].mxu1 }
 0x250   :  { %v1822_v26 = vpack.c.bf16 %v1233_v37, %v1229_v50  ;;  %v7385_v2 = vpack.c.bf16 %v1565_v11, %v1562_v9 }
 0x251   :  { %9779 = vst [vmem:[#allocation12_spill] sm:$0xff] %v7383_v17 }
 0x252   :  { %9780 = vst [vmem:[#allocation13_spill] sm:$0xff] %v7385_v2  ;;  %5695 = vmatprep.subr.bf16.mxu1 %v1822_v26 }
 0x253   :  { %5696 = vmatpush3.bf16.xpose.msra.mxu1 %v1822_v26 }
 0x254   :  { %v7387_v43 = vpop.f32.mrb[24].mxu0 }
 0x255   :  { %v1239_v21 = vpop.f32.mrb[25].mxu0 }
 0x256   :  { %v7389_v18 = vpop.f32.mrb[26].mxu0 }
 0x257   :  { %v1243_v48 = vpop.f32.mrb[27].mxu0 }
 0x258   :  { %v1823_v20 = vpack.c.bf16 %v1243_v48, %v1239_v21 }
 0x25a   :  { %5697 = vmatprep.subr.bf16.mxu1 %v1823_v20 }
 0x25b   :  { %5698 = vmatpush3.bf16.xpose.msra.mxu1 %v1823_v20 }
 0x25c   :  { %v7393_v19 = vpop.f32.mrb[28].mxu0  ;;  %v5635_v49 = vpop.f32.mrb[12].mxu1 }
 0x25d   :  { %v1249_v50 = vpop.f32.mrb[29].mxu0  ;;  %v1578_v9 = vpop.f32.mrb[13].mxu1 }
 0x25e   :  { %v7395_v37 = vpop.f32.mrb[30].mxu0  ;;  %v5636_v11 = vpop.f32.mrb[14].mxu1 }
 0x25f   :  { %v7399_v14 = vpack.c.bf16 %v5636_v11, %v5635_v49  ;;  %v1253_v1 = vpop.f32.mrb[31].mxu0  ;;  %v1581_v44 = vpop.f32.mrb[15].mxu1 }
 0x260   :  { %v1824_v24 = vpack.c.bf16 %v1253_v1, %v1249_v50  ;;  %v7401_v8 = vpack.c.bf16 %v1581_v44, %v1578_v9 }
 0x261   :  { %9781 = vst [vmem:[#allocation14_spill] sm:$0xff] %v7399_v14 }
 0x262   :  { %9782 = vst [vmem:[#allocation15_spill] sm:$0xff] %v7401_v8  ;;  %5699 = vmatprep.subr.bf16.mxu1 %v1824_v24 }
 0x263   :  { %5700 = vmatpush3.bf16.xpose.msra.mxu1 %v1824_v24 }
 0x264   :  { %v7403_v21 = vpop.f32.mrb[32].mxu0 }
 0x265   :  { %9783 = vst [vmem:[#allocation16_spill] sm:$0xff] %v7403_v21  ;;  %v512_v48 = vpop.xlane.xlu0 %511  ;;  %v1259_v20 = vpop.f32.mrb[33].mxu0 }
 0x266   :  { %v599_v55 = vmul.f32 0.0078125, %v512_v48  ;;  %v7405_v31 = vpop.f32.mrb[34].mxu0 }
 0x267   :  { %9784 = vst [vmem:[#allocation17_spill] sm:$0xff] %v7405_v31  ;;  %v1263_v26 = vpop.f32.mrb[35].mxu0 }
 0x268   :  { %v663_v49 = vadd.f32 1e-08, %v599_v55  ;;  %v7409_v11 = vpack.c.bf16 %v1263_v26, %v1259_v20 }
 0x269   :  { %v514_v14 = vpop.xlane.xlu1 %513  ;;  %v231_v1 = vpop.xlane.xlu0 %230 }
 0x26a   :  { %6079 = vrsqrt.f32 %v663_v49  ;;  %v600_v44 = vmul.f32 0.0078125, %v514_v14  ;;  %v299_v50 = vmul.f32 0.0078125, %v231_v1  ;;  %5717 = vmatprep.subr.bf16.mxu1 %v7409_v11 }
 0x26c   :  { %v664_v24 = vadd.f32 1e-08, %v600_v44  ;;  %v7413_v9 = vsub.f32 %v7155_v12, %v299_v50  ;;  %v7415_v48 = vpop.f32.mrb[36].mxu0  ;;  %v5639_v8 = vpop.f32.mrb[16].mxu1 }
 0x26d   :  { %v233_v17 = vpop.xlane.xlu1 %232  ;;  %v516_v0 = vpop.xlane.xlu0 %515 }
 0x26e   :  { %6081 = vrsqrt.f32 %v664_v24  ;;  %v300_v55 = vmul.f32 0.0078125, %v233_v17  ;;  %v601_v26 = vmul.f32 0.0078125, %v516_v0  ;;  %v1269_v20 = vpop.f32.mrb[37].mxu0  ;;  %v1594_v2 = vpop.f32.mrb[17].mxu1  ;;  %v427_v14 = vmul.f32 %v7413_v9, %v7413_v9 }
 0x26f   :  { %v7419_v49 = vpop.f32.mrb[38].mxu0  ;;  %v5640_v1 = vpop.f32.mrb[18].mxu1 }
 0x270   :  { %v7422_v44 = vsub.f32 %v7163_v54, %v300_v55  ;;  %v665_v12 = vadd.f32 1e-08, %v601_v26  ;;  %v7426_v23 = vpack.c.bf16 %v5640_v1, %v5639_v8  ;;  %v1273_v24 = vpop.f32.mrb[39].mxu0  ;;  %v1597_v17 = vpop.f32.mrb[19].mxu1  ;;  %551 = vadd.xlane.f32.xlu0 %v427_v14 }
 0x271   :  { %v7428_v0 = vpack.c.bf16 %v1273_v24, %v1269_v20  ;;  %v7430_v25 = vpack.c.bf16 %v1597_v17, %v1594_v2  ;;  %v518_v10 = vpop.xlane.xlu1 %517  ;;  %v235_v3 = vpop.xlane.xlu0 %234 }
 0x272   :  { %9785 = vst [vmem:[#allocation18_spill] sm:$0xff] %v7426_v23  ;;  %6083 = vrsqrt.f32 %v665_v12  ;;  %v602_v21 = vmul.f32 0.0078125, %v518_v10  ;;  %v301_v31 = vmul.f32 0.0078125, %v235_v3  ;;  %v428_v54 = vmul.f32 %v7422_v44, %v7422_v44 }
 0x273   :  { %9786 = vst [vmem:[#allocation19_spill] sm:$0xff] %v7430_v25 }
 0x274   :  { %v6080_v55 = vpop.eup %6079  ;;  %v666_v26 = vadd.f32 1e-08, %v602_v21  ;;  %v7435_v8 = vsub.f32 %v7172_v4, %v301_v31  ;;  %553 = vadd.xlane.f32.xlu1 %v428_v54 }
 0x275   :  { %v237_v1 = vpop.xlane.xlu1 %236  ;;  %v520_v14 = vpop.xlane.xlu0 %519  ;;  %v791_v20 = vmul.f32 %v6080_v55, %v7148_v15 }
 0x276   :  { %6085 = vrsqrt.f32 %v666_v26  ;;  %v302_v2 = vmul.f32 0.0078125, %v237_v1  ;;  %v603_v24 = vmul.f32 0.0078125, %v520_v14  ;;  %v429_v10 = vmul.f32 %v7435_v8, %v7435_v8 }
 0x277   :  { %v859_v31 = vmul.f32 %v7283_v36, %v791_v20 }
 0x278   :  { %v6082_v3 = vpop.eup %6081  ;;  %v7441_v12 = vsub.f32 %v7183_v51, %v302_v2  ;;  %v667_v17 = vadd.f32 1e-08, %v603_v24  ;;  %555 = vadd.xlane.f32.xlu0 %v429_v10 }
 0x279   :  { %v522_v21 = vpop.xlane.xlu1 %521  ;;  %v792_v4 = vmul.f32 %v6082_v3, %v7153_v5  ;;  %v927_v51 = vadd.f32 %v7296_v47, %v859_v31 }
 0x27a   :  { %6087 = vrsqrt.f32 %v667_v17  ;;  %v604_v54 = vmul.f32 0.0078125, %v522_v21  ;;  %v430_v15 = vmul.f32 %v7441_v12, %v7441_v12 }
 0x27b   :  { %v860_v55 = vmul.f32 %v7283_v36, %v792_v4 }
 0x27c   :  { %v6084_v26 = vpop.eup %6083  ;;  %v668_v1 = vadd.f32 1e-08, %v604_v54  ;;  %557 = vadd.xlane.f32.xlu1 %v430_v15  ;;  %v9787_v15 = vmov 0  }
 0x27d   :  { %v524_v14 = vpop.xlane.xlu0 %523  ;;  %v928_v2 = vadd.f32 %v7296_v47, %v860_v55  ;;  %v793_v24 = vmul.f32 %v6084_v26, %v7160_v6 }
 0x27e   :  { %6089 = vrsqrt.f32 %v668_v1  ;;  %v605_v5 = vmul.f32 0.0078125, %v524_v14 }
 0x27f   :  { %v971_v20 = vpack.c.bf16 %v928_v2, %v927_v51  ;;  %v861_v4 = vmul.f32 %v7283_v36, %v793_v24 }
 0x280   :  { %v6086_v10 = vpop.eup %6085  ;;  %v669_v3 = vadd.f32 1e-08, %v605_v5 }
 0x281   :  { %v526_v17 = vpop.xlane.xlu1 %525  ;;  %1376 = vmatmul.mubr.bf16.gmra.mrb[80].mxu0 %v971_v20  ;;  %5661 = vmatprep.mubr.bf16.mxu1 %v971_v20  ;;  %v794_v21 = vmul.f32 %v6086_v10, %v7169_v52  ;;  %v929_v1 = vadd.f32 %v7296_v47, %v861_v4 }
 0x282   :  { %6091 = vrsqrt.f32 %v669_v3  ;;  %v606_v54 = vmul.f32 0.0078125, %v526_v17  ;;  %1385 = vmatprep.mubr.bf16.mxu0 %v9787_v15 }
 0x283   :  { %v862_v31 = vmul.f32 %v7283_v36, %v794_v21 }
 0x284   :  { %v6088_v55 = vpop.eup %6087  ;;  %v670_v6 = vadd.f32 1e-08, %v606_v54 }
 0x285   :  { %v528_v26 = vpop.xlane.xlu0 %527  ;;  %v930_v14 = vadd.f32 %v7296_v47, %v862_v31  ;;  %v795_v51 = vmul.f32 %v6088_v55, %v7180_v27 }
 0x286   :  { %6093 = vrsqrt.f32 %v670_v6  ;;  %v607_v2 = vmul.f32 0.0078125, %v528_v26 }
 0x287   :  { %v972_v52 = vpack.c.bf16 %v930_v14, %v929_v1  ;;  %v863_v3 = vmul.f32 %v7283_v36, %v795_v51 }
 0x288   :  { %v6090_v5 = vpop.eup %6089  ;;  %v671_v24 = vadd.f32 1e-08, %v607_v2 }
 0x289   :  { %v530_v20 = vpop.xlane.xlu1 %529  ;;  %1386 = vmatmul.mubr.bf16.gmra.mrb[84].mxu0 %v972_v52  ;;  %5662 = vmatmul.mubr.bf16.gmra.mrb[40].mxu1 %v972_v52  ;;  %v796_v10 = vmul.f32 %v6090_v5, %v7191_v56  ;;  %v931_v31 = vadd.f32 %v7296_v47, %v863_v3 }
 0x28a   :  { %6095 = vrsqrt.f32 %v671_v24  ;;  %v608_v17 = vmul.f32 0.0078125, %v530_v20  ;;  %1395 = vmatprep.mubr.bf16.mxu0 %v9787_v15 }
 0x28b   :  { %v864_v21 = vmul.f32 %v7283_v36, %v796_v10 }
 0x28c   :  { %v6092_v4 = vpop.eup %6091  ;;  %v672_v27 = vadd.f32 1e-08, %v608_v17 }
 0x28d   :  { %v532_v54 = vpop.xlane.xlu0 %531  ;;  %v932_v55 = vadd.f32 %v7296_v47, %v864_v21  ;;  %v797_v6 = vmul.f32 %v6092_v4, %v7201_v38 }
 0x28e   :  { %6097 = vrsqrt.f32 %v672_v27  ;;  %v609_v26 = vmul.f32 0.0078125, %v532_v54 }
 0x28f   :  { %v973_v56 = vpack.c.bf16 %v932_v55, %v931_v31  ;;  %v865_v52 = vmul.f32 %v7283_v36, %v797_v6 }
 0x290   :  { %v6094_v1 = vpop.eup %6093  ;;  %v673_v14 = vadd.f32 1e-08, %v609_v26 }
 0x291   :  { %v534_v51 = vpop.xlane.xlu1 %533  ;;  %1396 = vmatmul.mubr.bf16.gmra.mrb[88].mxu0 %v973_v56  ;;  %5665 = vmatprep.mubr.bf16.mxu1 %v973_v56  ;;  %v798_v2 = vmul.f32 %v6094_v1, %v7209_v45  ;;  %v933_v3 = vadd.f32 %v7296_v47, %v865_v52 }
 0x292   :  { %6099 = vrsqrt.f32 %v673_v14  ;;  %v610_v5 = vmul.f32 0.0078125, %v534_v51  ;;  %1405 = vmatprep.mubr.bf16.mxu0 %v9787_v15 }
 0x293   :  { %v866_v24 = vmul.f32 %v7283_v36, %v798_v2 }
 0x294   :  { %v6096_v20 = vpop.eup %6095  ;;  %v674_v38 = vadd.f32 1e-08, %v610_v5 }
 0x295   :  { %v536_v10 = vpop.xlane.xlu0 %535  ;;  %v934_v17 = vadd.f32 %v7296_v47, %v866_v24  ;;  %v799_v21 = vmul.f32 %v6096_v20, %v7218_v63 }
 0x296   :  { %6101 = vrsqrt.f32 %v674_v38  ;;  %v611_v4 = vmul.f32 0.0078125, %v536_v10 }
 0x297   :  { %v974_v45 = vpack.c.bf16 %v934_v17, %v933_v3  ;;  %v867_v6 = vmul.f32 %v7283_v36, %v799_v21 }
 0x298   :  { %v6098_v27 = vpop.eup %6097  ;;  %v675_v54 = vadd.f32 1e-08, %v611_v4 }
 0x299   :  { %v538_v31 = vpop.xlane.xlu1 %537  ;;  %1406 = vmatmul.mubr.bf16.gmra.mrb[92].mxu0 %v974_v45  ;;  %5666 = vmatmul.mubr.bf16.gmra.mrb[44].mxu1 %v974_v45  ;;  %v800_v55 = vmul.f32 %v6098_v27, %v7226_v58  ;;  %v935_v51 = vadd.f32 %v7296_v47, %v867_v6 }
 0x29a   :  { %6103 = vrsqrt.f32 %v675_v54  ;;  %v612_v26 = vmul.f32 0.0078125, %v538_v31  ;;  %1415 = vmatprep.mubr.bf16.mxu0 %v9787_v15 }
 0x29b   :  { %v868_v56 = vmul.f32 %v7283_v36, %v800_v55 }
 0x29c   :  { %v6100_v1 = vpop.eup %6099  ;;  %v676_v63 = vadd.f32 1e-08, %v612_v26 }
 0x29d   :  { %v540_v14 = vpop.xlane.xlu0 %539  ;;  %v936_v2 = vadd.f32 %v7296_v47, %v868_v56  ;;  %v801_v52 = vmul.f32 %v6100_v1, %v7235_v46 }
 0x29e   :  { %6105 = vrsqrt.f32 %v676_v63  ;;  %v613_v5 = vmul.f32 0.0078125, %v540_v14 }
 0x29f   :  { %v975_v58 = vpack.c.bf16 %v936_v2, %v935_v51  ;;  %v869_v3 = vmul.f32 %v7283_v36, %v801_v52 }
 0x2a0   :  { %v6102_v24 = vpop.eup %6101  ;;  %v677_v20 = vadd.f32 1e-08, %v613_v5 }
 0x2a1   :  { %v542_v38 = vpop.xlane.xlu1 %541  ;;  %1416 = vmatmul.mubr.bf16.gmra.mrb[96].mxu0 %v975_v58  ;;  %5669 = vmatprep.mubr.bf16.mxu1 %v975_v58  ;;  %v802_v10 = vmul.f32 %v6102_v24, %v7243_v22  ;;  %v937_v27 = vadd.f32 %v7296_v47, %v869_v3 }
 0x2a2   :  { %6107 = vrsqrt.f32 %v677_v20  ;;  %v614_v17 = vmul.f32 0.0078125, %v542_v38  ;;  %1425 = vmatprep.mubr.bf16.mxu0 %v9787_v15 }
 0x2a3   :  { %v870_v21 = vmul.f32 %v7283_v36, %v802_v10 }
 0x2a4   :  { %v6104_v4 = vpop.eup %6103  ;;  %v678_v46 = vadd.f32 1e-08, %v614_v17 }
 0x2a5   :  { %v544_v45 = vpop.xlane.xlu0 %543  ;;  %v938_v54 = vadd.f32 %v7296_v47, %v870_v21  ;;  %v803_v31 = vmul.f32 %v6104_v4, %v7252_v32 }
 0x2a6   :  { %6109 = vrsqrt.f32 %v678_v46  ;;  %v615_v55 = vmul.f32 0.0078125, %v544_v45 }
 0x2a7   :  { %v976_v22 = vpack.c.bf16 %v938_v54, %v937_v27  ;;  %v871_v63 = vmul.f32 %v7283_v36, %v803_v31 }
 0x2a8   :  { %v6106_v6 = vpop.eup %6105  ;;  %v679_v26 = vadd.f32 1e-08, %v615_v55 }
 0x2a9   :  { %v546_v56 = vpop.xlane.xlu1 %545  ;;  %1426 = vmatmul.mubr.bf16.gmra.mrb[100].mxu0 %v976_v22  ;;  %5670 = vmatmul.mubr.bf16.gmra.mrb[48].mxu1 %v976_v22  ;;  %v804_v1 = vmul.f32 %v6106_v6, %v7260_v42  ;;  %v939_v5 = vadd.f32 %v7296_v47, %v871_v63 }
 0x2aa   :  { %6111 = vrsqrt.f32 %v679_v26  ;;  %v616_v14 = vmul.f32 0.0078125, %v546_v56  ;;  %1435 = vmatprep.mubr.bf16.mxu0 %v9787_v15 }
 0x2ab   :  { %v872_v51 = vmul.f32 %v7283_v36, %v804_v1 }
 0x2ac   :  { %v6108_v2 = vpop.eup %6107  ;;  %v680_v32 = vadd.f32 1e-08, %v616_v14 }
 0x2ad   :  { %v548_v52 = vpop.xlane.xlu0 %547  ;;  %v940_v58 = vadd.f32 %v7296_v47, %v872_v51  ;;  %v805_v24 = vmul.f32 %v6108_v2, %v7269_v7 }
 0x2ae   :  { %6113 = vrsqrt.f32 %v680_v32  ;;  %v617_v20 = vmul.f32 0.0078125, %v548_v52 }
 0x2af   :  { %v977_v42 = vpack.c.bf16 %v940_v58, %v939_v5  ;;  %v873_v21 = vmul.f32 %v7283_v36, %v805_v24 }
 0x2b0   :  { %v6110_v38 = vpop.eup %6109  ;;  %v681_v10 = vadd.f32 1e-08, %v617_v20 }
 0x2b1   :  { %v550_v3 = vpop.xlane.xlu1 %549  ;;  %1436 = vmatmul.mubr.bf16.gmra.mrb[104].mxu0 %v977_v42  ;;  %5673 = vmatprep.mubr.bf16.mxu1 %v977_v42  ;;  %v806_v17 = vmul.f32 %v6110_v38, %v7277_v61  ;;  %v941_v27 = vadd.f32 %v7296_v47, %v873_v21 }
 0x2b2   :  { %6115 = vrsqrt.f32 %v681_v10  ;;  %v618_v4 = vmul.f32 0.0078125, %v550_v3  ;;  %1445 = vmatprep.mubr.bf16.mxu0 %v9787_v15 }
 0x2b3   :  { %v874_v46 = vmul.f32 %v7283_v36, %v806_v17 }
 0x2b4   :  { %v6112_v45 = vpop.eup %6111  ;;  %v682_v7 = vadd.f32 1e-08, %v618_v4 }
 0x2b5   :  { %v942_v54 = vadd.f32 %v7296_v47, %v874_v46  ;;  %v807_v31 = vmul.f32 %v6112_v45, %v7291_v40 }
 0x2b6   :  { %6117 = vrsqrt.f32 %v682_v7 }
 0x2b7   :  { %v978_v55 = vpack.c.bf16 %v942_v54, %v941_v27  ;;  %v875_v6 = vmul.f32 %v7283_v36, %v807_v31 }
 0x2b8   :  { %v6114_v22 = vpop.eup %6113 }
 0x2b9   :  { %1446 = vmatmul.mubr.bf16.gmra.mrb[108].mxu0 %v978_v55  ;;  %5674 = vmatmul.mubr.bf16.gmra.mrb[52].mxu1 %v978_v55  ;;  %v808_v61 = vmul.f32 %v6114_v22, %v7304_v28  ;;  %v943_v14 = vadd.f32 %v7296_v47, %v875_v6 }
 0x2ba   :  { %1455 = vmatprep.mubr.bf16.mxu0 %v9787_v15 }
 0x2bb   :  { %v876_v26 = vmul.f32 %v7283_v36, %v808_v61 }
 0x2bc   :  { %v6116_v56 = vpop.eup %6115  ;;  %v7504_v1 = vpop.f32.mrb[40].mxu0 }
 0x2bd   :  { %v1279_v63 = vpop.f32.mrb[41].mxu0  ;;  %v944_v40 = vadd.f32 %v7296_v47, %v876_v26  ;;  %v809_v51 = vmul.f32 %v6116_v56, %v7313_v60 }
 0x2be   :  { %v7509_v2 = vpop.f32.mrb[42].mxu0 }
 0x2bf   :  { %v1283_v32 = vpop.f32.mrb[43].mxu0  ;;  %v979_v52 = vpack.c.bf16 %v944_v40, %v943_v14  ;;  %v877_v20 = vmul.f32 %v7283_v36, %v809_v51 }
 0x2c0   :  { %v6118_v5 = vpop.eup %6117  ;;  %v7513_v58 = vpack.c.bf16 %v1283_v32, %v1279_v63 }
 0x2c1   :  { %1456 = vmatmul.mubr.bf16.gmra.mrb[112].mxu0 %v979_v52  ;;  %5677 = vmatprep.mubr.bf16.mxu1 %v979_v52  ;;  %v810_v24 = vmul.f32 %v6118_v5, %v7321_v29  ;;  %v945_v17 = vadd.f32 %v7296_v47, %v877_v20 }
 0x2c2   :  { %1465 = vmatprep.mubr.bf16.mxu0 %v9787_v15 }
 0x2c3   :  { %v878_v60 = vmul.f32 %v7283_v36, %v810_v24 }
 0x2c4   :  { %v7519_v42 = vpop.f32.mrb[44].mxu0  ;;  %v5643_v38 = vpop.f32.mrb[20].mxu1 }
 0x2c5   :  { %v1289_v10 = vpop.f32.mrb[45].mxu0  ;;  %v1610_v3 = vpop.f32.mrb[21].mxu1  ;;  %v946_v21 = vadd.f32 %v7296_v47, %v878_v60 }
 0x2c6   :  { %v7523_v4 = vpop.f32.mrb[46].mxu0  ;;  %v5644_v46 = vpop.f32.mrb[22].mxu1 }
 0x2c7   :  { %v7527_v45 = vpack.c.bf16 %v5644_v46, %v5643_v38  ;;  %v1293_v7 = vpop.f32.mrb[47].mxu0  ;;  %v1613_v27 = vpop.f32.mrb[23].mxu1  ;;  %v980_v36 = vpack.c.bf16 %v946_v21, %v945_v17 }
 0x2c8   :  { %v7529_v54 = vpack.c.bf16 %v1293_v7, %v1289_v10  ;;  %v7531_v31 = vpack.c.bf16 %v1613_v27, %v1610_v3 }
 0x2c9   :  { %9788 = vst [vmem:[#allocation20_spill] sm:$0xff] %v7527_v45  ;;  %1466 = vmatmul.mubr.bf16.gmra.mrb[116].mxu0 %v980_v36  ;;  %5678 = vmatmul.mubr.bf16.gmra.mrb[56].mxu1 %v980_v36 }
 0x2ca   :  { %9789 = vst [vmem:[#allocation21_spill] sm:$0xff] %v7531_v31  ;;  %1475 = vmatprep.mubr.bf16.mxu0 %v9787_v15 }
 0x2cc   :  { %v7534_v47 = vpop.f32.mrb[48].mxu0 }
 0x2cd   :  { %v1299_v55 = vpop.f32.mrb[49].mxu0 }
 0x2ce   :  { %v7536_v22 = vpop.f32.mrb[50].mxu0 }
 0x2cf   :  { %v1303_v6 = vpop.f32.mrb[51].mxu0 }
 0x2d0   :  { %v7540_v26 = vpack.c.bf16 %v1303_v6, %v1299_v55 }
 0x2d4   :  { %v7542_v56 = vpop.f32.mrb[52].mxu0  ;;  %v5647_v63 = vpop.f32.mrb[24].mxu1 }
 0x2d5   :  { %v1309_v14 = vpop.f32.mrb[53].mxu0  ;;  %v1626_v40 = vpop.f32.mrb[25].mxu1 }
 0x2d6   :  { %v7544_v51 = vpop.f32.mrb[54].mxu0  ;;  %v5648_v32 = vpop.f32.mrb[26].mxu1 }
 0x2d7   :  { %v7548_v5 = vpack.c.bf16 %v5648_v32, %v5647_v63  ;;  %v1313_v24 = vpop.f32.mrb[55].mxu0  ;;  %v1629_v20 = vpop.f32.mrb[27].mxu1 }
 0x2d8   :  { %v7550_v60 = vpack.c.bf16 %v1313_v24, %v1309_v14  ;;  %v7552_v38 = vpack.c.bf16 %v1629_v20, %v1626_v40 }
 0x2d9   :  { %9790 = vst [vmem:[#allocation22_spill] sm:$0xff] %v7548_v5 }
 0x2da   :  { %9791 = vst [vmem:[#allocation23_spill] sm:$0xff] %v7552_v38 }
 0x2dc   :  { %v7554_v10 = vpop.f32.mrb[56].mxu0 }
 0x2dd   :  { %v1319_v3 = vpop.f32.mrb[57].mxu0 }
 0x2de   :  { %v7556_v17 = vpop.f32.mrb[58].mxu0 }
 0x2df   :  { %v1323_v46 = vpop.f32.mrb[59].mxu0 }
 0x2e0   :  { %v7560_v7 = vpack.c.bf16 %v1323_v46, %v1319_v3 }
 0x2e4   :  { %v7562_v27 = vpop.f32.mrb[60].mxu0  ;;  %v5651_v36 = vpop.f32.mrb[28].mxu1 }
 0x2e5   :  { %9792 = vst [vmem:[#allocation24_spill] sm:$0xff] %v7562_v27  ;;  %v1329_v55 = vpop.f32.mrb[61].mxu0  ;;  %v1642_v6 = vpop.f32.mrb[29].mxu1 }
 0x2e6   :  { %v7564_v63 = vpop.f32.mrb[62].mxu0  ;;  %v5652_v14 = vpop.f32.mrb[30].mxu1 }
 0x2e7   :  { %9793 = vst [vmem:[#allocation25_spill] sm:$0xff] %v7564_v63  ;;  %v7568_v32 = vpack.c.bf16 %v5652_v14, %v5651_v36  ;;  %v1333_v24 = vpop.f32.mrb[63].mxu0  ;;  %v1645_v20 = vpop.f32.mrb[31].mxu1 }
 0x2e8   :  { %v7570_v52 = vpack.c.bf16 %v1333_v24, %v1329_v55  ;;  %v7572_v21 = vpack.c.bf16 %v1645_v20, %v1642_v6 }
 0x2e9   :  { %9794 = vst [vmem:[#allocation26_spill] sm:$0xff] %v7568_v32 }
 0x2ea   :  { %9795 = vst [vmem:[#allocation27_spill] sm:$0xff] %v7572_v21 }
 0x2ec   :  { %v7574_v3 = vpop.f32.mrb[64].mxu0 }
 0x2ed   :  { %v1339_v46 = vpop.f32.mrb[65].mxu0 }
 0x2ee   :  { %v7576_v61 = vpop.f32.mrb[66].mxu0 }
 0x2ef   :  { %v1343_v28 = vpop.f32.mrb[67].mxu0 }
 0x2f0   :  { %v1833_v50 = vpack.c.bf16 %v1343_v28, %v1339_v46 }
 0x2f2   :  { %5749 = vmatprep.subr.bf16.mxu0 %v1833_v50 }
 0x2f3   :  { %5750 = vmatpush3.bf16.xpose.msra.mxu0 %v1833_v50 }
 0x2f4   :  { %v7580_v36 = vpop.f32.mrb[68].mxu0  ;;  %v5655_v14 = vpop.f32.mrb[32].mxu1 }
 0x2f5   :  { %v1349_v40 = vpop.f32.mrb[69].mxu0  ;;  %v1658_v55 = vpop.f32.mrb[33].mxu1 }
 0x2f6   :  { %v7582_v24 = vpop.f32.mrb[70].mxu0  ;;  %v5656_v6 = vpop.f32.mrb[34].mxu1 }
 0x2f7   :  { %v7586_v32 = vpack.c.bf16 %v5656_v6, %v5655_v14  ;;  %v1353_v21 = vpop.f32.mrb[71].mxu0  ;;  %v1661_v5 = vpop.f32.mrb[35].mxu1 }
 0x2f8   :  { %v1834_v29 = vpack.c.bf16 %v1353_v21, %v1349_v40  ;;  %v7588_v38 = vpack.c.bf16 %v1661_v5, %v1658_v55 }
 0x2f9   :  { %9796 = vst [vmem:[#allocation28_spill] sm:$0xff] %v7586_v32 }
 0x2fa   :  { %9797 = vst [vmem:[#allocation29_spill] sm:$0xff] %v7588_v38  ;;  %5751 = vmatprep.subr.bf16.mxu0 %v1834_v29 }
 0x2fb   :  { %5752 = vmatpush3.bf16.xpose.msra.mxu0 %v1834_v29 }
 0x2fc   :  { %v7590_v50 = vpop.f32.mrb[72].mxu0 }
 0x2fd   :  { %9798 = vst [vmem:[#allocation30_spill] sm:$0xff] %v7590_v50  ;;  %v552_v28 = vpop.xlane.xlu0 %551  ;;  %v1359_v46 = vpop.f32.mrb[73].mxu0 }
 0x2fe   :  { %v619_v45 = vmul.f32 0.0078125, %v552_v28  ;;  %v7592_v31 = vpop.f32.mrb[74].mxu0 }
 0x2ff   :  { %9799 = vst [vmem:[#allocation31_spill] sm:$0xff] %v7592_v31  ;;  %v1363_v20 = vpop.f32.mrb[75].mxu0 }
 0x300   :  { %v683_v14 = vadd.f32 1e-08, %v619_v45  ;;  %v1835_v6 = vpack.c.bf16 %v1363_v20, %v1359_v46 }
 0x301   :  { %v554_v32 = vpop.xlane.xlu1 %553 }
 0x302   :  { %6119 = vrsqrt.f32 %v683_v14  ;;  %v620_v21 = vmul.f32 0.0078125, %v554_v32  ;;  %5753 = vmatprep.subr.bf16.mxu0 %v1835_v6 }
 0x303   :  { %5754 = vmatpush3.bf16.xpose.msra.mxu0 %v1835_v6 }
 0x304   :  { %v684_v5 = vadd.f32 1e-08, %v620_v21  ;;  %v7596_v29 = vpop.f32.mrb[76].mxu0  ;;  %v5659_v40 = vpop.f32.mrb[36].mxu1 }
 0x305   :  { %9800 = vst [vmem:[#allocation32_spill] sm:$0xff] %v7596_v29  ;;  %v556_v55 = vpop.xlane.xlu0 %555  ;;  %v1369_v25 = vpop.f32.mrb[77].mxu0 }
 0x306   :  { %6121 = vrsqrt.f32 %v684_v5  ;;  %v621_v28 = vmul.f32 0.0078125, %v556_v55  ;;  %v1674_v38 = vpop.f32.mrb[37].mxu1  ;;  %v7598_v27 = vpop.f32.mrb[78].mxu0 }
 0x307   :  { %v5660_v20 = vpop.f32.mrb[38].mxu1  ;;  %v1373_v46 = vpop.f32.mrb[79].mxu0 }
 0x308   :  { %v685_v14 = vadd.f32 1e-08, %v621_v28  ;;  %v7602_v32 = vpack.c.bf16 %v5660_v20, %v5659_v40  ;;  %v1836_v6 = vpack.c.bf16 %v1373_v46, %v1369_v25  ;;  %v1677_v21 = vpop.f32.mrb[39].mxu1  ;;  %v6513_v25 = vld [vmem:[%s9651_s2] ss:$0 sm:$0xff] }
 0x309   :  { %v7604_v23 = vpack.c.bf16 %v1677_v21, %v1674_v38  ;;  %v558_v63 = vpop.xlane.xlu1 %557 }
 0x30a   :  { %9801 = vst [vmem:[#allocation33_spill] sm:$0xff] %v7602_v32  ;;  %6123 = vrsqrt.f32 %v685_v14  ;;  %v622_v50 = vmul.f32 0.0078125, %v558_v63  ;;  %5755 = vmatprep.subr.bf16.mxu0 %v1836_v6  ;;  %v6514_v63 = vld [vmem:[%s9651_s2 + $0x1] ss:$0 sm:$0xff] }
 0x30b   :  { %9802 = vst [vmem:[#allocation34_spill] sm:$0xff] %v7604_v23  ;;  %5756 = vmatpush3.bf16.xpose.msra.mxu0 %v1836_v6 }
 0x30c   :  { %v6120_v5 = vpop.eup %6119  ;;  %v686_v55 = vadd.f32 1e-08, %v622_v50 }
 0x30d   :  { %v811_v31 = vmul.f32 %v6120_v5, %v7413_v9  ;;  %v9803_v5 = vpack.c.bf16 %v7334_v34, %v7329_v30  ;;  %v9807_v30 = vpack.c.bf16 %v7363_v53, %v7361_v13  ;;  %v9808_v34 = vpack.c.bf16 %v7373_v35, %v7371_v41  ;;  %v9813_v13 = vld [vmem:[#allocation16_spill] sm:$0xff] }
 0x30e   :  { %6125 = vrsqrt.f32 %v686_v55  ;;  %v9806_v55 = vpack.c.bf16 %v7357_v62, %v7355_v39  ;;  %v9811_v39 = vpack.c.bf16 %v7395_v37, %v7393_v19  ;;  %v9812_v62 = vld [vmem:[#allocation17_spill] sm:$0xff] }
 0x30f   :  { %v879_v40 = vmul.f32 %v6513_v25, %v811_v31  ;;  %v9814_v53 = vpack.c.bf16 %v9812_v62, %v9813_v13  ;;  %v9824_v62 = vpack.c.bf16 %v7544_v51, %v7542_v56  ;;  %v9830_v51 = vld [vmem:[#allocation8_spill] sm:$0xff] }
 0x310   :  { %v6122_v45 = vpop.eup %6121 }
 0x311   :  { %v812_v29 = vmul.f32 %v6122_v45, %v7422_v44  ;;  %v947_v20 = vadd.f32 %v6514_v63, %v879_v40 }
 0x313   :  { %v880_v38 = vmul.f32 %v6513_v25, %v812_v29 }
 0x314   :  { %v6124_v28 = vpop.eup %6123 }
 0x315   :  { %v948_v46 = vadd.f32 %v6514_v63, %v880_v38  ;;  %v813_v50 = vmul.f32 %v6124_v28, %v7435_v8  ;;  %v9804_v8 = vpack.c.bf16 %v7576_v61, %v7574_v3 }
 0x317   :  { %v981_v9 = vpack.c.bf16 %v948_v46, %v947_v20  ;;  %v881_v45 = vmul.f32 %v6513_v25, %v813_v50  ;;  %v9817_v50 = vpack.c.bf16 %v7419_v49, %v7415_v48 }
 0x318   :  { %v6126_v14 = vpop.eup %6125 }
 0x319   :  { %1476 = vmatmul.mubr.bf16.gmra.mrb[120].mxu0 %v981_v9  ;;  %5681 = vmatprep.mubr.bf16.mxu1 %v981_v9  ;;  %v814_v44 = vmul.f32 %v6126_v14, %v7441_v12  ;;  %v949_v29 = vadd.f32 %v6514_v63, %v881_v45  ;;  %v9805_v12 = vpack.c.bf16 %v7346_v33, %v7342_v59 }
 0x31a   :  { %1485 = vmatprep.mubr.bf16.mxu0 %v9787_v15  ;;  %v9809_v59 = vpack.c.bf16 %v7379_v16, %v7377_v57  ;;  %v9810_v33 = vpack.c.bf16 %v7389_v18, %v7387_v43  ;;  %v9818_v9 = vpack.c.bf16 %v7509_v2, %v7504_v1  ;;  %v9821_v2 = vpack.c.bf16 %v7523_v4, %v7519_v42 }
 0x31b   :  { %v882_v31 = vmul.f32 %v6513_v25, %v814_v44  ;;  %v9825_v42 = vpack.c.bf16 %v7556_v17, %v7554_v10  ;;  %v9826_v4 = vpack.c.bf16 %v7582_v24, %v7580_v36 }
 0x31d   :  { %v950_v6 = vadd.f32 %v6514_v63, %v882_v31 }
 0x31f   :  { %v982_v21 = vpack.c.bf16 %v950_v6, %v949_v29 }
 0x321   :  { %1486 = vmatmul.mubr.bf16.gmra.mrb[124].mxu0 %v982_v21  ;;  %5682 = vmatmul.mubr.bf16.gmra.mrb[60].mxu1 %v982_v21 }
 0x322   :  { %5701 = vmatprep.mubr.bf16.mxu1 %v9803_v5  ;;  %5765 = vmatprep.mubr.bf16.mxu0 %v9804_v8  ;;  %v9822_v8 = vpack.c.bf16 %v7536_v22, %v7534_v47  ;;  %v9827_v47 = vld [vmem:[#allocation31_spill] sm:$0xff]  ;;  %v9828_v22 = vld [vmem:[#allocation30_spill] sm:$0xff] }
 0x323   :  { %v9829_v13 = vpack.c.bf16 %v9827_v47, %v9828_v22 }
 0x329   :  { %5702 = vmatmul.mubr.bf16.vlgmr.msra.gmra.mrb[64].mxu1 %v9805_v12 }
 0x32a   :  { %5718 = vmatpush3.bf16.xpose.msra.mxu1 %v7409_v11  ;;  %5705 = vmatprep.mubr.bf16.mxu1 %v9806_v55  ;;  %v9823_v55 = vld [vmem:[#allocation9_spill] sm:$0xff] }
 0x32b   :  { %5719 = vmatprep.subr.bf16.mxu1 %v7428_v0 }
 0x331   :  { %5706 = vmatmul.mubr.bf16.gmra.mrb[68].mxu1 %v9807_v30 }
 0x332   :  { %5720 = vmatpush3.bf16.xpose.msra.mxu1 %v7428_v0  ;;  %5709 = vmatprep.mubr.bf16.mxu1 %v9808_v34 }
 0x333   :  { %5721 = vmatprep.subr.bf16.mxu1 %v7513_v58 }
 0x339   :  { %5710 = vmatmul.mubr.bf16.gmra.mrb[72].mxu1 %v9809_v59 }
 0x33a   :  { %5722 = vmatpush3.bf16.xpose.msra.mxu1 %v7513_v58  ;;  %5713 = vmatprep.mubr.bf16.mxu1 %v9810_v33 }
 0x33b   :  { %5723 = vmatprep.subr.bf16.mxu1 %v7529_v54 }
 0x341   :  { %5714 = vmatmul.mubr.bf16.gmra.mrb[76].mxu1 %v9811_v39 }
 0x342   :  { %5724 = vmatpush3.bf16.xpose.msra.mxu1 %v7529_v54  ;;  %5733 = vmatprep.mubr.bf16.mxu1 %v9814_v53 }
 0x343   :  { %5725 = vmatprep.subr.bf16.mxu1 %v7540_v26 }
 0x34a   :  { %5726 = vmatpush3.bf16.xpose.msra.mxu1 %v7540_v26 }
 0x34b   :  { %5727 = vmatprep.subr.bf16.mxu1 %v7550_v60 }
 0x352   :  { %5728 = vmatpush3.bf16.xpose.msra.mxu1 %v7550_v60 }
 0x353   :  { %5729 = vmatprep.subr.bf16.mxu1 %v7560_v7 }
 0x354   :  { %v7659_v41 = vpop.f32.mrb[80].mxu0 }
 0x355   :  { %v1379_v35 = vpop.f32.mrb[81].mxu0 }
 0x356   :  { %v7661_v57 = vpop.f32.mrb[82].mxu0 }
 0x357   :  { %v1805_v16 = vpack.c.bf16 %v7661_v57, %v7659_v41  ;;  %v1383_v43 = vpop.f32.mrb[83].mxu0 }
 0x358   :  { %v1837_v18 = vpack.c.bf16 %v1383_v43, %v1379_v35 }
 0x35a   :  { %5730 = vmatpush3.bf16.xpose.msra.mxu1 %v7560_v7  ;;  %5757 = vmatprep.subr.bf16.mxu0 %v1837_v18 }
 0x35b   :  { %5731 = vmatprep.subr.bf16.mxu1 %v7570_v52  ;;  %5758 = vmatpush3.bf16.xpose.msra.mxu0 %v1837_v18 }
 0x35c   :  { %v7667_v19 = vpop.f32.mrb[84].mxu0  ;;  %v5663_v37 = vpop.f32.mrb[40].mxu1 }
 0x35d   :  { %v1389_v11 = vpop.f32.mrb[85].mxu0  ;;  %v1690_v0 = vpop.f32.mrb[41].mxu1 }
 0x35e   :  { %v7669_v58 = vpop.f32.mrb[86].mxu0  ;;  %v5664_v54 = vpop.f32.mrb[42].mxu1 }
 0x35f   :  { %v1806_v61 = vpack.c.bf16 %v7669_v58, %v7667_v19  ;;  %v7673_v26 = vpack.c.bf16 %v5664_v54, %v5663_v37  ;;  %v1393_v60 = vpop.f32.mrb[87].mxu0  ;;  %v1693_v3 = vpop.f32.mrb[43].mxu1  ;;  %v9833_v54 = vld [vmem:[#allocation25_spill] sm:$0xff] }
 0x360   :  { %v1838_v7 = vpack.c.bf16 %v1393_v60, %v1389_v11  ;;  %v7675_v25 = vpack.c.bf16 %v1693_v3, %v1690_v0  ;;  %v9834_v60 = vld [vmem:[#allocation24_spill] sm:$0xff] }
 0x361   :  { %9815 = vst [vmem:[#allocation17_spill] sm:$0xff] %v7673_v26  ;;  %v9835_v3 = vpack.c.bf16 %v9833_v54, %v9834_v60 }
 0x362   :  { %9816 = vst [vmem:[#allocation16_spill] sm:$0xff] %v7675_v25  ;;  %5732 = vmatpush3.bf16.xpose.msra.mxu1 %v7570_v52  ;;  %5759 = vmatprep.subr.bf16.mxu0 %v1838_v7 }
 0x363   :  { %5760 = vmatpush3.bf16.xpose.msra.mxu0 %v1838_v7  ;;  %v9836_v7 = vld [vmem:[#allocation11_spill] sm:$0xff] }
 0x364   :  { %v7678_v40 = vpop.f32.mrb[88].mxu0 }
 0x365   :  { %v1399_v38 = vpop.f32.mrb[89].mxu0 }
 0x366   :  { %v7680_v28 = vpop.f32.mrb[90].mxu0 }
 0x367   :  { %v1807_v63 = vpack.c.bf16 %v7680_v28, %v7678_v40  ;;  %v1403_v20 = vpop.f32.mrb[91].mxu0 }
 0x368   :  { %v1839_v46 = vpack.c.bf16 %v1403_v20, %v1399_v38  ;;  %v9837_v38 = vld [vmem:[#allocation32_spill] sm:$0xff] }
 0x369   :  { %5734 = vmatmul.mubr.bf16.vlgmr.msra.gmra.mrb[80].mxu1 %v9817_v50  ;;  %v9838_v20 = vpack.c.bf16 %v7598_v27, %v9837_v38  ;;  %v9839_v50 = vld [vmem:[#allocation10_spill] sm:$0xff] }
 0x36a   :  { %5737 = vmatprep.mubr.bf16.mxu1 %v9818_v9  ;;  %5761 = vmatprep.subr.bf16.mxu0 %v1839_v46 }
 0x36b   :  { %5762 = vmatpush3.bf16.xpose.msra.mxu0 %v1839_v46 }
 0x36c   :  { %v7690_v52 = vpop.f32.mrb[92].mxu0  ;;  %v5667_v14 = vpop.f32.mrb[44].mxu1 }
 0x36d   :  { %v1409_v44 = vpop.f32.mrb[93].mxu0  ;;  %v1706_v45 = vpop.f32.mrb[45].mxu1 }
 0x36e   :  { %v7692_v31 = vpop.f32.mrb[94].mxu0  ;;  %v5668_v29 = vpop.f32.mrb[46].mxu1 }
 0x36f   :  { %v1808_v6 = vpack.c.bf16 %v7692_v31, %v7690_v52  ;;  %v7696_v21 = vpack.c.bf16 %v5668_v29, %v5667_v14  ;;  %v1413_v48 = vpop.f32.mrb[95].mxu0  ;;  %v1709_v49 = vpop.f32.mrb[47].mxu1  ;;  %v9840_v29 = vld [vmem:[#allocation13_spill] sm:$0xff] }
 0x370   :  { %v1840_v5 = vpack.c.bf16 %v1413_v48, %v1409_v44  ;;  %v7698_v1 = vpack.c.bf16 %v1709_v49, %v1706_v45  ;;  %v9846_v52 = vld [vmem:[#allocation29_spill] sm:$0xff] }
 0x371   :  { %9819 = vst [vmem:[#allocation35_spill] sm:$0xff] %v7696_v21  ;;  %5738 = vmatmul.mubr.bf16.gmra.mrb[84].mxu1 %v9821_v2 }
 0x372   :  { %9820 = vst [vmem:[#allocation36_spill] sm:$0xff] %v7698_v1  ;;  %5741 = vmatprep.mubr.bf16.mxu1 %v9822_v8  ;;  %5763 = vmatprep.subr.bf16.mxu0 %v1840_v5  ;;  %v9844_v8 = vld [vmem:[#allocation15_spill] sm:$0xff] }
 0x373   :  { %5764 = vmatpush3.bf16.xpose.msra.mxu0 %v1840_v5 }
 0x374   :  { %v1417_v12 = vpop.f32.mrb[96].mxu0  ;;  %5813 = vmatprep.subr.bf16.mxu0 %v9823_v55 }
 0x375   :  { %v1419_v30 = vpop.f32.mrb[97].mxu0 }
 0x376   :  { %v1421_v34 = vpop.f32.mrb[98].mxu0 }
 0x377   :  { %v1809_v59 = vpack.c.bf16 %v1421_v34, %v1417_v12  ;;  %v1423_v33 = vpop.f32.mrb[99].mxu0 }
 0x378   :  { %v1841_v39 = vpack.c.bf16 %v1423_v33, %v1419_v30 }
 0x379   :  { %5742 = vmatmul.mubr.bf16.gmra.mrb[88].mxu1 %v9824_v62 }
 0x37a   :  { %5745 = vmatprep.mubr.bf16.mxu1 %v9825_v42  ;;  %5766 = vmatmul.mubr.bf16.vlgmr.msra.gmra.mrb[128].mxu0 %v9826_v4 }
 0x37b   :  { %5781 = vmatprep.subr.bf16.mxu1 %v1841_v39  ;;  %5769 = vmatprep.mubr.bf16.mxu0 %v9829_v13 }
 0x37c   :  { %5782 = vmatpush3.bf16.xpose.msra.mxu1 %v1841_v39  ;;  %5814 = vmatpush3.bf16.msra.mxu0 %v9823_v55  ;;  %v7720_v53 = vpop.f32.mrb[100].mxu0  ;;  %v5671_v56 = vpop.f32.mrb[48].mxu1  ;;  %v9845_v55 = vld [vmem:[#allocation14_spill] sm:$0xff] }
 0x37d   :  { %5815 = vmatprep.subr.bf16.mxu0 %v9830_v51  ;;  %v1429_v35 = vpop.f32.mrb[101].mxu0  ;;  %v1722_v10 = vpop.f32.mrb[49].mxu1 }
 0x37e   :  { %v7723_v17 = vpop.f32.mrb[102].mxu0  ;;  %v5672_v43 = vpop.f32.mrb[50].mxu1 }
 0x37f   :  { %v1810_v36 = vpack.c.bf16 %v7723_v17, %v7720_v53  ;;  %v7727_v24 = vpack.c.bf16 %v5672_v43, %v5671_v56  ;;  %v1433_v18 = vpop.f32.mrb[103].mxu0  ;;  %v1725_v37 = vpop.f32.mrb[51].mxu1  ;;  %v7862_v53 = vld [vmem:[%s9650_s1 + $0x38] sm:$0xff] }
 0x380   :  { %v1842_v11 = vpack.c.bf16 %v1433_v18, %v1429_v35  ;;  %v7729_v0 = vpack.c.bf16 %v1725_v37, %v1722_v10  ;;  %5816 = vmatpush3.bf16.msra.mxu0 %v9830_v51 }
 0x381   :  { %9831 = vst [vmem:[#allocation9_spill] sm:$0xff] %v7727_v24  ;;  %5746 = vmatmul.mubr.bf16.gmra.mrb[92].mxu1 %v9835_v3  ;;  %5817 = vmatprep.subr.bf16.mxu0 %v9836_v7 }
 0x382   :  { %9832 = vst [vmem:[#allocation31_spill] sm:$0xff] %v7729_v0  ;;  %5797 = vmatprep.mubr.bf16.mxu1 %v1809_v59  ;;  %5770 = vmatmul.mubr.bf16.gmra.mrb[132].mxu0 %v9838_v20 }
 0x383   :  { %5783 = vmatprep.subr.bf16.mxu1 %v1842_v11  ;;  %5773 = vmatprep.mubr.bf16.mxu0 %v1805_v16  ;;  %v9841_v16 = vld [vmem:[#allocation12_spill] sm:$0xff] }
 0x384   :  { %5784 = vmatpush3.bf16.xpose.msra.mxu1 %v1842_v11  ;;  %5818 = vmatpush3.bf16.msra.mxu0 %v9836_v7  ;;  %v7743_v46 = vpop.f32.mrb[104].mxu0 }
 0x385   :  { %5819 = vmatprep.subr.bf16.mxu0 %v9839_v50  ;;  %v1439_v9 = vpop.f32.mrb[105].mxu0 }
 0x386   :  { %v7746_v14 = vpop.f32.mrb[106].mxu0 }
 0x387   :  { %v1811_v44 = vpack.c.bf16 %v7746_v14, %v7743_v46  ;;  %v1443_v27 = vpop.f32.mrb[107].mxu0  ;;  %v7872_v46 = vld [vmem:[%s9650_s1 + $0x20] sm:$0xff] }
 0x388   :  { %v1843_v45 = vpack.c.bf16 %v1443_v27, %v1439_v9  ;;  %5820 = vmatpush3.bf16.msra.mxu0 %v9839_v50 }
 0x389   :  { %5821 = vmatprep.subr.bf16.mxu0 %v9840_v29 }
 0x38a   :  { %5774 = vmatmul.mubr.bf16.gmra.mrb[136].mxu0 %v1806_v61  ;;  %5785 = vmatprep.subr.bf16.mxu1 %v1843_v45 }
 0x38b   :  { %5777 = vmatprep.mubr.bf16.mxu0 %v1807_v63 }
 0x38c   :  { %5786 = vmatpush3.bf16.xpose.msra.mxu1 %v1843_v45  ;;  %5822 = vmatpush3.bf16.msra.mxu0 %v9840_v29  ;;  %v7759_v41 = vpop.f32.mrb[108].mxu0  ;;  %v5675_v57 = vpop.f32.mrb[52].mxu1 }
 0x38d   :  { %5823 = vmatprep.subr.bf16.mxu0 %v9841_v16  ;;  %v1449_v48 = vpop.f32.mrb[109].mxu0  ;;  %v1738_v49 = vpop.f32.mrb[53].mxu1 }
 0x38e   :  { %v7762_v5 = vpop.f32.mrb[110].mxu0  ;;  %v5676_v2 = vpop.f32.mrb[54].mxu1 }
 0x38f   :  { %v1812_v19 = vpack.c.bf16 %v7762_v5, %v7759_v41  ;;  %v7766_v58 = vpack.c.bf16 %v5676_v2, %v5675_v57  ;;  %v1453_v61 = vpop.f32.mrb[111].mxu0  ;;  %v1741_v40 = vpop.f32.mrb[55].mxu1  ;;  %v7908_v41 = vld [vmem:[%s9650_s1 + $0x58] sm:$0xff] }
 0x390   :  { %v1844_v28 = vpack.c.bf16 %v1453_v61, %v1449_v48  ;;  %v7768_v63 = vpack.c.bf16 %v1741_v40, %v1738_v49  ;;  %5824 = vmatpush3.bf16.msra.mxu0 %v9841_v16  ;;  %v7814_v49 = vld [vmem:[%s9650_s1 + $0x10] sm:$0xff]  ;;  %v9851_v61 = vld [vmem:[#allocation19_spill] sm:$0xff] }
 0x391   :  { %9842 = vst [vmem:[#allocation30_spill] sm:$0xff] %v7766_v58  ;;  %5825 = vmatprep.subr.bf16.mxu0 %v9844_v8  ;;  %v7820_v40 = vld [vmem:[%s9650_s1 + $0x18] sm:$0xff] }
 0x392   :  { %9843 = vst [vmem:[#allocation8_spill] sm:$0xff] %v7768_v63  ;;  %5778 = vmatmul.mubr.bf16.gmra.mrb[140].mxu0 %v1808_v6  ;;  %5787 = vmatprep.subr.bf16.mxu1 %v1844_v28 }
 0x394   :  { %5788 = vmatpush3.bf16.xpose.msra.mxu1 %v1844_v28  ;;  %5826 = vmatpush3.bf16.msra.mxu0 %v9844_v8  ;;  %v7776_v12 = vpop.f32.mrb[112].mxu0 }
 0x395   :  { %5827 = vmatprep.subr.bf16.mxu0 %v9845_v55  ;;  %v1459_v30 = vpop.f32.mrb[113].mxu0 }
 0x396   :  { %v7779_v34 = vpop.f32.mrb[114].mxu0 }
 0x397   :  { %v1813_v59 = vpack.c.bf16 %v7779_v34, %v7776_v12  ;;  %v1463_v33 = vpop.f32.mrb[115].mxu0  ;;  %v7918_v12 = vld [vmem:[%s9650_s1 + $0x40] sm:$0xff] }
 0x398   :  { %v1845_v39 = vpack.c.bf16 %v1463_v33, %v1459_v30  ;;  %5828 = vmatpush3.bf16.msra.mxu0 %v9845_v55  ;;  %v7828_v55 = vld [vmem:[%s9650_s1] sm:$0xff] }
 0x399   :  { %5877 = vmatprep.subr.bf16.mxu0 %v9846_v52 }
 0x39a   :  { %5789 = vmatprep.subr.bf16.mxu1 %v1845_v39 }
 0x39c   :  { %5790 = vmatpush3.bf16.xpose.msra.mxu1 %v1845_v39  ;;  %v7785_v31 = vpop.f32.mrb[116].mxu0  ;;  %v5679_v6 = vpop.f32.mrb[56].mxu1 }
 0x39d   :  { %v1469_v62 = vpop.f32.mrb[117].mxu0  ;;  %v1754_v42 = vpop.f32.mrb[57].mxu1 }
 0x39e   :  { %v7787_v4 = vpop.f32.mrb[118].mxu0  ;;  %v5680_v47 = vpop.f32.mrb[58].mxu1 }
 0x39f   :  { %v1814_v22 = vpack.c.bf16 %v7787_v4, %v7785_v31  ;;  %v7791_v13 = vpack.c.bf16 %v5680_v47, %v5679_v6  ;;  %v1473_v56 = vpop.f32.mrb[119].mxu0  ;;  %v1757_v51 = vpop.f32.mrb[59].mxu1  ;;  %v7837_v6 = vld [vmem:[%s9650_s1 + $0x8] sm:$0xff]  ;;  %v7954_v31 = vld [vmem:[%s9650_s1 + $0x78] sm:$0xff] }
 0x3a0   :  { %v1846_v35 = vpack.c.bf16 %v1473_v56, %v1469_v62  ;;  %v7793_v10 = vpack.c.bf16 %v1757_v51, %v1754_v42  ;;  %v7849_v42 = vld [vmem:[%s9650_s1 + $0x30] sm:$0xff] }
 0x3a1   :  { %9847 = vst [vmem:[#allocation25_spill] sm:$0xff] %v7791_v13 }
 0x3a2   :  { %9848 = vst [vmem:[#allocation24_spill] sm:$0xff] %v7793_v10  ;;  %5791 = vmatprep.subr.bf16.mxu1 %v1846_v35 }
 0x3a4   :  { %5792 = vmatpush3.bf16.xpose.msra.mxu1 %v1846_v35 }
 0x3ec   :  { %v7795_v43 = vpop.f32.mrb[120].mxu0 }
 0x3ed   :  { %v1479_v18 = vpop.f32.mrb[121].mxu0 }
 0x3ee   :  { %v7797_v37 = vpop.f32.mrb[122].mxu0 }
 0x3ef   :  { %v1815_v11 = vpack.c.bf16 %v7797_v37, %v7795_v43  ;;  %v1483_v54 = vpop.f32.mrb[123].mxu0  ;;  %v7964_v43 = vld [vmem:[%s9650_s1 + $0x60] sm:$0xff] }
 0x3f0   :  { %v1847_v60 = vpack.c.bf16 %v1483_v54, %v1479_v18  ;;  %v7881_v18 = vld [vmem:[%s9650_s1 + $0x28] sm:$0xff] }
 0x3f2   :  { %5793 = vmatprep.subr.bf16.mxu1 %v1847_v60 }
 0x3f3   :  { %5794 = vmatpush3.bf16.xpose.msra.mxu1 %v1847_v60  ;;  %v9853_v60 = vld [vmem:[#allocation21_spill] sm:$0xff] }
 0x3f4   :  { %v7801_v3 = vpop.f32.mrb[124].mxu0  ;;  %v5683_v7 = vpop.f32.mrb[60].mxu1 }
 0x3f5   :  { %v1489_v38 = vpop.f32.mrb[125].mxu0  ;;  %v1770_v20 = vpop.f32.mrb[61].mxu1 }
 0x3f6   :  { %v7803_v50 = vpop.f32.mrb[126].mxu0  ;;  %v5684_v9 = vpop.f32.mrb[62].mxu1 }
 0x3f7   :  { %v1816_v27 = vpack.c.bf16 %v7803_v50, %v7801_v3  ;;  %v7807_v45 = vpack.c.bf16 %v5684_v9, %v5683_v7  ;;  %v1493_v29 = vpop.f32.mrb[127].mxu0  ;;  %v1773_v57 = vpop.f32.mrb[63].mxu1  ;;  %v7895_v7 = vld [vmem:[%s9650_s1 + $0x50] sm:$0xff] }
 0x3f8   :  { %v1848_v16 = vpack.c.bf16 %v1493_v29, %v1489_v38  ;;  %v7809_v48 = vpack.c.bf16 %v1773_v57, %v1770_v20  ;;  %v7927_v57 = vld [vmem:[%s9650_s1 + $0x48] sm:$0xff] }
 0x3f9   :  { %9849 = vst [vmem:[#allocation11_spill] sm:$0xff] %v7807_v45 }
 0x3fa   :  { %9850 = vst [vmem:[#allocation32_spill] sm:$0xff] %v7809_v48  ;;  %5795 = vmatprep.subr.bf16.mxu1 %v1848_v16 }
 0x3fb   :  { %5796 = vmatpush3.bf16.xpose.msra.mxu1 %v1848_v16 }
 0x3fc   :  { %v5703_v2 = vpop.f32.mrb[64].mxu1  ;;  %5845 = vmatprep.subr.bf16.mxu1 %v9851_v61 }
 0x3fd   :  { %v7823_v28 = vadd.f32 %v5703_v2, %v7814_v49  ;;  %v1931_v8 = vpop.f32.mrb[65].mxu1  ;;  %v9855_v2 = vld [vmem:[#allocation23_spill] sm:$0xff] }
 0x3fe   :  { %v5704_v30 = vpop.f32.mrb[66].mxu1  ;;  %v7840_v62 = vadd.f32 %v1931_v8, %v7828_v55 }
 0x3ff   :  { %v7831_v33 = vadd.f32 %v5704_v30, %v7820_v40  ;;  %2289 = vmax.xlane.f32.xlu0 %v7823_v28  ;;  %v1934_v39 = vpop.f32.mrb[67].mxu1 }
 0x400   :  { %v7852_v47 = vadd.f32 %v1934_v39, %v7837_v6 }
 0x401   :  { %2291 = vmax.xlane.f32.xlu1 %v7831_v33 }
 0x402   :  { %5798 = vmatmul.mubr.bf16.vlgmr.msra.gmra.mrb[96].mxu1 %v1810_v36  ;;  %v9852_v36 = vld [vmem:[#allocation18_spill] sm:$0xff] }
 0x403   :  { %2285 = vmax.xlane.f32.xlu0 %v7840_v62  ;;  %5801 = vmatprep.mubr.bf16.mxu1 %v1811_v44 }
 0x404   :  { %5846 = vmatpush3.bf16.msra.mxu1 %v9851_v61  ;;  %v5707_v56 = vpop.f32.mrb[68].mxu1  ;;  %v7941_v61 = vld [vmem:[%s9650_s1 + $0x70] sm:$0xff] }
 0x405   :  { %v7865_v17 = vadd.f32 %v5707_v56, %v7849_v42  ;;  %5847 = vmatprep.subr.bf16.mxu1 %v9852_v36  ;;  %v1947_v51 = vpop.f32.mrb[69].mxu1  ;;  %2287 = vmax.xlane.f32.xlu1 %v7852_v47 }
 0x406   :  { %v5708_v14 = vpop.f32.mrb[70].mxu1  ;;  %v7885_v54 = vadd.f32 %v1947_v51, %v7872_v46 }
 0x407   :  { %v7875_v44 = vadd.f32 %v5708_v14, %v7862_v53  ;;  %v1950_v35 = vpop.f32.mrb[71].mxu1  ;;  %2297 = vmax.xlane.f32.xlu0 %v7865_v17  ;;  %v9857_v14 = vld [vmem:[#allocation27_spill] sm:$0xff] }
 0x408   :  { %5848 = vmatpush3.bf16.msra.mxu1 %v9852_v36  ;;  %v7898_v38 = vadd.f32 %v1950_v35, %v7881_v18  ;;  %v7973_v36 = vld [vmem:[%s9650_s1 + $0x68] sm:$0xff] }
 0x409   :  { %5849 = vmatprep.subr.bf16.mxu1 %v9853_v60  ;;  %2299 = vmax.xlane.f32.xlu1 %v7875_v44 }
 0x40a   :  { %5802 = vmatmul.mubr.bf16.gmra.mrb[100].mxu1 %v1812_v19  ;;  %v9854_v19 = vld [vmem:[#allocation20_spill] sm:$0xff] }
 0x40b   :  { %2293 = vmax.xlane.f32.xlu0 %v7885_v54  ;;  %5805 = vmatprep.mubr.bf16.mxu1 %v1813_v59 }
 0x40c   :  { %5850 = vmatpush3.bf16.msra.mxu1 %v9853_v60  ;;  %v5711_v20 = vpop.f32.mrb[72].mxu1  ;;  %v9858_v60 = vld [vmem:[#allocation26_spill] sm:$0xff] }
 0x40d   :  { %v7911_v5 = vadd.f32 %v5711_v20, %v7895_v7  ;;  %5851 = vmatprep.subr.bf16.mxu1 %v9854_v19  ;;  %v1963_v9 = vpop.f32.mrb[73].mxu1  ;;  %2295 = vmax.xlane.f32.xlu1 %v7898_v38 }
 0x40e   :  { %v5712_v34 = vpop.f32.mrb[74].mxu1  ;;  %v7931_v16 = vadd.f32 %v1963_v9, %v7918_v12 }
 0x40f   :  { %v7921_v59 = vadd.f32 %v5712_v34, %v7908_v41  ;;  %v1966_v29 = vpop.f32.mrb[75].mxu1  ;;  %2305 = vmax.xlane.f32.xlu0 %v7911_v5 }
 0x410   :  { %5852 = vmatpush3.bf16.msra.mxu1 %v9854_v19  ;;  %v7944_v8 = vadd.f32 %v1966_v29, %v7927_v57 }
 0x411   :  { %5853 = vmatprep.subr.bf16.mxu1 %v9855_v2  ;;  %2307 = vmax.xlane.f32.xlu1 %v7921_v59 }
 0x412   :  { %5806 = vmatmul.mubr.bf16.gmra.mrb[104].mxu1 %v1814_v22  ;;  %v9856_v22 = vld [vmem:[#allocation22_spill] sm:$0xff] }
 0x413   :  { %2301 = vmax.xlane.f32.xlu0 %v7931_v16  ;;  %5809 = vmatprep.mubr.bf16.mxu1 %v1815_v11 }
 0x414   :  { %5854 = vmatpush3.bf16.msra.mxu1 %v9855_v2  ;;  %v5715_v30 = vpop.f32.mrb[76].mxu1 }
 0x415   :  { %v7957_v4 = vadd.f32 %v5715_v30, %v7941_v61  ;;  %5855 = vmatprep.subr.bf16.mxu1 %v9856_v22  ;;  %v1979_v39 = vpop.f32.mrb[77].mxu1  ;;  %2303 = vmax.xlane.f32.xlu1 %v7944_v8 }
 0x416   :  { %v5716_v37 = vpop.f32.mrb[78].mxu1  ;;  %v7977_v51 = vadd.f32 %v1979_v39, %v7964_v43 }
 0x417   :  { %v7967_v11 = vadd.f32 %v5716_v37, %v7954_v31  ;;  %v1982_v56 = vpop.f32.mrb[79].mxu1  ;;  %2313 = vmax.xlane.f32.xlu0 %v7957_v4 }
 0x418   :  { %5856 = vmatpush3.bf16.msra.mxu1 %v9856_v22  ;;  %v7985_v35 = vadd.f32 %v1982_v56, %v7973_v36 }
 0x419   :  { %5857 = vmatprep.subr.bf16.mxu1 %v9857_v14  ;;  %2315 = vmax.xlane.f32.xlu1 %v7967_v11 }
 0x41a   :  { %5810 = vmatmul.mubr.bf16.gmra.mrb[108].mxu1 %v1816_v27 }
 0x41b   :  { %2309 = vmax.xlane.f32.xlu0 %v7977_v51 }
 0x41c   :  { %5858 = vmatpush3.bf16.msra.mxu1 %v9857_v14 }
 0x41d   :  { %5859 = vmatprep.subr.bf16.mxu1 %v9858_v60  ;;  %2311 = vmax.xlane.f32.xlu1 %v7985_v35 }
 0x420   :  { %5860 = vmatpush3.bf16.msra.mxu1 %v9858_v60 }
 0x421   :  { %5909 = vmatprep.subr.bf16.mxu1 %v7729_v0 }
 0x43c   :  { %v5735_v20 = vpop.f32.mrb[80].mxu1 }
 0x43d   :  { %v7994_v19 = vadd.f32 %v5735_v20, %v7814_v49  ;;  %v2028_v3 = vpop.f32.mrb[81].mxu1 }
 0x43e   :  { %v5736_v50 = vpop.f32.mrb[82].mxu1  ;;  %v8001_v34 = vadd.f32 %v2028_v3, %v7828_v55 }
 0x43f   :  { %v7997_v27 = vadd.f32 %v5736_v50, %v7820_v40  ;;  %2321 = vmax.xlane.f32.xlu0 %v7994_v19  ;;  %v2031_v9 = vpop.f32.mrb[83].mxu1 }
 0x440   :  { %v8005_v29 = vadd.f32 %v2031_v9, %v7837_v6 }
 0x441   :  { %2323 = vmax.xlane.f32.xlu1 %v7997_v27 }
 0x443   :  { %2317 = vmax.xlane.f32.xlu0 %v8001_v34 }
 0x444   :  { %v5739_v2 = vpop.f32.mrb[84].mxu1 }
 0x445   :  { %v8009_v30 = vadd.f32 %v5739_v2, %v7849_v42  ;;  %v2044_v22 = vpop.f32.mrb[85].mxu1  ;;  %2319 = vmax.xlane.f32.xlu1 %v8005_v29 }
 0x446   :  { %v5740_v39 = vpop.f32.mrb[86].mxu1  ;;  %v8017_v14 = vadd.f32 %v2044_v22, %v7872_v46 }
 0x447   :  { %v8013_v37 = vadd.f32 %v5740_v39, %v7862_v53  ;;  %v2047_v56 = vpop.f32.mrb[87].mxu1  ;;  %2329 = vmax.xlane.f32.xlu0 %v8009_v30 }
 0x448   :  { %v8021_v60 = vadd.f32 %v2047_v56, %v7881_v18 }
 0x449   :  { %2331 = vmax.xlane.f32.xlu1 %v8013_v37 }
 0x44b   :  { %2325 = vmax.xlane.f32.xlu0 %v8017_v14 }
 0x44c   :  { %v5743_v20 = vpop.f32.mrb[88].mxu1 }
 0x44d   :  { %v8025_v3 = vadd.f32 %v5743_v20, %v7895_v7  ;;  %v2060_v50 = vpop.f32.mrb[89].mxu1  ;;  %2327 = vmax.xlane.f32.xlu1 %v8021_v60  ;;  %v5767_v9 = vpop.f32.mrb[128].mxu0 }
 0x44e   :  { %v5744_v2 = vpop.f32.mrb[90].mxu1  ;;  %v2125_v39 = vpop.f32.mrb[129].mxu0  ;;  %v8033_v48 = vadd.f32 %v2060_v50, %v7918_v12  ;;  %v8057_v26 = vadd.f32 %v5767_v9, %v7814_v49 }
 0x44f   :  { %v8029_v22 = vadd.f32 %v5744_v2, %v7908_v41  ;;  %v2063_v15 = vpop.f32.mrb[91].mxu1  ;;  %2337 = vmax.xlane.f32.xlu0 %v8025_v3  ;;  %v5768_v56 = vpop.f32.mrb[130].mxu0  ;;  %v8065_v52 = vadd.f32 %v2125_v39, %v7828_v55 }
 0x450   :  { %v2128_v45 = vpop.f32.mrb[131].mxu0  ;;  %v8037_v20 = vadd.f32 %v2063_v15, %v7927_v57  ;;  %9861 = vst [vmem:[#allocation12_spill] sm:$0xff] %v8057_v26  ;;  %v8061_v32 = vadd.f32 %v5768_v56, %v7820_v40 }
 0x451   :  { %2339 = vmax.xlane.f32.xlu1 %v8029_v22 }
 0x452   :  { %9862 = vst [vmem:[#allocation15_spill] sm:$0xff] %v8061_v32 }
 0x453   :  { %2333 = vmax.xlane.f32.xlu0 %v8033_v48 }
 0x454   :  { %v5747_v13 = vpop.f32.mrb[92].mxu1 }
 0x455   :  { %v8041_v10 = vadd.f32 %v5747_v13, %v7941_v61  ;;  %v2076_v2 = vpop.f32.mrb[93].mxu1  ;;  %2335 = vmax.xlane.f32.xlu1 %v8037_v20  ;;  %v5771_v58 = vpop.f32.mrb[132].mxu0 }
 0x456   :  { %v5748_v63 = vpop.f32.mrb[94].mxu1  ;;  %v2141_v24 = vpop.f32.mrb[133].mxu0  ;;  %v8049_v1 = vadd.f32 %v2076_v2, %v7964_v43  ;;  %v8073_v9 = vadd.f32 %v5771_v58, %v7849_v42 }
 0x457   :  { %v8045_v50 = vadd.f32 %v5748_v63, %v7954_v31  ;;  %v2079_v0 = vpop.f32.mrb[95].mxu1  ;;  %2345 = vmax.xlane.f32.xlu0 %v8041_v10  ;;  %v5772_v15 = vpop.f32.mrb[134].mxu0 }
 0x458   :  { %v2144_v21 = vpop.f32.mrb[135].mxu0  ;;  %9859 = vst [vmem:[#allocation10_spill] sm:$0xff] %v8049_v1  ;;  %v8053_v13 = vadd.f32 %v2079_v0, %v7973_v36  ;;  %v8069_v0 = vadd.f32 %v2128_v45, %v7837_v6 }
 0x459   :  { %2347 = vmax.xlane.f32.xlu1 %v8045_v50  ;;  %v8085_v45 = vadd.f32 %v2144_v21, %v7881_v18 }
 0x45a   :  { %9860 = vst [vmem:[#allocation13_spill] sm:$0xff] %v8053_v13 }
 0x45b   :  { %2341 = vmax.xlane.f32.xlu0 %v8049_v1  ;;  %9864 = vst [vmem:[#allocation19_spill] sm:$0xff] %v8085_v45 }
 0x45d   :  { %2343 = vmax.xlane.f32.xlu1 %v8053_v13  ;;  %v5775_v63 = vpop.f32.mrb[136].mxu0 }
 0x45e   :  { %v2157_v25 = vpop.f32.mrb[137].mxu0  ;;  %v8089_v58 = vadd.f32 %v5775_v63, %v7895_v7 }
 0x45f   :  { %2353 = vmax.xlane.f32.xlu0 %v8057_v26  ;;  %v5776_v2 = vpop.f32.mrb[138].mxu0  ;;  %v8077_v26 = vadd.f32 %v5772_v15, %v7862_v53 }
 0x460   :  { %v2160_v23 = vpop.f32.mrb[139].mxu0  ;;  %9865 = vst [vmem:[#allocation18_spill] sm:$0xff] %v8089_v58  ;;  %v8093_v15 = vadd.f32 %v5776_v2, %v7908_v41 }
 0x461   :  { %2355 = vmax.xlane.f32.xlu1 %v8061_v32  ;;  %v8081_v32 = vadd.f32 %v2141_v24, %v7872_v46  ;;  %v8097_v24 = vadd.f32 %v2157_v25, %v7918_v12  ;;  %v8101_v21 = vadd.f32 %v2160_v23, %v7927_v57 }
 0x462   :  { %9866 = vst [vmem:[#allocation21_spill] sm:$0xff] %v8093_v15 }
 0x463   :  { %2349 = vmax.xlane.f32.xlu0 %v8065_v52  ;;  %9863 = vst [vmem:[#allocation14_spill] sm:$0xff] %v8081_v32  ;;  %9867 = vst [vmem:[#allocation20_spill] sm:$0xff] %v8097_v24 }
 0x464   :  { %9868 = vst [vmem:[#allocation23_spill] sm:$0xff] %v8101_v21 }
 0x465   :  { %2351 = vmax.xlane.f32.xlu1 %v8069_v0  ;;  %v5779_v56 = vpop.f32.mrb[140].mxu0 }
 0x466   :  { %v2173_v13 = vpop.f32.mrb[141].mxu0  ;;  %v8105_v63 = vadd.f32 %v5779_v56, %v7941_v61 }
 0x467   :  { %2361 = vmax.xlane.f32.xlu0 %v8073_v9  ;;  %v5780_v39 = vpop.f32.mrb[142].mxu0  ;;  %v8113_v25 = vadd.f32 %v2173_v13, %v7964_v43 }
 0x468   :  { %v2176_v1 = vpop.f32.mrb[143].mxu0  ;;  %9869 = vst [vmem:[#allocation22_spill] sm:$0xff] %v8105_v63  ;;  %v8109_v2 = vadd.f32 %v5780_v39, %v7954_v31 }
 0x469   :  { %2363 = vmax.xlane.f32.xlu1 %v8077_v26  ;;  %9871 = vst [vmem:[#allocation26_spill] sm:$0xff] %v8113_v25  ;;  %v8117_v23 = vadd.f32 %v2176_v1, %v7973_v36 }
 0x46a   :  { %9870 = vst [vmem:[#allocation27_spill] sm:$0xff] %v8109_v2 }
 0x46b   :  { %2357 = vmax.xlane.f32.xlu0 %v8081_v32  ;;  %9872 = vst [vmem:[#allocation37_spill] sm:$0xff] %v8117_v23 }
 0x46d   :  { %2359 = vmax.xlane.f32.xlu1 %v8085_v45 }
 0x46f   :  { %2369 = vmax.xlane.f32.xlu0 %v8089_v58 }
 0x471   :  { %2371 = vmax.xlane.f32.xlu1 %v8093_v15 }
 0x473   :  { %2365 = vmax.xlane.f32.xlu0 %v8097_v24 }
 0x475   :  { %2367 = vmax.xlane.f32.xlu1 %v8101_v21 }
 0x477   :  { %2377 = vmax.xlane.f32.xlu0 %v8105_v63 }
 0x479   :  { %2379 = vmax.xlane.f32.xlu1 %v8109_v2 }
 0x47b   :  { %2373 = vmax.xlane.f32.xlu0 %v8113_v25 }
 0x47d   :  { %2375 = vmax.xlane.f32.xlu1 %v8117_v23 }
 0x48c   :  { %v2290_v56 = vpop.xlane.xlu0 %2289 }
 0x48d   :  { %v2415_v21 = vsub.f32 %v7823_v28, %v2290_v56 }
 0x48e   :  { %v2292_v24 = vpop.xlane.xlu1 %2291 }
 0x48f   :  { %v2481_v39 = vmul.f32 1.442695, %v2415_v21  ;;  %v2416_v15 = vsub.f32 %v7831_v33, %v2292_v24 }
 0x490   :  { %v2286_v63 = vpop.xlane.xlu0 %2285 }
 0x491   :  { %6127 = vpow2.f32 %v2481_v39  ;;  %v2483_v13 = vmul.f32 1.442695, %v2416_v15  ;;  %v2413_v58 = vsub.f32 %v7840_v62, %v2286_v63 }
 0x492   :  { %v2288_v2 = vpop.xlane.xlu1 %2287 }
 0x493   :  { %6129 = vpow2.f32 %v2483_v13  ;;  %v2477_v1 = vmul.f32 1.442695, %v2413_v58  ;;  %v2414_v45 = vsub.f32 %v7852_v47, %v2288_v2 }
 0x494   :  { %v2298_v25 = vpop.xlane.xlu0 %2297 }
 0x495   :  { %6131 = vpow2.f32 %v2477_v1  ;;  %v2479_v23 = vmul.f32 1.442695, %v2414_v45  ;;  %v2419_v32 = vsub.f32 %v7865_v17, %v2298_v25 }
 0x496   :  { %v2300_v28 = vpop.xlane.xlu1 %2299 }
 0x497   :  { %6133 = vpow2.f32 %v2479_v23  ;;  %v2489_v21 = vmul.f32 1.442695, %v2419_v32  ;;  %v2420_v33 = vsub.f32 %v7875_v44, %v2300_v28 }
 0x498   :  { %v2294_v24 = vpop.xlane.xlu0 %2293 }
 0x499   :  { %6135 = vpow2.f32 %v2489_v21  ;;  %v2491_v15 = vmul.f32 1.442695, %v2420_v33  ;;  %v2417_v62 = vsub.f32 %v7885_v54, %v2294_v24 }
 0x49a   :  { %v2296_v63 = vpop.xlane.xlu1 %2295 }
 0x49b   :  { %v8128_v56 = vpop.eup %6127  ;;  %6137 = vpow2.f32 %v2491_v15  ;;  %v2485_v47 = vmul.f32 1.442695, %v2417_v62  ;;  %v2418_v58 = vsub.f32 %v7898_v38, %v2296_v63 }
 0x49c   :  { %v2306_v45 = vpop.xlane.xlu0 %2305  ;;  %2609 = vadd.xlane.f32.xlu0 %v8128_v56 }
 0x49d   :  { %v8132_v17 = vpop.eup %6129  ;;  %6139 = vpow2.f32 %v2485_v47  ;;  %v2487_v32 = vmul.f32 1.442695, %v2418_v58  ;;  %v2423_v44 = vsub.f32 %v7911_v5, %v2306_v45 }
 0x49e   :  { %v2308_v2 = vpop.xlane.xlu1 %2307  ;;  %2611 = vadd.xlane.f32.xlu1 %v8132_v17 }
 0x49f   :  { %v8136_v54 = vpop.eup %6131  ;;  %6141 = vpow2.f32 %v2487_v32  ;;  %v2497_v25 = vmul.f32 1.442695, %v2423_v44  ;;  %v2424_v23 = vsub.f32 %v7921_v59, %v2308_v2 }
 0x4a0   :  { %v2302_v39 = vpop.xlane.xlu0 %2301  ;;  %2605 = vadd.xlane.f32.xlu0 %v8136_v54 }
 0x4a1   :  { %v8140_v38 = vpop.eup %6133  ;;  %6143 = vpow2.f32 %v2497_v25  ;;  %v2499_v13 = vmul.f32 1.442695, %v2424_v23  ;;  %v2421_v1 = vsub.f32 %v7931_v16, %v2302_v39 }
 0x4a2   :  { %v2304_v28 = vpop.xlane.xlu1 %2303  ;;  %2607 = vadd.xlane.f32.xlu1 %v8140_v38 }
 0x4a3   :  { %v8144_v5 = vpop.eup %6135  ;;  %6145 = vpow2.f32 %v2499_v13  ;;  %v2493_v21 = vmul.f32 1.442695, %v2421_v1  ;;  %v2422_v33 = vsub.f32 %v7944_v8, %v2304_v28 }
 0x4a4   :  { %v2314_v24 = vpop.xlane.xlu0 %2313  ;;  %2617 = vadd.xlane.f32.xlu0 %v8144_v5 }
 0x4a5   :  { %v8148_v59 = vpop.eup %6137  ;;  %6147 = vpow2.f32 %v2493_v21  ;;  %v2495_v15 = vmul.f32 1.442695, %v2422_v33  ;;  %v2427_v62 = vsub.f32 %v7957_v4, %v2314_v24 }
 0x4a6   :  { %v2316_v63 = vpop.xlane.xlu1 %2315  ;;  %2619 = vadd.xlane.f32.xlu1 %v8148_v59 }
 0x4a7   :  { %v8152_v16 = vpop.eup %6139  ;;  %6149 = vpow2.f32 %v2495_v15  ;;  %v2505_v47 = vmul.f32 1.442695, %v2427_v62  ;;  %v2428_v58 = vsub.f32 %v7967_v11, %v2316_v63 }
 0x4a8   :  { %v2310_v45 = vpop.xlane.xlu0 %2309  ;;  %2613 = vadd.xlane.f32.xlu0 %v8152_v16 }
 0x4a9   :  { %v8156_v8 = vpop.eup %6141  ;;  %6151 = vpow2.f32 %v2505_v47  ;;  %v2507_v32 = vmul.f32 1.442695, %v2428_v58  ;;  %v2425_v44 = vsub.f32 %v7977_v51, %v2310_v45 }
 0x4aa   :  { %v2312_v2 = vpop.xlane.xlu1 %2311  ;;  %2615 = vadd.xlane.f32.xlu1 %v8156_v8 }
 0x4ab   :  { %v8160_v4 = vpop.eup %6143  ;;  %6153 = vpow2.f32 %v2507_v32  ;;  %v2501_v25 = vmul.f32 1.442695, %v2425_v44  ;;  %v2426_v23 = vsub.f32 %v7985_v35, %v2312_v2 }
 0x4ac   :  { %2625 = vadd.xlane.f32.xlu0 %v8160_v4 }
 0x4ad   :  { %v8164_v11 = vpop.eup %6145  ;;  %6155 = vpow2.f32 %v2501_v25  ;;  %v2503_v39 = vmul.f32 1.442695, %v2426_v23 }
 0x4ae   :  { %2627 = vadd.xlane.f32.xlu1 %v8164_v11 }
 0x4af   :  { %v8167_v13 = vpop.eup %6147  ;;  %6157 = vpow2.f32 %v2503_v39 }
 0x4b0   :  { %2621 = vadd.xlane.f32.xlu0 %v8167_v13 }
 0x4b1   :  { %v8170_v51 = vpop.eup %6149 }
 0x4b2   :  { %2623 = vadd.xlane.f32.xlu1 %v8170_v51 }
 0x4b3   :  { %v8173_v1 = vpop.eup %6151 }
 0x4b4   :  { %9873 = vst [vmem:[#allocation38_spill] sm:$0xff] %v8173_v1  ;;  %2633 = vadd.xlane.f32.xlu0 %v8173_v1 }
 0x4b5   :  { %v8176_v35 = vpop.eup %6153 }
 0x4b6   :  { %2635 = vadd.xlane.f32.xlu1 %v8176_v35 }
 0x4b7   :  { %v8179_v28 = vpop.eup %6155 }
 0x4b8   :  { %2629 = vadd.xlane.f32.xlu0 %v8179_v28 }
 0x4b9   :  { %v8182_v21 = vpop.eup %6157 }
 0x4ba   :  { %9874 = vst [vmem:[#allocation39_spill] sm:$0xff] %v8182_v21  ;;  %2631 = vadd.xlane.f32.xlu1 %v8182_v21 }
 0x4cc   :  { %v2322_v33 = vpop.xlane.xlu0 %2321 }
 0x4ce   :  { %v2324_v24 = vpop.xlane.xlu1 %2323 }
 0x4d0   :  { %v2318_v15 = vpop.xlane.xlu0 %2317 }
 0x4d2   :  { %v2320_v62 = vpop.xlane.xlu1 %2319 }
 0x4d4   :  { %v8185_v63 = vpop.xlane.xlu0 %2329 }
 0x4d5   :  { %v5799_v47 = vpop.f32.mrb[96].mxu1 }
 0x4d6   :  { %v8187_v58 = vpop.xlane.xlu1 %2331  ;;  %v8190_v45 = vadd.f32 %v5799_v47, %v7814_v49  ;;  %v2222_v32 = vpop.f32.mrb[97].mxu1 }
 0x4d7   :  { %v5800_v44 = vpop.f32.mrb[98].mxu1  ;;  %v8199_v39 = vadd.f32 %v2222_v32, %v7828_v55 }
 0x4d8   :  { %9875 = vst [vmem:[#allocation40_spill] sm:$0xff] %v8190_v45  ;;  %v8192_v2 = vpop.xlane.xlu0 %2325  ;;  %v8195_v25 = vadd.f32 %v5800_v44, %v7820_v40  ;;  %2385 = vmax.xlane.f32.xlu0 %v8190_v45  ;;  %v2225_v23 = vpop.f32.mrb[99].mxu1 }
 0x4d9   :  { %9877 = vst [vmem:[#allocation42_spill] sm:$0xff] %v8199_v39  ;;  %v8205_v49 = vadd.f32 %v2225_v23, %v7837_v6 }
 0x4da   :  { %9876 = vst [vmem:[#allocation41_spill] sm:$0xff] %v8195_v25  ;;  %v8201_v1 = vpop.xlane.xlu1 %2327  ;;  %2387 = vmax.xlane.f32.xlu1 %v8195_v25 }
 0x4db   :  { %9878 = vst [vmem:[#allocation43_spill] sm:$0xff] %v8205_v49 }
 0x4dc   :  { %v8207_v47 = vpop.xlane.xlu0 %2337  ;;  %2381 = vmax.xlane.f32.xlu0 %v8199_v39 }
 0x4dd   :  { %v5803_v21 = vpop.f32.mrb[100].mxu1 }
 0x4de   :  { %v8210_v40 = vpop.xlane.xlu1 %2339  ;;  %v8213_v44 = vadd.f32 %v5803_v21, %v7849_v42  ;;  %v2238_v45 = vpop.f32.mrb[101].mxu1  ;;  %2383 = vmax.xlane.f32.xlu1 %v8205_v49 }
 0x4df   :  { %v5804_v55 = vpop.f32.mrb[102].mxu1  ;;  %v8223_v23 = vadd.f32 %v2238_v45, %v7872_v46  ;;  %v2432_v45 = vsub.f32 %v7997_v27, %v2324_v24  ;;  %v2430_v27 = vsub.f32 %v8005_v29, %v2320_v62 }
 0x4e0   :  { %9879 = vst [vmem:[#allocation44_spill] sm:$0xff] %v8213_v44  ;;  %v8216_v32 = vpop.xlane.xlu0 %2333  ;;  %v8219_v25 = vadd.f32 %v5804_v55, %v7862_v53  ;;  %v2241_v6 = vpop.f32.mrb[103].mxu1  ;;  %2393 = vmax.xlane.f32.xlu0 %v8213_v44  ;;  %v2431_v53 = vsub.f32 %v7994_v19, %v2322_v33  ;;  %v2429_v19 = vsub.f32 %v8001_v34, %v2318_v15 }
 0x4e1   :  { %9881 = vst [vmem:[#allocation46_spill] sm:$0xff] %v8223_v23  ;;  %v8229_v42 = vadd.f32 %v2241_v6, %v7881_v18  ;;  %v2511_v29 = vmul.f32 1.442695, %v2430_v27 }
 0x4e2   :  { %9880 = vst [vmem:[#allocation45_spill] sm:$0xff] %v8219_v25  ;;  %v8225_v39 = vpop.xlane.xlu1 %2335  ;;  %2395 = vmax.xlane.f32.xlu1 %v8219_v25 }
 0x4e4   :  { %v8231_v21 = vpop.xlane.xlu0 %2345  ;;  %2389 = vmax.xlane.f32.xlu0 %v8223_v23  ;;  %v2513_v23 = vmul.f32 1.442695, %v2431_v53 }
 0x4e5   :  { %v5807_v55 = vpop.f32.mrb[104].mxu1 }
 0x4e6   :  { %v8235_v49 = vpop.xlane.xlu1 %2347  ;;  %v8238_v44 = vadd.f32 %v5807_v55, %v7895_v7  ;;  %v2254_v46 = vpop.f32.mrb[105].mxu1  ;;  %2391 = vmax.xlane.f32.xlu1 %v8229_v42  ;;  %v2515_v55 = vmul.f32 1.442695, %v2432_v45  ;;  %6159 = vpow2.f32 %v2513_v23 }
 0x4e7   :  { %v5808_v25 = vpop.f32.mrb[106].mxu1  ;;  %v8248_v33 = vadd.f32 %v2254_v46, %v7918_v12  ;;  %v2435_v12 = vsub.f32 %v8009_v30, %v8185_v63  ;;  %v2433_v30 = vsub.f32 %v8017_v14, %v8192_v2  ;;  %v2439_v14 = vsub.f32 %v8025_v3, %v8207_v47 }
 0x4e8   :  { %v8243_v18 = vadd.f32 %v5808_v25, %v7908_v41  ;;  %v2257_v6 = vpop.f32.mrb[107].mxu1  ;;  %2401 = vmax.xlane.f32.xlu0 %v8238_v44  ;;  %v8250_v7 = vpop.xlane.xlu0 %2341  ;;  %v2509_v25 = vmul.f32 1.442695, %v2429_v19  ;;  %6161 = vpow2.f32 %v2515_v55  ;;  %v2437_v3 = vsub.f32 %v8033_v48, %v8216_v32 }
 0x4e9   :  { %v8255_v24 = vadd.f32 %v2257_v6, %v7927_v57  ;;  %v2436_v57 = vsub.f32 %v8013_v37, %v8187_v58  ;;  %v2517_v19 = vmul.f32 1.442695, %v2433_v30  ;;  %v2529_v27 = vmul.f32 1.442695, %v2439_v14  ;;  %v9883_v30 = vld [vmem:[#allocation13_spill] sm:$0xff] }
 0x4ea   :  { %2403 = vmax.xlane.f32.xlu1 %v8243_v18  ;;  %v8257_v41 = vpop.xlane.xlu1 %2343  ;;  %6163 = vpow2.f32 %v2509_v25 }
 0x4eb   :  { %6165 = vpow2.f32 %v2511_v29  ;;  %v2523_v37 = vmul.f32 1.442695, %v2436_v57 }
 0x4ec   :  { %2397 = vmax.xlane.f32.xlu0 %v8248_v33  ;;  %v8268_v46 = vpop.xlane.xlu0 %2353 }
 0x4ed   :  { %v5811_v34 = vpop.f32.mrb[108].mxu1 }
 0x4ee   :  { %v8263_v15 = vadd.f32 %v5811_v34, %v7941_v61  ;;  %v2270_v53 = vpop.f32.mrb[109].mxu1  ;;  %2399 = vmax.xlane.f32.xlu1 %v8255_v24  ;;  %v2521_v61 = vmul.f32 1.442695, %v2435_v12  ;;  %v8276_v63 = vpop.xlane.xlu1 %2355  ;;  %v2525_v34 = vmul.f32 1.442695, %v2437_v3 }
 0x4ef   :  { %v5812_v62 = vpop.f32.mrb[110].mxu1  ;;  %v8279_v6 = vadd.f32 %v2270_v53, %v7964_v43  ;;  %v2443_v53 = vsub.f32 %v8041_v10, %v8231_v21 }
 0x4f0   :  { %v8271_v23 = vadd.f32 %v5812_v62, %v7954_v31  ;;  %v2273_v45 = vpop.f32.mrb[111].mxu1  ;;  %2409 = vmax.xlane.f32.xlu0 %v8263_v15  ;;  %v2434_v31 = vsub.f32 %v8021_v60, %v8201_v1  ;;  %6167 = vpow2.f32 %v2521_v61  ;;  %v8290_v2 = vpop.xlane.xlu0 %2349  ;;  %v2440_v60 = vsub.f32 %v8029_v22, %v8210_v40  ;;  %v9882_v62 = vld [vmem:[#allocation10_spill] sm:$0xff] }
 0x4f1   :  { %v8285_v58 = vadd.f32 %v2273_v45, %v7973_v36  ;;  %v8293_v43 = vpop.eup %6159  ;;  %6169 = vpow2.f32 %v2523_v37  ;;  %v2438_v22 = vsub.f32 %v8037_v20, %v8225_v39  ;;  %v2444_v20 = vsub.f32 %v8045_v50, %v8235_v49 }
 0x4f2   :  { %2411 = vmax.xlane.f32.xlu1 %v8271_v23  ;;  %v2519_v55 = vmul.f32 1.442695, %v2434_v31  ;;  %v8297_v36 = vpop.xlane.xlu1 %2351  ;;  %v8300_v1 = vpop.eup %6161  ;;  %6171 = vpow2.f32 %v2517_v19  ;;  %v2531_v25 = vmul.f32 1.442695, %v2440_v60  ;;  %v2537_v57 = vmul.f32 1.442695, %v2443_v53 }
 0x4f3   :  { %v2527_v29 = vmul.f32 1.442695, %v2438_v22  ;;  %v2441_v45 = vsub.f32 %v9882_v62, %v8250_v7  ;;  %v2539_v61 = vmul.f32 1.442695, %v2444_v20  ;;  %v2442_v37 = vsub.f32 %v9883_v30, %v8257_v41  ;;  %v9884_v19 = vld [vmem:[#allocation12_spill] sm:$0xff]  ;;  %v9885_v60 = vld [vmem:[#allocation15_spill] sm:$0xff] }
 0x4f4   :  { %2405 = vmax.xlane.f32.xlu0 %v8279_v6  ;;  %v8305_v47 = vpop.eup %6163  ;;  %6173 = vpow2.f32 %v2519_v55  ;;  %v2362_v40 = vpop.xlane.xlu0 %2361  ;;  %v2447_v7 = vsub.f32 %v9884_v19, %v8268_v46  ;;  %v2445_v22 = vsub.f32 %v8065_v52, %v8290_v2  ;;  %v9886_v30 = vld [vmem:[#allocation14_spill] sm:$0xff] }
 0x4f5   :  { %v8310_v12 = vpop.eup %6165  ;;  %6175 = vpow2.f32 %v2529_v27  ;;  %v2533_v31 = vmul.f32 1.442695, %v2441_v45  ;;  %v2535_v55 = vmul.f32 1.442695, %v2442_v37  ;;  %v2448_v27 = vsub.f32 %v9885_v60, %v8276_v63 }
 0x4f6   :  { %2407 = vmax.xlane.f32.xlu1 %v8285_v58  ;;  %v2364_v48 = vpop.xlane.xlu1 %2363  ;;  %6177 = vpow2.f32 %v2531_v25  ;;  %v2545_v25 = vmul.f32 1.442695, %v2447_v7  ;;  %v2446_v63 = vsub.f32 %v8069_v0, %v8297_v36  ;;  %v2541_v20 = vmul.f32 1.442695, %v2445_v22  ;;  %v9889_v22 = vld [vmem:[#allocation21_spill] sm:$0xff] }
 0x4f7   :  { %6179 = vpow2.f32 %v2525_v34  ;;  %v2547_v53 = vmul.f32 1.442695, %v2448_v27  ;;  %v2452_v45 = vsub.f32 %v8077_v26, %v2364_v48 }
 0x4f8   :  { %2641 = vadd.xlane.f32.xlu0 %v8293_v43  ;;  %v2358_v10 = vpop.xlane.xlu0 %2357  ;;  %6181 = vpow2.f32 %v2527_v29  ;;  %v2543_v2 = vmul.f32 1.442695, %v2446_v63 }
 0x4f9   :  { %6183 = vpow2.f32 %v2537_v57  ;;  %v2451_v57 = vsub.f32 %v8073_v9, %v2362_v40  ;;  %v2449_v37 = vsub.f32 %v9886_v30, %v2358_v10  ;;  %v2555_v40 = vmul.f32 1.442695, %v2452_v45 }
 0x4fa   :  { %2643 = vadd.xlane.f32.xlu1 %v8300_v1  ;;  %v8315_v32 = vpop.eup %6167  ;;  %v2360_v50 = vpop.xlane.xlu1 %2359  ;;  %6185 = vpow2.f32 %v2539_v61 }
 0x4fb   :  { %v8320_v39 = vpop.eup %6169  ;;  %6187 = vpow2.f32 %v2533_v31  ;;  %v2553_v36 = vmul.f32 1.442695, %v2451_v57  ;;  %v9887_v31 = vld [vmem:[#allocation19_spill] sm:$0xff]  ;;  %v2549_v48 = vmul.f32 1.442695, %v2449_v37 }
 0x4fc   :  { %2637 = vadd.xlane.f32.xlu0 %v8305_v47  ;;  %v8325_v21 = vpop.eup %6171  ;;  %v2370_v41 = vpop.xlane.xlu0 %2369  ;;  %6189 = vpow2.f32 %v2535_v55  ;;  %v2450_v19 = vsub.f32 %v9887_v31, %v2360_v50  ;;  %v9888_v55 = vld [vmem:[#allocation18_spill] sm:$0xff] }
 0x4fd   :  { %6191 = vpow2.f32 %v2545_v25  ;;  %v2455_v60 = vsub.f32 %v9888_v55, %v2370_v41  ;;  %v9892_v31 = vld [vmem:[#allocation26_spill] sm:$0xff]  ;;  %v9894_v55 = vld [vmem:[#allocation37_spill] sm:$0xff] }
 0x4fe   :  { %2639 = vadd.xlane.f32.xlu1 %v8310_v12  ;;  %v8330_v49 = vpop.eup %6173  ;;  %v2372_v46 = vpop.xlane.xlu1 %2371  ;;  %6193 = vpow2.f32 %v2547_v53  ;;  %v2551_v25 = vmul.f32 1.442695, %v2450_v19 }
 0x4ff   :  { %v8335_v14 = vpop.eup %6175  ;;  %6195 = vpow2.f32 %v2541_v20  ;;  %v2456_v50 = vsub.f32 %v9889_v22, %v2372_v46  ;;  %v2561_v63 = vmul.f32 1.442695, %v2455_v60  ;;  %v9890_v20 = vld [vmem:[#allocation20_spill] sm:$0xff] }
 0x500   :  { %2649 = vadd.xlane.f32.xlu0 %v8315_v32  ;;  %v8340_v3 = vpop.eup %6177  ;;  %v2366_v62 = vpop.xlane.xlu0 %2365  ;;  %6197 = vpow2.f32 %v2543_v2 }
 0x501   :  { %v8345_v34 = vpop.eup %6179  ;;  %6199 = vpow2.f32 %v2553_v36  ;;  %v2453_v57 = vsub.f32 %v9890_v20, %v2366_v62  ;;  %v2563_v45 = vmul.f32 1.442695, %v2456_v50  ;;  %v9891_v36 = vld [vmem:[#allocation23_spill] sm:$0xff] }
 0x502   :  { %2651 = vadd.xlane.f32.xlu1 %v8320_v39  ;;  %v8350_v29 = vpop.eup %6181  ;;  %v2368_v61 = vpop.xlane.xlu1 %2367  ;;  %6201 = vpow2.f32 %v2555_v40 }
 0x503   :  { %v8354_v52 = vpop.eup %6183  ;;  %6203 = vpow2.f32 %v2549_v48  ;;  %v2454_v30 = vsub.f32 %v9891_v36, %v2368_v61  ;;  %v2557_v40 = vmul.f32 1.442695, %v2453_v57 }
 0x504   :  { %2645 = vadd.xlane.f32.xlu0 %v8325_v21  ;;  %v8358_v0 = vpop.eup %6185  ;;  %v8365_v7 = vpop.xlane.xlu0 %2377  ;;  %6205 = vpow2.f32 %v2551_v25 }
 0x505   :  { %v8362_v9 = vpop.eup %6187  ;;  %6207 = vpow2.f32 %v2561_v63  ;;  %v2559_v48 = vmul.f32 1.442695, %v2454_v30 }
 0x506   :  { %2647 = vadd.xlane.f32.xlu1 %v8330_v49  ;;  %v8368_v26 = vpop.eup %6189  ;;  %v8371_v27 = vpop.xlane.xlu1 %2379  ;;  %6209 = vpow2.f32 %v2563_v45 }
 0x507   :  { %v8374_v10 = vpop.eup %6191  ;;  %6211 = vpow2.f32 %v2557_v40 }
 0x508   :  { %2657 = vadd.xlane.f32.xlu0 %v8335_v14  ;;  %v8378_v53 = vpop.eup %6193  ;;  %v2374_v2 = vpop.xlane.xlu0 %2373  ;;  %6213 = vpow2.f32 %v2559_v48 }
 0x509   :  { %v8382_v41 = vpop.eup %6195  ;;  %v2457_v19 = vsub.f32 %v9892_v31, %v2374_v2 }
 0x50a   :  { %2659 = vadd.xlane.f32.xlu1 %v8340_v3  ;;  %v2376_v37 = vpop.xlane.xlu1 %2375  ;;  %v8386_v46 = vpop.eup %6197 }
 0x50b   :  { %v8390_v62 = vpop.eup %6199  ;;  %v2458_v60 = vsub.f32 %v9894_v55, %v2376_v37  ;;  %v2565_v25 = vmul.f32 1.442695, %v2457_v19 }
 0x50c   :  { %2653 = vadd.xlane.f32.xlu0 %v8345_v34  ;;  %9893 = vst [vmem:[#allocation10_spill] sm:$0xff] %v8390_v62  ;;  %v8394_v61 = vpop.eup %6201 }
 0x50d   :  { %v8397_v22 = vpop.eup %6203  ;;  %v2567_v50 = vmul.f32 1.442695, %v2458_v60  ;;  %6215 = vpow2.f32 %v2565_v25 }
 0x50e   :  { %2655 = vadd.xlane.f32.xlu1 %v8350_v29  ;;  %v8400_v63 = vpop.eup %6205 }
 0x50f   :  { %v8403_v20 = vpop.eup %6207  ;;  %6217 = vpow2.f32 %v2567_v50 }
 0x510   :  { %2665 = vadd.xlane.f32.xlu0 %v8354_v52  ;;  %9895 = vst [vmem:[#allocation13_spill] sm:$0xff] %v8403_v20  ;;  %v8406_v57 = vpop.eup %6209 }
 0x511   :  { %9896 = vst [vmem:[#allocation12_spill] sm:$0xff] %v8406_v57  ;;  %v8409_v45 = vpop.eup %6211 }
 0x512   :  { %2667 = vadd.xlane.f32.xlu1 %v8358_v0  ;;  %9897 = vst [vmem:[#allocation15_spill] sm:$0xff] %v8409_v45  ;;  %v8412_v30 = vpop.eup %6213 }
 0x513   :  { %9898 = vst [vmem:[#allocation14_spill] sm:$0xff] %v8412_v30 }
 0x514   :  { %2661 = vadd.xlane.f32.xlu0 %v8362_v9 }
 0x516   :  { %2663 = vadd.xlane.f32.xlu1 %v8368_v26 }
 0x517   :  { %v8415_v40 = vpop.eup %6215 }
 0x518   :  { %2673 = vadd.xlane.f32.xlu0 %v8374_v10  ;;  %9899 = vst [vmem:[#allocation19_spill] sm:$0xff] %v8415_v40 }
 0x519   :  { %v8418_v19 = vpop.eup %6217 }
 0x51a   :  { %2675 = vadd.xlane.f32.xlu1 %v8378_v53  ;;  %9900 = vst [vmem:[#allocation18_spill] sm:$0xff] %v8418_v19 }
 0x51c   :  { %2669 = vadd.xlane.f32.xlu0 %v8382_v41 }
 0x51e   :  { %2671 = vadd.xlane.f32.xlu1 %v8386_v46 }
 0x520   :  { %2681 = vadd.xlane.f32.xlu0 %v8390_v62 }
 0x522   :  { %2683 = vadd.xlane.f32.xlu1 %v8394_v61 }
 0x524   :  { %2677 = vadd.xlane.f32.xlu0 %v8397_v22 }
 0x526   :  { %2679 = vadd.xlane.f32.xlu1 %v8400_v63 }
 0x528   :  { %2689 = vadd.xlane.f32.xlu0 %v8403_v20 }
 0x529   :  { %v2610_v2 = vpop.xlane.xlu0 %2609 }
 0x52a   :  { %2691 = vadd.xlane.f32.xlu1 %v8406_v57 }
 0x52b   :  { %v2612_v36 = vpop.xlane.xlu1 %2611 }
 0x52c   :  { %2685 = vadd.xlane.f32.xlu0 %v8409_v45  ;;  %6219 = vrcp.f32 %v2612_v36 }
 0x52d   :  { %v2606_v37 = vpop.xlane.xlu0 %2605 }
 0x52e   :  { %6221 = vrcp.f32 %v2606_v37  ;;  %2687 = vadd.xlane.f32.xlu1 %v8412_v30 }
 0x52f   :  { %6223 = vrcp.f32 %v2610_v2  ;;  %v2608_v31 = vpop.xlane.xlu1 %2607 }
 0x530   :  { %6225 = vrcp.f32 %v2608_v31  ;;  %2693 = vadd.xlane.f32.xlu0 %v8415_v40 }
 0x531   :  { %v2618_v48 = vpop.xlane.xlu0 %2617 }
 0x532   :  { %2695 = vadd.xlane.f32.xlu1 %v8418_v19 }
 0x533   :  { %v2620_v55 = vpop.xlane.xlu1 %2619 }
 0x534   :  { %6227 = vrcp.f32 %v2620_v55 }
 0x535   :  { %v2614_v60 = vpop.xlane.xlu0 %2613 }
 0x536   :  { %6229 = vrcp.f32 %v2614_v60  ;;  %v6220_v25 = vpop.eup %6219 }
 0x537   :  { %6231 = vrcp.f32 %v2618_v48  ;;  %v2616_v50 = vpop.xlane.xlu1 %2615  ;;  %v2800_v31 = vmul.f32 %v6220_v25, %v8132_v17  ;;  %v9901_v25 = vld [vmem:[#allocation29_spill] sm:$0xff] }
 0x538   :  { %v6222_v36 = vpop.eup %6221  ;;  %6233 = vrcp.f32 %v2616_v50 }
 0x539   :  { %v6224_v37 = vpop.eup %6223  ;;  %v2626_v2 = vpop.xlane.xlu0 %2625  ;;  %v2797_v30 = vmul.f32 %v6222_v36, %v8136_v54 }
 0x53a   :  { %v6226_v20 = vpop.eup %6225  ;;  %v2799_v19 = vmul.f32 %v6224_v37, %v8128_v56 }
 0x53b   :  { %v2628_v40 = vpop.xlane.xlu1 %2627  ;;  %v2798_v45 = vmul.f32 %v6226_v20, %v8140_v38  ;;  %v9902_v38 = vld [vmem:[#allocation28_spill] sm:$0xff] }
 0x53c   :  { %6235 = vrcp.f32 %v2628_v40  ;;  %v2862_v48 = vpack.c.bf16 %v2800_v31, %v2799_v19 }
 0x53d   :  { %v2622_v55 = vpop.xlane.xlu0 %2621  ;;  %v2861_v60 = vpack.c.bf16 %v2798_v45, %v2797_v30 }
 0x53e   :  { %6237 = vrcp.f32 %v2622_v55  ;;  %v6228_v57 = vpop.eup %6227 }
 0x53f   :  { %6239 = vrcp.f32 %v2626_v2  ;;  %v2624_v50 = vpop.xlane.xlu1 %2623  ;;  %5829 = vmatprep.mubr.bf16.mxu0 %v2861_v60  ;;  %v2804_v56 = vmul.f32 %v6228_v57, %v8148_v59  ;;  %v9903_v2 = vld [vmem:[#allocation34_spill] sm:$0xff] }
 0x540   :  { %v6230_v62 = vpop.eup %6229  ;;  %6241 = vrcp.f32 %v2624_v50  ;;  %5830 = vmatmul.mubr.bf16.vlgmr.msra.gmra.mrb[144].mxu0 %v2862_v48 }
 0x541   :  { %v6232_v17 = vpop.eup %6231  ;;  %5878 = vmatpush3.bf16.msra.mxu0 %v9901_v25  ;;  %v2634_v54 = vpop.xlane.xlu0 %2633  ;;  %v2801_v45 = vmul.f32 %v6230_v62, %v8152_v16  ;;  %v9905_v25 = vld [vmem:[#allocation16_spill] sm:$0xff] }
 0x542   :  { %v6234_v36 = vpop.eup %6233  ;;  %5879 = vmatprep.subr.bf16.mxu0 %v9902_v38  ;;  %v2803_v40 = vmul.f32 %v6232_v17, %v8144_v5 }
 0x543   :  { %v2636_v20 = vpop.xlane.xlu1 %2635  ;;  %v2802_v30 = vmul.f32 %v6234_v36, %v8156_v8  ;;  %v9904_v8 = vld [vmem:[#allocation33_spill] sm:$0xff] }
 0x544   :  { %6243 = vrcp.f32 %v2636_v20  ;;  %v2864_v31 = vpack.c.bf16 %v2804_v56, %v2803_v40  ;;  %v9906_v20 = vld [vmem:[#allocation17_spill] sm:$0xff] }
 0x545   :  { %5880 = vmatpush3.bf16.msra.mxu0 %v9902_v38  ;;  %v2630_v19 = vpop.xlane.xlu0 %2629  ;;  %v2863_v37 = vpack.c.bf16 %v2802_v30, %v2801_v45  ;;  %v9908_v30 = vld [vmem:[#allocation38_spill] sm:$0xff] }
 0x546   :  { %5881 = vmatprep.subr.bf16.mxu0 %v9903_v2  ;;  %6245 = vrcp.f32 %v2630_v19  ;;  %v6236_v55 = vpop.eup %6235 }
 0x547   :  { %6247 = vrcp.f32 %v2634_v54  ;;  %v2632_v60 = vpop.xlane.xlu1 %2631  ;;  %5833 = vmatprep.mubr.bf16.mxu0 %v2863_v37  ;;  %v2808_v62 = vmul.f32 %v6236_v55, %v8164_v11  ;;  %v9909_v37 = vld [vmem:[#allocation36_spill] sm:$0xff] }
 0x548   :  { %v6238_v59 = vpop.eup %6237  ;;  %6249 = vrcp.f32 %v2632_v60  ;;  %5834 = vmatmul.mubr.bf16.gmra.mrb[148].mxu0 %v2864_v31  ;;  %v9910_v31 = vld [vmem:[#allocation35_spill] sm:$0xff] }
 0x549   :  { %v6240_v16 = vpop.eup %6239  ;;  %5882 = vmatpush3.bf16.msra.mxu0 %v9903_v2  ;;  %v2805_v57 = vmul.f32 %v6238_v59, %v8167_v13 }
 0x54a   :  { %v6242_v5 = vpop.eup %6241  ;;  %5883 = vmatprep.subr.bf16.mxu0 %v9904_v8  ;;  %v2807_v50 = vmul.f32 %v6240_v16, %v8160_v4  ;;  %v9912_v16 = vld [vmem:[#allocation41_spill] sm:$0xff] }
 0x54b   :  { %v2806_v48 = vmul.f32 %v6242_v5, %v8170_v51  ;;  %v9907_v51 = vld [vmem:[#allocation39_spill] sm:$0xff] }
 0x54c   :  { %v2866_v54 = vpack.c.bf16 %v2808_v62, %v2807_v50 }
 0x54d   :  { %5884 = vmatpush3.bf16.msra.mxu0 %v9904_v8  ;;  %v2865_v17 = vpack.c.bf16 %v2806_v48, %v2805_v57  ;;  %v9913_v57 = vld [vmem:[#allocation42_spill] sm:$0xff] }
 0x54e   :  { %5885 = vmatprep.subr.bf16.mxu0 %v9905_v25  ;;  %v6244_v36 = vpop.eup %6243 }
 0x54f   :  { %5837 = vmatprep.mubr.bf16.mxu0 %v2865_v17  ;;  %v2812_v13 = vmul.f32 %v6244_v36, %v8176_v35 }
 0x550   :  { %v6246_v38 = vpop.eup %6245  ;;  %5838 = vmatmul.mubr.bf16.gmra.mrb[152].mxu0 %v2866_v54 }
 0x551   :  { %v6248_v56 = vpop.eup %6247  ;;  %5886 = vmatpush3.bf16.msra.mxu0 %v9905_v25  ;;  %v2809_v4 = vmul.f32 %v6246_v38, %v8179_v28  ;;  %v9911_v28 = vld [vmem:[#allocation40_spill] sm:$0xff]  ;;  %v9914_v25 = vld [vmem:[#allocation43_spill] sm:$0xff] }
 0x552   :  { %v6250_v11 = vpop.eup %6249  ;;  %5887 = vmatprep.subr.bf16.mxu0 %v9906_v20  ;;  %v2811_v40 = vmul.f32 %v6248_v56, %v9908_v30  ;;  %v9915_v56 = vld [vmem:[#allocation44_spill] sm:$0xff] }
 0x553   :  { %v2810_v45 = vmul.f32 %v6250_v11, %v9907_v51 }
 0x554   :  { %v2868_v2 = vpack.c.bf16 %v2812_v13, %v2811_v40  ;;  %v9917_v40 = vld [vmem:[#allocation46_spill] sm:$0xff] }
 0x555   :  { %5888 = vmatpush3.bf16.msra.mxu0 %v9906_v20  ;;  %v2867_v19 = vpack.c.bf16 %v2810_v45, %v2809_v4  ;;  %v9916_v4 = vld [vmem:[#allocation45_spill] sm:$0xff] }
 0x556   :  { %5889 = vmatprep.subr.bf16.mxu0 %v9909_v37 }
 0x557   :  { %5841 = vmatprep.mubr.bf16.mxu0 %v2867_v19 }
 0x558   :  { %5842 = vmatmul.mubr.bf16.gmra.mrb[156].mxu0 %v2868_v2 }
 0x559   :  { %5890 = vmatpush3.bf16.msra.mxu0 %v9909_v37 }
 0x55a   :  { %5891 = vmatprep.subr.bf16.mxu0 %v9910_v31 }
 0x55d   :  { %5892 = vmatpush3.bf16.msra.mxu0 %v9910_v31 }
 0x565   :  { %v2386_v35 = vpop.xlane.xlu0 %2385 }
 0x566   :  { %v2463_v55 = vsub.f32 %v9911_v28, %v2386_v35 }
 0x567   :  { %v2388_v60 = vpop.xlane.xlu1 %2387 }
 0x568   :  { %v2577_v59 = vmul.f32 1.442695, %v2463_v55  ;;  %v2464_v5 = vsub.f32 %v9912_v16, %v2388_v60 }
 0x569   :  { %v2382_v8 = vpop.xlane.xlu0 %2381 }
 0x56a   :  { %6251 = vpow2.f32 %v2577_v59  ;;  %v2579_v62 = vmul.f32 1.442695, %v2464_v5  ;;  %v2461_v48 = vsub.f32 %v9913_v57, %v2382_v8 }
 0x56b   :  { %v2384_v50 = vpop.xlane.xlu1 %2383 }
 0x56c   :  { %6253 = vpow2.f32 %v2579_v62  ;;  %v2573_v17 = vmul.f32 1.442695, %v2461_v48  ;;  %v2462_v54 = vsub.f32 %v9914_v25, %v2384_v50 }
 0x56d   :  { %v2394_v36 = vpop.xlane.xlu0 %2393 }
 0x56e   :  { %6255 = vpow2.f32 %v2573_v17  ;;  %v2575_v38 = vmul.f32 1.442695, %v2462_v54  ;;  %v2467_v11 = vsub.f32 %v9915_v56, %v2394_v36 }
 0x56f   :  { %v2396_v20 = vpop.xlane.xlu1 %2395 }
 0x570   :  { %6257 = vpow2.f32 %v2575_v38  ;;  %v2585_v13 = vmul.f32 1.442695, %v2467_v11  ;;  %v2468_v51 = vsub.f32 %v9916_v4, %v2396_v20  ;;  %v9919_v20 = vld [vmem:[#allocation27_spill] sm:$0xff] }
 0x571   :  { %v2390_v45 = vpop.xlane.xlu0 %2389 }
 0x572   :  { %6259 = vpow2.f32 %v2585_v13  ;;  %v2587_v30 = vmul.f32 1.442695, %v2468_v51  ;;  %v2465_v19 = vsub.f32 %v9917_v40, %v2390_v45  ;;  %v2460_v13 = vsub.f32 %v9919_v20, %v8371_v27 }
 0x573   :  { %v2392_v37 = vpop.xlane.xlu1 %2391 }
 0x574   :  { %v8459_v2 = vpop.eup %6251  ;;  %6261 = vpow2.f32 %v2587_v30  ;;  %v2581_v31 = vmul.f32 1.442695, %v2465_v19  ;;  %v2466_v35 = vsub.f32 %v8229_v42, %v2392_v37  ;;  %v2571_v27 = vmul.f32 1.442695, %v2460_v13 }
 0x575   :  { %2705 = vadd.xlane.f32.xlu0 %v8459_v2  ;;  %v2402_v28 = vpop.xlane.xlu0 %2401 }
 0x576   :  { %v8463_v55 = vpop.eup %6253  ;;  %6263 = vpow2.f32 %v2581_v31  ;;  %v2583_v60 = vmul.f32 1.442695, %v2466_v35  ;;  %v2471_v59 = vsub.f32 %v8238_v44, %v2402_v28 }
 0x577   :  { %2707 = vadd.xlane.f32.xlu1 %v8463_v55  ;;  %v2404_v16 = vpop.xlane.xlu1 %2403 }
 0x578   :  { %v8467_v5 = vpop.eup %6255  ;;  %6265 = vpow2.f32 %v2583_v60  ;;  %v2593_v8 = vmul.f32 1.442695, %v2471_v59  ;;  %v2472_v62 = vsub.f32 %v8243_v18, %v2404_v16  ;;  %v9918_v18 = vld [vmem:[#allocation22_spill] sm:$0xff] }
 0x579   :  { %2701 = vadd.xlane.f32.xlu0 %v8467_v5  ;;  %v2398_v42 = vpop.xlane.xlu0 %2397  ;;  %v2459_v36 = vsub.f32 %v9918_v18, %v8365_v7 }
 0x57a   :  { %v8471_v57 = vpop.eup %6257  ;;  %6267 = vpow2.f32 %v2593_v8  ;;  %v2595_v48 = vmul.f32 1.442695, %v2472_v62  ;;  %v2469_v50 = vsub.f32 %v8248_v33, %v2398_v42 }
 0x57b   :  { %2703 = vadd.xlane.f32.xlu1 %v8471_v57  ;;  %v2400_v44 = vpop.xlane.xlu1 %2399  ;;  %v2569_v45 = vmul.f32 1.442695, %v2459_v36 }
 0x57c   :  { %v8475_v17 = vpop.eup %6259  ;;  %6269 = vpow2.f32 %v2595_v48  ;;  %v2589_v25 = vmul.f32 1.442695, %v2469_v50  ;;  %v2470_v54 = vsub.f32 %v8255_v24, %v2400_v44 }
 0x57d   :  { %2713 = vadd.xlane.f32.xlu0 %v8475_v17  ;;  %v2410_v38 = vpop.xlane.xlu0 %2409 }
 0x57e   :  { %v8481_v56 = vpop.eup %6261  ;;  %6271 = vpow2.f32 %v2589_v25  ;;  %v2591_v11 = vmul.f32 1.442695, %v2470_v54  ;;  %v2475_v33 = vsub.f32 %v8263_v15, %v2410_v38 }
 0x57f   :  { %2715 = vadd.xlane.f32.xlu1 %v8481_v56  ;;  %v2412_v4 = vpop.xlane.xlu1 %2411 }
 0x580   :  { %v8487_v51 = vpop.eup %6263  ;;  %6273 = vpow2.f32 %v2591_v11  ;;  %v2601_v24 = vmul.f32 1.442695, %v2475_v33  ;;  %v2476_v7 = vsub.f32 %v8271_v23, %v2412_v4 }
 0x581   :  { %2709 = vadd.xlane.f32.xlu0 %v8487_v51  ;;  %v2406_v30 = vpop.xlane.xlu0 %2405 }
 0x582   :  { %v8491_v40 = vpop.eup %6265  ;;  %6275 = vpow2.f32 %v2601_v24  ;;  %v2603_v15 = vmul.f32 1.442695, %v2476_v7  ;;  %v2473_v19 = vsub.f32 %v8279_v6, %v2406_v30 }
 0x583   :  { %2711 = vadd.xlane.f32.xlu1 %v8491_v40  ;;  %v2408_v37 = vpop.xlane.xlu1 %2407 }
 0x584   :  { %v8495_v31 = vpop.eup %6267  ;;  %6277 = vpow2.f32 %v2603_v15  ;;  %v2597_v35 = vmul.f32 1.442695, %v2473_v19  ;;  %v2474_v23 = vsub.f32 %v8285_v58, %v2408_v37 }
 0x585   :  { %6279 = vpow2.f32 %v2569_v45  ;;  %2721 = vadd.xlane.f32.xlu0 %v8495_v31  ;;  %v2642_v28 = vpop.xlane.xlu0 %2641 }
 0x586   :  { %v8499_v60 = vpop.eup %6269  ;;  %6281 = vpow2.f32 %v2597_v35  ;;  %v2599_v59 = vmul.f32 1.442695, %v2474_v23 }
 0x587   :  { %6283 = vpow2.f32 %v2571_v27  ;;  %2723 = vadd.xlane.f32.xlu1 %v8499_v60  ;;  %v2644_v6 = vpop.xlane.xlu1 %2643 }
 0x588   :  { %v8502_v16 = vpop.eup %6271  ;;  %6285 = vpow2.f32 %v2599_v59 }
 0x589   :  { %6287 = vrcp.f32 %v2644_v6  ;;  %2717 = vadd.xlane.f32.xlu0 %v8502_v16  ;;  %v2638_v8 = vpop.xlane.xlu0 %2637  ;;  %v9920_v6 = vld [vmem:[#allocation31_spill] sm:$0xff] }
 0x58a   :  { %v8505_v58 = vpop.eup %6273  ;;  %6289 = vrcp.f32 %v2638_v8 }
 0x58b   :  { %6291 = vrcp.f32 %v2642_v28  ;;  %2719 = vadd.xlane.f32.xlu1 %v8505_v58  ;;  %v2640_v62 = vpop.xlane.xlu1 %2639 }
 0x58c   :  { %v8508_v42 = vpop.eup %6275  ;;  %6293 = vrcp.f32 %v2640_v62 }
 0x58d   :  { %2729 = vadd.xlane.f32.xlu0 %v8508_v42  ;;  %v2650_v48 = vpop.xlane.xlu0 %2649 }
 0x58e   :  { %v8511_v50 = vpop.eup %6277 }
 0x58f   :  { %v8513_v44 = vpop.eup %6279  ;;  %2731 = vadd.xlane.f32.xlu1 %v8511_v50  ;;  %v2652_v25 = vpop.xlane.xlu1 %2651 }
 0x590   :  { %v8516_v54 = vpop.eup %6281  ;;  %6295 = vrcp.f32 %v2652_v25 }
 0x591   :  { %v8518_v18 = vpop.eup %6283  ;;  %2725 = vadd.xlane.f32.xlu0 %v8516_v54  ;;  %v2646_v36 = vpop.xlane.xlu0 %2645 }
 0x592   :  { %v8521_v38 = vpop.eup %6285  ;;  %6297 = vrcp.f32 %v2646_v36 }
 0x593   :  { %v6288_v11 = vpop.eup %6287  ;;  %6299 = vrcp.f32 %v2650_v48  ;;  %2727 = vadd.xlane.f32.xlu1 %v8521_v38  ;;  %v2648_v33 = vpop.xlane.xlu1 %2647 }
 0x594   :  { %v6290_v20 = vpop.eup %6289  ;;  %6301 = vrcp.f32 %v2648_v33  ;;  %v2816_v7 = vmul.f32 %v6288_v11, %v8300_v1 }
 0x595   :  { %v6292_v13 = vpop.eup %6291  ;;  %2697 = vadd.xlane.f32.xlu0 %v8513_v44  ;;  %v2658_v4 = vpop.xlane.xlu0 %2657  ;;  %v2813_v30 = vmul.f32 %v6290_v20, %v8305_v47  ;;  %v9922_v20 = vld [vmem:[#allocation8_spill] sm:$0xff] }
 0x596   :  { %v6294_v24 = vpop.eup %6293  ;;  %v2815_v19 = vmul.f32 %v6292_v13, %v8293_v43 }
 0x597   :  { %2699 = vadd.xlane.f32.xlu1 %v8518_v18  ;;  %v2660_v45 = vpop.xlane.xlu1 %2659  ;;  %v2814_v15 = vmul.f32 %v6294_v24, %v8310_v12  ;;  %v9921_v12 = vld [vmem:[#allocation9_spill] sm:$0xff] }
 0x598   :  { %6303 = vrcp.f32 %v2660_v45  ;;  %v2870_v35 = vpack.c.bf16 %v2816_v7, %v2815_v19  ;;  %v9923_v7 = vld [vmem:[#allocation30_spill] sm:$0xff] }
 0x599   :  { %v2654_v27 = vpop.xlane.xlu0 %2653  ;;  %v2869_v37 = vpack.c.bf16 %v2814_v15, %v2813_v30 }
 0x59a   :  { %6305 = vrcp.f32 %v2654_v27  ;;  %v6296_v23 = vpop.eup %6295 }
 0x59b   :  { %6307 = vrcp.f32 %v2658_v4  ;;  %v2656_v28 = vpop.xlane.xlu1 %2655  ;;  %5861 = vmatprep.mubr.bf16.mxu1 %v2869_v37  ;;  %v2820_v43 = vmul.f32 %v6296_v23, %v8320_v39  ;;  %v9924_v23 = vld [vmem:[#allocation24_spill] sm:$0xff] }
 0x59c   :  { %v6298_v59 = vpop.eup %6297  ;;  %6309 = vrcp.f32 %v2656_v28  ;;  %5862 = vmatmul.mubr.bf16.vlgmr.msra.gmra.mrb[112].mxu1 %v2870_v35 }
 0x59d   :  { %v6300_v1 = vpop.eup %6299  ;;  %5910 = vmatpush3.bf16.msra.mxu1 %v9920_v6  ;;  %v2666_v47 = vpop.xlane.xlu0 %2665  ;;  %v2817_v48 = vmul.f32 %v6298_v59, %v8325_v21  ;;  %v9925_v6 = vld [vmem:[#allocation25_spill] sm:$0xff] }
 0x59e   :  { %v6302_v8 = vpop.eup %6301  ;;  %5911 = vmatprep.subr.bf16.mxu1 %v9921_v12  ;;  %v2819_v36 = vmul.f32 %v6300_v1, %v8315_v32 }
 0x59f   :  { %v2668_v62 = vpop.xlane.xlu1 %2667  ;;  %v2818_v25 = vmul.f32 %v6302_v8, %v8330_v49 }
 0x5a0   :  { %6311 = vrcp.f32 %v2668_v62  ;;  %v2872_v13 = vpack.c.bf16 %v2820_v43, %v2819_v36  ;;  %v9926_v36 = vld [vmem:[#allocation32_spill] sm:$0xff] }
 0x5a1   :  { %5912 = vmatpush3.bf16.msra.mxu1 %v9921_v12  ;;  %v2662_v11 = vpop.xlane.xlu0 %2661  ;;  %v2871_v33 = vpack.c.bf16 %v2818_v25, %v2817_v48 }
 0x5a2   :  { %5913 = vmatprep.subr.bf16.mxu1 %v9922_v20  ;;  %6313 = vrcp.f32 %v2662_v11  ;;  %v6304_v4 = vpop.eup %6303 }
 0x5a3   :  { %6315 = vrcp.f32 %v2666_v47  ;;  %v2664_v24 = vpop.xlane.xlu1 %2663  ;;  %5865 = vmatprep.mubr.bf16.mxu1 %v2871_v33  ;;  %v2824_v45 = vmul.f32 %v6304_v4, %v8340_v3  ;;  %v9927_v4 = vld [vmem:[#allocation11_spill] sm:$0xff] }
 0x5a4   :  { %v6306_v39 = vpop.eup %6305  ;;  %6317 = vrcp.f32 %v2664_v24  ;;  %5866 = vmatmul.mubr.bf16.gmra.mrb[116].mxu1 %v2872_v13 }
 0x5a5   :  { %v6308_v21 = vpop.eup %6307  ;;  %5914 = vmatpush3.bf16.msra.mxu1 %v9922_v20  ;;  %v2674_v32 = vpop.xlane.xlu0 %2673  ;;  %v2821_v15 = vmul.f32 %v6306_v39, %v8345_v34 }
 0x5a6   :  { %v6310_v49 = vpop.eup %6309  ;;  %5915 = vmatprep.subr.bf16.mxu1 %v9923_v7  ;;  %v2823_v27 = vmul.f32 %v6308_v21, %v8335_v14 }
 0x5a7   :  { %v2676_v30 = vpop.xlane.xlu1 %2675  ;;  %v2822_v19 = vmul.f32 %v6310_v49, %v8350_v29 }
 0x5a8   :  { %6319 = vrcp.f32 %v2676_v30  ;;  %v2874_v28 = vpack.c.bf16 %v2824_v45, %v2823_v27 }
 0x5a9   :  { %5916 = vmatpush3.bf16.msra.mxu1 %v9923_v7  ;;  %v2670_v37 = vpop.xlane.xlu0 %2669  ;;  %v2873_v35 = vpack.c.bf16 %v2822_v19, %v2821_v15 }
 0x5aa   :  { %5917 = vmatprep.subr.bf16.mxu1 %v9924_v23  ;;  %6321 = vrcp.f32 %v2670_v37  ;;  %v6312_v59 = vpop.eup %6311 }
 0x5ab   :  { %6323 = vrcp.f32 %v2674_v32  ;;  %v2672_v1 = vpop.xlane.xlu1 %2671  ;;  %5869 = vmatprep.mubr.bf16.mxu1 %v2873_v35  ;;  %v2828_v47 = vmul.f32 %v6312_v59, %v8358_v0 }
 0x5ac   :  { %v6314_v3 = vpop.eup %6313  ;;  %6325 = vrcp.f32 %v2672_v1  ;;  %5870 = vmatmul.mubr.bf16.gmra.mrb[120].mxu1 %v2874_v28 }
 0x5ad   :  { %v6316_v34 = vpop.eup %6315  ;;  %5918 = vmatpush3.bf16.msra.mxu1 %v9924_v23  ;;  %v2682_v14 = vpop.xlane.xlu0 %2681  ;;  %v2825_v12 = vmul.f32 %v6314_v3, %v8362_v9  ;;  %v9928_v23 = vld [vmem:[#allocation10_spill] sm:$0xff] }
 0x5ae   :  { %v6318_v29 = vpop.eup %6317  ;;  %5919 = vmatprep.subr.bf16.mxu1 %v9925_v6  ;;  %v2827_v62 = vmul.f32 %v6316_v34, %v8354_v52 }
 0x5af   :  { %v2684_v8 = vpop.xlane.xlu1 %2683  ;;  %v2826_v43 = vmul.f32 %v6318_v29, %v8368_v26 }
 0x5b0   :  { %6327 = vrcp.f32 %v2684_v8  ;;  %v2876_v11 = vpack.c.bf16 %v2828_v47, %v2827_v62  ;;  %v9930_v8 = vld [vmem:[#allocation15_spill] sm:$0xff]  ;;  %v9932_v62 = vld [vmem:[#allocation13_spill] sm:$0xff] }
 0x5b1   :  { %5920 = vmatpush3.bf16.msra.mxu1 %v9925_v6  ;;  %v2678_v48 = vpop.xlane.xlu0 %2677  ;;  %v2875_v25 = vpack.c.bf16 %v2826_v43, %v2825_v12  ;;  %v9929_v6 = vld [vmem:[#allocation12_spill] sm:$0xff]  ;;  %v9931_v12 = vld [vmem:[#allocation14_spill] sm:$0xff] }
 0x5b2   :  { %5921 = vmatprep.subr.bf16.mxu1 %v9926_v36  ;;  %6329 = vrcp.f32 %v2678_v48  ;;  %v6320_v33 = vpop.eup %6319 }
 0x5b3   :  { %6331 = vrcp.f32 %v2682_v14  ;;  %v2680_v20 = vpop.xlane.xlu1 %2679  ;;  %5873 = vmatprep.mubr.bf16.mxu1 %v2875_v25  ;;  %v2832_v13 = vmul.f32 %v6320_v33, %v8378_v53 }
 0x5b4   :  { %v6322_v0 = vpop.eup %6321  ;;  %6333 = vrcp.f32 %v2680_v20  ;;  %5874 = vmatmul.mubr.bf16.gmra.mrb[124].mxu1 %v2876_v11  ;;  %v9933_v11 = vld [vmem:[#allocation19_spill] sm:$0xff]  ;;  %v9934_v20 = vld [vmem:[#allocation18_spill] sm:$0xff] }
 0x5b5   :  { %v6324_v9 = vpop.eup %6323  ;;  %5922 = vmatpush3.bf16.msra.mxu1 %v9926_v36  ;;  %v2690_v52 = vpop.xlane.xlu0 %2689  ;;  %v2829_v39 = vmul.f32 %v6322_v0, %v8382_v41 }
 0x5b6   :  { %v6326_v26 = vpop.eup %6325  ;;  %5923 = vmatprep.subr.bf16.mxu1 %v9927_v4  ;;  %v2831_v32 = vmul.f32 %v6324_v9, %v8374_v10 }
 0x5b7   :  { %v2692_v24 = vpop.xlane.xlu1 %2691  ;;  %v2830_v21 = vmul.f32 %v6326_v26, %v8386_v46 }
 0x5b8   :  { %6335 = vrcp.f32 %v2692_v24  ;;  %v2878_v45 = vpack.c.bf16 %v2832_v13, %v2831_v32 }
 0x5b9   :  { %5924 = vmatpush3.bf16.msra.mxu1 %v9927_v4  ;;  %v2686_v49 = vpop.xlane.xlu0 %2685  ;;  %v2877_v7 = vpack.c.bf16 %v2830_v21, %v2829_v39 }
 0x5ba   :  { %6337 = vrcp.f32 %v2686_v49  ;;  %v6328_v30 = vpop.eup %6327 }
 0x5bb   :  { %6339 = vrcp.f32 %v2690_v52  ;;  %v2688_v15 = vpop.xlane.xlu1 %2687  ;;  %5893 = vmatprep.mubr.bf16.mxu0 %v2877_v7  ;;  %v2836_v10 = vmul.f32 %v6328_v30, %v8394_v61 }
 0x5bc   :  { %v6330_v53 = vpop.eup %6329  ;;  %6341 = vrcp.f32 %v2688_v15  ;;  %5894 = vmatmul.mubr.bf16.vlgmr.msra.gmra.mrb[160].mxu0 %v2878_v45  ;;  %v3283_v45 = vld [vmem:[#allocation2 + $0x10] sm:$0xff] }
 0x5bd   :  { %v6332_v19 = vpop.eup %6331  ;;  %v2694_v41 = vpop.xlane.xlu0 %2693  ;;  %v2833_v37 = vmul.f32 %v6330_v53, %v8397_v22  ;;  %v3281_v53 = vld [vmem:[#allocation2] sm:$0xff] }
 0x5be   :  { %v6334_v27 = vpop.eup %6333  ;;  %6343 = vrcp.f32 %v2694_v41  ;;  %v2835_v28 = vmul.f32 %v6332_v19, %v9928_v23  ;;  %v3282_v23 = vld [vmem:[#allocation2 + $0x8] sm:$0xff] }
 0x5bf   :  { %v2696_v46 = vpop.xlane.xlu1 %2695  ;;  %v2834_v35 = vmul.f32 %v6334_v27, %v8400_v63 }
 0x5c0   :  { %6345 = vrcp.f32 %v2696_v46  ;;  %v2880_v1 = vpack.c.bf16 %v2836_v10, %v2835_v28  ;;  %v3284_v10 = vld [vmem:[#allocation2 + $0x18] sm:$0xff] }
 0x5c1   :  { %v2879_v59 = vpack.c.bf16 %v2834_v35, %v2833_v37 }
 0x5c2   :  { %v6336_v3 = vpop.eup %6335 }
 0x5c3   :  { %5897 = vmatprep.mubr.bf16.mxu0 %v2879_v59  ;;  %v2840_v47 = vmul.f32 %v6336_v3, %v9929_v6 }
 0x5c4   :  { %v6338_v34 = vpop.eup %6337  ;;  %5898 = vmatmul.mubr.bf16.gmra.mrb[164].mxu0 %v2880_v1 }
 0x5c5   :  { %v6340_v14 = vpop.eup %6339  ;;  %v2837_v61 = vmul.f32 %v6338_v34, %v9930_v8 }
 0x5c6   :  { %v6342_v29 = vpop.eup %6341  ;;  %v2839_v63 = vmul.f32 %v6340_v14, %v9932_v62 }
 0x5c7   :  { %v2838_v43 = vmul.f32 %v6342_v29, %v9931_v12 }
 0x5c8   :  { %v6344_v22 = vpop.eup %6343  ;;  %v2882_v36 = vpack.c.bf16 %v2840_v47, %v2839_v63 }
 0x5c9   :  { %v2881_v48 = vpack.c.bf16 %v2838_v43, %v2837_v61  ;;  %v2841_v33 = vmul.f32 %v6344_v22, %v9933_v11  ;;  %v3287_v61 = vld [vmem:[#allocation2 + $0x30] sm:$0xff]  ;;  %v3285_v22 = vld [vmem:[#allocation2 + $0x20] sm:$0xff] }
 0x5ca   :  { %v6346_v25 = vpop.eup %6345 }
 0x5cb   :  { %5901 = vmatprep.mubr.bf16.mxu0 %v2881_v48  ;;  %v2842_v0 = vmul.f32 %v6346_v25, %v9934_v20  ;;  %v3288_v48 = vld [vmem:[#allocation2 + $0x38] sm:$0xff]  ;;  %v3286_v20 = vld [vmem:[#allocation2 + $0x28] sm:$0xff] }
 0x5cc   :  { %5902 = vmatmul.mubr.bf16.gmra.mrb[168].mxu0 %v2882_v36 }
 0x5cd   :  { %v2883_v9 = vpack.c.bf16 %v2842_v0, %v2841_v33 }
 0x5cf   :  { %5905 = vmatprep.mubr.bf16.mxu0 %v2883_v9 }
 0x602   :  { %v2706_v52 = vpop.xlane.xlu0 %2705 }
 0x604   :  { %v2708_v26 = vpop.xlane.xlu1 %2707 }
 0x605   :  { %6347 = vrcp.f32 %v2708_v26 }
 0x606   :  { %v2702_v13 = vpop.xlane.xlu0 %2701 }
 0x607   :  { %6349 = vrcp.f32 %v2702_v13 }
 0x608   :  { %6351 = vrcp.f32 %v2706_v52  ;;  %v2704_v4 = vpop.xlane.xlu1 %2703 }
 0x609   :  { %6353 = vrcp.f32 %v2704_v4 }
 0x60a   :  { %v2714_v24 = vpop.xlane.xlu0 %2713 }
 0x60c   :  { %v2716_v39 = vpop.xlane.xlu1 %2715 }
 0x60d   :  { %6355 = vrcp.f32 %v2716_v39 }
 0x60e   :  { %v2710_v21 = vpop.xlane.xlu0 %2709 }
 0x60f   :  { %6357 = vrcp.f32 %v2710_v21  ;;  %v6348_v32 = vpop.eup %6347 }
 0x610   :  { %6359 = vrcp.f32 %v2714_v24  ;;  %v2712_v49 = vpop.xlane.xlu1 %2711  ;;  %v2848_v41 = vmul.f32 %v6348_v32, %v8463_v55 }
 0x611   :  { %v6350_v7 = vpop.eup %6349  ;;  %6361 = vrcp.f32 %v2712_v49  ;;  %v3291_v49 = vld [vmem:[#allocation2 + $0x50] sm:$0xff] }
 0x612   :  { %v6352_v30 = vpop.eup %6351  ;;  %v2722_v15 = vpop.xlane.xlu0 %2721  ;;  %v2845_v28 = vmul.f32 %v6350_v7, %v8467_v5 }
 0x613   :  { %v6354_v19 = vpop.eup %6353  ;;  %v5831_v27 = vpop.f32.mrb[144].mxu0  ;;  %v2847_v1 = vmul.f32 %v6352_v30, %v8459_v2  ;;  %v3289_v30 = vld [vmem:[#allocation2 + $0x40] sm:$0xff] }
 0x614   :  { %v8572_v46 = vadd.f32 %v5831_v27, %v3283_v45  ;;  %v2927_v37 = vpop.f32.mrb[145].mxu0  ;;  %v2724_v35 = vpop.xlane.xlu1 %2723  ;;  %v2846_v59 = vmul.f32 %v6354_v19, %v8471_v57  ;;  %v3292_v19 = vld [vmem:[#allocation2 + $0x58] sm:$0xff] }
 0x615   :  { %v8577_v3 = vadd.f32 %v3281_v53, %v2927_v37  ;;  %v5832_v34 = vpop.f32.mrb[146].mxu0  ;;  %6363 = vrcp.f32 %v2724_v35  ;;  %v2886_v57 = vpack.c.bf16 %v2848_v41, %v2847_v1  ;;  %v3290_v35 = vld [vmem:[#allocation2 + $0x48] sm:$0xff] }
 0x616   :  { %3411 = vst [vmem:[#allocation5 + $0x10] sm:$0xff] %v8572_v46  ;;  %v8580_v55 = vadd.f32 %v5832_v34, %v3284_v10  ;;  %v2930_v14 = vpop.f32.mrb[147].mxu0  ;;  %3477 = vadd.xlane.f32.xlu0 %v8572_v46  ;;  %v2718_v29 = vpop.xlane.xlu0 %2717  ;;  %v2885_v6 = vpack.c.bf16 %v2846_v59, %v2845_v28 }
 0x617   :  { %3409 = vst [vmem:[#allocation5] sm:$0xff] %v8577_v3  ;;  %v8584_v5 = vadd.f32 %v3282_v23, %v2930_v14  ;;  %6365 = vrcp.f32 %v2718_v29  ;;  %v6356_v2 = vpop.eup %6355 }
 0x618   :  { %6367 = vrcp.f32 %v2722_v15  ;;  %3412 = vst [vmem:[#allocation5 + $0x18] sm:$0xff] %v8580_v55  ;;  %3479 = vadd.xlane.f32.xlu1 %v8580_v55  ;;  %v2720_v47 = vpop.xlane.xlu1 %2719  ;;  %5925 = vmatprep.mubr.bf16.mxu1 %v2885_v6  ;;  %v2852_v25 = vmul.f32 %v6356_v2, %v8481_v56 }
 0x619   :  { %v6358_v8 = vpop.eup %6357  ;;  %3410 = vst [vmem:[#allocation5 + $0x8] sm:$0xff] %v8584_v5  ;;  %6369 = vrcp.f32 %v2720_v47  ;;  %5926 = vmatmul.mubr.bf16.vlgmr.msra.gmra.mrb[128].mxu1 %v2886_v57  ;;  %v3295_v57 = vld [vmem:[#allocation2 + $0x70] sm:$0xff]  ;;  %v3293_v47 = vld [vmem:[#allocation2 + $0x60] sm:$0xff] }
 0x61a   :  { %v6360_v12 = vpop.eup %6359  ;;  %3473 = vadd.xlane.f32.xlu0 %v8577_v3  ;;  %v2730_v43 = vpop.xlane.xlu0 %2729  ;;  %v2849_v0 = vmul.f32 %v6358_v8, %v8487_v51 }
 0x61b   :  { %v6362_v62 = vpop.eup %6361  ;;  %v5835_v63 = vpop.f32.mrb[148].mxu0  ;;  %v2851_v13 = vmul.f32 %v6360_v12, %v8475_v17  ;;  %v3296_v12 = vld [vmem:[#allocation2 + $0x78] sm:$0xff] }
 0x61c   :  { %v8591_v36 = vadd.f32 %v5835_v63, %v3287_v61  ;;  %v2943_v11 = vpop.f32.mrb[149].mxu0  ;;  %3475 = vadd.xlane.f32.xlu1 %v8584_v5  ;;  %v2732_v33 = vpop.xlane.xlu1 %2731  ;;  %v2850_v9 = vmul.f32 %v6362_v62, %v8491_v40  ;;  %v3294_v63 = vld [vmem:[#allocation2 + $0x68] sm:$0xff] }
 0x61d   :  { %v8596_v52 = vadd.f32 %v3285_v22, %v2943_v11  ;;  %v5836_v26 = vpop.f32.mrb[150].mxu0  ;;  %6371 = vrcp.f32 %v2732_v33  ;;  %v2888_v40 = vpack.c.bf16 %v2852_v25, %v2851_v13 }
 0x61e   :  { %3415 = vst [vmem:[#allocation5 + $0x30] sm:$0xff] %v8591_v36  ;;  %v8600_v56 = vadd.f32 %v5836_v26, %v3288_v48  ;;  %v2946_v4 = vpop.f32.mrb[151].mxu0  ;;  %3485 = vadd.xlane.f32.xlu0 %v8591_v36  ;;  %v2726_v24 = vpop.xlane.xlu0 %2725  ;;  %v2887_v39 = vpack.c.bf16 %v2850_v9, %v2849_v0 }
 0x61f   :  { %3413 = vst [vmem:[#allocation5 + $0x20] sm:$0xff] %v8596_v52  ;;  %v8604_v51 = vadd.f32 %v3286_v20, %v2946_v4  ;;  %6373 = vrcp.f32 %v2726_v24  ;;  %v6364_v21 = vpop.eup %6363 }
 0x620   :  { %6375 = vrcp.f32 %v2730_v43  ;;  %3416 = vst [vmem:[#allocation5 + $0x38] sm:$0xff] %v8600_v56  ;;  %3487 = vadd.xlane.f32.xlu1 %v8600_v56  ;;  %v2728_v17 = vpop.xlane.xlu1 %2727  ;;  %5929 = vmatprep.mubr.bf16.mxu1 %v2887_v39  ;;  %v2856_v41 = vmul.f32 %v6364_v21, %v8499_v60  ;;  %v9935_v39 = vmov 0   ;;  %v3297_v21 = vld [vmem:[#allocation2 + $0x80] sm:$0xff] }
 0x621   :  { %v6366_v32 = vpop.eup %6365  ;;  %3414 = vst [vmem:[#allocation5 + $0x28] sm:$0xff] %v8604_v51  ;;  %6377 = vrcp.f32 %v2728_v17  ;;  %5930 = vmatmul.mubr.bf16.gmra.mrb[132].mxu1 %v2888_v40  ;;  %v3299_v40 = vld [vmem:[#allocation2 + $0x90] sm:$0xff] }
 0x622   :  { %v6368_v7 = vpop.eup %6367  ;;  %3481 = vadd.xlane.f32.xlu0 %v8596_v52  ;;  %v2698_v45 = vpop.xlane.xlu0 %2697  ;;  %v2853_v23 = vmul.f32 %v6366_v32, %v8502_v16  ;;  %v3300_v32 = vld [vmem:[#allocation2 + $0x98] sm:$0xff] }
 0x623   :  { %v6370_v15 = vpop.eup %6369  ;;  %6379 = vrcp.f32 %v2698_v45  ;;  %v5839_v53 = vpop.f32.mrb[152].mxu0  ;;  %v2855_v34 = vmul.f32 %v6368_v7, %v8495_v31 }
 0x624   :  { %v8611_v27 = vadd.f32 %v5839_v53, %v3291_v49  ;;  %v2959_v10 = vpop.f32.mrb[153].mxu0  ;;  %3483 = vadd.xlane.f32.xlu1 %v8604_v51  ;;  %v2700_v37 = vpop.xlane.xlu1 %2699  ;;  %v2854_v28 = vmul.f32 %v6370_v15, %v8505_v58  ;;  %v3298_v49 = vld [vmem:[#allocation2 + $0x88] sm:$0xff] }
 0x625   :  { %v8616_v59 = vadd.f32 %v3289_v30, %v2959_v10  ;;  %6381 = vrcp.f32 %v2700_v37  ;;  %v5840_v1 = vpop.f32.mrb[154].mxu0  ;;  %v2890_v16 = vpack.c.bf16 %v2856_v41, %v2855_v34  ;;  %v3301_v41 = vld [vmem:[#allocation2 + $0xa0] sm:$0xff]  ;;  %v3304_v37 = vld [vmem:[#allocation2 + $0xb8] sm:$0xff] }
 0x626   :  { %3419 = vst [vmem:[#allocation5 + $0x50] sm:$0xff] %v8611_v27  ;;  %v8620_v60 = vadd.f32 %v5840_v1, %v3292_v19  ;;  %v2962_v14 = vpop.f32.mrb[155].mxu0  ;;  %3493 = vadd.xlane.f32.xlu0 %v8611_v27  ;;  %v2889_v29 = vpack.c.bf16 %v2854_v28, %v2853_v23  ;;  %v3303_v19 = vld [vmem:[#allocation2 + $0xb0] sm:$0xff]  ;;  %v3302_v28 = vld [vmem:[#allocation2 + $0xa8] sm:$0xff] }
 0x627   :  { %3417 = vst [vmem:[#allocation5 + $0x40] sm:$0xff] %v8616_v59  ;;  %v8624_v6 = vadd.f32 %v3290_v35, %v2962_v14  ;;  %v6372_v58 = vpop.eup %6371 }
 0x628   :  { %3420 = vst [vmem:[#allocation5 + $0x58] sm:$0xff] %v8620_v60  ;;  %3495 = vadd.xlane.f32.xlu1 %v8620_v60  ;;  %5933 = vmatprep.mubr.bf16.mxu1 %v2889_v29  ;;  %v2860_v43 = vmul.f32 %v6372_v58, %v8511_v50  ;;  %v3307_v58 = vld [vmem:[#allocation2 + $0xd0] sm:$0xff] }
 0x629   :  { %v6374_v31 = vpop.eup %6373  ;;  %3418 = vst [vmem:[#allocation5 + $0x48] sm:$0xff] %v8624_v6  ;;  %5934 = vmatmul.mubr.bf16.gmra.mrb[136].mxu1 %v2890_v16 }
 0x62a   :  { %v6376_v2 = vpop.eup %6375  ;;  %3489 = vadd.xlane.f32.xlu0 %v8616_v59  ;;  %v2857_v48 = vmul.f32 %v6374_v31, %v8516_v54  ;;  %v3305_v31 = vld [vmem:[#allocation2 + $0xc0] sm:$0xff] }
 0x62b   :  { %v6378_v8 = vpop.eup %6377  ;;  %v5843_v61 = vpop.f32.mrb[156].mxu0  ;;  %v2859_v0 = vmul.f32 %v6376_v2, %v8508_v42  ;;  %v3308_v2 = vld [vmem:[#allocation2 + $0xd8] sm:$0xff] }
 0x62c   :  { %v3359_v22 = vadd.f32 %v5843_v61, %v3295_v57  ;;  %v2975_v62 = vpop.f32.mrb[157].mxu0  ;;  %3491 = vadd.xlane.f32.xlu1 %v8624_v6  ;;  %v2858_v25 = vmul.f32 %v6378_v8, %v8521_v38  ;;  %v3306_v61 = vld [vmem:[#allocation2 + $0xc8] sm:$0xff] }
 0x62d   :  { %v6380_v11 = vpop.eup %6379  ;;  %v8634_v33 = vadd.f32 %v3293_v47, %v2975_v62  ;;  %v5844_v20 = vpop.f32.mrb[158].mxu0  ;;  %v2892_v24 = vpack.c.bf16 %v2860_v43, %v2859_v0 }
 0x62e   :  { %3423 = vst [vmem:[#allocation5 + $0x70] sm:$0xff] %v3359_v22  ;;  %v3360_v9 = vadd.f32 %v5844_v20, %v3296_v12  ;;  %v2978_v26 = vpop.f32.mrb[159].mxu0  ;;  %3501 = vadd.xlane.f32.xlu0 %v3359_v22  ;;  %v2891_v50 = vpack.c.bf16 %v2858_v25, %v2857_v48  ;;  %v2843_v54 = vmul.f32 %v6380_v11, %v8513_v44  ;;  %v3311_v48 = vld [vmem:[#allocation2 + $0xf0] sm:$0xff]  ;;  %v3309_v25 = vld [vmem:[#allocation2 + $0xe0] sm:$0xff]  ;;  %v3312_v20 = vld [vmem:[#allocation2 + $0xf8] sm:$0xff] }
 0x62f   :  { %v6382_v13 = vpop.eup %6381  ;;  %3421 = vst [vmem:[#allocation5 + $0x60] sm:$0xff] %v8634_v33  ;;  %v8638_v4 = vadd.f32 %v3294_v63, %v2978_v26  ;;  %v3310_v26 = vld [vmem:[#allocation2 + $0xe8] sm:$0xff] }
 0x630   :  { %3424 = vst [vmem:[#allocation5 + $0x78] sm:$0xff] %v3360_v9  ;;  %3503 = vadd.xlane.f32.xlu1 %v3360_v9  ;;  %5937 = vmatprep.mubr.bf16.mxu1 %v2891_v50  ;;  %v2844_v38 = vmul.f32 %v6382_v13, %v8518_v18 }
 0x631   :  { %3422 = vst [vmem:[#allocation5 + $0x68] sm:$0xff] %v8638_v4  ;;  %5938 = vmatmul.mubr.bf16.gmra.mrb[140].mxu1 %v2892_v24 }
 0x632   :  { %3497 = vadd.xlane.f32.xlu0 %v8634_v33  ;;  %v2884_v42 = vpack.c.bf16 %v2844_v38, %v2843_v54  ;;  %4650 = vmatprep.mubr.bf16.mxu1 %v9935_v39 }
 0x634   :  { %3499 = vadd.xlane.f32.xlu1 %v8638_v4  ;;  %5906 = vmatmul.mubr.bf16.gmra.mrb[172].mxu0 %v2884_v42  ;;  %v3315_v42 = vld [vmem:[#allocation2 + $0x110] sm:$0xff] }
 0x635   :  { %4537 = vmatprep.mubr.bf16.mxu0 %v9935_v39 }
 0x66f   :  { %v5863_v17 = vpop.f32.mrb[112].mxu1 }
 0x670   :  { %v8647_v44 = vadd.f32 %v5863_v17, %v3299_v40  ;;  %v3024_v18 = vpop.f32.mrb[113].mxu1  ;;  %v3313_v40 = vld [vmem:[#allocation2 + $0x100] sm:$0xff]  ;;  %v3316_v17 = vld [vmem:[#allocation2 + $0x118] sm:$0xff] }
 0x671   :  { %v8649_v7 = vadd.f32 %v3297_v21, %v3024_v18  ;;  %v5864_v45 = vpop.f32.mrb[114].mxu1 }
 0x672   :  { %3427 = vst [vmem:[#allocation5 + $0x90] sm:$0xff] %v8647_v44  ;;  %v8652_v30 = vadd.f32 %v5864_v45, %v3300_v32  ;;  %3509 = vadd.xlane.f32.xlu0 %v8647_v44  ;;  %v3027_v15 = vpop.f32.mrb[115].mxu1 }
 0x673   :  { %3425 = vst [vmem:[#allocation5 + $0x80] sm:$0xff] %v8649_v7  ;;  %v8656_v53 = vadd.f32 %v3298_v49, %v3027_v15  ;;  %v3314_v49 = vld [vmem:[#allocation2 + $0x108] sm:$0xff] }
 0x674   :  { %3428 = vst [vmem:[#allocation5 + $0x98] sm:$0xff] %v8652_v30  ;;  %3511 = vadd.xlane.f32.xlu1 %v8652_v30 }
 0x675   :  { %3426 = vst [vmem:[#allocation5 + $0x88] sm:$0xff] %v8656_v53 }
 0x676   :  { %3505 = vadd.xlane.f32.xlu0 %v8649_v7 }
 0x677   :  { %v5867_v10 = vpop.f32.mrb[116].mxu1 }
 0x678   :  { %v8662_v35 = vadd.f32 %v5867_v10, %v3303_v19  ;;  %3507 = vadd.xlane.f32.xlu1 %v8656_v53  ;;  %v3040_v23 = vpop.f32.mrb[117].mxu1 }
 0x679   :  { %v8665_v1 = vadd.f32 %v3301_v41, %v3040_v23  ;;  %v5868_v34 = vpop.f32.mrb[118].mxu1  ;;  %v3317_v23 = vld [vmem:[#allocation2 + $0x120] sm:$0xff] }
 0x67a   :  { %3431 = vst [vmem:[#allocation5 + $0xb0] sm:$0xff] %v8662_v35  ;;  %v8668_v14 = vadd.f32 %v5868_v34, %v3304_v37  ;;  %3517 = vadd.xlane.f32.xlu0 %v8662_v35  ;;  %v3043_v29 = vpop.f32.mrb[119].mxu1  ;;  %v3319_v37 = vld [vmem:[#allocation2 + $0x130] sm:$0xff]  ;;  %v3320_v34 = vld [vmem:[#allocation2 + $0x138] sm:$0xff] }
 0x67b   :  { %3429 = vst [vmem:[#allocation5 + $0xa0] sm:$0xff] %v8665_v1  ;;  %v8672_v16 = vadd.f32 %v3302_v28, %v3043_v29 }
 0x67c   :  { %3432 = vst [vmem:[#allocation5 + $0xb8] sm:$0xff] %v8668_v14  ;;  %3519 = vadd.xlane.f32.xlu1 %v8668_v14 }
 0x67d   :  { %3430 = vst [vmem:[#allocation5 + $0xa8] sm:$0xff] %v8672_v16 }
 0x67e   :  { %3513 = vadd.xlane.f32.xlu0 %v8665_v1 }
 0x67f   :  { %v5871_v57 = vpop.f32.mrb[120].mxu1 }
 0x680   :  { %v8678_v47 = vadd.f32 %v5871_v57, %v3307_v58  ;;  %3515 = vadd.xlane.f32.xlu1 %v8672_v16  ;;  %v3056_v8 = vpop.f32.mrb[121].mxu1 }
 0x681   :  { %v8681_v12 = vadd.f32 %v3305_v31, %v3056_v8  ;;  %v5872_v43 = vpop.f32.mrb[122].mxu1  ;;  %v3318_v31 = vld [vmem:[#allocation2 + $0x128] sm:$0xff] }
 0x682   :  { %3435 = vst [vmem:[#allocation5 + $0xd0] sm:$0xff] %v8678_v47  ;;  %v8684_v22 = vadd.f32 %v5872_v43, %v3308_v2  ;;  %3525 = vadd.xlane.f32.xlu0 %v8678_v47  ;;  %v3059_v62 = vpop.f32.mrb[123].mxu1 }
 0x683   :  { %3433 = vst [vmem:[#allocation5 + $0xc0] sm:$0xff] %v8681_v12  ;;  %v8688_v63 = vadd.f32 %v3306_v61, %v3059_v62  ;;  %v3323_v62 = vld [vmem:[#allocation2 + $0x150] sm:$0xff] }
 0x684   :  { %3436 = vst [vmem:[#allocation5 + $0xd8] sm:$0xff] %v8684_v22  ;;  %3527 = vadd.xlane.f32.xlu1 %v8684_v22 }
 0x685   :  { %3434 = vst [vmem:[#allocation5 + $0xc8] sm:$0xff] %v8688_v63 }
 0x686   :  { %3521 = vadd.xlane.f32.xlu0 %v8681_v12 }
 0x687   :  { %v5875_v11 = vpop.f32.mrb[124].mxu1 }
 0x688   :  { %v8694_v0 = vadd.f32 %v5875_v11, %v3311_v48  ;;  %3523 = vadd.xlane.f32.xlu1 %v8688_v63  ;;  %v3072_v9 = vpop.f32.mrb[125].mxu1  ;;  %v3321_v48 = vld [vmem:[#allocation2 + $0x140] sm:$0xff]  ;;  %v3324_v11 = vld [vmem:[#allocation2 + $0x158] sm:$0xff] }
 0x689   :  { %v8697_v50 = vadd.f32 %v3309_v25, %v3072_v9  ;;  %v5876_v13 = vpop.f32.mrb[126].mxu1 }
 0x68a   :  { %3439 = vst [vmem:[#allocation5 + $0xf0] sm:$0xff] %v8694_v0  ;;  %v8700_v24 = vadd.f32 %v5876_v13, %v3312_v20  ;;  %3533 = vadd.xlane.f32.xlu0 %v8694_v0  ;;  %v3075_v54 = vpop.f32.mrb[127].mxu1 }
 0x68b   :  { %3437 = vst [vmem:[#allocation5 + $0xe0] sm:$0xff] %v8697_v50  ;;  %v8704_v38 = vadd.f32 %v3310_v26, %v3075_v54  ;;  %v3322_v26 = vld [vmem:[#allocation2 + $0x148] sm:$0xff] }
 0x68c   :  { %3440 = vst [vmem:[#allocation5 + $0xf8] sm:$0xff] %v8700_v24  ;;  %3535 = vadd.xlane.f32.xlu1 %v8700_v24 }
 0x68d   :  { %3438 = vst [vmem:[#allocation5 + $0xe8] sm:$0xff] %v8704_v38 }
 0x68e   :  { %3529 = vadd.xlane.f32.xlu0 %v8697_v50 }
 0x68f   :  { %v5895_v21 = vpop.f32.mrb[160].mxu0 }
 0x690   :  { %v8710_v32 = vadd.f32 %v5895_v21, %v3315_v42  ;;  %3531 = vadd.xlane.f32.xlu1 %v8704_v38  ;;  %v3121_v18 = vpop.f32.mrb[161].mxu0 }
 0x691   :  { %v8713_v45 = vadd.f32 %v3313_v40, %v3121_v18  ;;  %v5896_v15 = vpop.f32.mrb[162].mxu0 }
 0x692   :  { %3443 = vst [vmem:[#allocation5 + $0x110] sm:$0xff] %v8710_v32  ;;  %v8716_v19 = vadd.f32 %v5896_v15, %v3316_v17  ;;  %3541 = vadd.xlane.f32.xlu0 %v8710_v32  ;;  %v3124_v41 = vpop.f32.mrb[163].mxu0 }
 0x693   :  { %9936 = vst [vmem:[#allocation21_spill] sm:$0xff] %v8713_v45  ;;  %3441 = vst [vmem:[#allocation5 + $0x100] sm:$0xff] %v8713_v45  ;;  %v8720_v10 = vadd.f32 %v3314_v49, %v3124_v41 }
 0x694   :  { %9937 = vst [vmem:[#allocation20_spill] sm:$0xff] %v8716_v19  ;;  %3444 = vst [vmem:[#allocation5 + $0x118] sm:$0xff] %v8716_v19  ;;  %3543 = vadd.xlane.f32.xlu1 %v8716_v19 }
 0x695   :  { %9938 = vst [vmem:[#allocation23_spill] sm:$0xff] %v8720_v10  ;;  %3442 = vst [vmem:[#allocation5 + $0x108] sm:$0xff] %v8720_v10 }
 0x696   :  { %3537 = vadd.xlane.f32.xlu0 %v8713_v45  ;;  %v3326_v45 = vld [vmem:[#allocation2 + $0x168] sm:$0xff] }
 0x697   :  { %v5899_v28 = vpop.f32.mrb[164].mxu0 }
 0x698   :  { %v8726_v29 = vadd.f32 %v5899_v28, %v3319_v37  ;;  %3539 = vadd.xlane.f32.xlu1 %v8720_v10  ;;  %v3137_v58 = vpop.f32.mrb[165].mxu0 }
 0x699   :  { %v8729_v57 = vadd.f32 %v3317_v23, %v3137_v58  ;;  %v5900_v2 = vpop.f32.mrb[166].mxu0 }
 0x69a   :  { %9939 = vst [vmem:[#allocation26_spill] sm:$0xff] %v8726_v29  ;;  %3447 = vst [vmem:[#allocation5 + $0x130] sm:$0xff] %v8726_v29  ;;  %v8732_v8 = vadd.f32 %v5900_v2, %v3320_v34  ;;  %3549 = vadd.xlane.f32.xlu0 %v8726_v29  ;;  %v3140_v61 = vpop.f32.mrb[167].mxu0 }
 0x69b   :  { %9940 = vst [vmem:[#allocation37_spill] sm:$0xff] %v8729_v57  ;;  %3445 = vst [vmem:[#allocation5 + $0x120] sm:$0xff] %v8729_v57  ;;  %v8736_v43 = vadd.f32 %v3318_v31, %v3140_v61 }
 0x69c   :  { %9941 = vst [vmem:[#allocation29_spill] sm:$0xff] %v8732_v8  ;;  %3448 = vst [vmem:[#allocation5 + $0x138] sm:$0xff] %v8732_v8  ;;  %3551 = vadd.xlane.f32.xlu1 %v8732_v8  ;;  %v3328_v8 = vld [vmem:[#allocation2 + $0x178] sm:$0xff] }
 0x69d   :  { %9942 = vst [vmem:[#allocation28_spill] sm:$0xff] %v8736_v43  ;;  %3446 = vst [vmem:[#allocation5 + $0x128] sm:$0xff] %v8736_v43 }
 0x69e   :  { %3545 = vadd.xlane.f32.xlu0 %v8729_v57 }
 0x69f   :  { %v5903_v25 = vpop.f32.mrb[168].mxu0 }
 0x6a0   :  { %v8742_v20 = vadd.f32 %v5903_v25, %v3323_v62  ;;  %3547 = vadd.xlane.f32.xlu1 %v8736_v43  ;;  %v3153_v9 = vpop.f32.mrb[169].mxu0 }
 0x6a1   :  { %v8745_v13 = vadd.f32 %v3321_v48, %v3153_v9  ;;  %v5904_v54 = vpop.f32.mrb[170].mxu0  ;;  %v3331_v48 = vld [vmem:[#allocation2 + $0x190] sm:$0xff] }
 0x6a2   :  { %9943 = vst [vmem:[#allocation34_spill] sm:$0xff] %v8742_v20  ;;  %3451 = vst [vmem:[#allocation5 + $0x150] sm:$0xff] %v8742_v20  ;;  %v8748_v42 = vadd.f32 %v5904_v54, %v3324_v11  ;;  %3557 = vadd.xlane.f32.xlu0 %v8742_v20  ;;  %v3156_v40 = vpop.f32.mrb[171].mxu0  ;;  %v3332_v11 = vld [vmem:[#allocation2 + $0x198] sm:$0xff]  ;;  %v3330_v54 = vld [vmem:[#allocation2 + $0x188] sm:$0xff] }
 0x6a3   :  { %9944 = vst [vmem:[#allocation33_spill] sm:$0xff] %v8745_v13  ;;  %3449 = vst [vmem:[#allocation5 + $0x140] sm:$0xff] %v8745_v13  ;;  %v8752_v21 = vadd.f32 %v3322_v26, %v3156_v40  ;;  %v3478_v17 = vpop.xlane.xlu0 %3477 }
 0x6a4   :  { %9945 = vst [vmem:[#allocation16_spill] sm:$0xff] %v8748_v42  ;;  %3452 = vst [vmem:[#allocation5 + $0x158] sm:$0xff] %v8748_v42  ;;  %v3603_v18 = vmul.f32 0.0078125, %v3478_v17  ;;  %3559 = vadd.xlane.f32.xlu1 %v8748_v42 }
 0x6a5   :  { %9946 = vst [vmem:[#allocation17_spill] sm:$0xff] %v8752_v21  ;;  %3450 = vst [vmem:[#allocation5 + $0x148] sm:$0xff] %v8752_v21  ;;  %v3480_v49 = vpop.xlane.xlu1 %3479 }
 0x6a6   :  { %v8758_v15 = vsub.f32 %v8572_v46, %v3603_v18  ;;  %v3604_v41 = vmul.f32 0.0078125, %v3480_v49  ;;  %3553 = vadd.xlane.f32.xlu0 %v8745_v13 }
 0x6a7   :  { %v3474_v37 = vpop.xlane.xlu0 %3473 }
 0x6a8   :  { %9947 = vst [vmem:[#allocation39_spill] sm:$0xff] %v8758_v15  ;;  %v8762_v23 = vsub.f32 %v8580_v55, %v3604_v41  ;;  %v3601_v28 = vmul.f32 0.0078125, %v3474_v37  ;;  %3555 = vadd.xlane.f32.xlu1 %v8752_v21  ;;  %v3731_v34 = vmul.f32 %v8758_v15, %v8758_v15  ;;  %v3335_v41 = vld [vmem:[#allocation2 + $0x1b0] sm:$0xff]  ;;  %v3333_v37 = vld [vmem:[#allocation2 + $0x1a0] sm:$0xff] }
 0x6a9   :  { %v3476_v58 = vpop.xlane.xlu1 %3475 }
 0x6aa   :  { %9948 = vst [vmem:[#allocation38_spill] sm:$0xff] %v8762_v23  ;;  %v8768_v31 = vsub.f32 %v8577_v3, %v3601_v28  ;;  %v3602_v2 = vmul.f32 0.0078125, %v3476_v58  ;;  %3797 = vadd.xlane.f32.xlu0 %v3731_v34  ;;  %v3732_v46 = vmul.f32 %v8762_v23, %v8762_v23  ;;  %v3329_v3 = vld [vmem:[#allocation2 + $0x180] sm:$0xff]  ;;  %v3336_v34 = vld [vmem:[#allocation2 + $0x1b8] sm:$0xff] }
 0x6ac   :  { %9949 = vst [vmem:[#allocation36_spill] sm:$0xff] %v8768_v31  ;;  %v8773_v61 = vsub.f32 %v8584_v5, %v3602_v2  ;;  %3799 = vadd.xlane.f32.xlu1 %v3732_v46  ;;  %v3729_v55 = vmul.f32 %v8768_v31, %v8768_v31  ;;  %v3334_v46 = vld [vmem:[#allocation2 + $0x1a8] sm:$0xff] }
 0x6ae   :  { %9950 = vst [vmem:[#allocation35_spill] sm:$0xff] %v8773_v61  ;;  %3793 = vadd.xlane.f32.xlu0 %v3729_v55  ;;  %v3730_v62 = vmul.f32 %v8773_v61, %v8773_v61  ;;  %v3341_v61 = vld [vmem:[#allocation2 + $0x1e0] sm:$0xff] }
 0x6b0   :  { %3795 = vadd.xlane.f32.xlu1 %v3730_v62 }
 0x6ec   :  { %v5927_v25 = vpop.f32.mrb[128].mxu1 }
 0x6ed   :  { %v8779_v9 = vadd.f32 %v5927_v25, %v3331_v48  ;;  %v3218_v26 = vpop.f32.mrb[129].mxu1  ;;  %v3486_v48 = vpop.xlane.xlu0 %3485 }
 0x6ee   :  { %v8781_v40 = vadd.f32 %v3329_v3, %v3218_v26  ;;  %v5928_v5 = vpop.f32.mrb[130].mxu1  ;;  %v3488_v26 = vpop.xlane.xlu1 %3487  ;;  %v3607_v29 = vmul.f32 0.0078125, %v3486_v48 }
 0x6ef   :  { %3459 = vst [vmem:[#allocation5 + $0x190] sm:$0xff] %v8779_v9  ;;  %v8784_v17 = vadd.f32 %v5928_v5, %v3332_v11  ;;  %v3221_v18 = vpop.f32.mrb[131].mxu1  ;;  %v3337_v5 = vld [vmem:[#allocation2 + $0x1c0] sm:$0xff] }
 0x6f0   :  { %3457 = vst [vmem:[#allocation5 + $0x180] sm:$0xff] %v8781_v40  ;;  %v8787_v49 = vadd.f32 %v3330_v54, %v3221_v18  ;;  %v3339_v54 = vld [vmem:[#allocation2 + $0x1d0] sm:$0xff] }
 0x6f1   :  { %3460 = vst [vmem:[#allocation5 + $0x198] sm:$0xff] %v8784_v17 }
 0x6f2   :  { %3458 = vst [vmem:[#allocation5 + $0x188] sm:$0xff] %v8787_v49  ;;  %v3484_v15 = vpop.xlane.xlu1 %3483 }
 0x6f4   :  { %v5931_v28 = vpop.f32.mrb[132].mxu1 }
 0x6f5   :  { %v8791_v58 = vadd.f32 %v5931_v28, %v3335_v41  ;;  %v3234_v2 = vpop.f32.mrb[133].mxu1  ;;  %v3340_v41 = vld [vmem:[#allocation2 + $0x1d8] sm:$0xff] }
 0x6f6   :  { %v8793_v55 = vadd.f32 %v3333_v37, %v3234_v2  ;;  %v5932_v62 = vpop.f32.mrb[134].mxu1  ;;  %v3482_v37 = vpop.xlane.xlu0 %3481 }
 0x6f7   :  { %3463 = vst [vmem:[#allocation5 + $0x1b0] sm:$0xff] %v8791_v58  ;;  %v8796_v3 = vadd.f32 %v5932_v62, %v3336_v34  ;;  %v3237_v25 = vpop.f32.mrb[135].mxu1  ;;  %v3338_v34 = vld [vmem:[#allocation2 + $0x1c8] sm:$0xff]  ;;  %v3496_v31 = vpop.xlane.xlu1 %3495 }
 0x6f8   :  { %3461 = vst [vmem:[#allocation5 + $0x1a0] sm:$0xff] %v8793_v55  ;;  %v8799_v11 = vadd.f32 %v3334_v46, %v3237_v25 }
 0x6f9   :  { %3464 = vst [vmem:[#allocation5 + $0x1b8] sm:$0xff] %v8796_v3 }
 0x6fa   :  { %3462 = vst [vmem:[#allocation5 + $0x1a8] sm:$0xff] %v8799_v11 }
 0x6fc   :  { %v5935_v18 = vpop.f32.mrb[136].mxu1 }
 0x6fd   :  { %v8803_v28 = vadd.f32 %v5935_v18, %v3339_v54  ;;  %v3250_v2 = vpop.f32.mrb[137].mxu1  ;;  %v3343_v54 = vld [vmem:[#allocation2 + $0x1f0] sm:$0xff]  ;;  %v3494_v18 = vpop.xlane.xlu0 %3493 }
 0x6fe   :  { %v8805_v62 = vadd.f32 %v3337_v5, %v3250_v2  ;;  %v5936_v39 = vpop.f32.mrb[138].mxu1  ;;  %v3344_v2 = vld [vmem:[#allocation2 + $0x1f8] sm:$0xff] }
 0x6ff   :  { %3467 = vst [vmem:[#allocation5 + $0x1d0] sm:$0xff] %v8803_v28  ;;  %v8808_v46 = vadd.f32 %v5936_v39, %v3340_v41  ;;  %v3253_v25 = vpop.f32.mrb[139].mxu1  ;;  %v3327_v39 = vld [vmem:[#allocation2 + $0x170] sm:$0xff]  ;;  %v3342_v41 = vld [vmem:[#allocation2 + $0x1e8] sm:$0xff] }
 0x700   :  { %3465 = vst [vmem:[#allocation5 + $0x1c0] sm:$0xff] %v8805_v62  ;;  %v8811_v23 = vadd.f32 %v3338_v34, %v3253_v25  ;;  %v3325_v34 = vld [vmem:[#allocation2 + $0x160] sm:$0xff] }
 0x701   :  { %3468 = vst [vmem:[#allocation5 + $0x1d8] sm:$0xff] %v8808_v46 }
 0x702   :  { %3466 = vst [vmem:[#allocation5 + $0x1c8] sm:$0xff] %v8811_v23 }
 0x704   :  { %v5939_v5 = vpop.f32.mrb[140].mxu1 }
 0x705   :  { %v8815_v21 = vadd.f32 %v5939_v5, %v3343_v54  ;;  %v3266_v13 = vpop.f32.mrb[141].mxu1 }
 0x706   :  { %v8817_v42 = vadd.f32 %v3341_v61, %v3266_v13  ;;  %v5940_v20 = vpop.f32.mrb[142].mxu1  ;;  %v3490_v13 = vpop.xlane.xlu0 %3489 }
 0x707   :  { %3471 = vst [vmem:[#allocation5 + $0x1f0] sm:$0xff] %v8815_v21  ;;  %v8820_v25 = vadd.f32 %v5940_v20, %v3344_v2  ;;  %v5907_v43 = vpop.f32.mrb[172].mxu0  ;;  %v3269_v57 = vpop.f32.mrb[143].mxu1  ;;  %v3608_v20 = vmul.f32 0.0078125, %v3488_v26 }
 0x708   :  { %3469 = vst [vmem:[#allocation5 + $0x1e0] sm:$0xff] %v8817_v42  ;;  %v8823_v10 = vadd.f32 %v5907_v43, %v3327_v39  ;;  %v8825_v54 = vadd.f32 %v3342_v41, %v3269_v57  ;;  %v3169_v5 = vpop.f32.mrb[173].mxu0  ;;  %v3492_v57 = vpop.xlane.xlu1 %3491  ;;  %v8839_v39 = vsub.f32 %v8591_v36, %v3607_v29  ;;  %v3605_v41 = vmul.f32 0.0078125, %v3482_v37 }
 0x709   :  { %3472 = vst [vmem:[#allocation5 + $0x1f8] sm:$0xff] %v8820_v25  ;;  %v8828_v61 = vadd.f32 %v3325_v34, %v3169_v5  ;;  %v5908_v19 = vpop.f32.mrb[174].mxu0  ;;  %v3611_v36 = vmul.f32 0.0078125, %v3494_v18 }
 0x70a   :  { %3455 = vst [vmem:[#allocation5 + $0x170] sm:$0xff] %v8823_v10  ;;  %3470 = vst [vmem:[#allocation5 + $0x1e8] sm:$0xff] %v8825_v54  ;;  %v8832_v48 = vadd.f32 %v5908_v19, %v3328_v8  ;;  %v3172_v2 = vpop.f32.mrb[175].mxu0  ;;  %3565 = vadd.xlane.f32.xlu0 %v8823_v10  ;;  %v8845_v19 = vsub.f32 %v8600_v56, %v3608_v20  ;;  %v3606_v8 = vmul.f32 0.0078125, %v3484_v15  ;;  %v8848_v26 = vpop.xlane.xlu0 %3501  ;;  %v3612_v56 = vmul.f32 0.0078125, %v3496_v31 }
 0x70b   :  { %3453 = vst [vmem:[#allocation5 + $0x160] sm:$0xff] %v8828_v61  ;;  %v8836_v43 = vadd.f32 %v3326_v45, %v3172_v2  ;;  %v8851_v45 = vsub.f32 %v8596_v52, %v3605_v41  ;;  %v3735_v29 = vmul.f32 %v8839_v39, %v8839_v39  ;;  %v8864_v5 = vsub.f32 %v8611_v27, %v3611_v36 }
 0x70c   :  { %3456 = vst [vmem:[#allocation5 + $0x178] sm:$0xff] %v8832_v48  ;;  %3567 = vadd.xlane.f32.xlu1 %v8832_v48  ;;  %v8856_v37 = vpop.xlane.xlu1 %3503  ;;  %v8859_v34 = vsub.f32 %v8604_v51, %v3606_v8  ;;  %v3736_v15 = vmul.f32 %v8845_v19, %v8845_v19  ;;  %v3609_v52 = vmul.f32 0.0078125, %v3490_v13  ;;  %v8869_v2 = vsub.f32 %v8620_v60, %v3612_v56 }
 0x70d   :  { %3454 = vst [vmem:[#allocation5 + $0x168] sm:$0xff] %v8836_v43  ;;  %9951 = vst [vmem:[#allocation40_spill] sm:$0xff] %v8864_v5  ;;  %v3733_v18 = vmul.f32 %v8851_v45, %v8851_v45  ;;  %v3610_v41 = vmul.f32 0.0078125, %v3492_v57  ;;  %v3739_v13 = vmul.f32 %v8864_v5, %v8864_v5 }
 0x70e   :  { %3561 = vadd.xlane.f32.xlu0 %v8828_v61  ;;  %v3498_v20 = vpop.xlane.xlu0 %3497  ;;  %9952 = vst [vmem:[#allocation41_spill] sm:$0xff] %v8869_v2  ;;  %v3734_v51 = vmul.f32 %v8859_v34, %v8859_v34  ;;  %v8874_v8 = vsub.f32 %v8616_v59, %v3609_v52  ;;  %v3740_v60 = vmul.f32 %v8869_v2, %v8869_v2 }
 0x70f   :  { %v3613_v27 = vmul.f32 0.0078125, %v3498_v20  ;;  %v8879_v36 = vsub.f32 %v8624_v6, %v3610_v41 }
 0x710   :  { %3563 = vadd.xlane.f32.xlu1 %v8836_v43  ;;  %v3500_v31 = vpop.xlane.xlu1 %3499  ;;  %v3737_v59 = vmul.f32 %v8874_v8, %v8874_v8 }
 0x711   :  { %v8884_v57 = vsub.f32 %v8634_v33, %v3613_v27  ;;  %v3738_v6 = vmul.f32 %v8879_v36, %v8879_v36 }
 0x712   :  { %3805 = vadd.xlane.f32.xlu0 %v3735_v29  ;;  %v3614_v29 = vmul.f32 0.0078125, %v3500_v31 }
 0x713   :  { %9953 = vst [vmem:[#allocation42_spill] sm:$0xff] %v8884_v57  ;;  %v3741_v52 = vmul.f32 %v8884_v57, %v8884_v57 }
 0x714   :  { %3807 = vadd.xlane.f32.xlu1 %v3736_v15  ;;  %v8889_v56 = vsub.f32 %v8638_v4, %v3614_v29  ;;  %v3510_v15 = vpop.xlane.xlu0 %3509 }
 0x716   :  { %3801 = vadd.xlane.f32.xlu0 %v3733_v18  ;;  %9954 = vst [vmem:[#allocation43_spill] sm:$0xff] %v8889_v56  ;;  %v3512_v18 = vpop.xlane.xlu1 %3511  ;;  %v3742_v33 = vmul.f32 %v8889_v56, %v8889_v56 }
 0x717   :  { %v3620_v29 = vmul.f32 0.0078125, %v3512_v18 }
 0x718   :  { %3803 = vadd.xlane.f32.xlu1 %v3734_v51  ;;  %v3506_v20 = vpop.xlane.xlu0 %3505 }
 0x71a   :  { %3813 = vadd.xlane.f32.xlu0 %v3739_v13  ;;  %v3508_v4 = vpop.xlane.xlu1 %3507  ;;  %v3619_v13 = vmul.f32 0.0078125, %v3510_v15 }
 0x71b   :  { %v3618_v57 = vmul.f32 0.0078125, %v3508_v4 }
 0x71c   :  { %3815 = vadd.xlane.f32.xlu1 %v3740_v60  ;;  %v3518_v41 = vpop.xlane.xlu0 %3517 }
 0x71e   :  { %3809 = vadd.xlane.f32.xlu0 %v3737_v59  ;;  %v3520_v51 = vpop.xlane.xlu1 %3519  ;;  %v8907_v59 = vsub.f32 %v8647_v44, %v3619_v13 }
 0x71f   :  { %v3624_v5 = vmul.f32 0.0078125, %v3520_v51 }
 0x720   :  { %3811 = vadd.xlane.f32.xlu1 %v3738_v6  ;;  %v3514_v31 = vpop.xlane.xlu0 %3513  ;;  %v3617_v6 = vmul.f32 0.0078125, %v3506_v20  ;;  %v3747_v18 = vmul.f32 %v8907_v59, %v8907_v59  ;;  %v8921_v20 = vsub.f32 %v8656_v53, %v3618_v57 }
 0x721   :  { %v3621_v57 = vmul.f32 0.0078125, %v3514_v31 }
 0x722   :  { %3817 = vadd.xlane.f32.xlu0 %v3741_v52  ;;  %v3516_v27 = vpop.xlane.xlu1 %3515  ;;  %v8915_v15 = vsub.f32 %v8649_v7, %v3617_v6  ;;  %v3746_v7 = vmul.f32 %v8921_v20, %v8921_v20  ;;  %v3623_v6 = vmul.f32 0.0078125, %v3518_v41 }
 0x723   :  { %v8939_v41 = vsub.f32 %v8665_v1, %v3621_v57 }
 0x724   :  { %3819 = vadd.xlane.f32.xlu1 %v3742_v33  ;;  %v3526_v60 = vpop.xlane.xlu0 %3525  ;;  %v8911_v33 = vsub.f32 %v8652_v30, %v3620_v29  ;;  %v3745_v4 = vmul.f32 %v8915_v15, %v8915_v15  ;;  %v8931_v53 = vsub.f32 %v8662_v35, %v3623_v6 }
 0x725   :  { %v3627_v51 = vmul.f32 0.0078125, %v3526_v60  ;;  %v3749_v60 = vmul.f32 %v8939_v41, %v8939_v41 }
 0x726   :  { %3573 = vadd.xlane.f32.xlu0 %v8779_v9  ;;  %v3528_v52 = vpop.xlane.xlu1 %3527  ;;  %v3748_v30 = vmul.f32 %v8911_v33, %v8911_v33  ;;  %v3751_v35 = vmul.f32 %v8931_v53, %v8931_v53 }
 0x728   :  { %3575 = vadd.xlane.f32.xlu1 %v8784_v17  ;;  %v3522_v44 = vpop.xlane.xlu0 %3521 }
 0x729   :  { %v3625_v1 = vmul.f32 0.0078125, %v3522_v44 }
 0x72a   :  { %3569 = vadd.xlane.f32.xlu0 %v8781_v40  ;;  %v3524_v13 = vpop.xlane.xlu1 %3523 }
 0x72c   :  { %3571 = vadd.xlane.f32.xlu1 %v8787_v49  ;;  %v3534_v29 = vpop.xlane.xlu0 %3533 }
 0x72e   :  { %3581 = vadd.xlane.f32.xlu0 %v8791_v58  ;;  %v3536_v56 = vpop.xlane.xlu1 %3535 }
 0x730   :  { %3583 = vadd.xlane.f32.xlu1 %v8796_v3 }
 0x732   :  { %3577 = vadd.xlane.f32.xlu0 %v8793_v55  ;;  %v3532_v2 = vpop.xlane.xlu1 %3531 }
 0x734   :  { %3579 = vadd.xlane.f32.xlu1 %v8799_v11 }
 0x736   :  { %3589 = vadd.xlane.f32.xlu0 %v8803_v28  ;;  %v3544_v6 = vpop.xlane.xlu1 %3543 }
 0x738   :  { %3591 = vadd.xlane.f32.xlu1 %v8808_v46 }
 0x73a   :  { %3585 = vadd.xlane.f32.xlu0 %v8805_v62 }
 0x73c   :  { %3587 = vadd.xlane.f32.xlu1 %v8811_v23 }
 0x73e   :  { %3829 = vadd.xlane.f32.xlu0 %v3747_v18  ;;  %v3530_v18 = vpop.xlane.xlu0 %3529 }
 0x740   :  { %3831 = vadd.xlane.f32.xlu1 %v3748_v30  ;;  %v8935_v30 = vsub.f32 %v8668_v14, %v3624_v5 }
 0x742   :  { %3825 = vadd.xlane.f32.xlu0 %v3745_v4  ;;  %v3622_v4 = vmul.f32 0.0078125, %v3516_v27  ;;  %v3752_v14 = vmul.f32 %v8935_v30, %v8935_v30  ;;  %v3542_v5 = vpop.xlane.xlu0 %3541  ;;  %v8950_v27 = vsub.f32 %v8678_v47, %v3627_v51 }
 0x744   :  { %3827 = vadd.xlane.f32.xlu1 %v3746_v7  ;;  %v8945_v31 = vsub.f32 %v8672_v16, %v3622_v4  ;;  %v3628_v7 = vmul.f32 0.0078125, %v3528_v52  ;;  %9955 = vst [vmem:[#allocation44_spill] sm:$0xff] %v8950_v27  ;;  %v3626_v16 = vmul.f32 0.0078125, %v3524_v13  ;;  %v8960_v4 = vsub.f32 %v8681_v12, %v3625_v1  ;;  %v3540_v13 = vpop.xlane.xlu1 %3539 }
 0x745   :  { %v3755_v47 = vmul.f32 %v8950_v27, %v8950_v27  ;;  %v3629_v12 = vmul.f32 0.0078125, %v3530_v18 }
 0x746   :  { %3597 = vadd.xlane.f32.xlu0 %v8815_v21  ;;  %v8955_v57 = vsub.f32 %v8684_v22, %v3628_v7  ;;  %v3750_v52 = vmul.f32 %v8945_v31, %v8945_v31  ;;  %9956 = vst [vmem:[#allocation45_spill] sm:$0xff] %v8960_v4  ;;  %v3538_v44 = vpop.xlane.xlu0 %3537  ;;  %v8965_v51 = vsub.f32 %v8688_v63, %v3626_v16 }
 0x747   :  { %v8980_v16 = vsub.f32 %v8697_v50, %v3629_v12 }
 0x748   :  { %3599 = vadd.xlane.f32.xlu1 %v8820_v25  ;;  %9957 = vst [vmem:[#allocation46_spill] sm:$0xff] %v8965_v51  ;;  %v3756_v22 = vmul.f32 %v8955_v57, %v8955_v57  ;;  %v3754_v63 = vmul.f32 %v8965_v51, %v8965_v51  ;;  %v3552_v18 = vpop.xlane.xlu1 %3551 }
 0x749   :  { %9960 = vst [vmem:[#allocation31_spill] sm:$0xff] %v8980_v16  ;;  %v3757_v50 = vmul.f32 %v8980_v16, %v8980_v16 }
 0x74a   :  { %3593 = vadd.xlane.f32.xlu0 %v8817_v42 }
 0x74c   :  { %3595 = vadd.xlane.f32.xlu1 %v8825_v54 }
 0x74e   :  { %3837 = vadd.xlane.f32.xlu0 %v3751_v35  ;;  %v3631_v35 = vmul.f32 0.0078125, %v3534_v29  ;;  %v3753_v29 = vmul.f32 %v8960_v4, %v8960_v4 }
 0x750   :  { %3839 = vadd.xlane.f32.xlu1 %v3752_v14  ;;  %v3632_v14 = vmul.f32 0.0078125, %v3536_v56  ;;  %v8970_v7 = vsub.f32 %v8694_v0, %v3631_v35  ;;  %v3550_v56 = vpop.xlane.xlu0 %3549 }
 0x752   :  { %3833 = vadd.xlane.f32.xlu0 %v3749_v60  ;;  %9958 = vst [vmem:[#allocation22_spill] sm:$0xff] %v8970_v7  ;;  %v8975_v1 = vsub.f32 %v8700_v24, %v3632_v14  ;;  %v3630_v60 = vmul.f32 0.0078125, %v3532_v2  ;;  %v3759_v0 = vmul.f32 %v8970_v7, %v8970_v7  ;;  %v3636_v24 = vmul.f32 0.0078125, %v3544_v6  ;;  %v3548_v6 = vpop.xlane.xlu1 %3547 }
 0x753   :  { %v3633_v14 = vmul.f32 0.0078125, %v3538_v44 }
 0x754   :  { %3835 = vadd.xlane.f32.xlu1 %v3750_v52  ;;  %9959 = vst [vmem:[#allocation27_spill] sm:$0xff] %v8975_v1  ;;  %v3635_v52 = vmul.f32 0.0078125, %v3542_v5  ;;  %v8985_v35 = vsub.f32 %v8704_v38, %v3630_v60  ;;  %v3760_v2 = vmul.f32 %v8975_v1, %v8975_v1  ;;  %v3546_v5 = vpop.xlane.xlu0 %3545  ;;  %v9965_v60 = vld [vmem:[#allocation21_spill] sm:$0xff] }
 0x756   :  { %3845 = vadd.xlane.f32.xlu0 %v3755_v47  ;;  %9961 = vst [vmem:[#allocation9_spill] sm:$0xff] %v8985_v35  ;;  %v8990_v47 = vsub.f32 %v8710_v32, %v3635_v52  ;;  %v3758_v38 = vmul.f32 %v8985_v35, %v8985_v35  ;;  %v3639_v32 = vmul.f32 0.0078125, %v3550_v56  ;;  %v9967_v52 = vld [vmem:[#allocation23_spill] sm:$0xff]  ;;  %v3637_v35 = vmul.f32 0.0078125, %v3546_v5 }
 0x758   :  { %3847 = vadd.xlane.f32.xlu1 %v3756_v22  ;;  %9962 = vst [vmem:[#allocation8_spill] sm:$0xff] %v8990_v47  ;;  %v9963_v22 = vld [vmem:[#allocation20_spill] sm:$0xff]  ;;  %v3763_v44 = vmul.f32 %v8990_v47, %v8990_v47 }
 0x759   :  { %v8995_v12 = vsub.f32 %v9963_v22, %v3636_v24  ;;  %v3558_v24 = vpop.xlane.xlu0 %3557 }
 0x75a   :  { %3841 = vadd.xlane.f32.xlu0 %v3753_v29  ;;  %v3634_v29 = vmul.f32 0.0078125, %v3540_v13 }
 0x75b   :  { %9964 = vst [vmem:[#allocation30_spill] sm:$0xff] %v8995_v12  ;;  %v3764_v13 = vmul.f32 %v8995_v12, %v8995_v12  ;;  %v3643_v12 = vmul.f32 0.0078125, %v3558_v24 }
 0x75c   :  { %3843 = vadd.xlane.f32.xlu1 %v3754_v63  ;;  %v9000_v63 = vsub.f32 %v9965_v60, %v3633_v14  ;;  %v3560_v14 = vpop.xlane.xlu1 %3559 }
 0x75e   :  { %3853 = vadd.xlane.f32.xlu0 %v3759_v0  ;;  %9966 = vst [vmem:[#allocation24_spill] sm:$0xff] %v9000_v63  ;;  %v9005_v0 = vsub.f32 %v9967_v52, %v3634_v29  ;;  %v3761_v56 = vmul.f32 %v9000_v63, %v9000_v63  ;;  %v3638_v29 = vmul.f32 0.0078125, %v3548_v6  ;;  %v3644_v63 = vmul.f32 0.0078125, %v3560_v14 }
 0x760   :  { %3855 = vadd.xlane.f32.xlu1 %v3760_v2  ;;  %9968 = vst [vmem:[#allocation25_spill] sm:$0xff] %v9005_v0  ;;  %v3640_v2 = vmul.f32 0.0078125, %v3552_v18  ;;  %v3762_v18 = vmul.f32 %v9005_v0, %v9005_v0 }
 0x762   :  { %3849 = vadd.xlane.f32.xlu0 %v3757_v50  ;;  %v9969_v50 = vld [vmem:[#allocation26_spill] sm:$0xff] }
 0x763   :  { %v9010_v22 = vsub.f32 %v9969_v50, %v3639_v32  ;;  %v3554_v32 = vpop.xlane.xlu0 %3553 }
 0x764   :  { %3851 = vadd.xlane.f32.xlu1 %v3758_v38  ;;  %v9971_v38 = vld [vmem:[#allocation29_spill] sm:$0xff] }
 0x765   :  { %9970 = vst [vmem:[#allocation32_spill] sm:$0xff] %v9010_v22  ;;  %v9015_v60 = vsub.f32 %v9971_v38, %v3640_v2  ;;  %v3767_v5 = vmul.f32 %v9010_v22, %v9010_v22  ;;  %v3556_v2 = vpop.xlane.xlu1 %3555 }
 0x766   :  { %3861 = vadd.xlane.f32.xlu0 %v3763_v44  ;;  %v9973_v44 = vld [vmem:[#allocation37_spill] sm:$0xff]  ;;  %v3642_v22 = vmul.f32 0.0078125, %v3556_v2 }
 0x767   :  { %9972 = vst [vmem:[#allocation11_spill] sm:$0xff] %v9015_v60  ;;  %v9020_v52 = vsub.f32 %v9973_v44, %v3637_v35  ;;  %v3768_v6 = vmul.f32 %v9015_v60, %v9015_v60  ;;  %v3641_v35 = vmul.f32 0.0078125, %v3554_v32  ;;  %v9983_v32 = vld [vmem:[#allocation17_spill] sm:$0xff] }
 0x768   :  { %3863 = vadd.xlane.f32.xlu1 %v3764_v13  ;;  %v9975_v13 = vld [vmem:[#allocation28_spill] sm:$0xff] }
 0x769   :  { %9974 = vst [vmem:[#allocation10_spill] sm:$0xff] %v9020_v52  ;;  %v9025_v50 = vsub.f32 %v9975_v13, %v3638_v29  ;;  %v3765_v24 = vmul.f32 %v9020_v52, %v9020_v52  ;;  %v9981_v29 = vld [vmem:[#allocation33_spill] sm:$0xff]  ;;  %v9045_v13 = vsub.f32 %v9983_v32, %v3642_v22 }
 0x76a   :  { %3857 = vadd.xlane.f32.xlu0 %v3761_v56  ;;  %v9977_v56 = vld [vmem:[#allocation34_spill] sm:$0xff] }
 0x76b   :  { %9976 = vst [vmem:[#allocation12_spill] sm:$0xff] %v9025_v50  ;;  %v9030_v38 = vsub.f32 %v9977_v56, %v3643_v12  ;;  %v3766_v14 = vmul.f32 %v9025_v50, %v9025_v50  ;;  %9984 = vst [vmem:[#allocation19_spill] sm:$0xff] %v9045_v13  ;;  %v3770_v2 = vmul.f32 %v9045_v13, %v9045_v13  ;;  %v3798_v56 = vpop.xlane.xlu0 %3797 }
 0x76c   :  { %3859 = vadd.xlane.f32.xlu1 %v3762_v18  ;;  %v9979_v18 = vld [vmem:[#allocation16_spill] sm:$0xff] }
 0x76d   :  { %9978 = vst [vmem:[#allocation15_spill] sm:$0xff] %v9030_v38  ;;  %v9035_v44 = vsub.f32 %v9979_v18, %v3644_v63  ;;  %v3771_v12 = vmul.f32 %v9030_v38, %v9030_v38 }
 0x76e   :  { %3869 = vadd.xlane.f32.xlu0 %v3767_v5  ;;  %v9040_v5 = vsub.f32 %v9981_v29, %v3641_v35  ;;  %v3800_v35 = vpop.xlane.xlu1 %3799 }
 0x76f   :  { %9980 = vst [vmem:[#allocation14_spill] sm:$0xff] %v9035_v44  ;;  %v3772_v63 = vmul.f32 %v9035_v44, %v9035_v44 }
 0x770   :  { %3871 = vadd.xlane.f32.xlu1 %v3768_v6  ;;  %9982 = vst [vmem:[#allocation13_spill] sm:$0xff] %v9040_v5  ;;  %v3769_v6 = vmul.f32 %v9040_v5, %v9040_v5 }
 0x772   :  { %3865 = vadd.xlane.f32.xlu0 %v3765_v24  ;;  %v3794_v24 = vpop.xlane.xlu0 %3793  ;;  %v3796_v18 = vpop.xlane.xlu1 %3795 }
 0x773   :  { %v3922_v4 = vmul.f32 0.0078125, %v3796_v18 }
 0x774   :  { %3867 = vadd.xlane.f32.xlu1 %v3766_v14 }
 0x776   :  { %3877 = vadd.xlane.f32.xlu0 %v3771_v12 }
 0x778   :  { %3879 = vadd.xlane.f32.xlu1 %v3772_v63 }
 0x77a   :  { %3873 = vadd.xlane.f32.xlu0 %v3769_v6 }
 0x77c   :  { %3875 = vadd.xlane.f32.xlu1 %v3770_v2 }
 0x797   :  { %v9053_v14 = vpop.xlane.xlu0 %3565 }
 0x799   :  { %v9055_v22 = vpop.xlane.xlu1 %3567 }
 0x79b   :  { %v3562_v29 = vpop.xlane.xlu0 %3561 }
 0x79c   :  { %v3645_v12 = vmul.f32 0.0078125, %v3562_v29 }
 0x79d   :  { %v3564_v32 = vpop.xlane.xlu1 %3563 }
 0x79e   :  { %v9058_v63 = vsub.f32 %v8828_v61, %v3645_v12  ;;  %v3646_v5 = vmul.f32 0.0078125, %v3564_v32 }
 0x79f   :  { %v9060_v6 = vpop.xlane.xlu0 %3805 }
 0x7a0   :  { %9985 = vst [vmem:[#allocation18_spill] sm:$0xff] %v9058_v63  ;;  %v9063_v44 = vsub.f32 %v8836_v43, %v3646_v5  ;;  %v3773_v2 = vmul.f32 %v9058_v63, %v9058_v63 }
 0x7a1   :  { %v9067_v13 = vpop.xlane.xlu1 %3807 }
 0x7a2   :  { %9986 = vst [vmem:[#allocation20_spill] sm:$0xff] %v9063_v44  ;;  %3881 = vadd.xlane.f32.xlu0 %v3773_v2  ;;  %v3774_v38 = vmul.f32 %v9063_v44, %v9063_v44 }
 0x7a3   :  { %v9071_v29 = vpop.xlane.xlu0 %3801 }
 0x7a4   :  { %3883 = vadd.xlane.f32.xlu1 %v3774_v38 }
 0x7a5   :  { %v9073_v61 = vpop.xlane.xlu1 %3803 }
 0x7a7   :  { %v9075_v12 = vpop.xlane.xlu0 %3813 }
 0x7a9   :  { %v9077_v32 = vpop.xlane.xlu1 %3815 }
 0x7ab   :  { %v9079_v43 = vpop.xlane.xlu0 %3809 }
 0x7ad   :  { %v9081_v5 = vpop.xlane.xlu1 %3811 }
 0x7af   :  { %v9083_v63 = vpop.xlane.xlu0 %3817 }
 0x7b1   :  { %v9085_v52 = vpop.xlane.xlu1 %3819 }
 0x7b3   :  { %v3574_v2 = vpop.xlane.xlu0 %3573 }
 0x7b4   :  { %v3651_v50 = vmul.f32 0.0078125, %v3574_v2 }
 0x7b5   :  { %v3576_v44 = vpop.xlane.xlu1 %3575 }
 0x7b6   :  { %v9088_v60 = vsub.f32 %v8779_v9, %v3651_v50  ;;  %v3652_v38 = vmul.f32 0.0078125, %v3576_v44  ;;  %v3924_v50 = vmul.f32 0.0078125, %v3800_v35 }
 0x7b7   :  { %v3570_v0 = vpop.xlane.xlu0 %3569 }
 0x7b8   :  { %9987 = vst [vmem:[#allocation21_spill] sm:$0xff] %v9088_v60  ;;  %v9091_v47 = vsub.f32 %v8784_v17, %v3652_v38  ;;  %v3649_v7 = vmul.f32 0.0078125, %v3570_v0  ;;  %v3779_v16 = vmul.f32 %v9088_v60, %v9088_v60  ;;  %v3921_v38 = vmul.f32 0.0078125, %v3794_v24 }
 0x7b9   :  { %v3572_v1 = vpop.xlane.xlu1 %3571 }
 0x7ba   :  { %v9096_v51 = vsub.f32 %v8781_v40, %v3649_v7  ;;  %v3650_v27 = vmul.f32 0.0078125, %v3572_v1  ;;  %3893 = vadd.xlane.f32.xlu0 %v3779_v16  ;;  %v3780_v2 = vmul.f32 %v9091_v47, %v9091_v47  ;;  %v3923_v16 = vmul.f32 0.0078125, %v3798_v56 }
 0x7bb   :  { %v3582_v9 = vpop.xlane.xlu0 %3581  ;;  %v3985_v18 = vadd.f32 1e-08, %v3921_v38 }
 0x7bc   :  { %v9101_v44 = vsub.f32 %v8787_v49, %v3650_v27  ;;  %v3655_v17 = vmul.f32 0.0078125, %v3582_v9  ;;  %3895 = vadd.xlane.f32.xlu1 %v3780_v2  ;;  %v3777_v0 = vmul.f32 %v9096_v51, %v9096_v51  ;;  %v3988_v49 = vadd.f32 1e-08, %v3924_v50 }
 0x7bd   :  { %v3584_v60 = vpop.xlane.xlu1 %3583  ;;  %v3987_v50 = vadd.f32 1e-08, %v3923_v16 }
 0x7be   :  { %v9106_v40 = vsub.f32 %v8791_v58, %v3655_v17  ;;  %v3656_v7 = vmul.f32 0.0078125, %v3584_v60  ;;  %3889 = vadd.xlane.f32.xlu0 %v3777_v0  ;;  %v3778_v1 = vmul.f32 %v9101_v44, %v9101_v44  ;;  %v3986_v58 = vadd.f32 1e-08, %v3922_v4 }
 0x7bf   :  { %v3578_v35 = vpop.xlane.xlu0 %3577  ;;  %6383 = vrsqrt.f32 %v3988_v49 }
 0x7c0   :  { %v9111_v27 = vsub.f32 %v8796_v3, %v3656_v7  ;;  %v3653_v2 = vmul.f32 0.0078125, %v3578_v35  ;;  %3891 = vadd.xlane.f32.xlu1 %v3778_v1  ;;  %v3783_v24 = vmul.f32 %v9106_v40, %v9106_v40  ;;  %6385 = vrsqrt.f32 %v3985_v18 }
 0x7c1   :  { %v3580_v9 = vpop.xlane.xlu1 %3579  ;;  %6387 = vrsqrt.f32 %v3986_v58  ;;  %v3615_v58 = vmul.f32 0.0078125, %v8848_v26 }
 0x7c2   :  { %v9116_v60 = vsub.f32 %v8793_v55, %v3653_v2  ;;  %v3654_v17 = vmul.f32 0.0078125, %v3580_v9  ;;  %3901 = vadd.xlane.f32.xlu0 %v3783_v24  ;;  %v3784_v56 = vmul.f32 %v9111_v27, %v9111_v27  ;;  %6389 = vrsqrt.f32 %v3987_v50 }
 0x7c3   :  { %v3590_v0 = vpop.xlane.xlu0 %3589 }
 0x7c4   :  { %v9121_v3 = vsub.f32 %v8799_v11, %v3654_v17  ;;  %v3659_v7 = vmul.f32 0.0078125, %v3590_v0  ;;  %3903 = vadd.xlane.f32.xlu1 %v3784_v56  ;;  %v3781_v38 = vmul.f32 %v9116_v60, %v9116_v60  ;;  %v3616_v0 = vmul.f32 0.0078125, %v8856_v37 }
 0x7c5   :  { %v3592_v4 = vpop.xlane.xlu1 %3591 }
 0x7c6   :  { %v9126_v55 = vsub.f32 %v8803_v28, %v3659_v7  ;;  %v3660_v1 = vmul.f32 0.0078125, %v3592_v4  ;;  %3897 = vadd.xlane.f32.xlu0 %v3781_v38  ;;  %v3782_v16 = vmul.f32 %v9121_v3, %v9121_v3 }
 0x7c7   :  { %v3586_v35 = vpop.xlane.xlu0 %3585 }
 0x7c8   :  { %9988 = vst [vmem:[#allocation23_spill] sm:$0xff] %v9126_v55  ;;  %v9131_v11 = vsub.f32 %v8808_v46, %v3660_v1  ;;  %v3657_v49 = vmul.f32 0.0078125, %v3586_v35  ;;  %3899 = vadd.xlane.f32.xlu1 %v3782_v16  ;;  %v3787_v2 = vmul.f32 %v9126_v55, %v9126_v55  ;;  %v6515_v16 = vld [vmem:[#allocation5 + $0x70] sm:$0xff]  ;;  %v9993_v55 = vld [vmem:[#allocation35_spill] sm:$0xff] }
 0x7c9   :  { %v3588_v24 = vpop.xlane.xlu1 %3587  ;;  %v6384_v7 = vpop.eup %6383  ;;  %v9149_v35 = vsub.f32 %v6515_v16, %v3615_v58  ;;  %v9992_v58 = vld [vmem:[#allocation36_spill] sm:$0xff] }
 0x7ca   :  { %v9136_v18 = vsub.f32 %v8805_v62, %v3657_v49  ;;  %v3658_v28 = vmul.f32 0.0078125, %v3588_v24  ;;  %3909 = vadd.xlane.f32.xlu0 %v3787_v2  ;;  %v3788_v9 = vmul.f32 %v9131_v11, %v9131_v11  ;;  %v6386_v26 = vpop.eup %6385 }
 0x7cb   :  { %v3830_v17 = vpop.xlane.xlu0 %3829  ;;  %9991 = vst [vmem:[#allocation37_spill] sm:$0xff] %v9149_v35  ;;  %v6388_v49 = vpop.eup %6387  ;;  %v4113_v16 = vmul.f32 %v6386_v26, %v9992_v58 }
 0x7cc   :  { %9989 = vst [vmem:[#allocation26_spill] sm:$0xff] %v9136_v18  ;;  %v9142_v46 = vsub.f32 %v8811_v23, %v3658_v28  ;;  %v3939_v56 = vmul.f32 0.0078125, %v3830_v17  ;;  %3911 = vadd.xlane.f32.xlu1 %v3788_v9  ;;  %v3785_v50 = vmul.f32 %v9136_v18, %v9136_v18  ;;  %v6516_v28 = vld [vmem:[#allocation5 + $0x78] sm:$0xff]  ;;  %v6390_v17 = vpop.eup %6389 }
 0x7cd   :  { %v3832_v62 = vpop.xlane.xlu1 %3831  ;;  %v9151_v9 = vsub.f32 %v6516_v28, %v3616_v0  ;;  %v3927_v0 = vmul.f32 0.0078125, %v9060_v6  ;;  %v9995_v18 = vld [vmem:[#allocation39_spill] sm:$0xff] }
 0x7ce   :  { %9990 = vst [vmem:[#allocation29_spill] sm:$0xff] %v9142_v46  ;;  %v4003_v38 = vadd.f32 1e-08, %v3939_v56  ;;  %v3940_v4 = vmul.f32 0.0078125, %v3832_v62  ;;  %3905 = vadd.xlane.f32.xlu0 %v3785_v50  ;;  %v3786_v1 = vmul.f32 %v9142_v46, %v9142_v46  ;;  %v9155_v46 = vmul.f32 %v9149_v35, %v9149_v35 }
 0x7cf   :  { %v3826_v23 = vpop.xlane.xlu0 %3825  ;;  %v9165_v35 = vmul.f32 %v9151_v9, %v9151_v9  ;;  %v4115_v26 = vmul.f32 %v6390_v17, %v9995_v18 }
 0x7d0   :  { %v4004_v2 = vadd.f32 1e-08, %v3940_v4  ;;  %v3937_v24 = vmul.f32 0.0078125, %v3826_v23  ;;  %3907 = vadd.xlane.f32.xlu1 %v3786_v1  ;;  %6391 = vrsqrt.f32 %v4003_v38  ;;  %v4114_v4 = vmul.f32 %v6388_v49, %v9993_v55  ;;  %v9994_v23 = vld [vmem:[#allocation38_spill] sm:$0xff] }
 0x7d1   :  { %v3828_v37 = vpop.xlane.xlu1 %3827  ;;  %v4116_v1 = vmul.f32 %v6384_v7, %v9994_v23  ;;  %v3925_v55 = vmul.f32 0.0078125, %v9071_v29  ;;  %v3991_v29 = vadd.f32 1e-08, %v3927_v0 }
 0x7d2   :  { %6393 = vrsqrt.f32 %v4004_v2  ;;  %v4001_v56 = vadd.f32 1e-08, %v3937_v24  ;;  %v3938_v50 = vmul.f32 0.0078125, %v3828_v37  ;;  %v3647_v2 = vmul.f32 0.0078125, %v9053_v14  ;;  %v9175_v14 = vld [vmem:[%s9651_s2 + $0x2] ss:$0 sm:$0xff] }
 0x7d3   :  { %v3598_v62 = vpop.xlane.xlu0 %3597  ;;  %v3928_v24 = vmul.f32 0.0078125, %v9067_v13  ;;  %v3926_v13 = vmul.f32 0.0078125, %v9073_v61  ;;  %v4184_v18 = vmul.f32 %v9175_v14, %v4116_v1  ;;  %v3648_v61 = vmul.f32 0.0078125, %v9055_v22 }
 0x7d4   :  { %6395 = vrsqrt.f32 %v4001_v56  ;;  %v4002_v38 = vadd.f32 1e-08, %v3938_v50  ;;  %v3663_v28 = vmul.f32 0.0078125, %v3598_v62  ;;  %v4181_v56 = vmul.f32 %v9175_v14, %v4113_v16 }
 0x7d5   :  { %v3600_v37 = vpop.xlane.xlu1 %3599  ;;  %v4182_v50 = vmul.f32 %v9175_v14, %v4114_v4  ;;  %v9187_v58 = vsub.f32 %v8823_v10, %v3647_v2  ;;  %v3992_v23 = vadd.f32 1e-08, %v3928_v24  ;;  %v9191_v16 = vmul.f32 %v9175_v14, %v4115_v26  ;;  %v9201_v10 = vld [vmem:[%s9651_s2 + $0x3] ss:$0 sm:$0xff] }
 0x7d6   :  { %6397 = vrsqrt.f32 %v4002_v38  ;;  %v9170_v7 = vsub.f32 %v8815_v21, %v3663_v28  ;;  %v3664_v6 = vmul.f32 0.0078125, %v3600_v37  ;;  %v3989_v4 = vadd.f32 1e-08, %v3925_v55 }
 0x7d7   :  { %v3594_v49 = vpop.xlane.xlu0 %3593  ;;  %v3990_v28 = vadd.f32 1e-08, %v3926_v13  ;;  %v9204_v24 = vadd.f32 %v9201_v10, %v4181_v56  ;;  %v9207_v37 = vadd.f32 %v9201_v10, %v4182_v50  ;;  %6399 = vrsqrt.f32 %v3991_v29 }
 0x7d8   :  { %v9182_v17 = vsub.f32 %v8820_v25, %v3664_v6  ;;  %v3661_v21 = vmul.f32 0.0078125, %v3594_v49  ;;  %v3791_v62 = vmul.f32 %v9170_v7, %v9170_v7  ;;  %v9218_v49 = vsub.f32 %v8832_v48, %v3648_v61 }
 0x7d9   :  { %v3596_v38 = vpop.xlane.xlu1 %3595  ;;  %6401 = vrsqrt.f32 %v3992_v23  ;;  %v3775_v50 = vmul.f32 %v9187_v58, %v9187_v58 }
 0x7da   :  { %v9194_v1 = vsub.f32 %v8817_v42, %v3661_v21  ;;  %v3662_v25 = vmul.f32 0.0078125, %v3596_v38  ;;  %3917 = vadd.xlane.f32.xlu0 %v3791_v62  ;;  %v3792_v0 = vmul.f32 %v9182_v17, %v9182_v17  ;;  %v6392_v22 = vpop.eup %6391  ;;  %v9210_v42 = vadd.f32 %v9201_v10, %v4184_v18 }
 0x7db   :  { %v3838_v2 = vpop.xlane.xlu0 %3837  ;;  %6403 = vrsqrt.f32 %v3989_v4  ;;  %v3930_v38 = vmul.f32 0.0078125, %v9081_v5  ;;  %v4131_v23 = vmul.f32 %v6392_v22, %v8907_v59  ;;  %v3776_v59 = vmul.f32 %v9218_v49, %v9218_v49 }
 0x7dc   :  { %v6394_v26 = vpop.eup %6393  ;;  %v9213_v55 = vsub.f32 %v8825_v54, %v3662_v25  ;;  %v3943_v6 = vmul.f32 0.0078125, %v3838_v2  ;;  %3919 = vadd.xlane.f32.xlu1 %v3792_v0  ;;  %v3789_v13 = vmul.f32 %v9194_v1, %v9194_v1  ;;  %6405 = vrsqrt.f32 %v3990_v28 }
 0x7dd   :  { %v3840_v56 = vpop.xlane.xlu1 %3839  ;;  %v4132_v18 = vmul.f32 %v6394_v26, %v8911_v33  ;;  %v3932_v0 = vmul.f32 0.0078125, %v9077_v32  ;;  %v3929_v33 = vmul.f32 0.0078125, %v9079_v43  ;;  %v3931_v32 = vmul.f32 0.0078125, %v9075_v12 }
 0x7de   :  { %v6396_v21 = vpop.eup %6395  ;;  %v4007_v29 = vadd.f32 1e-08, %v3943_v6  ;;  %v3944_v54 = vmul.f32 0.0078125, %v3840_v56  ;;  %3913 = vadd.xlane.f32.xlu0 %v3789_v13  ;;  %v3790_v62 = vmul.f32 %v9213_v55, %v9213_v55  ;;  %v3994_v43 = vadd.f32 1e-08, %v3930_v38 }
 0x7df   :  { %v3834_v48 = vpop.xlane.xlu0 %3833  ;;  %v4129_v61 = vmul.f32 %v6396_v21, %v8915_v15  ;;  %v4200_v5 = vmul.f32 %v9175_v14, %v4132_v18  ;;  %v3993_v21 = vadd.f32 1e-08, %v3929_v33 }
 0x7e0   :  { %v6398_v25 = vpop.eup %6397  ;;  %v4008_v4 = vadd.f32 1e-08, %v3944_v54  ;;  %v3941_v2 = vmul.f32 0.0078125, %v3834_v48  ;;  %3915 = vadd.xlane.f32.xlu1 %v3790_v62  ;;  %6407 = vrsqrt.f32 %v4007_v29  ;;  %v3996_v54 = vadd.f32 1e-08, %v3932_v0 }
 0x7e1   :  { %v3836_v26 = vpop.xlane.xlu1 %3835  ;;  %v4130_v6 = vmul.f32 %v6398_v25, %v8921_v20  ;;  %v4197_v28 = vmul.f32 %v9175_v14, %v4129_v61  ;;  %v4199_v20 = vmul.f32 %v9175_v14, %v4131_v23  ;;  %v4268_v12 = vadd.f32 %v9201_v10, %v4200_v5  ;;  %v6400_v38 = vpop.eup %6399 }
 0x7e2   :  { %6409 = vrsqrt.f32 %v4008_v4  ;;  %v4005_v15 = vadd.f32 1e-08, %v3941_v2  ;;  %v3942_v13 = vmul.f32 0.0078125, %v3836_v26  ;;  %3821 = vadd.xlane.f32.xlu0 %v9155_v46  ;;  %v3933_v61 = vmul.f32 0.0078125, %v9083_v63 }
 0x7e3   :  { %v3846_v22 = vpop.xlane.xlu0 %3845  ;;  %v4198_v56 = vmul.f32 %v9175_v14, %v4130_v6  ;;  %v4265_v46 = vadd.f32 %v9201_v10, %v4197_v28  ;;  %v6402_v33 = vpop.eup %6401  ;;  %v3934_v4 = vmul.f32 0.0078125, %v9085_v52  ;;  %v4267_v2 = vadd.f32 %v9201_v10, %v4199_v20 }
 0x7e4   :  { %6411 = vrsqrt.f32 %v4005_v15  ;;  %v4006_v29 = vadd.f32 1e-08, %v3942_v13  ;;  %v3947_v18 = vmul.f32 0.0078125, %v3846_v22  ;;  %3823 = vadd.xlane.f32.xlu1 %v9165_v35  ;;  %v4313_v63 = vpack.c.bf16 %v9207_v37, %v9204_v24 }
 0x7e5   :  { %v3848_v62 = vpop.xlane.xlu1 %3847  ;;  %v4266_v48 = vadd.f32 %v9201_v10, %v4198_v56  ;;  %v6404_v26 = vpop.eup %6403  ;;  %v3995_v15 = vadd.f32 1e-08, %v3931_v32  ;;  %v4322_v13 = vpack.c.bf16 %v4268_v12, %v4267_v2  ;;  %v4251_v52 = vadd.f32 %v9201_v10, %v9191_v16 }
 0x7e6   :  { %6413 = vrsqrt.f32 %v4006_v29  ;;  %v4011_v25 = vadd.f32 1e-08, %v3947_v18  ;;  %v3948_v23 = vmul.f32 0.0078125, %v3848_v62  ;;  %3885 = vadd.xlane.f32.xlu0 %v3775_v50  ;;  %v6406_v5 = vpop.eup %6405  ;;  %v3997_v20 = vadd.f32 1e-08, %v3933_v61 }
 0x7e7   :  { %6415 = vrsqrt.f32 %v3994_v43  ;;  %v3842_v35 = vpop.xlane.xlu0 %3841  ;;  %v4321_v0 = vpack.c.bf16 %v4266_v48, %v4265_v46  ;;  %v4314_v24 = vpack.c.bf16 %v9210_v42, %v4251_v52  ;;  %v4118_v18 = vmul.f32 %v6406_v5, %v8859_v34 }
 0x7e8   :  { %6417 = vrsqrt.f32 %v3993_v21  ;;  %v4012_v6 = vadd.f32 1e-08, %v3948_v23  ;;  %v3945_v28 = vmul.f32 0.0078125, %v3842_v35  ;;  %3887 = vadd.xlane.f32.xlu1 %v3776_v59  ;;  %v3998_v59 = vadd.f32 1e-08, %v3934_v4 }
 0x7e9   :  { %6419 = vrsqrt.f32 %v4011_v25  ;;  %v3844_v50 = vpop.xlane.xlu1 %3843  ;;  %4505 = vmatprep.subr.bf16.mxu0 %v4321_v0  ;;  %v4119_v46 = vmul.f32 %v6400_v38, %v8839_v39  ;;  %v4120_v34 = vmul.f32 %v6402_v33, %v8845_v19  ;;  %v4186_v39 = vmul.f32 %v9175_v14, %v4118_v18  ;;  %v9996_v18 = vld [vmem:[#allocation45_spill] sm:$0xff] }
 0x7ea   :  { %6421 = vrsqrt.f32 %v4012_v6  ;;  %v4009_v43 = vadd.f32 1e-08, %v3945_v28  ;;  %v3946_v22 = vmul.f32 0.0078125, %v3844_v50  ;;  %4506 = vmatpush1.bf16.msra.mxu0 %v4313_v63  ;;  %v6408_v56 = vpop.eup %6407 }
 0x7eb   :  { %6423 = vrsqrt.f32 %v3996_v54  ;;  %4507 = vmatprep.subr.bf16.mxu0 %v4322_v13  ;;  %v3854_v21 = vpop.xlane.xlu0 %3853  ;;  %v4117_v54 = vmul.f32 %v6404_v26, %v8851_v45  ;;  %v4135_v23 = vmul.f32 %v6408_v56, %v8931_v53  ;;  %v4188_v5 = vmul.f32 %v9175_v14, %v4120_v34 }
 0x7ec   :  { %v6410_v37 = vpop.eup %6409  ;;  %6425 = vrsqrt.f32 %v4009_v43  ;;  %v4010_v32 = vadd.f32 1e-08, %v3946_v22  ;;  %v3951_v29 = vmul.f32 0.0078125, %v3854_v21  ;;  %v4254_v50 = vadd.f32 %v9201_v10, %v4186_v39  ;;  %v10000_v39 = vld [vmem:[#allocation40_spill] sm:$0xff] }
 0x7ed   :  { %6427 = vrsqrt.f32 %v3995_v15  ;;  %v3856_v16 = vpop.xlane.xlu1 %3855  ;;  %v4136_v62 = vmul.f32 %v6410_v37, %v8935_v30  ;;  %v4185_v19 = vmul.f32 %v9175_v14, %v4117_v54  ;;  %v4203_v63 = vmul.f32 %v9175_v14, %v4135_v23 }
 0x7ee   :  { %v6412_v48 = vpop.eup %6411  ;;  %6429 = vrsqrt.f32 %v4010_v32  ;;  %v4015_v12 = vadd.f32 1e-08, %v3951_v29  ;;  %v3952_v61 = vmul.f32 0.0078125, %v3856_v16  ;;  %4508 = vmatpush1.bf16.msra.mxu0 %v4314_v24  ;;  %v4187_v37 = vmul.f32 %v9175_v14, %v4119_v46  ;;  %v9999_v46 = vld [vmem:[#allocation46_spill] sm:$0xff] }
 0x7ef   :  { %6431 = vrsqrt.f32 %v3998_v59  ;;  %v3850_v42 = vpop.xlane.xlu0 %3849  ;;  %v4133_v25 = vmul.f32 %v6412_v48, %v8939_v41  ;;  %v4204_v26 = vmul.f32 %v9175_v14, %v4136_v62  ;;  %v4253_v24 = vadd.f32 %v9201_v10, %v4185_v19  ;;  %v9997_v62 = vld [vmem:[#allocation44_spill] sm:$0xff] }
 0x7f0   :  { %v6414_v4 = vpop.eup %6413  ;;  %6433 = vrsqrt.f32 %v3997_v20  ;;  %v4016_v30 = vadd.f32 1e-08, %v3952_v61  ;;  %v3949_v35 = vmul.f32 0.0078125, %v3850_v42 }
 0x7f1   :  { %v6416_v38 = vpop.eup %6415  ;;  %6435 = vrsqrt.f32 %v4015_v12  ;;  %v3852_v45 = vpop.xlane.xlu1 %3851  ;;  %v4134_v0 = vmul.f32 %v6414_v4, %v8945_v31  ;;  %v4201_v2 = vmul.f32 %v9175_v14, %v4133_v25  ;;  %v4272_v56 = vadd.f32 %v9201_v10, %v4204_v26 }
 0x7f2   :  { %v6418_v41 = vpop.eup %6417  ;;  %6437 = vrsqrt.f32 %v4016_v30  ;;  %v4013_v53 = vadd.f32 1e-08, %v3949_v35  ;;  %v3950_v6 = vmul.f32 0.0078125, %v3852_v45  ;;  %v4122_v13 = vmul.f32 %v6416_v38, %v8879_v36 }
 0x7f3   :  { %v6420_v33 = vpop.eup %6419  ;;  %v4202_v28 = vmul.f32 %v9175_v14, %v4134_v0  ;;  %v4269_v43 = vadd.f32 %v9201_v10, %v4201_v2  ;;  %v4121_v21 = vmul.f32 %v6418_v41, %v8874_v8  ;;  %v4271_v36 = vadd.f32 %v9201_v10, %v4203_v63  ;;  %v9998_v8 = vld [vmem:[#allocation41_spill] sm:$0xff] }
 0x7f4   :  { %v6422_v15 = vpop.eup %6421  ;;  %6439 = vrsqrt.f32 %v4013_v53  ;;  %v4014_v31 = vadd.f32 1e-08, %v3950_v6  ;;  %v4139_v48 = vmul.f32 %v6420_v33, %v9997_v62  ;;  %v4315_v12 = vpack.c.bf16 %v4254_v50, %v4253_v24  ;;  %v10002_v50 = vld [vmem:[#allocation27_spill] sm:$0xff] }
 0x7f5   :  { %v6424_v52 = vpop.eup %6423  ;;  %v4270_v22 = vadd.f32 %v9201_v10, %v4202_v28  ;;  %v4140_v20 = vmul.f32 %v6422_v15, %v8955_v57  ;;  %v4256_v57 = vadd.f32 %v9201_v10, %v4188_v5  ;;  %v4190_v61 = vmul.f32 %v9175_v14, %v4122_v13  ;;  %v10001_v28 = vld [vmem:[#allocation43_spill] sm:$0xff] }
 0x7f6   :  { %v6426_v59 = vpop.eup %6425  ;;  %6441 = vrsqrt.f32 %v4014_v31  ;;  %v4124_v42 = vmul.f32 %v6424_v52, %v9998_v8  ;;  %v4324_v23 = vpack.c.bf16 %v4272_v56, %v4271_v36  ;;  %v4255_v45 = vadd.f32 %v9201_v10, %v4187_v37  ;;  %v10004_v24 = vld [vmem:[#allocation31_spill] sm:$0xff] }
 0x7f7   :  { %v6428_v32 = vpop.eup %6427  ;;  %v4323_v29 = vpack.c.bf16 %v4270_v22, %v4269_v43  ;;  %v4137_v16 = vmul.f32 %v6426_v59, %v9996_v18  ;;  %v4208_v30 = vmul.f32 %v9175_v14, %v4140_v20  ;;  %v4189_v0 = vmul.f32 %v9175_v14, %v4121_v21  ;;  %v10003_v43 = vld [vmem:[#allocation42_spill] sm:$0xff] }
 0x7f8   :  { %v6430_v54 = vpop.eup %6429  ;;  %v4123_v38 = vmul.f32 %v6428_v32, %v10000_v39  ;;  %v4207_v41 = vmul.f32 %v9175_v14, %v4139_v48  ;;  %v4316_v6 = vpack.c.bf16 %v4256_v57, %v4255_v45  ;;  %v4258_v19 = vadd.f32 %v9201_v10, %v4190_v61  ;;  %v10005_v32 = vld [vmem:[#allocation22_spill] sm:$0xff] }
 0x7f9   :  { %v6432_v25 = vpop.eup %6431  ;;  %4509 = vmatprep.subr.bf16.mxu0 %v4323_v29  ;;  %v4138_v34 = vmul.f32 %v6430_v54, %v9999_v46  ;;  %v4205_v4 = vmul.f32 %v9175_v14, %v4137_v16  ;;  %v4192_v33 = vmul.f32 %v9175_v14, %v4124_v42  ;;  %v4276_v31 = vadd.f32 %v9201_v10, %v4208_v30  ;;  %v10006_v54 = vld [vmem:[#allocation9_spill] sm:$0xff] }
 0x7fa   :  { %v6434_v35 = vpop.eup %6433  ;;  %4510 = vmatpush1.bf16.msra.mxu0 %v4315_v12  ;;  %v4126_v63 = vmul.f32 %v6432_v25, %v10001_v28  ;;  %v4257_v56 = vadd.f32 %v9201_v10, %v4189_v0  ;;  %v4191_v20 = vmul.f32 %v9175_v14, %v4123_v38  ;;  %v4275_v21 = vadd.f32 %v9201_v10, %v4207_v41  ;;  %v3864_v41 = vpop.xlane.xlu1 %3863 }
 0x7fb   :  { %v6436_v2 = vpop.eup %6435  ;;  %4511 = vmatprep.subr.bf16.mxu0 %v4324_v23  ;;  %v4206_v26 = vmul.f32 %v9175_v14, %v4138_v34  ;;  %v4273_v5 = vadd.f32 %v9201_v10, %v4205_v4  ;;  %v4125_v22 = vmul.f32 %v6434_v35, %v10003_v43  ;;  %v4260_v16 = vadd.f32 %v9201_v10, %v4192_v33 }
 0x7fc   :  { %v6438_v53 = vpop.eup %6437  ;;  %v4143_v29 = vmul.f32 %v6436_v2, %v10005_v32  ;;  %v4317_v18 = vpack.c.bf16 %v4258_v19, %v4257_v56  ;;  %v4194_v62 = vmul.f32 %v9175_v14, %v4126_v63  ;;  %v4326_v48 = vpack.c.bf16 %v4276_v31, %v4275_v21 }
 0x7fd   :  { %v4274_v15 = vadd.f32 %v9201_v10, %v4206_v26  ;;  %v4144_v13 = vmul.f32 %v6438_v53, %v10002_v50  ;;  %v4259_v8 = vadd.f32 %v9201_v10, %v4191_v20  ;;  %v4193_v42 = vmul.f32 %v9175_v14, %v4125_v22  ;;  %v3862_v26 = vpop.xlane.xlu0 %3861 }
 0x7fe   :  { %v6440_v52 = vpop.eup %6439  ;;  %4512 = vmatpush1.bf16.msra.mxu0 %v4316_v6  ;;  %v4211_v23 = vmul.f32 %v9175_v14, %v4143_v29  ;;  %v4262_v34 = vadd.f32 %v9201_v10, %v4194_v62  ;;  %v3860_v6 = vpop.xlane.xlu1 %3859  ;;  %v3956_v50 = vmul.f32 0.0078125, %v3864_v41  ;;  %v9349_v41 = vld [vmem:[%s9655_s6 + $0x18] sm:$0xff] }
 0x7ff   :  { %v4325_v59 = vpack.c.bf16 %v4274_v15, %v4273_v5  ;;  %v4141_v37 = vmul.f32 %v6440_v52, %v10004_v24  ;;  %v4212_v61 = vmul.f32 %v9175_v14, %v4144_v13  ;;  %v4318_v46 = vpack.c.bf16 %v4260_v16, %v4259_v8 }
 0x800   :  { %v6442_v36 = vpop.eup %6441  ;;  %v4261_v39 = vadd.f32 %v9201_v10, %v4193_v42  ;;  %v4279_v45 = vadd.f32 %v9201_v10, %v4211_v23  ;;  %v3955_v15 = vmul.f32 0.0078125, %v3862_v26  ;;  %v3954_v43 = vmul.f32 0.0078125, %v3860_v6  ;;  %v10007_v6 = vld [vmem:[#allocation8_spill] sm:$0xff] }
 0x801   :  { %4513 = vmatprep.subr.bf16.mxu0 %v4325_v59  ;;  %v4142_v12 = vmul.f32 %v6442_v36, %v10006_v54  ;;  %v4209_v57 = vmul.f32 %v9175_v14, %v4141_v37  ;;  %v4280_v35 = vadd.f32 %v9201_v10, %v4212_v61  ;;  %v3858_v53 = vpop.xlane.xlu0 %3857  ;;  %v4020_v56 = vadd.f32 1e-08, %v3956_v50  ;;  %v9326_v54 = vld [vmem:[%s9655_s6 + $0x8] sm:$0xff]  ;;  %v9332_v61 = vld [vmem:[%s9655_s6] sm:$0xff] }
 0x802   :  { %4514 = vmatpush1.bf16.msra.mxu0 %v4317_v18  ;;  %v4319_v0 = vpack.c.bf16 %v4262_v34, %v4261_v39  ;;  %v3872_v33 = vpop.xlane.xlu1 %3871  ;;  %v3953_v13 = vmul.f32 0.0078125, %v3858_v53  ;;  %v4019_v52 = vadd.f32 1e-08, %v3955_v15  ;;  %v4018_v21 = vadd.f32 1e-08, %v3954_v43  ;;  %4384 = vperm.xlu1 %5948, %v9326_v54   ;;  %v9343_v34 = vld [vmem:[%s9655_s6 + $0x48] sm:$0xff] }
 0x803   :  { %4515 = vmatprep.subr.bf16.mxu0 %v4326_v48  ;;  %v4210_v25 = vmul.f32 %v9175_v14, %v4142_v12  ;;  %v4277_v4 = vadd.f32 %v9201_v10, %v4209_v57  ;;  %v4328_v2 = vpack.c.bf16 %v4280_v35, %v4279_v45  ;;  %v3960_v32 = vmul.f32 0.0078125, %v3872_v33  ;;  %4379 = vperm.xlu0 %5947, %v9332_v61  }
 0x804   :  { %v4017_v20 = vadd.f32 1e-08, %v3953_v13  ;;  %6443 = vrsqrt.f32 %v4019_v52  ;;  %v10008_v52 = vld [vmem:[#allocation30_spill] sm:$0xff] }
 0x805   :  { %v4278_v30 = vadd.f32 %v9201_v10, %v4210_v25  ;;  %v3870_v19 = vpop.xlane.xlu0 %3869  ;;  %6445 = vrsqrt.f32 %v4020_v56  ;;  %v4024_v62 = vadd.f32 1e-08, %v3960_v32  ;;  %v9337_v25 = vld [vmem:[%s9655_s6 + $0x10] sm:$0xff] }
 0x806   :  { %4516 = vmatpush1.bf16.msra.mxu0 %v4318_v46  ;;  %v3868_v63 = vpop.xlane.xlu1 %3867  ;;  %v3959_v24 = vmul.f32 0.0078125, %v3870_v19  ;;  %6447 = vrsqrt.f32 %v4017_v20  ;;  %4389 = vperm.xlu1 %5948, %v9337_v25  }
 0x807   :  { %v4327_v38 = vpack.c.bf16 %v4278_v30, %v4277_v4  ;;  %6449 = vrsqrt.f32 %v4018_v21  ;;  %v3958_v18 = vmul.f32 0.0078125, %v3868_v63  ;;  %4424 = vperm.xlu0 %5947, %v9343_v34   ;;  %v9356_v63 = vld [vmem:[%s9655_s6 + $0x58] sm:$0xff]  ;;  %v10009_v21 = vld [vmem:[#allocation24_spill] sm:$0xff] }
 0x808   :  { %v4023_v36 = vadd.f32 1e-08, %v3959_v24 }
 0x809   :  { %4517 = vmatprep.subr.bf16.mxu0 %v4327_v38  ;;  %v3866_v28 = vpop.xlane.xlu0 %3865  ;;  %v4022_v23 = vadd.f32 1e-08, %v3958_v18 }
 0x80a   :  { %4518 = vmatpush1.bf16.msra.mxu0 %v4319_v0  ;;  %v3880_v31 = vpop.xlane.xlu1 %3879  ;;  %v3957_v12 = vmul.f32 0.0078125, %v3866_v28  ;;  %6451 = vrsqrt.f32 %v4023_v36  ;;  %4394 = vperm.xlu1 %5948, %v9349_v41   ;;  %v9364_v36 = vld [vmem:[%s9655_s6 + $0x20] sm:$0xff] }
 0x80b   :  { %4519 = vmatprep.subr.bf16.mxu0 %v4328_v2  ;;  %6453 = vrsqrt.f32 %v4024_v62  ;;  %v3964_v33 = vmul.f32 0.0078125, %v3880_v31  ;;  %4434 = vperm.xlu0 %5947, %v9356_v63  }
 0x80c   :  { %v4021_v38 = vadd.f32 1e-08, %v3957_v12  ;;  %v10010_v12 = vld [vmem:[#allocation25_spill] sm:$0xff] }
 0x80d   :  { %v3878_v5 = vpop.xlane.xlu0 %3877  ;;  %v4028_v18 = vadd.f32 1e-08, %v3964_v33 }
 0x80e   :  { %v3876_v59 = vpop.xlane.xlu1 %3875  ;;  %v6444_v4 = vpop.eup %6443  ;;  %v3963_v30 = vmul.f32 0.0078125, %v3878_v5  ;;  %4399 = vperm.xlu1 %5948, %v9364_v36  }
 0x80f   :  { %v6446_v0 = vpop.eup %6445  ;;  %v4147_v19 = vmul.f32 %v6444_v4, %v10007_v6  ;;  %v3962_v56 = vmul.f32 0.0078125, %v3876_v59  ;;  %v9390_v6 = vld [vmem:[%s9655_s6 + $0x78] sm:$0xff] }
 0x810   :  { %v6448_v53 = vpop.eup %6447  ;;  %v4027_v5 = vadd.f32 1e-08, %v3963_v30  ;;  %v4148_v43 = vmul.f32 %v6446_v0, %v10008_v52 }
 0x811   :  { %v9317_v22 = vpop.xlane.xlu0 %3873  ;;  %v6450_v13 = vpop.eup %6449  ;;  %v4145_v31 = vmul.f32 %v6448_v53, %v10009_v21  ;;  %v4215_v59 = vmul.f32 %v9175_v14, %v4147_v19 }
 0x812   :  { %v4216_v30 = vmul.f32 %v9175_v14, %v4148_v43 }
 0x813   :  { %v9385_v53 = vadd.f32 %v9201_v10, %v4215_v59 }
 0x82f   :  { %v9319_v37 = vpop.xlane.xlu0 %3881 }
 0x831   :  { %v9321_v29 = vpop.xlane.xlu1 %3883 }
 0x847   :  { %v3894_v16 = vpop.xlane.xlu0 %3893 }
 0x848   :  { %v3971_v48 = vmul.f32 0.0078125, %v3894_v16  ;;  %v3961_v16 = vmul.f32 0.0078125, %v9317_v22 }
 0x849   :  { %v3896_v57 = vpop.xlane.xlu1 %3895 }
 0x84a   :  { %v4035_v8 = vadd.f32 1e-08, %v3971_v48  ;;  %v3972_v42 = vmul.f32 0.0078125, %v3896_v57  ;;  %v9372_v48 = vld [vmem:[%s9655_s6 + $0x68] sm:$0xff]  ;;  %v4146_v57 = vmul.f32 %v6450_v13, %v10010_v12 }
 0x84b   :  { %v3890_v46 = vpop.xlane.xlu0 %3889  ;;  %4444 = vperm.xlu0 %5947, %v9372_v48   ;;  %v10013_v12 = vld [vmem:[#allocation21_spill] sm:$0xff] }
 0x84c   :  { %v4036_v35 = vadd.f32 1e-08, %v3972_v42  ;;  %v3969_v39 = vmul.f32 0.0078125, %v3890_v46  ;;  %6455 = vrsqrt.f32 %v4035_v8  ;;  %v4026_v46 = vadd.f32 1e-08, %v3962_v56 }
 0x84d   :  { %v3892_v45 = vpop.xlane.xlu1 %3891  ;;  %v9396_v56 = vadd.f32 %v9201_v10, %v4216_v30 }
 0x84e   :  { %6457 = vrsqrt.f32 %v4036_v35  ;;  %v4033_v2 = vadd.f32 1e-08, %v3969_v39  ;;  %v3970_v26 = vmul.f32 0.0078125, %v3892_v45  ;;  %v9381_v45 = vld [vmem:[%s9655_s6 + $0x28] sm:$0xff] }
 0x84f   :  { %6459 = vrsqrt.f32 %v4022_v23  ;;  %v3902_v28 = vpop.xlane.xlu0 %3901  ;;  %v6452_v23 = vpop.eup %6451  ;;  %4404 = vperm.xlu1 %5948, %v9381_v45   ;;  %4454 = vperm.xlu0 %5947, %v9390_v6  }
 0x850   :  { %6461 = vrsqrt.f32 %v4033_v2  ;;  %v4034_v15 = vadd.f32 1e-08, %v3970_v26  ;;  %v3975_v50 = vmul.f32 0.0078125, %v3902_v28  ;;  %v6454_v22 = vpop.eup %6453  ;;  %v4025_v2 = vadd.f32 1e-08, %v3961_v16 }
 0x851   :  { %6463 = vrsqrt.f32 %v4021_v38  ;;  %v3904_v20 = vpop.xlane.xlu1 %3903  ;;  %v4213_v38 = vmul.f32 %v9175_v14, %v4145_v31 }
 0x852   :  { %6465 = vrsqrt.f32 %v4034_v15  ;;  %v4039_v24 = vadd.f32 1e-08, %v3975_v50  ;;  %v3976_v32 = vmul.f32 0.0078125, %v3904_v20  ;;  %v10011_v50 = vld [vmem:[#allocation32_spill] sm:$0xff] }
 0x853   :  { %v3898_v62 = vpop.xlane.xlu0 %3897  ;;  %6467 = vrsqrt.f32 %v4027_v5  ;;  %v4214_v5 = vmul.f32 %v9175_v14, %v4146_v57  ;;  %v4151_v13 = vmul.f32 %v6452_v23, %v10011_v50 }
 0x854   :  { %v4040_v8 = vadd.f32 1e-08, %v3976_v32  ;;  %v3973_v42 = vmul.f32 0.0078125, %v3898_v62  ;;  %6469 = vrsqrt.f32 %v4039_v24  ;;  %v9400_v24 = vadd.f32 %v9201_v10, %v4213_v38  ;;  %v9405_v32 = vld [vmem:[%s9655_s6 + $0x30] sm:$0xff] }
 0x855   :  { %v3900_v4 = vpop.xlane.xlu1 %3899  ;;  %v4282_v30 = vadd.f32 %v9201_v10, %v4214_v5  ;;  %4409 = vperm.xlu1 %5948, %v9405_v32   ;;  %v4219_v50 = vmul.f32 %v9175_v14, %v4151_v13 }
 0x856   :  { %6471 = vrsqrt.f32 %v4040_v8  ;;  %v4037_v35 = vadd.f32 1e-08, %v3973_v42  ;;  %v3974_v39 = vmul.f32 0.0078125, %v3900_v4  ;;  %v6456_v0 = vpop.eup %6455  ;;  %v10014_v42 = vld [vmem:[#allocation12_spill] sm:$0xff] }
 0x857   :  { %6473 = vrsqrt.f32 %v4028_v18  ;;  %v3910_v26 = vpop.xlane.xlu0 %3909  ;;  %v10012_v18 = vld [vmem:[#allocation11_spill] sm:$0xff]  ;;  %v4163_v57 = vmul.f32 %v6456_v0, %v10013_v12  ;;  %v9441_v12 = vld [vmem:[%s9655_s6 + $0x40] sm:$0xff] }
 0x858   :  { %v6458_v19 = vpop.eup %6457  ;;  %6475 = vrsqrt.f32 %v4037_v35  ;;  %v4038_v33 = vadd.f32 1e-08, %v3974_v39  ;;  %v3979_v28 = vmul.f32 0.0078125, %v3910_v26  ;;  %v4152_v16 = vmul.f32 %v6454_v22, %v10012_v18 }
 0x859   :  { %v6460_v15 = vpop.eup %6459  ;;  %6477 = vrsqrt.f32 %v4026_v46  ;;  %v3912_v52 = vpop.xlane.xlu1 %3911  ;;  %v4164_v43 = vmul.f32 %v6458_v19, %v9091_v47  ;;  %v4231_v5 = vmul.f32 %v9175_v14, %v4163_v57 }
 0x85a   :  { %v6462_v20 = vpop.eup %6461  ;;  %6479 = vrsqrt.f32 %v4038_v33  ;;  %v4043_v21 = vadd.f32 1e-08, %v3979_v28  ;;  %v3980_v31 = vmul.f32 0.0078125, %v3912_v52  ;;  %v4150_v23 = vmul.f32 %v6460_v15, %v10014_v42  ;;  %v9421_v33 = vld [vmem:[%s9655_s6 + $0x38] sm:$0xff] }
 0x85b   :  { %v6464_v47 = vpop.eup %6463  ;;  %6481 = vrsqrt.f32 %v4025_v2  ;;  %v3906_v62 = vpop.xlane.xlu0 %3905  ;;  %v4161_v59 = vmul.f32 %v6462_v20, %v9096_v51  ;;  %v4232_v22 = vmul.f32 %v9175_v14, %v4164_v43  ;;  %v10015_v2 = vld [vmem:[#allocation10_spill] sm:$0xff]  ;;  %v4330_v15 = vpack.c.bf16 %v9396_v56, %v9385_v53  ;;  %4414 = vperm.xlu1 %5948, %v9421_v33  }
 0x85c   :  { %v6466_v8 = vpop.eup %6465  ;;  %v4044_v46 = vadd.f32 1e-08, %v3980_v31  ;;  %v3977_v4 = vmul.f32 0.0078125, %v3906_v62  ;;  %6483 = vrsqrt.f32 %v4043_v21  ;;  %v4149_v0 = vmul.f32 %v6464_v47, %v10015_v2 }
 0x85d   :  { %v3908_v35 = vpop.xlane.xlu1 %3907  ;;  %v4162_v39 = vmul.f32 %v6466_v8, %v9101_v44  ;;  %v4229_v38 = vmul.f32 %v9175_v14, %v4161_v59  ;;  %v6468_v51 = vpop.eup %6467  ;;  %v4329_v20 = vpack.c.bf16 %v4282_v30, %v9400_v24  ;;  %v4218_v21 = vmul.f32 %v9175_v14, %v4150_v23 }
 0x85e   :  { %6485 = vrsqrt.f32 %v4044_v46  ;;  %v4041_v26 = vadd.f32 1e-08, %v3977_v4  ;;  %v3978_v19 = vmul.f32 0.0078125, %v3908_v35  ;;  %v6470_v28 = vpop.eup %6469  ;;  %v4300_v62 = vadd.f32 %v9201_v10, %v4232_v22 }
 0x85f   :  { %v4230_v44 = vmul.f32 %v9175_v14, %v4162_v39  ;;  %v4297_v47 = vadd.f32 %v9201_v10, %v4229_v38  ;;  %v4217_v13 = vmul.f32 %v9175_v14, %v4149_v0  ;;  %v4167_v56 = vmul.f32 %v6470_v28, %v9106_v40  ;;  %4419 = vperm.xlu1 %5948, %v9441_v12   ;;  %v10018_v28 = vld [vmem:[#allocation14_spill] sm:$0xff] }
 0x860   :  { %v6472_v52 = vpop.eup %6471  ;;  %6487 = vrsqrt.f32 %v4041_v26  ;;  %v4042_v43 = vadd.f32 1e-08, %v3978_v19  ;;  %v4220_v24 = vmul.f32 %v9175_v14, %v4152_v16  ;;  %v3966_v8 = vmul.f32 0.0078125, %v9321_v29  ;;  %v9466_v19 = vld [vmem:[%s9655_s6 + $0x50] sm:$0xff] }
 0x861   :  { %v6474_v31 = vpop.eup %6473  ;;  %v4298_v18 = vadd.f32 %v9201_v10, %v4230_v44  ;;  %v4168_v59 = vmul.f32 %v6472_v52, %v9111_v27  ;;  %v4299_v27 = vadd.f32 %v9201_v10, %v4231_v5  ;;  %v3965_v4 = vmul.f32 0.0078125, %v9319_v37  ;;  %v10017_v37 = vld [vmem:[#allocation19_spill] sm:$0xff] }
 0x862   :  { %v6476_v53 = vpop.eup %6475  ;;  %6489 = vrsqrt.f32 %v4042_v43  ;;  %v4286_v40 = vadd.f32 %v9201_v10, %v4218_v21  ;;  %v9450_v30 = vadd.f32 %v9201_v10, %v4219_v50  ;;  %v4235_v0 = vmul.f32 %v9175_v14, %v4167_v56 }
 0x863   :  { %v6478_v57 = vpop.eup %6477  ;;  %v4337_v42 = vpack.c.bf16 %v4298_v18, %v4297_v47  ;;  %v4165_v23 = vmul.f32 %v6476_v53, %v9116_v60  ;;  %v4236_v16 = vmul.f32 %v9175_v14, %v4168_v59  ;;  %v4338_v39 = vpack.c.bf16 %v4300_v62, %v4299_v27  ;;  %v10016_v60 = vld [vmem:[#allocation15_spill] sm:$0xff]  ;;  %4429 = vperm.xlu1 %5948, %v9466_v19  }
 0x864   :  { %v6480_v46 = vpop.eup %6479  ;;  %v9456_v22 = vmul.f32 %v6468_v51, %v10016_v60  ;;  %v4154_v2 = vmul.f32 %v6478_v57, %v10017_v37  ;;  %v9461_v26 = vadd.f32 %v9201_v10, %v4220_v24  ;;  %v4156_v44 = vmul.f32 %v6474_v31, %v10018_v28  ;;  %v10022_v37 = vld [vmem:[#allocation29_spill] sm:$0xff] }
 0x865   :  { %v6482_v35 = vpop.eup %6481  ;;  %4618 = vmatprep.subr.bf16.mxu1 %v4337_v42  ;;  %v4166_v29 = vmul.f32 %v6480_v46, %v9121_v3  ;;  %v4233_v38 = vmul.f32 %v9175_v14, %v4165_v23  ;;  %v4030_v5 = vadd.f32 1e-08, %v3966_v8  ;;  %v4285_v52 = vadd.f32 %v9201_v10, %v4217_v13  ;;  %v9482_v23 = vld [vmem:[%s9655_s6 + $0x60] sm:$0xff] }
 0x866   :  { %4619 = vmatpush1.bf16.msra.mxu1 %v4329_v20  ;;  %v6484_v3 = vpop.eup %6483  ;;  %v10019_v20 = vld [vmem:[#allocation13_spill] sm:$0xff]  ;;  %v4029_v47 = vadd.f32 1e-08, %v3965_v4  ;;  %v4304_v62 = vadd.f32 %v9201_v10, %v4236_v16  ;;  %v4303_v42 = vadd.f32 %v9201_v10, %v4235_v0  ;;  %v4222_v27 = vmul.f32 %v9175_v14, %v4154_v2  ;;  %v10021_v16 = vld [vmem:[#allocation23_spill] sm:$0xff] }
 0x867   :  { %4620 = vmatprep.subr.bf16.mxu1 %v4338_v39  ;;  %v3918_v51 = vpop.xlane.xlu0 %3917  ;;  %v4234_v50 = vmul.f32 %v9175_v14, %v4166_v29  ;;  %v4153_v21 = vmul.f32 %v6482_v35, %v10019_v20  ;;  %v4301_v53 = vadd.f32 %v9201_v10, %v4233_v38  ;;  %v4331_v31 = vpack.c.bf16 %v4286_v40, %v4285_v52  ;;  %v10020_v40 = vld [vmem:[#allocation26_spill] sm:$0xff] }
 0x868   :  { %v6486_v43 = vpop.eup %6485  ;;  %v3983_v18 = vmul.f32 0.0078125, %v3918_v51  ;;  %6491 = vrsqrt.f32 %v4030_v5  ;;  %v4171_v35 = vmul.f32 %v6484_v3, %v10021_v16  ;;  %v4340_v38 = vpack.c.bf16 %v4304_v62, %v4303_v42  ;;  %4439 = vperm.xlu1 %5948, %v9482_v23  }
 0x869   :  { %v3920_v59 = vpop.xlane.xlu1 %3919  ;;  %v4302_v56 = vadd.f32 %v9201_v10, %v4234_v50  ;;  %v4172_v24 = vmul.f32 %v6486_v43, %v9131_v11  ;;  %6493 = vrsqrt.f32 %v4029_v47  ;;  %v4221_v3 = vmul.f32 %v9175_v14, %v4153_v21  ;;  %v9494_v50 = vld [vmem:[%s9655_s6 + $0x70] sm:$0xff] }
 0x86a   :  { %v6488_v57 = vpop.eup %6487  ;;  %v4047_v8 = vadd.f32 1e-08, %v3983_v18  ;;  %v3984_v13 = vmul.f32 0.0078125, %v3920_v59  ;;  %4621 = vmatpush1.bf16.msra.mxu1 %v4330_v15  ;;  %v4332_v43 = vpack.c.bf16 %v9461_v26, %v9450_v30  ;;  %v4239_v47 = vmul.f32 %v9175_v14, %v4171_v35 }
 0x86b   :  { %v3914_v46 = vpop.xlane.xlu0 %3913  ;;  %v4339_v4 = vpack.c.bf16 %v4302_v56, %v4301_v53  ;;  %v4169_v11 = vmul.f32 %v6488_v57, %v10020_v40  ;;  %v4240_v28 = vmul.f32 %v9175_v14, %v4172_v24  ;;  %v4224_v18 = vmul.f32 %v9175_v14, %v4156_v44 }
 0x86c   :  { %v6490_v39 = vpop.eup %6489  ;;  %v4048_v29 = vadd.f32 1e-08, %v3984_v13  ;;  %v3981_v15 = vmul.f32 0.0078125, %v3914_v46  ;;  %6495 = vrsqrt.f32 %v4047_v8  ;;  %v4290_v21 = vadd.f32 %v9201_v10, %v4222_v27  ;;  %4449 = vperm.xlu1 %5948, %v9494_v50  }
 0x86d   :  { %v3916_v60 = vpop.xlane.xlu1 %3915  ;;  %4622 = vmatprep.subr.bf16.mxu1 %v4339_v4  ;;  %v4170_v2 = vmul.f32 %v6490_v39, %v10022_v37  ;;  %v4237_v0 = vmul.f32 %v9175_v14, %v4169_v11  ;;  %v4308_v24 = vadd.f32 %v9201_v10, %v4240_v28  ;;  %v4223_v30 = vmul.f32 %v9175_v14, %v9456_v22 }
 0x86e   :  { %6497 = vrsqrt.f32 %v4048_v29  ;;  %v4045_v5 = vadd.f32 1e-08, %v3981_v15  ;;  %v3982_v51 = vmul.f32 0.0078125, %v3916_v60  ;;  %4623 = vmatpush1.bf16.msra.mxu1 %v4331_v31  ;;  %v4289_v57 = vadd.f32 %v9201_v10, %v4221_v3  ;;  %v10023_v60 = vld [vmem:[#allocation20_spill] sm:$0xff] }
 0x86f   :  { %4624 = vmatprep.subr.bf16.mxu1 %v4340_v38  ;;  %v3822_v52 = vpop.xlane.xlu0 %3821  ;;  %v4238_v20 = vmul.f32 %v9175_v14, %v4170_v2  ;;  %v4305_v56 = vadd.f32 %v9201_v10, %v4237_v0  ;;  %v4307_v42 = vadd.f32 %v9201_v10, %v4239_v47  ;;  %v4292_v27 = vadd.f32 %v9201_v10, %v4224_v18 }
 0x870   :  { %6499 = vrsqrt.f32 %v4045_v5  ;;  %v4046_v62 = vadd.f32 1e-08, %v3982_v51  ;;  %v3935_v59 = vmul.f32 0.0078125, %v3822_v52  ;;  %v4333_v40 = vpack.c.bf16 %v4290_v21, %v4289_v57  ;;  %v10024_v51 = vld [vmem:[#allocation18_spill] sm:$0xff] }
 0x871   :  { %v3824_v53 = vpop.xlane.xlu1 %3823  ;;  %v4306_v31 = vadd.f32 %v9201_v10, %v4238_v20  ;;  %v4342_v22 = vpack.c.bf16 %v4308_v24, %v4307_v42  ;;  %v4291_v29 = vadd.f32 %v9201_v10, %v4223_v30  ;;  %v6517_v20 = vld [vmem:[%s9651_s2 + $0x2] ss:$0 sm:$0xff] }
 0x872   :  { %6501 = vrsqrt.f32 %v4046_v62  ;;  %v3999_v26 = vadd.f32 1e-08, %v3935_v59  ;;  %v3936_v44 = vmul.f32 0.0078125, %v3824_v53  ;;  %4625 = vmatpush1.bf16.msra.mxu1 %v4332_v43  ;;  %v6492_v11 = vpop.eup %6491 }
 0x873   :  { %v3886_v8 = vpop.xlane.xlu0 %3885  ;;  %v4341_v13 = vpack.c.bf16 %v4306_v31, %v4305_v56  ;;  %v6494_v16 = vpop.eup %6493  ;;  %v4158_v37 = vmul.f32 %v6492_v11, %v10023_v60  ;;  %v4334_v0 = vpack.c.bf16 %v4292_v27, %v4291_v29  ;;  %v10025_v56 = vld [vmem:[#allocation37_spill] sm:$0xff] }
 0x874   :  { %6503 = vrsqrt.f32 %v3999_v26  ;;  %v4000_v46 = vadd.f32 1e-08, %v3936_v44  ;;  %v3967_v4 = vmul.f32 0.0078125, %v3886_v8  ;;  %v4157_v3 = vmul.f32 %v6494_v16, %v10024_v51  ;;  %v5988_v51 = vld [vmem:[%s9653_s4 + $0x28] sm:$0xff]  }
 0x875   :  { %v3888_v14 = vpop.xlane.xlu1 %3887  ;;  %4626 = vmatprep.subr.bf16.mxu1 %v4341_v13  ;;  %v4226_v47 = vmul.f32 %v6517_v20, %v4158_v37 }
 0x876   :  { %6505 = vrsqrt.f32 %v4000_v46  ;;  %v4031_v35 = vadd.f32 1e-08, %v3967_v4  ;;  %v3968_v39 = vmul.f32 0.0078125, %v3888_v14  ;;  %4627 = vmatpush1.bf16.msra.mxu1 %v4333_v40  ;;  %v6496_v15 = vpop.eup %6495  ;;  %v4225_v21 = vmul.f32 %v6517_v20, %v4157_v3  ;;  %v5989_v3 = vld [vmem:[%s9653_s4 + $0x30] sm:$0xff]  }
 0x877   :  { %4628 = vmatprep.subr.bf16.mxu1 %v4342_v22  ;;  %v4175_v52 = vmul.f32 %v6496_v15, %v9170_v7  ;;  %v6518_v7 = vld [vmem:[%s9651_s2 + $0x3] ss:$0 sm:$0xff] }
 0x878   :  { %v6498_v38 = vpop.eup %6497  ;;  %6507 = vrsqrt.f32 %v4031_v35  ;;  %v4032_v2 = vadd.f32 1e-08, %v3968_v39  ;;  %v4293_v42 = vadd.f32 %v6518_v7, %v4225_v21 }
 0x879   :  { %v4176_v28 = vmul.f32 %v6498_v38, %v9182_v17  ;;  %v4243_v53 = vmul.f32 %v6517_v20, %v4175_v52  ;;  %v5983_v38 = vld [vmem:[%s9653_s4] sm:$0xff]   ;;  %v5990_v52 = vld [vmem:[%s9653_s4 + $0x38] sm:$0xff]  }
 0x87a   :  { %v6500_v5 = vpop.eup %6499  ;;  %6509 = vrsqrt.f32 %v4032_v2  ;;  %4629 = vmatpush1.bf16.msra.mxu1 %v4334_v0  ;;  %v10026_v2 = vmov 0   ;;  %v5985_v0 = vld [vmem:[%s9653_s4 + $0x10] sm:$0xff]  }
 0x87b   :  { %v4173_v43 = vmul.f32 %v6500_v5, %v9194_v1  ;;  %v4244_v18 = vmul.f32 %v6517_v20, %v4176_v28  ;;  %v4294_v1 = vadd.f32 %v6518_v7, %v4226_v47  ;;  %v4311_v27 = vadd.f32 %v6518_v7, %v4243_v53  ;;  %v5986_v28 = vld [vmem:[%s9653_s4 + $0x18] sm:$0xff]   ;;  %v5987_v5 = vld [vmem:[%s9653_s4 + $0x20] sm:$0xff]  }
 0x87c   :  { %v6502_v10 = vpop.eup %6501 }
 0x87d   :  { %v4174_v62 = vmul.f32 %v6502_v10, %v9213_v55  ;;  %v4241_v59 = vmul.f32 %v6517_v20, %v4173_v43  ;;  %v4312_v26 = vadd.f32 %v6518_v7, %v4244_v18  ;;  %v4335_v14 = vpack.c.bf16 %v4294_v1, %v4293_v42 }
 0x87e   :  { %v6504_v17 = vpop.eup %6503 }
 0x87f   :  { %v4127_v31 = vmul.f32 %v6504_v17, %v10025_v56  ;;  %v4242_v24 = vmul.f32 %v6517_v20, %v4174_v62  ;;  %v4309_v57 = vadd.f32 %v6518_v7, %v4241_v59  ;;  %v4344_v22 = vpack.c.bf16 %v4312_v26, %v4311_v27 }
 0x880   :  { %v6506_v30 = vpop.eup %6505 }
 0x881   :  { %v4128_v44 = vmul.f32 %v6506_v30, %v9151_v9  ;;  %v4310_v8 = vadd.f32 %v6518_v7, %v4242_v24  ;;  %v4195_v13 = vmul.f32 %v6517_v20, %v4127_v31  ;;  %v4385_v43 = vpop.permute.xlu1 %4384  ;;  %v6571_v24 = vmov 1  }
 0x882   :  { %v6508_v55 = vpop.eup %6507  ;;  %5949 = vset.pattern.permute.xlu1 %v6571_v24  ;;  %5950 = vset.pattern.permute.xlu0 %v6571_v24 }
 0x883   :  { %v4159_v46 = vmul.f32 %v6508_v55, %v9187_v58  ;;  %v4343_v4 = vpack.c.bf16 %v4310_v8, %v4309_v57  ;;  %v4196_v40 = vmul.f32 %v6517_v20, %v4128_v44  ;;  %v4263_v35 = vadd.f32 %v6518_v7, %v4195_v13  ;;  %4844 = vperm.xlu1 %5949, %v9332_v61  }
 0x884   :  { %v6510_v11 = vpop.eup %6509  ;;  %4848 = vperm.xlu0 %5950, %v9326_v54  }
 0x885   :  { %v4160_v16 = vmul.f32 %v6510_v11, %v9218_v49  ;;  %4630 = vmatprep.subr.bf16.mxu1 %v4343_v4  ;;  %v4264_v39 = vadd.f32 %v6518_v7, %v4196_v40  ;;  %v4227_v29 = vmul.f32 %v6517_v20, %v4159_v46  ;;  %v5984_v49 = vld [vmem:[%s9653_s4 + $0x8] sm:$0xff]   ;;  %v4390_v10 = vpop.permute.xlu1 %4389 }
 0x886   :  { %4631 = vmatpush1.bf16.msra.mxu1 %v4335_v14 }
 0x887   :  { %4632 = vmatprep.subr.bf16.mxu1 %v4344_v22  ;;  %v4320_v9 = vpack.c.bf16 %v4264_v39, %v4263_v35  ;;  %v4228_v15 = vmul.f32 %v6517_v20, %v4160_v16  ;;  %v4295_v58 = vadd.f32 %v6518_v7, %v4227_v29  ;;  %v4380_v20 = vpop.permute.xlu0 %4379  ;;  %4852 = vperm.xlu1 %5949, %v9337_v25  }
 0x888   :  { %4860 = vperm.xlu0 %5950, %v9364_v36  }
 0x889   :  { %4520 = vmatpush1.bf16.msra.mxu0 %v4320_v9  ;;  %v4296_v60 = vadd.f32 %v6518_v7, %v4228_v15  ;;  %v9568_v59 = vpop.permute.xlu1 %4394 }
 0x88b   :  { %v4336_v37 = vpack.c.bf16 %v4296_v60, %v4295_v58  ;;  %4856 = vperm.xlu1 %5949, %v9349_v41  }
 0x88c   :  { %4538 = vmatmul.mubr.bf16.vlgmr.msra.gmra.mrb[176].mxu0 %v5983_v38  ;;  %4868 = vperm.xlu0 %5950, %v9405_v32  }
 0x88d   :  { %4633 = vmatpush1.bf16.msra.mxu1 %v4336_v37  ;;  %4547 = vmatprep.mubr.bf16.mxu0 %v10026_v2  ;;  %v9572_v4 = vpop.permute.xlu1 %4399 }
 0x88f   :  { %4864 = vperm.xlu1 %5949, %v9381_v45  }
 0x890   :  { %4651 = vmatmul.mubr.bf16.vlgmr.msra.gmra.mrb[144].mxu1 %v5983_v38  ;;  %4876 = vperm.xlu0 %5950, %v9441_v12  }
 0x891   :  { %4660 = vmatprep.mubr.bf16.mxu1 %v10026_v2 }
 0x893   :  { %4872 = vperm.xlu1 %5949, %v9421_v33  }
 0x894   :  { %4548 = vmatmul.mubr.bf16.gmra.mrb[180].mxu0 %v5984_v49  ;;  %4884 = vperm.xlu0 %5950, %v9466_v19  }
 0x895   :  { %4557 = vmatprep.mubr.bf16.mxu0 %v10026_v2 }
 0x897   :  { %4880 = vperm.xlu1 %5949, %v9343_v34  }
 0x898   :  { %4661 = vmatmul.mubr.bf16.gmra.mrb[148].mxu1 %v5984_v49  ;;  %4892 = vperm.xlu0 %5950, %v9482_v23  }
 0x899   :  { %4670 = vmatprep.mubr.bf16.mxu1 %v10026_v2 }
 0x89b   :  { %4888 = vperm.xlu1 %5949, %v9356_v63  }
 0x89c   :  { %4558 = vmatmul.mubr.bf16.gmra.mrb[184].mxu0 %v5985_v0  ;;  %4900 = vperm.xlu0 %5950, %v9494_v50  }
 0x89d   :  { %4567 = vmatprep.mubr.bf16.mxu0 %v10026_v2 }
 0x89f   :  { %4896 = vperm.xlu1 %5949, %v9372_v48  }
 0x8a0   :  { %4671 = vmatmul.mubr.bf16.gmra.mrb[152].mxu1 %v5985_v0 }
 0x8a1   :  { %4680 = vmatprep.mubr.bf16.mxu1 %v10026_v2 }
 0x8a3   :  { %4904 = vperm.xlu1 %5949, %v9390_v6  }
 0x8a4   :  { %4568 = vmatmul.mubr.bf16.gmra.mrb[188].mxu0 %v5986_v28 }
 0x8a5   :  { %4577 = vmatprep.mubr.bf16.mxu0 %v10026_v2 }
 0x8a8   :  { %4681 = vmatmul.mubr.bf16.gmra.mrb[156].mxu1 %v5986_v28 }
 0x8a9   :  { %4690 = vmatprep.mubr.bf16.mxu1 %v10026_v2 }
 0x8ac   :  { %4578 = vmatmul.mubr.bf16.gmra.mrb[192].mxu0 %v5987_v5 }
 0x8ad   :  { %4587 = vmatprep.mubr.bf16.mxu0 %v10026_v2 }
 0x8b0   :  { %4691 = vmatmul.mubr.bf16.gmra.mrb[160].mxu1 %v5987_v5 }
 0x8b1   :  { %4700 = vmatprep.mubr.bf16.mxu1 %v10026_v2 }
 0x8b4   :  { %4588 = vmatmul.mubr.bf16.gmra.mrb[196].mxu0 %v5988_v51 }
 0x8b5   :  { %4597 = vmatprep.mubr.bf16.mxu0 %v10026_v2 }
 0x8b8   :  { %4701 = vmatmul.mubr.bf16.gmra.mrb[164].mxu1 %v5988_v51 }
 0x8b9   :  { %4710 = vmatprep.mubr.bf16.mxu1 %v10026_v2 }
 0x8bc   :  { %4598 = vmatmul.mubr.bf16.gmra.mrb[200].mxu0 %v5989_v3 }
 0x8bd   :  { %4607 = vmatprep.mubr.bf16.mxu0 %v10026_v2 }
 0x8c0   :  { %4711 = vmatmul.mubr.bf16.gmra.mrb[168].mxu1 %v5989_v3 }
 0x8c1   :  { %4720 = vmatprep.mubr.bf16.mxu1 %v10026_v2 }
 0x8c4   :  { %4608 = vmatmul.mubr.bf16.gmra.mrb[204].mxu0 %v5990_v52 }
 0x8c5   :  { %4987 = vmatprep.mubr.bf16.mxu0 %v10026_v2 }
 0x8c8   :  { %4721 = vmatmul.mubr.bf16.gmra.mrb[172].mxu1 %v5990_v52 }
 0x8c9   :  { %5100 = vmatprep.mubr.bf16.mxu1 %v10026_v2 }
 0x8ce   :  { %v4405_v51 = vpop.permute.xlu1 %4404 }
 0x95f   :  { %v4539_v47 = vpop.f32.mrb[176].mxu0 }
 0x960   :  { %v4541_v18 = vpop.f32.mrb[177].mxu0  ;;  %v4540_v62 = vadd.f32 %v4539_v47, %v4380_v20 }
 0x961   :  { %v4543_v17 = vpop.f32.mrb[178].mxu0  ;;  %v4542_v21 = vadd.f32 %v4541_v18, %v4380_v20 }
 0x962   :  { %v4544_v53 = vadd.f32 %v4543_v17, %v4385_v43  ;;  %v4545_v56 = vpop.f32.mrb[179].mxu0  ;;  %v4731_v31 = vmax.f32 %v4540_v62, 0.0 }
 0x963   :  { %v4546_v30 = vadd.f32 %v4545_v56, %v4385_v43  ;;  %v4652_v7 = vpop.f32.mrb[144].mxu1  ;;  %v4732_v1 = vmax.f32 %v4542_v21, 0.0 }
 0x964   :  { %v4735_v26 = vmax.f32 %v4544_v53, 0.0  ;;  %v4654_v44 = vpop.f32.mrb[145].mxu1  ;;  %v4653_v57 = vadd.f32 %v4652_v7, %v4380_v20 }
 0x965   :  { %v4736_v8 = vmax.f32 %v4546_v30, 0.0  ;;  %v4655_v13 = vadd.f32 %v4654_v44, %v4380_v20  ;;  %v4656_v55 = vpop.f32.mrb[146].mxu1 }
 0x966   :  { %v4657_v42 = vadd.f32 %v4656_v55, %v4385_v43  ;;  %v4658_v27 = vpop.f32.mrb[147].mxu1  ;;  %v4811_v46 = vpack.c.bf16 %v4735_v26, %v4731_v31  ;;  %v4733_v22 = vmax.f32 %v4653_v57, 0.0 }
 0x967   :  { %v4549_v40 = vpop.f32.mrb[180].mxu0  ;;  %v4659_v11 = vadd.f32 %v4658_v27, %v4385_v43  ;;  %v4812_v14 = vpack.c.bf16 %v4736_v8, %v4732_v1  ;;  %v4734_v35 = vmax.f32 %v4655_v13, 0.0 }
 0x968   :  { %v4550_v61 = vadd.f32 %v4549_v40, %v4390_v10  ;;  %v4551_v54 = vpop.f32.mrb[181].mxu0  ;;  %v4737_v16 = vmax.f32 %v4657_v42, 0.0 }
 0x969   :  { %v4552_v39 = vadd.f32 %v4551_v54, %v4390_v10  ;;  %v4553_v29 = vpop.f32.mrb[182].mxu0  ;;  %v4738_v9 = vmax.f32 %v4659_v11, 0.0  ;;  %4955 = vmatprep.subr.bf16.mxu0 %v4812_v14 }
 0x96a   :  { %v4739_v15 = vmax.f32 %v4550_v61, 0.0  ;;  %v4813_v38 = vpack.c.bf16 %v4737_v16, %v4733_v22  ;;  %v4554_v58 = vadd.f32 %v4553_v29, %v9568_v59  ;;  %v4555_v60 = vpop.f32.mrb[183].mxu0  ;;  %4956 = vmatpush1.bf16.msra.mxu0 %v4811_v46 }
 0x96b   :  { %v4740_v37 = vmax.f32 %v4552_v39, 0.0  ;;  %v4814_v49 = vpack.c.bf16 %v4738_v9, %v4734_v35  ;;  %v4556_v25 = vadd.f32 %v4555_v60, %v9568_v59  ;;  %v4662_v36 = vpop.f32.mrb[148].mxu1 }
 0x96c   :  { %v4743_v0 = vmax.f32 %v4554_v58, 0.0  ;;  %v4663_v28 = vadd.f32 %v4662_v36, %v4390_v10  ;;  %v4664_v5 = vpop.f32.mrb[149].mxu1 }
 0x96d   :  { %v4744_v3 = vmax.f32 %v4556_v25, 0.0  ;;  %v4665_v52 = vadd.f32 %v4664_v5, %v4390_v10  ;;  %v4666_v43 = vpop.f32.mrb[150].mxu1  ;;  %5068 = vmatprep.subr.bf16.mxu1 %v4814_v49 }
 0x96e   :  { %v4815_v20 = vpack.c.bf16 %v4743_v0, %v4739_v15  ;;  %v4667_v47 = vadd.f32 %v4666_v43, %v9568_v59  ;;  %v4668_v18 = vpop.f32.mrb[151].mxu1  ;;  %5069 = vmatpush1.bf16.msra.mxu1 %v4813_v38  ;;  %v4741_v41 = vmax.f32 %v4663_v28, 0.0 }
 0x96f   :  { %v4816_v62 = vpack.c.bf16 %v4744_v3, %v4740_v37  ;;  %v4559_v17 = vpop.f32.mrb[184].mxu0  ;;  %v4669_v21 = vadd.f32 %v4668_v18, %v9568_v59  ;;  %v4742_v56 = vmax.f32 %v4665_v52, 0.0  ;;  %v4410_v59 = vpop.permute.xlu1 %4409 }
 0x970   :  { %v4560_v32 = vadd.f32 %v4559_v17, %v9572_v4  ;;  %v4561_v53 = vpop.f32.mrb[185].mxu0  ;;  %v4745_v10 = vmax.f32 %v4667_v47, 0.0 }
 0x971   :  { %v4562_v31 = vadd.f32 %v4561_v53, %v9572_v4  ;;  %v4563_v24 = vpop.f32.mrb[186].mxu0  ;;  %v4746_v30 = vmax.f32 %v4669_v21, 0.0  ;;  %4957 = vmatprep.subr.bf16.mxu0 %v4816_v62  ;;  %v4425_v53 = vpop.permute.xlu0 %4424 }
 0x972   :  { %v4747_v7 = vmax.f32 %v4560_v32, 0.0  ;;  %v4817_v1 = vpack.c.bf16 %v4745_v10, %v4741_v41  ;;  %v4564_v26 = vadd.f32 %v4563_v24, %v4405_v51  ;;  %v4565_v44 = vpop.f32.mrb[187].mxu0  ;;  %4958 = vmatpush1.bf16.msra.mxu0 %v4815_v20 }
 0x973   :  { %v4748_v45 = vmax.f32 %v4562_v31, 0.0  ;;  %v4818_v57 = vpack.c.bf16 %v4746_v30, %v4742_v56  ;;  %v4566_v12 = vadd.f32 %v4565_v44, %v4405_v51  ;;  %v4672_v8 = vpop.f32.mrb[152].mxu1  ;;  %v4415_v29 = vpop.permute.xlu1 %4414 }
 0x974   :  { %v4751_v13 = vmax.f32 %v4564_v26, 0.0  ;;  %v4673_v55 = vadd.f32 %v4672_v8, %v9572_v4  ;;  %v4674_v42 = vpop.f32.mrb[153].mxu1 }
 0x975   :  { %v4752_v27 = vmax.f32 %v4566_v12, 0.0  ;;  %v4675_v46 = vadd.f32 %v4674_v42, %v9572_v4  ;;  %v4676_v40 = vpop.f32.mrb[154].mxu1  ;;  %5070 = vmatprep.subr.bf16.mxu1 %v4818_v57 }
 0x976   :  { %v4819_v11 = vpack.c.bf16 %v4751_v13, %v4747_v7  ;;  %v4677_v14 = vadd.f32 %v4676_v40, %v4405_v51  ;;  %v4678_v61 = vpop.f32.mrb[155].mxu1  ;;  %5071 = vmatpush1.bf16.msra.mxu1 %v4817_v1  ;;  %v4749_v33 = vmax.f32 %v4673_v55, 0.0 }
 0x977   :  { %v4820_v54 = vpack.c.bf16 %v4752_v27, %v4748_v45  ;;  %v4569_v22 = vpop.f32.mrb[188].mxu0  ;;  %v4679_v16 = vadd.f32 %v4678_v61, %v4405_v51  ;;  %v4750_v9 = vmax.f32 %v4675_v46, 0.0  ;;  %v4420_v18 = vpop.permute.xlu1 %4419 }
 0x978   :  { %v4570_v19 = vadd.f32 %v4569_v22, %v4410_v59  ;;  %v4571_v35 = vpop.f32.mrb[189].mxu0  ;;  %v4753_v39 = vmax.f32 %v4677_v14, 0.0 }
 0x979   :  { %v4572_v4 = vadd.f32 %v4571_v35, %v4410_v59  ;;  %v4573_v15 = vpop.f32.mrb[190].mxu0  ;;  %v4754_v38 = vmax.f32 %v4679_v16, 0.0  ;;  %4959 = vmatprep.subr.bf16.mxu0 %v4820_v54 }
 0x97a   :  { %v4821_v58 = vpack.c.bf16 %v4753_v39, %v4749_v33  ;;  %v4574_v60 = vadd.f32 %v4573_v15, %v4415_v29  ;;  %v4575_v37 = vpop.f32.mrb[191].mxu0  ;;  %4960 = vmatpush1.bf16.msra.mxu0 %v4819_v11  ;;  %v4755_v34 = vmax.f32 %v4570_v19, 0.0  ;;  %v4435_v19 = vpop.permute.xlu0 %4434 }
 0x97b   :  { %v4822_v49 = vpack.c.bf16 %v4754_v38, %v4750_v9  ;;  %v4576_v25 = vadd.f32 %v4575_v37, %v4415_v29  ;;  %v4682_v36 = vpop.f32.mrb[156].mxu1  ;;  %v4756_v5 = vmax.f32 %v4572_v4, 0.0  ;;  %v4430_v11 = vpop.permute.xlu1 %4429 }
 0x97c   :  { %v4759_v23 = vmax.f32 %v4574_v60, 0.0  ;;  %v4683_v0 = vadd.f32 %v4682_v36, %v4410_v59  ;;  %v4684_v28 = vpop.f32.mrb[157].mxu1 }
 0x97d   :  { %v4760_v51 = vmax.f32 %v4576_v25, 0.0  ;;  %v4685_v3 = vadd.f32 %v4684_v28, %v4410_v59  ;;  %v4686_v52 = vpop.f32.mrb[158].mxu1  ;;  %5072 = vmatprep.subr.bf16.mxu1 %v4822_v49 }
 0x97e   :  { %v4823_v43 = vpack.c.bf16 %v4759_v23, %v4755_v34  ;;  %v4687_v20 = vadd.f32 %v4686_v52, %v4415_v29  ;;  %v4688_v47 = vpop.f32.mrb[159].mxu1  ;;  %5073 = vmatpush1.bf16.msra.mxu1 %v4821_v58  ;;  %v4757_v63 = vmax.f32 %v4683_v0, 0.0 }
 0x97f   :  { %v4824_v62 = vpack.c.bf16 %v4760_v51, %v4756_v5  ;;  %v4579_v17 = vpop.f32.mrb[192].mxu0  ;;  %v4689_v21 = vadd.f32 %v4688_v47, %v4415_v29  ;;  %v4758_v10 = vmax.f32 %v4685_v3, 0.0 }
 0x980   :  { %v4580_v50 = vadd.f32 %v4579_v17, %v4420_v18  ;;  %v4581_v41 = vpop.f32.mrb[193].mxu0  ;;  %v4761_v32 = vmax.f32 %v4687_v20, 0.0 }
 0x981   :  { %v4582_v56 = vadd.f32 %v4581_v41, %v4420_v18  ;;  %v4583_v31 = vpop.f32.mrb[194].mxu0  ;;  %v4762_v24 = vmax.f32 %v4689_v21, 0.0  ;;  %4961 = vmatprep.subr.bf16.mxu0 %v4824_v62 }
 0x982   :  { %v4825_v30 = vpack.c.bf16 %v4761_v32, %v4757_v63  ;;  %v4584_v7 = vadd.f32 %v4583_v31, %v4425_v53  ;;  %v4585_v1 = vpop.f32.mrb[195].mxu0  ;;  %4962 = vmatpush1.bf16.msra.mxu0 %v4823_v43  ;;  %v4763_v48 = vmax.f32 %v4580_v50, 0.0  ;;  %v4440_v43 = vpop.permute.xlu1 %4439 }
 0x983   :  { %v4826_v26 = vpack.c.bf16 %v4762_v24, %v4758_v10  ;;  %v4586_v44 = vadd.f32 %v4585_v1, %v4425_v53  ;;  %v4692_v59 = vpop.f32.mrb[160].mxu1  ;;  %v4764_v8 = vmax.f32 %v4582_v56, 0.0  ;;  %v4445_v50 = vpop.permute.xlu0 %4444 }
 0x984   :  { %v4767_v45 = vmax.f32 %v4584_v7, 0.0  ;;  %v4693_v57 = vadd.f32 %v4692_v59, %v4420_v18  ;;  %v4694_v12 = vpop.f32.mrb[161].mxu1 }
 0x985   :  { %v4768_v13 = vmax.f32 %v4586_v44, 0.0  ;;  %v4695_v55 = vadd.f32 %v4694_v12, %v4420_v18  ;;  %v4696_v42 = vpop.f32.mrb[162].mxu1  ;;  %5074 = vmatprep.subr.bf16.mxu1 %v4826_v26 }
 0x986   :  { %v4827_v27 = vpack.c.bf16 %v4767_v45, %v4763_v48  ;;  %v4697_v46 = vadd.f32 %v4696_v42, %v4425_v53  ;;  %v4698_v40 = vpop.f32.mrb[163].mxu1  ;;  %5075 = vmatpush1.bf16.msra.mxu1 %v4825_v30  ;;  %v4765_v22 = vmax.f32 %v4693_v57, 0.0 }
 0x987   :  { %v4828_v14 = vpack.c.bf16 %v4768_v13, %v4764_v8  ;;  %v4589_v61 = vpop.f32.mrb[196].mxu0  ;;  %v4699_v54 = vadd.f32 %v4698_v40, %v4425_v53  ;;  %v4766_v35 = vmax.f32 %v4695_v55, 0.0 }
 0x988   :  { %v4590_v16 = vadd.f32 %v4589_v61, %v4430_v11  ;;  %v4591_v6 = vpop.f32.mrb[197].mxu0  ;;  %v4769_v33 = vmax.f32 %v4697_v46, 0.0 }
 0x989   :  { %v4592_v39 = vadd.f32 %v4591_v6, %v4430_v11  ;;  %v4593_v29 = vpop.f32.mrb[198].mxu0  ;;  %v4770_v9 = vmax.f32 %v4699_v54, 0.0  ;;  %4963 = vmatprep.subr.bf16.mxu0 %v4828_v14 }
 0x98a   :  { %v4829_v4 = vpack.c.bf16 %v4769_v33, %v4765_v22  ;;  %v4594_v15 = vadd.f32 %v4593_v29, %v4435_v19  ;;  %v4595_v38 = vpop.f32.mrb[199].mxu0  ;;  %4964 = vmatpush1.bf16.msra.mxu0 %v4827_v27  ;;  %v4771_v49 = vmax.f32 %v4590_v16, 0.0  ;;  %v4450_v27 = vpop.permute.xlu1 %4449 }
 0x98b   :  { %v4830_v58 = vpack.c.bf16 %v4770_v9, %v4766_v35  ;;  %v4596_v60 = vadd.f32 %v4595_v38, %v4435_v19  ;;  %v4702_v37 = vpop.f32.mrb[164].mxu1  ;;  %v4772_v23 = vmax.f32 %v4592_v39, 0.0  ;;  %v4455_v16 = vpop.permute.xlu0 %4454 }
 0x98c   :  { %v4775_v25 = vmax.f32 %v4594_v15, 0.0  ;;  %v4703_v36 = vadd.f32 %v4702_v37, %v4430_v11  ;;  %v4704_v34 = vpop.f32.mrb[165].mxu1 }
 0x98d   :  { %v4776_v0 = vmax.f32 %v4596_v60, 0.0  ;;  %v4705_v28 = vadd.f32 %v4704_v34, %v4430_v11  ;;  %v4706_v5 = vpop.f32.mrb[166].mxu1  ;;  %5076 = vmatprep.subr.bf16.mxu1 %v4830_v58 }
 0x98e   :  { %v4831_v51 = vpack.c.bf16 %v4775_v25, %v4771_v49  ;;  %v4707_v3 = vadd.f32 %v4706_v5, %v4435_v19  ;;  %v4708_v52 = vpop.f32.mrb[167].mxu1  ;;  %5077 = vmatpush1.bf16.msra.mxu1 %v4829_v4  ;;  %v4773_v62 = vmax.f32 %v4703_v36, 0.0 }
 0x98f   :  { %v4832_v20 = vpack.c.bf16 %v4776_v0, %v4772_v23  ;;  %v4599_v47 = vpop.f32.mrb[200].mxu0  ;;  %v4709_v18 = vadd.f32 %v4708_v52, %v4435_v19  ;;  %v4774_v41 = vmax.f32 %v4705_v28, 0.0 }
 0x990   :  { %v4600_v17 = vadd.f32 %v4599_v47, %v4440_v43  ;;  %v4601_v21 = vpop.f32.mrb[201].mxu0  ;;  %v4777_v63 = vmax.f32 %v4707_v3, 0.0 }
 0x991   :  { %v4602_v32 = vadd.f32 %v4601_v21, %v4440_v43  ;;  %v4603_v53 = vpop.f32.mrb[202].mxu0  ;;  %v4778_v10 = vmax.f32 %v4709_v18, 0.0  ;;  %4965 = vmatprep.subr.bf16.mxu0 %v4832_v20  ;;  %v5991_v18 = vld [vmem:[%s9654_s5] sm:$0xff]   ;;  %v5992_v21 = vld [vmem:[%s9654_s5 + $0x8] sm:$0xff]  }
 0x992   :  { %v4833_v56 = vpack.c.bf16 %v4777_v63, %v4773_v62  ;;  %v4604_v31 = vadd.f32 %v4603_v53, %v4445_v50  ;;  %v4605_v24 = vpop.f32.mrb[203].mxu0  ;;  %4966 = vmatpush1.bf16.msra.mxu0 %v4831_v51  ;;  %v4779_v26 = vmax.f32 %v4600_v17, 0.0  ;;  %v5993_v63 = vld [vmem:[%s9654_s5 + $0x10] sm:$0xff]  }
 0x993   :  { %v4834_v30 = vpack.c.bf16 %v4778_v10, %v4774_v41  ;;  %v4606_v7 = vadd.f32 %v4605_v24, %v4445_v50  ;;  %v4712_v1 = vpop.f32.mrb[168].mxu1  ;;  %v4780_v45 = vmax.f32 %v4602_v32, 0.0  ;;  %v5995_v41 = vld [vmem:[%s9654_s5 + $0x20] sm:$0xff]   ;;  %v5996_v32 = vld [vmem:[%s9654_s5 + $0x28] sm:$0xff]   ;;  %v5997_v53 = vld [vmem:[%s9654_s5 + $0x30] sm:$0xff]   ;;  %v4849_v24 = vpop.permute.xlu0 %4848 }
 0x994   :  { %v4783_v44 = vmax.f32 %v4604_v31, 0.0  ;;  %v4713_v59 = vadd.f32 %v4712_v1, %v4440_v43  ;;  %v4714_v48 = vpop.f32.mrb[169].mxu1  ;;  %v5998_v10 = vld [vmem:[%s9654_s5 + $0x38] sm:$0xff]   ;;  %v5181_v1 = vld [vmem:[#allocation5] sm:$0xff] }
 0x995   :  { %v4784_v57 = vmax.f32 %v4606_v7, 0.0  ;;  %v4715_v12 = vadd.f32 %v4714_v48, %v4440_v43  ;;  %v4716_v8 = vpop.f32.mrb[170].mxu1  ;;  %5078 = vmatprep.subr.bf16.mxu1 %v4834_v30  ;;  %v5230_v48 = vld [vmem:[#allocation5 + $0x80] sm:$0xff] }
 0x996   :  { %v4835_v13 = vpack.c.bf16 %v4783_v44, %v4779_v26  ;;  %v4717_v55 = vadd.f32 %v4716_v8, %v4445_v50  ;;  %v4718_v42 = vpop.f32.mrb[171].mxu1  ;;  %5079 = vmatpush1.bf16.msra.mxu1 %v4833_v56  ;;  %v4781_v14 = vmax.f32 %v4713_v59, 0.0  ;;  %v4845_v56 = vpop.permute.xlu1 %4844  ;;  %v5182_v8 = vld [vmem:[#allocation5 + $0x8] sm:$0xff] }
 0x997   :  { %v4836_v46 = vpack.c.bf16 %v4784_v57, %v4780_v45  ;;  %v4719_v40 = vadd.f32 %v4718_v42, %v4445_v50  ;;  %v4609_v11 = vpop.f32.mrb[204].mxu0  ;;  %v4782_v6 = vmax.f32 %v4715_v12, 0.0  ;;  %v5994_v50 = vld [vmem:[%s9654_s5 + $0x18] sm:$0xff]   ;;  %s6572_s5 = smov [#allocation5]  }
 0x998   :  { %v4785_v61 = vmax.f32 %v4717_v55, 0.0  ;;  %v4610_v54 = vadd.f32 %v4609_v11, %v4450_v27  ;;  %v4611_v22 = vpop.f32.mrb[205].mxu0  ;;  %s5381_s10 = sshll.u32 %s6572_s5, 4  ;;  %s5382_s10 = int_to_ptr.vmem [resolvable:$true] %s5381_s10 }
 0x999   :  { %v4786_v33 = vmax.f32 %v4719_v40, 0.0  ;;  %v4612_v19 = vadd.f32 %v4611_v22, %v4450_v27  ;;  %v4613_v35 = vpop.f32.mrb[206].mxu0  ;;  %4967 = vmatprep.subr.bf16.mxu0 %v4836_v46  ;;  %s6541_s13 = scalar_lea.vmem %s5382_s10, 8192  ;;  %p6546_p9 = scmp.lt.s32.totalorder %s5382_s10, %s5382_s10 }
 0x99a   :  { %v4837_v39 = vpack.c.bf16 %v4785_v61, %v4781_v14  ;;  %v4614_v29 = vadd.f32 %v4613_v35, %v4455_v16  ;;  %v4615_v9 = vpop.f32.mrb[207].mxu0  ;;  %4968 = vmatpush1.bf16.msra.mxu0 %v4835_v13  ;;  %v4787_v58 = vmax.f32 %v4610_v54, 0.0  ;;  %v4853_v42 = vpop.permute.xlu1 %4852  ;;  %v5279_v14 = vld [vmem:[#allocation5 + $0x100] sm:$0xff]  ;;  %v5280_v35 = vld [vmem:[#allocation5 + $0x108] sm:$0xff]  ;;  %p6542_p8 = scmp.ne.s32.totalorder %s5382_s10, %s6541_s13  ;;  %p6547_p10 = scmp.lt.s32.totalorder %s6541_s13, %s6541_s13 }
 0x99b   :  { %v4838_v4 = vpack.c.bf16 %v4786_v33, %v4782_v6  ;;  %v4616_v15 = vadd.f32 %v4615_v9, %v4455_v16  ;;  %v4722_v38 = vpop.f32.mrb[172].mxu1  ;;  %v4788_v25 = vmax.f32 %v4612_v19, 0.0 }
 0x99c   :  { %v4791_v60 = vmax.f32 %v4614_v29, 0.0  ;;  %v4723_v37 = vadd.f32 %v4722_v38, %v4450_v27  ;;  %v4724_v49 = vpop.f32.mrb[173].mxu1  ;;  %p6548_p11 = por %p6547_p10, %p6546_p9 }
 0x99d   :  { %v4792_v36 = vmax.f32 %v4616_v15, 0.0  ;;  %v4725_v34 = vadd.f32 %v4724_v49, %v4450_v27  ;;  %v4726_v23 = vpop.f32.mrb[174].mxu1  ;;  %5080 = vmatprep.subr.bf16.mxu1 %v4838_v4  ;;  %v5231_v27 = vld [vmem:[#allocation5 + $0x88] sm:$0xff] }
 0x99e   :  { %v4839_v0 = vpack.c.bf16 %v4791_v60, %v4787_v58  ;;  %v4727_v28 = vadd.f32 %v4726_v23, %v4455_v16  ;;  %v4728_v5 = vpop.f32.mrb[175].mxu1  ;;  %5081 = vmatpush1.bf16.msra.mxu1 %v4837_v39  ;;  %v4789_v52 = vmax.f32 %v4723_v37, 0.0  ;;  %v5329_v4 = vld [vmem:[#allocation5 + $0x188] sm:$0xff]  ;;  %v5183_v60 = vld [vmem:[#allocation5 + $0x10] sm:$0xff]  ;;  %v4857_v49 = vpop.permute.xlu1 %4856  ;;  %p6549_p12 = pnand %p6548_p11, %p6542_p8 }
 0x99f   :  { %v4840_v51 = vpack.c.bf16 %v4792_v36, %v4788_v25  ;;  %v4729_v3 = vadd.f32 %v4728_v5, %v4455_v16  ;;  %v4790_v20 = vmax.f32 %v4725_v34, 0.0  ;;  %v5328_v16 = vld [vmem:[#allocation5 + $0x180] sm:$0xff]  ;;  %v5232_v34 = vld [vmem:[#allocation5 + $0x90] sm:$0xff]  ;;  %v5184_v5 = vld [vmem:[#allocation5 + $0x18] sm:$0xff] }
 0x9a0   :  { %v4793_v43 = vmax.f32 %v4727_v28, 0.0 }
 0x9a1   :  { %v4794_v47 = vmax.f32 %v4729_v3, 0.0  ;;  %4969 = vmatprep.subr.bf16.mxu0 %v4840_v51 }
 0x9a2   :  { %v4841_v62 = vpack.c.bf16 %v4793_v43, %v4789_v52  ;;  %4970 = vmatpush1.bf16.msra.mxu0 %v4839_v0  ;;  %v5233_v43 = vld [vmem:[#allocation5 + $0x98] sm:$0xff] }
 0x9a3   :  { %v4842_v17 = vpack.c.bf16 %v4794_v47, %v4790_v20 }
 0x9a5   :  { %4988 = vmatmul.mubr.bf16.vlgmr.msra.gmra.mrb[208].mxu0 %v5991_v18  ;;  %5082 = vmatprep.subr.bf16.mxu1 %v4842_v17 }
 0x9a6   :  { %5083 = vmatpush1.bf16.msra.mxu1 %v4841_v62  ;;  %4997 = vmatprep.mubr.bf16.mxu0 %v10026_v2  ;;  %v5281_v62 = vld [vmem:[#allocation5 + $0x110] sm:$0xff] }
 0x9a9   :  { %5101 = vmatmul.mubr.bf16.vlgmr.msra.gmra.mrb[176].mxu1 %v5991_v18 }
 0x9aa   :  { %5110 = vmatprep.mubr.bf16.mxu1 %v10026_v2 }
 0x9ad   :  { %4998 = vmatmul.mubr.bf16.gmra.mrb[212].mxu0 %v5992_v21 }
 0x9ae   :  { %5007 = vmatprep.mubr.bf16.mxu0 %v10026_v2 }
 0x9b1   :  { %5111 = vmatmul.mubr.bf16.gmra.mrb[180].mxu1 %v5992_v21 }
 0x9b2   :  { %5120 = vmatprep.mubr.bf16.mxu1 %v10026_v2 }
 0x9b5   :  { %5008 = vmatmul.mubr.bf16.gmra.mrb[216].mxu0 %v5993_v63 }
 0x9b6   :  { %5017 = vmatprep.mubr.bf16.mxu0 %v10026_v2 }
 0x9b9   :  { %5121 = vmatmul.mubr.bf16.gmra.mrb[184].mxu1 %v5993_v63  ;;  %v4861_v63 = vpop.permute.xlu0 %4860 }
 0x9ba   :  { %5130 = vmatprep.mubr.bf16.mxu1 %v10026_v2 }
 0x9bd   :  { %5018 = vmatmul.mubr.bf16.gmra.mrb[220].mxu0 %v5994_v50 }
 0x9be   :  { %5027 = vmatprep.mubr.bf16.mxu0 %v10026_v2 }
 0x9c1   :  { %5131 = vmatmul.mubr.bf16.gmra.mrb[188].mxu1 %v5994_v50 }
 0x9c2   :  { %5140 = vmatprep.mubr.bf16.mxu1 %v10026_v2 }
 0x9c5   :  { %5028 = vmatmul.mubr.bf16.gmra.mrb[224].mxu0 %v5995_v41 }
 0x9c6   :  { %5037 = vmatprep.mubr.bf16.mxu0 %v10026_v2 }
 0x9c9   :  { %5141 = vmatmul.mubr.bf16.gmra.mrb[192].mxu1 %v5995_v41  ;;  %v5330_v41 = vld [vmem:[#allocation5 + $0x190] sm:$0xff] }
 0x9ca   :  { %5150 = vmatprep.mubr.bf16.mxu1 %v10026_v2 }
 0x9cd   :  { %5038 = vmatmul.mubr.bf16.gmra.mrb[228].mxu0 %v5996_v32 }
 0x9ce   :  { %5047 = vmatprep.mubr.bf16.mxu0 %v10026_v2 }
 0x9d1   :  { %5151 = vmatmul.mubr.bf16.gmra.mrb[196].mxu1 %v5996_v32 }
 0x9d2   :  { %5160 = vmatprep.mubr.bf16.mxu1 %v10026_v2 }
 0x9d5   :  { %5048 = vmatmul.mubr.bf16.gmra.mrb[232].mxu0 %v5997_v53 }
 0x9d6   :  { %5057 = vmatprep.mubr.bf16.mxu0 %v10026_v2 }
 0x9d9   :  { %5161 = vmatmul.mubr.bf16.gmra.mrb[200].mxu1 %v5997_v53 }
 0x9da   :  { %5170 = vmatprep.mubr.bf16.mxu1 %v10026_v2 }
 0x9dd   :  { %5058 = vmatmul.mubr.bf16.gmra.mrb[236].mxu0 %v5998_v10 }
 0x9e1   :  { %5171 = vmatmul.mubr.bf16.gmra.mrb[204].mxu1 %v5998_v10 }
 0xa78   :  { %v4989_v31 = vpop.f32.mrb[208].mxu0 }
 0xa79   :  { %v4990_v30 = vadd.f32 %v4989_v31, %v4845_v56  ;;  %v4991_v7 = vpop.f32.mrb[209].mxu0 }
 0xa7a   :  { %v4992_v26 = vadd.f32 %v4991_v7, %v4845_v56  ;;  %v4993_v44 = vpop.f32.mrb[210].mxu0  ;;  %v5331_v7 = vld [vmem:[#allocation5 + $0x198] sm:$0xff] }
 0xa7b   :  { %v5197_v59 = vadd.f32 %v5181_v1, %v4990_v30  ;;  %v4994_v45 = vadd.f32 %v4993_v44, %v4849_v24  ;;  %v4995_v57 = vpop.f32.mrb[211].mxu0 }
 0xa7c   :  { %v5246_v12 = vadd.f32 %v5230_v48, %v4992_v26  ;;  %v4996_v13 = vadd.f32 %v4995_v57, %v4849_v24  ;;  %v5102_v55 = vpop.f32.mrb[176].mxu1 }
 0xa7d   :  { %5213 = vst [vmem:[#allocation5] sm:$0xff] %v5197_v59  ;;  %v5198_v2 = vadd.f32 %v5182_v8, %v4994_v45  ;;  %v5103_v46 = vadd.f32 %v5102_v55, %v4845_v56  ;;  %v5104_v40 = vpop.f32.mrb[177].mxu1  ;;  %v5185_v59 = vld [vmem:[#allocation5 + $0x20] sm:$0xff]  ;;  %v4865_v45 = vpop.permute.xlu1 %4864 }
 0xa7e   :  { %5262 = vst [vmem:[#allocation5 + $0x80] sm:$0xff] %v5246_v12  ;;  %v5247_v11 = vadd.f32 %v5231_v27, %v4996_v13  ;;  %v5105_v61 = vadd.f32 %v5104_v40, %v4845_v56  ;;  %v5106_v54 = vpop.f32.mrb[178].mxu1  ;;  %v5282_v56 = vld [vmem:[#allocation5 + $0x118] sm:$0xff]  ;;  %v5234_v8 = vld [vmem:[#allocation5 + $0xa0] sm:$0xff] }
 0xa7f   :  { %5214 = vst [vmem:[#allocation5 + $0x8] sm:$0xff] %v5198_v2  ;;  %v5295_v22 = vadd.f32 %v5279_v14, %v5103_v46  ;;  %v5107_v6 = vadd.f32 %v5106_v54, %v4849_v24  ;;  %v5108_v33 = vpop.f32.mrb[179].mxu1  ;;  %v5186_v2 = vld [vmem:[#allocation5 + $0x28] sm:$0xff] }
 0xa80   :  { %5263 = vst [vmem:[#allocation5 + $0x88] sm:$0xff] %v5247_v11  ;;  %v5344_v19 = vadd.f32 %v5328_v16, %v5105_v61  ;;  %v5109_v39 = vadd.f32 %v5108_v33, %v4849_v24  ;;  %v4999_v29 = vpop.f32.mrb[212].mxu0  ;;  %v5235_v11 = vld [vmem:[#allocation5 + $0xa8] sm:$0xff]  ;;  %v4869_v33 = vpop.permute.xlu0 %4868 }
 0xa81   :  { %5311 = vst [vmem:[#allocation5 + $0x100] sm:$0xff] %v5295_v22  ;;  %v5296_v9 = vadd.f32 %v5280_v35, %v5107_v6  ;;  %v5000_v15 = vadd.f32 %v4999_v29, %v4853_v42  ;;  %v5001_v38 = vpop.f32.mrb[213].mxu0  ;;  %v5283_v22 = vld [vmem:[#allocation5 + $0x120] sm:$0xff] }
 0xa82   :  { %5360 = vst [vmem:[#allocation5 + $0x180] sm:$0xff] %v5344_v19  ;;  %v5345_v58 = vadd.f32 %v5329_v4, %v5109_v39  ;;  %v5002_v37 = vadd.f32 %v5001_v38, %v4853_v42  ;;  %v5003_v25 = vpop.f32.mrb[214].mxu0  ;;  %v5332_v35 = vld [vmem:[#allocation5 + $0x1a0] sm:$0xff]  ;;  %v5284_v4 = vld [vmem:[#allocation5 + $0x128] sm:$0xff] }
 0xa83   :  { %5312 = vst [vmem:[#allocation5 + $0x108] sm:$0xff] %v5296_v9  ;;  %v5199_v36 = vadd.f32 %v5183_v60, %v5000_v15  ;;  %v5004_v23 = vadd.f32 %v5003_v25, %v4857_v49  ;;  %v5005_v0 = vpop.f32.mrb[215].mxu0  ;;  %v5333_v60 = vld [vmem:[#allocation5 + $0x1a8] sm:$0xff] }
 0xa84   :  { %5361 = vst [vmem:[#allocation5 + $0x188] sm:$0xff] %v5345_v58  ;;  %v5248_v28 = vadd.f32 %v5232_v34, %v5002_v37  ;;  %v5006_v51 = vadd.f32 %v5005_v0, %v4857_v49  ;;  %v5112_v3 = vpop.f32.mrb[180].mxu1 }
 0xa85   :  { %5215 = vst [vmem:[#allocation5 + $0x10] sm:$0xff] %v5199_v36  ;;  %v5200_v52 = vadd.f32 %v5184_v5, %v5004_v23  ;;  %v5113_v20 = vadd.f32 %v5112_v3, %v4853_v42  ;;  %v5114_v47 = vpop.f32.mrb[181].mxu1  ;;  %v5187_v36 = vld [vmem:[#allocation5 + $0x30] sm:$0xff]  ;;  %v4873_v23 = vpop.permute.xlu1 %4872 }
 0xa86   :  { %5264 = vst [vmem:[#allocation5 + $0x90] sm:$0xff] %v5248_v28  ;;  %v5249_v18 = vadd.f32 %v5233_v43, %v5006_v51  ;;  %v5115_v17 = vadd.f32 %v5114_v47, %v4853_v42  ;;  %v5116_v21 = vpop.f32.mrb[182].mxu1  ;;  %v5236_v5 = vld [vmem:[#allocation5 + $0xb0] sm:$0xff]  ;;  %v5188_v43 = vld [vmem:[#allocation5 + $0x38] sm:$0xff] }
 0xa87   :  { %5216 = vst [vmem:[#allocation5 + $0x18] sm:$0xff] %v5200_v52  ;;  %v5297_v50 = vadd.f32 %v5281_v62, %v5113_v20  ;;  %v5117_v32 = vadd.f32 %v5116_v21, %v4857_v49  ;;  %v5118_v53 = vpop.f32.mrb[183].mxu1  ;;  %v5237_v62 = vld [vmem:[#allocation5 + $0xb8] sm:$0xff] }
 0xa88   :  { %5265 = vst [vmem:[#allocation5 + $0x98] sm:$0xff] %v5249_v18  ;;  %v5346_v10 = vadd.f32 %v5330_v41, %v5115_v17  ;;  %v5119_v31 = vadd.f32 %v5118_v53, %v4857_v49  ;;  %v5009_v24 = vpop.f32.mrb[216].mxu0 }
 0xa89   :  { %5313 = vst [vmem:[#allocation5 + $0x110] sm:$0xff] %v5297_v50  ;;  %v5298_v30 = vadd.f32 %v5282_v56, %v5117_v32  ;;  %v5010_v1 = vadd.f32 %v5009_v24, %v4861_v63  ;;  %v5011_v26 = vpop.f32.mrb[217].mxu0  ;;  %v5285_v50 = vld [vmem:[#allocation5 + $0x130] sm:$0xff] }
 0xa8a   :  { %5362 = vst [vmem:[#allocation5 + $0x190] sm:$0xff] %v5346_v10  ;;  %v5347_v44 = vadd.f32 %v5331_v7, %v5119_v31  ;;  %v5012_v48 = vadd.f32 %v5011_v26, %v4861_v63  ;;  %v5013_v57 = vpop.f32.mrb[218].mxu0  ;;  %v5334_v10 = vld [vmem:[#allocation5 + $0x1b0] sm:$0xff]  ;;  %v4877_v26 = vpop.permute.xlu0 %4876 }
 0xa8b   :  { %5314 = vst [vmem:[#allocation5 + $0x118] sm:$0xff] %v5298_v30  ;;  %v5201_v12 = vadd.f32 %v5185_v59, %v5010_v1  ;;  %v5014_v13 = vadd.f32 %v5013_v57, %v4865_v45  ;;  %v5015_v55 = vpop.f32.mrb[219].mxu0  ;;  %v5286_v30 = vld [vmem:[#allocation5 + $0x138] sm:$0xff] }
 0xa8c   :  { %5363 = vst [vmem:[#allocation5 + $0x198] sm:$0xff] %v5347_v44  ;;  %v5250_v42 = vadd.f32 %v5234_v8, %v5012_v48  ;;  %v5016_v27 = vadd.f32 %v5015_v55, %v4865_v45  ;;  %v5122_v46 = vpop.f32.mrb[184].mxu1  ;;  %v5335_v59 = vld [vmem:[#allocation5 + $0x1b8] sm:$0xff] }
 0xa8d   :  { %5217 = vst [vmem:[#allocation5 + $0x20] sm:$0xff] %v5201_v12  ;;  %v5202_v40 = vadd.f32 %v5186_v2, %v5014_v13  ;;  %v5123_v14 = vadd.f32 %v5122_v46, %v4861_v63  ;;  %v5124_v61 = vpop.f32.mrb[185].mxu1  ;;  %v5189_v12 = vld [vmem:[#allocation5 + $0x40] sm:$0xff]  ;;  %v4881_v13 = vpop.permute.xlu1 %4880 }
 0xa8e   :  { %5266 = vst [vmem:[#allocation5 + $0xa0] sm:$0xff] %v5250_v42  ;;  %v5251_v54 = vadd.f32 %v5235_v11, %v5016_v27  ;;  %v5125_v16 = vadd.f32 %v5124_v61, %v4861_v63  ;;  %v5126_v6 = vpop.f32.mrb[186].mxu1  ;;  %v5238_v2 = vld [vmem:[#allocation5 + $0xc0] sm:$0xff]  ;;  %v5190_v11 = vld [vmem:[#allocation5 + $0x48] sm:$0xff] }
 0xa8f   :  { %5218 = vst [vmem:[#allocation5 + $0x28] sm:$0xff] %v5202_v40  ;;  %v5299_v19 = vadd.f32 %v5283_v22, %v5123_v14  ;;  %v5127_v39 = vadd.f32 %v5126_v6, %v4865_v45  ;;  %v5128_v29 = vpop.f32.mrb[187].mxu1  ;;  %v5239_v22 = vld [vmem:[#allocation5 + $0xc8] sm:$0xff] }
 0xa90   :  { %5267 = vst [vmem:[#allocation5 + $0xa8] sm:$0xff] %v5251_v54  ;;  %v5348_v9 = vadd.f32 %v5332_v35, %v5125_v16  ;;  %v5129_v15 = vadd.f32 %v5128_v29, %v4865_v45  ;;  %v5019_v38 = vpop.f32.mrb[220].mxu0 }
 0xa91   :  { %5315 = vst [vmem:[#allocation5 + $0x120] sm:$0xff] %v5299_v19  ;;  %v5300_v58 = vadd.f32 %v5284_v4, %v5127_v39  ;;  %v5020_v37 = vadd.f32 %v5019_v38, %v4869_v33  ;;  %v5021_v49 = vpop.f32.mrb[221].mxu0  ;;  %v5287_v19 = vld [vmem:[#allocation5 + $0x140] sm:$0xff] }
 0xa92   :  { %5364 = vst [vmem:[#allocation5 + $0x1a0] sm:$0xff] %v5348_v9  ;;  %v5349_v25 = vadd.f32 %v5333_v60, %v5129_v15  ;;  %v5022_v34 = vadd.f32 %v5021_v49, %v4869_v33  ;;  %v5023_v0 = vpop.f32.mrb[222].mxu0  ;;  %v5336_v9 = vld [vmem:[#allocation5 + $0x1c0] sm:$0xff]  ;;  %v4885_v49 = vpop.permute.xlu0 %4884 }
 0xa93   :  { %5316 = vst [vmem:[#allocation5 + $0x128] sm:$0xff] %v5300_v58  ;;  %v5203_v28 = vadd.f32 %v5187_v36, %v5020_v37  ;;  %v5024_v51 = vadd.f32 %v5023_v0, %v4873_v23  ;;  %v5025_v3 = vpop.f32.mrb[223].mxu0  ;;  %v5288_v58 = vld [vmem:[#allocation5 + $0x148] sm:$0xff] }
 0xa94   :  { %5365 = vst [vmem:[#allocation5 + $0x1a8] sm:$0xff] %v5349_v25  ;;  %v5252_v52 = vadd.f32 %v5236_v5, %v5022_v34  ;;  %v5026_v20 = vadd.f32 %v5025_v3, %v4873_v23  ;;  %v5132_v47 = vpop.f32.mrb[188].mxu1  ;;  %v5337_v36 = vld [vmem:[#allocation5 + $0x1c8] sm:$0xff] }
 0xa95   :  { %5219 = vst [vmem:[#allocation5 + $0x30] sm:$0xff] %v5203_v28  ;;  %v5204_v18 = vadd.f32 %v5188_v43, %v5024_v51  ;;  %v5133_v17 = vadd.f32 %v5132_v47, %v4869_v33  ;;  %v5134_v21 = vpop.f32.mrb[189].mxu1  ;;  %v5191_v28 = vld [vmem:[#allocation5 + $0x50] sm:$0xff]  ;;  %v4889_v51 = vpop.permute.xlu1 %4888 }
 0xa96   :  { %5268 = vst [vmem:[#allocation5 + $0xb0] sm:$0xff] %v5252_v52  ;;  %v5253_v63 = vadd.f32 %v5237_v62, %v5026_v20  ;;  %v5135_v41 = vadd.f32 %v5134_v21, %v4869_v33  ;;  %v5136_v32 = vpop.f32.mrb[190].mxu1  ;;  %v5240_v43 = vld [vmem:[#allocation5 + $0xd0] sm:$0xff]  ;;  %v5192_v62 = vld [vmem:[#allocation5 + $0x58] sm:$0xff] }
 0xa97   :  { %5220 = vst [vmem:[#allocation5 + $0x38] sm:$0xff] %v5204_v18  ;;  %v5301_v53 = vadd.f32 %v5285_v50, %v5133_v17  ;;  %v5137_v56 = vadd.f32 %v5136_v32, %v4873_v23  ;;  %v5138_v31 = vpop.f32.mrb[191].mxu1  ;;  %v5241_v50 = vld [vmem:[#allocation5 + $0xd8] sm:$0xff] }
 0xa98   :  { %5269 = vst [vmem:[#allocation5 + $0xb8] sm:$0xff] %v5253_v63  ;;  %v5350_v24 = vadd.f32 %v5334_v10, %v5135_v41  ;;  %v5139_v7 = vadd.f32 %v5138_v31, %v4873_v23  ;;  %v5029_v1 = vpop.f32.mrb[224].mxu0  ;;  %v5289_v10 = vld [vmem:[#allocation5 + $0x150] sm:$0xff] }
 0xa99   :  { %5317 = vst [vmem:[#allocation5 + $0x130] sm:$0xff] %v5301_v53  ;;  %v5302_v44 = vadd.f32 %v5286_v30, %v5137_v56  ;;  %v5030_v48 = vadd.f32 %v5029_v1, %v4877_v26  ;;  %v5031_v45 = vpop.f32.mrb[225].mxu0  ;;  %v5338_v30 = vld [vmem:[#allocation5 + $0x1d0] sm:$0xff] }
 0xa9a   :  { %5366 = vst [vmem:[#allocation5 + $0x1b0] sm:$0xff] %v5350_v24  ;;  %v5351_v57 = vadd.f32 %v5335_v59, %v5139_v7  ;;  %v5032_v8 = vadd.f32 %v5031_v45, %v4877_v26  ;;  %v5033_v55 = vpop.f32.mrb[226].mxu0  ;;  %v4893_v45 = vpop.permute.xlu0 %4892 }
 0xa9b   :  { %5318 = vst [vmem:[#allocation5 + $0x138] sm:$0xff] %v5302_v44  ;;  %v5205_v42 = vadd.f32 %v5189_v12, %v5030_v48  ;;  %v5034_v27 = vadd.f32 %v5033_v55, %v4881_v13  ;;  %v5035_v46 = vpop.f32.mrb[227].mxu0  ;;  %v5290_v44 = vld [vmem:[#allocation5 + $0x158] sm:$0xff] }
 0xa9c   :  { %5367 = vst [vmem:[#allocation5 + $0x1b8] sm:$0xff] %v5351_v57  ;;  %v5254_v40 = vadd.f32 %v5238_v2, %v5032_v8  ;;  %v5036_v14 = vadd.f32 %v5035_v46, %v4881_v13  ;;  %v5142_v61 = vpop.f32.mrb[192].mxu1  ;;  %v5339_v12 = vld [vmem:[#allocation5 + $0x1d8] sm:$0xff] }
 0xa9d   :  { %5221 = vst [vmem:[#allocation5 + $0x40] sm:$0xff] %v5205_v42  ;;  %v5206_v54 = vadd.f32 %v5190_v11, %v5034_v27  ;;  %v5143_v16 = vadd.f32 %v5142_v61, %v4877_v26  ;;  %v5144_v6 = vpop.f32.mrb[193].mxu1  ;;  %v5193_v42 = vld [vmem:[#allocation5 + $0x60] sm:$0xff]  ;;  %v4897_v27 = vpop.permute.xlu1 %4896 }
 0xa9e   :  { %5270 = vst [vmem:[#allocation5 + $0xc0] sm:$0xff] %v5254_v40  ;;  %v5255_v33 = vadd.f32 %v5239_v22, %v5036_v14  ;;  %v5145_v35 = vadd.f32 %v5144_v6, %v4877_v26  ;;  %v5146_v39 = vpop.f32.mrb[194].mxu1  ;;  %v5242_v11 = vld [vmem:[#allocation5 + $0xe0] sm:$0xff]  ;;  %v5194_v22 = vld [vmem:[#allocation5 + $0x68] sm:$0xff] }
 0xa9f   :  { %5222 = vst [vmem:[#allocation5 + $0x48] sm:$0xff] %v5206_v54  ;;  %v5303_v29 = vadd.f32 %v5287_v19, %v5143_v16  ;;  %v5147_v4 = vadd.f32 %v5146_v39, %v4881_v13  ;;  %v5148_v15 = vpop.f32.mrb[195].mxu1  ;;  %v5243_v19 = vld [vmem:[#allocation5 + $0xe8] sm:$0xff] }
 0xaa0   :  { %5271 = vst [vmem:[#allocation5 + $0xc8] sm:$0xff] %v5255_v33  ;;  %v5352_v38 = vadd.f32 %v5336_v9, %v5145_v35  ;;  %v5149_v60 = vadd.f32 %v5148_v15, %v4881_v13  ;;  %v5039_v37 = vpop.f32.mrb[228].mxu0  ;;  %v5291_v9 = vld [vmem:[#allocation5 + $0x160] sm:$0xff] }
 0xaa1   :  { %5319 = vst [vmem:[#allocation5 + $0x140] sm:$0xff] %v5303_v29  ;;  %v5304_v25 = vadd.f32 %v5288_v58, %v5147_v4  ;;  %v5040_v34 = vadd.f32 %v5039_v37, %v4885_v49  ;;  %v5041_v23 = vpop.f32.mrb[229].mxu0  ;;  %v5340_v58 = vld [vmem:[#allocation5 + $0x1e0] sm:$0xff] }
 0xaa2   :  { %5368 = vst [vmem:[#allocation5 + $0x1c0] sm:$0xff] %v5352_v38  ;;  %v5353_v0 = vadd.f32 %v5337_v36, %v5149_v60  ;;  %v5042_v5 = vadd.f32 %v5041_v23, %v4885_v49  ;;  %v5043_v3 = vpop.f32.mrb[230].mxu0  ;;  %v4901_v23 = vpop.permute.xlu0 %4900 }
 0xaa3   :  { %5320 = vst [vmem:[#allocation5 + $0x148] sm:$0xff] %v5304_v25  ;;  %v5207_v52 = vadd.f32 %v5191_v28, %v5040_v34  ;;  %v5044_v20 = vadd.f32 %v5043_v3, %v4889_v51  ;;  %v5045_v47 = vpop.f32.mrb[231].mxu0  ;;  %v5292_v25 = vld [vmem:[#allocation5 + $0x168] sm:$0xff] }
 0xaa4   :  { %5369 = vst [vmem:[#allocation5 + $0x1c8] sm:$0xff] %v5353_v0  ;;  %v5256_v18 = vadd.f32 %v5240_v43, %v5042_v5  ;;  %v5046_v17 = vadd.f32 %v5045_v47, %v4889_v51  ;;  %v5152_v21 = vpop.f32.mrb[196].mxu1  ;;  %v5341_v28 = vld [vmem:[#allocation5 + $0x1e8] sm:$0xff] }
 0xaa5   :  { %5223 = vst [vmem:[#allocation5 + $0x50] sm:$0xff] %v5207_v52  ;;  %v5208_v63 = vadd.f32 %v5192_v62, %v5044_v20  ;;  %v5153_v41 = vadd.f32 %v5152_v21, %v4885_v49  ;;  %v5154_v32 = vpop.f32.mrb[197].mxu1  ;;  %v5195_v52 = vld [vmem:[#allocation5 + $0x70] sm:$0xff]  ;;  %v4905_v20 = vpop.permute.xlu1 %4904 }
 0xaa6   :  { %5272 = vst [vmem:[#allocation5 + $0xd0] sm:$0xff] %v5256_v18  ;;  %v5257_v53 = vadd.f32 %v5241_v50, %v5046_v17  ;;  %v5155_v56 = vadd.f32 %v5154_v32, %v4885_v49  ;;  %v5156_v31 = vpop.f32.mrb[198].mxu1  ;;  %v5244_v62 = vld [vmem:[#allocation5 + $0xf0] sm:$0xff]  ;;  %v5196_v50 = vld [vmem:[#allocation5 + $0x78] sm:$0xff] }
 0xaa7   :  { %5224 = vst [vmem:[#allocation5 + $0x58] sm:$0xff] %v5208_v63  ;;  %v5305_v24 = vadd.f32 %v5289_v10, %v5153_v41  ;;  %v5157_v7 = vadd.f32 %v5156_v31, %v4889_v51  ;;  %v5158_v1 = vpop.f32.mrb[199].mxu1  ;;  %v5245_v10 = vld [vmem:[#allocation5 + $0xf8] sm:$0xff] }
 0xaa8   :  { %5273 = vst [vmem:[#allocation5 + $0xd8] sm:$0xff] %v5257_v53  ;;  %v5354_v26 = vadd.f32 %v5338_v30, %v5155_v56  ;;  %v5159_v59 = vadd.f32 %v5158_v1, %v4889_v51  ;;  %v5049_v48 = vpop.f32.mrb[232].mxu0  ;;  %v5293_v30 = vld [vmem:[#allocation5 + $0x170] sm:$0xff] }
 0xaa9   :  { %5321 = vst [vmem:[#allocation5 + $0x150] sm:$0xff] %v5305_v24  ;;  %v5306_v57 = vadd.f32 %v5290_v44, %v5157_v7  ;;  %v5050_v8 = vadd.f32 %v5049_v48, %v4893_v45  ;;  %v5051_v13 = vpop.f32.mrb[233].mxu0  ;;  %v5342_v44 = vld [vmem:[#allocation5 + $0x1f0] sm:$0xff] }
 0xaaa   :  { %5370 = vst [vmem:[#allocation5 + $0x1d0] sm:$0xff] %v5354_v26  ;;  %v5355_v55 = vadd.f32 %v5339_v12, %v5159_v59  ;;  %v5052_v2 = vadd.f32 %v5051_v13, %v4893_v45  ;;  %v5053_v46 = vpop.f32.mrb[234].mxu0  ;;  %v5343_v13 = vld [vmem:[#allocation5 + $0x1f8] sm:$0xff] }
 0xaab   :  { %5322 = vst [vmem:[#allocation5 + $0x158] sm:$0xff] %v5306_v57  ;;  %v5209_v40 = vadd.f32 %v5193_v42, %v5050_v8  ;;  %v5054_v14 = vadd.f32 %v5053_v46, %v4897_v27  ;;  %v5055_v61 = vpop.f32.mrb[235].mxu0  ;;  %v5294_v57 = vld [vmem:[#allocation5 + $0x178] sm:$0xff] }
 0xaac   :  { %5371 = vst [vmem:[#allocation5 + $0x1d8] sm:$0xff] %v5355_v55  ;;  %v5258_v54 = vadd.f32 %v5242_v11, %v5052_v2  ;;  %v5056_v16 = vadd.f32 %v5055_v61, %v4897_v27  ;;  %v5162_v6 = vpop.f32.mrb[200].mxu1 }
 0xaad   :  { %5225 = vst [vmem:[#allocation5 + $0x60] sm:$0xff] %v5209_v40  ;;  %v5210_v33 = vadd.f32 %v5194_v22, %v5054_v14  ;;  %v5163_v35 = vadd.f32 %v5162_v6, %v4893_v45  ;;  %v5164_v39 = vpop.f32.mrb[201].mxu1 }
 0xaae   :  { %5274 = vst [vmem:[#allocation5 + $0xe0] sm:$0xff] %v5258_v54  ;;  %v5259_v29 = vadd.f32 %v5243_v19, %v5056_v16  ;;  %v5165_v4 = vadd.f32 %v5164_v39, %v4893_v45  ;;  %v5166_v15 = vpop.f32.mrb[202].mxu1 }
 0xaaf   :  { %5226 = vst [vmem:[#allocation5 + $0x68] sm:$0xff] %v5210_v33  ;;  %v5307_v38 = vadd.f32 %v5291_v9, %v5163_v35  ;;  %v5167_v60 = vadd.f32 %v5166_v15, %v4897_v27  ;;  %v5168_v37 = vpop.f32.mrb[203].mxu1 }
 0xab0   :  { %5275 = vst [vmem:[#allocation5 + $0xe8] sm:$0xff] %v5259_v29  ;;  %v5356_v49 = vadd.f32 %v5340_v58, %v5165_v4  ;;  %v5169_v36 = vadd.f32 %v5168_v37, %v4897_v27  ;;  %v5059_v34 = vpop.f32.mrb[236].mxu0 }
 0xab1   :  { %5323 = vst [vmem:[#allocation5 + $0x160] sm:$0xff] %v5307_v38  ;;  %v5308_v0 = vadd.f32 %v5292_v25, %v5167_v60  ;;  %v5060_v5 = vadd.f32 %v5059_v34, %v4901_v23  ;;  %v5061_v51 = vpop.f32.mrb[237].mxu0 }
 0xab2   :  { %5372 = vst [vmem:[#allocation5 + $0x1e0] sm:$0xff] %v5356_v49  ;;  %v5357_v3 = vadd.f32 %v5341_v28, %v5169_v36  ;;  %v5062_v43 = vadd.f32 %v5061_v51, %v4901_v23  ;;  %v5063_v47 = vpop.f32.mrb[238].mxu0 }
 0xab3   :  { %5324 = vst [vmem:[#allocation5 + $0x168] sm:$0xff] %v5308_v0  ;;  %v5211_v18 = vadd.f32 %v5195_v52, %v5060_v5  ;;  %v5064_v17 = vadd.f32 %v5063_v47, %v4905_v20  ;;  %v5065_v21 = vpop.f32.mrb[239].mxu0 }
 0xab4   :  { %5373 = vst [vmem:[#allocation5 + $0x1e8] sm:$0xff] %v5357_v3  ;;  %v5260_v63 = vadd.f32 %v5244_v62, %v5062_v43  ;;  %v5066_v41 = vadd.f32 %v5065_v21, %v4905_v20  ;;  %v5172_v32 = vpop.f32.mrb[204].mxu1 }
 0xab5   :  { %5227 = vst [vmem:[#allocation5 + $0x70] sm:$0xff] %v5211_v18  ;;  %v5212_v53 = vadd.f32 %v5196_v50, %v5064_v17  ;;  %v5173_v56 = vadd.f32 %v5172_v32, %v4901_v23  ;;  %v5174_v31 = vpop.f32.mrb[205].mxu1 }
 0xab6   :  { %5276 = vst [vmem:[#allocation5 + $0xf0] sm:$0xff] %v5260_v63  ;;  %v5261_v24 = vadd.f32 %v5245_v10, %v5066_v41  ;;  %v5175_v7 = vadd.f32 %v5174_v31, %v4901_v23  ;;  %v5176_v1 = vpop.f32.mrb[206].mxu1 }
 0xab7   :  { %5228 = vst [vmem:[#allocation5 + $0x78] sm:$0xff] %v5212_v53  ;;  %v5309_v26 = vadd.f32 %v5293_v30, %v5173_v56  ;;  %v5177_v59 = vadd.f32 %v5176_v1, %v4905_v20  ;;  %v5178_v48 = vpop.f32.mrb[207].mxu1 }
 0xab8   :  { %5277 = vst [vmem:[#allocation5 + $0xf8] sm:$0xff] %v5261_v24  ;;  %v5358_v45 = vadd.f32 %v5342_v44, %v5175_v7  ;;  %v5179_v12 = vadd.f32 %v5178_v48, %v4905_v20 }
 0xab9   :  { %5325 = vst [vmem:[#allocation5 + $0x170] sm:$0xff] %v5309_v26  ;;  %v5310_v8 = vadd.f32 %v5294_v57, %v5177_v59 }
 0xaba   :  { %5374 = vst [vmem:[#allocation5 + $0x1f0] sm:$0xff] %v5358_v45  ;;  %v5359_v55 = vadd.f32 %v5343_v13, %v5179_v12 }
 0xabb   :  { %5326 = vst [vmem:[#allocation5 + $0x178] sm:$0xff] %v5310_v8 }
 0xabc   :  { %5375 = vst [vmem:[#allocation5 + $0x1f8] sm:$0xff] %v5359_v55 }
 0xabd   :  { %6552 = shalt.err (!%p6549_p12)
}
 0xabe   :  { %s6553_s15 = scalar_lea.hbm %s9656_s7, 8192 }
 0xabf   :  { %p6554_p13 = scmp.ne.s32.totalorder %s9656_s7, %s6553_s15  ;;  %p6557_p0 = scmp.lt.u32.totalorder %s6553_s15, %s9656_s7 }
 0xac1   :  { %p6559_p1 = pnand %p6557_p0, %p6554_p13 }
 0xac3   :  { %6562 = shalt.err (!%p6559_p1)
}
 0xac4   :  { %5387 = dma.vmem_to_hbm [thread:$0]  %s5382_s10, 8192, %s9656_s7, [#allocation4], %s6568_s11, %s6568_s11, %s6569_s12  }
 0xac5   :  { %6565 = dma.done.wait [#allocation4], 8192  }
 0xac6   :  { %6566 = vsyncadd [#allocation4], 4294959104 }
 0xac7   :  { %5391 = vsyncpa [#allocation3], 1 }
 0xac8   :  { %5392 = vsyncpa [#allocation4], 1 }

</bundles_post_ra>
